<compile_context>
chip_gen: v5e
topology: v5e:2x2
jax: 0.10.0
libtpu: 0.0.40
codegen_flags: <defaults>
</compile_context>

<pallas_src>
import functools
import numpy as np
import jax
import jax.numpy as jnp
from jax.experimental import pallas as pl
from jax.experimental.pallas import tpu as pltpu


# ----------------------------- reference helpers -----------------------------

def get_dct_matrix(N):
    dct_m = np.eye(N)
    for k in np.arange(N):
        for i in np.arange(N):
            w = np.sqrt(2 / N)
            if k == 0:
                w = np.sqrt(1 / N)
            dct_m[k, i] = w * np.cos(np.pi * (i + 1 / 2) * k / N)
    idct_m = np.linalg.inv(dct_m)
    return dct_m, idct_m


def position_encoding_1d(seq_length, num_pos_feats, temperature=10000.0, alpha=1.0):
    x = np.arange(seq_length, dtype=np.float64)
    dim_t = np.arange(num_pos_feats, dtype=np.float64)
    dim_t = temperature ** (2 * (dim_t // 2) / num_pos_feats)
    pos_x = x[:, None] * alpha / dim_t
    pe = np.stack((np.sin(pos_x[:, 0::2]), np.cos(pos_x[:, 1::2])), axis=2)
    pe = pe.reshape(seq_length, -1)
    return jnp.asarray(pe, jnp.float32)


# ----------------------------- Pallas fused kernel ----------------------------

def _full_spec(shape):
    nd = len(shape)
    return pl.BlockSpec(shape, lambda i, _nd=nd: (0,) * _nd)


def _branch_kernel(x_ref, res_ref, pos_ref,
                   ew1_ref, eb1_ref, ew2_ref, eb2_ref,
                   wq_ref, bq_ref, wk_ref, bk_ref, wv_ref, bv_ref,
                   wo_ref, bo_ref, g1_ref, be1_ref,
                   w1_ref, b1_ref, w2_ref, b2_ref, g2_ref, be2_ref,
                   dw1_ref, db1_ref, dw2_ref, db2_ref,
                   o_ref, *, num_heads, num_layers, B, C):
    """Fused: enc MLP -> num_layers transformer layers -> dec MLP -> + residual.

    x_ref:   (B*C, F_in)   batch folded into rows
    res_ref: (B*C, F_out)  residual (stacked last frame / DCT input)
    pos_ref: (B*C, D)      positional encoding, pre-tiled over batch
    o_ref:   (B*C, F_out)
    """
    x = x_ref[...]
    pos = pos_ref[...]
    D = pos.shape[-1]
    dh = D // num_heads
    scale = 1.0 / np.sqrt(float(dh))

    # --- temporal encoder MLP: Linear -> Tanh -> Linear ---
    h = jnp.tanh(jnp.dot(x, ew1_ref[...], preferred_element_type=jnp.float32)
                 + eb1_ref[...])
    y = jnp.dot(h, ew2_ref[...], preferred_element_type=jnp.float32) + eb2_ref[...]

    def layer_norm(z, g, b):
        mu = jnp.mean(z, axis=-1, keepdims=True)
        var = jnp.mean((z - mu) ** 2, axis=-1, keepdims=True)
        return (z - mu) * jax.lax.rsqrt(var + 1e-5) * g + b

    # --- spatial transformer encoder over joints, all batch elements at once ---
    for l in range(num_layers):                      # static, unrolled
        qk_in = y + pos
        q = jnp.dot(qk_in, wq_ref[l], preferred_element_type=jnp.float32) + bq_ref[l]
        k = jnp.dot(qk_in, wk_ref[l], preferred_element_type=jnp.float32) + bk_ref[l]
        v = jnp.dot(y, wv_ref[l], preferred_element_type=jnp.float32) + bv_ref[l]
        q3 = q.reshape(B, C, D)
        k3 = k.reshape(B, C, D)
        v3 = v.reshape(B, C, D)
        wo = wo_ref[l]

        attn = jnp.zeros_like(y)                     # (B*C, D)
        for hh in range(num_heads):                  # static, unrolled
            sl = slice(hh * dh, (hh + 1) * dh)
            qh = q3[:, :, sl]
            kh = k3[:, :, sl]
            vh = v3[:, :, sl]
            s = jnp.einsum('bqd,bkd->bqk', qh, kh,
                           preferred_element_type=jnp.float32) * scale
            s = s - jnp.max(s, axis=-1, keepdims=True)
            e = jnp.exp(s)
            a = e / jnp.sum(e, axis=-1, keepdims=True)
            ctx = jnp.einsum('bqk,bkd->bqd', a, vh,
                             preferred_element_type=jnp.float32)
            attn = attn + jnp.dot(ctx.reshape(B * C, dh), wo[sl, :],
                                  preferred_element_type=jnp.float32)
        attn = attn + bo_ref[l]

        y = layer_norm(y + attn, g1_ref[l], be1_ref[l])
        ff = jnp.maximum(
            jnp.dot(y, w1_ref[l], preferred_element_type=jnp.float32) + b1_ref[l],
            0.0)
        ff = jnp.dot(ff, w2_ref[l], preferred_element_type=jnp.float32) + b2_ref[l]
        y = layer_norm(y + ff, g2_ref[l], be2_ref[l])

    # --- temporal decoder MLP: Linear -> Tanh -> Linear, then residual add ---
    d1 = jnp.tanh(jnp.dot(y, dw1_ref[...], preferred_element_type=jnp.float32)
                  + db1_ref[...])
    out = jnp.dot(d1, dw2_ref[...], preferred_element_type=jnp.float32) + db2_ref[...]
    o_ref[...] = out + res_ref[...]


def pallas_branch_step(x_bcf, res_bcf, pos, bp, num_heads, num_layers):
    """x_bcf: (B, C, F_in); res_bcf: (B, C, F_out); returns (B, C, F_out)."""
    B, C, F_in = x_bcf.shape
    F_out = res_bcf.shape[-1]
    lp = bp["layers"]

    x2 = x_bcf.reshape(B * C, F_in)
    res2 = res_bcf.reshape(B * C, F_out)
    pos2 = jnp.tile(pos, (B, 1))                       # (B*C, D)

    args = (x2, res2, pos2,
            bp["enc"]["w1"], bp["enc"]["b1"], bp["enc"]["w2"], bp["enc"]["b2"],
            lp["wq"], lp["bq"], lp["wk"], lp["bk"], lp["wv"], lp["bv"],
            lp["wo"], lp["bo"], lp["g1"], lp["be1"],
            lp["w1"], lp["b1"], lp["w2"], lp["b2"], lp["g2"], lp["be2"],
            bp["dec"]["w1"], bp["dec"]["b1"], bp["dec"]["w2"], bp["dec"]["b2"])

    out = pl.pallas_call(
        functools.partial(_branch_kernel, num_heads=num_heads,
                          num_layers=num_layers, B=B, C=C),
        grid=(1,),
        out_shape=jax.ShapeDtypeStruct((B * C, F_out), jnp.float32),
        in_specs=[_full_spec(a.shape) for a in args],
        out_specs=_full_spec((B * C, F_out)),
        compiler_params=pltpu.CompilerParams(dimension_semantics=("arbitrary",)),
    )(*args)
    return out.reshape(B, C, F_out)


# ----------------------------- glue (plain JAX, inside jit) -------------------

def rearr_btcd_to_bc_td(x):
    # 'b t c d -> b c (t d)'
    B, T, C, d = x.shape
    return jnp.transpose(x, (0, 2, 1, 3)).reshape(B, C, T * d)


def rearr_bc_td_to_btcd(x, t):
    # 'b c (t d) -> b t c d'
    B, C, TD = x.shape
    d = TD // t
    return jnp.transpose(x.reshape(B, C, t, d), (0, 2, 1, 3))


def fusion_apply(out_res_lst, weight, is_norm):
    # sum_k out[k][i] * w[i,k]   (optionally / sum_k w[i,k])
    stacked = jnp.stack(out_res_lst, axis=0)            # (n, t_pred, B, C, 3)
    acc = jnp.einsum('ntbcd,tn->tbcd', stacked, weight)
    if is_norm:
        wsum = jnp.sum(weight, axis=1)                   # (t_pred,)
        acc = acc / wsum[:, None, None, None]
    return acc


def afanat_forward(x, params, cfg):
    t_his, t_pred = cfg["t_his"], cfg["t_pred"]
    t_pred_lst, C = cfg["t_pred_lst"], cfg["joint_num"]
    num_heads, num_layers = cfg["num_heads"], cfg["num_layers"]
    pos = params["pos"]

    out_res_lst, out_res_lst2 = [], []
    out_res = None
    for k, t_pred_ in enumerate(t_pred_lst):
        bp = params["branches"][k]
        input_x = x
        if t_pred_ < t_pred:
            chunks = []
            for _ in range(int(t_pred / t_pred_ + 0.5)):
                enc_in = rearr_btcd_to_bc_td(input_x)            # (B,C,t_his*3)
                last = input_x[:, -1]                            # (B,C,3)
                res_bcf = jnp.tile(last, (1, 1, t_pred_))        # (B,C,t_pred_*3)
                out_bcf = pallas_branch_step(enc_in, res_bcf, pos, bp,
                                             num_heads, num_layers)
                output = rearr_bc_td_to_btcd(out_bcf, t_pred_)   # (B,t_pred_,C,3)
                chunks.append(jnp.moveaxis(output, 1, 0))        # (t_pred_,B,C,3)
                if t_his - t_pred_ > 0:
                    input_x = jnp.concatenate(
                        [input_x[:, -(t_his - t_pred_):], output], axis=1)
                else:
                    input_x = output[:, -t_his:]
            res = jnp.concatenate(chunks, axis=0)[:t_pred]       # (t_pred,B,C,3)
            out_res_lst.append(res)
            out_res_lst2.append(res)
            out_res = res
        else:
            idx = np.array(list(range(t_his)) + [t_his - 1] * t_pred)
            input_x = input_x[:, idx]                            # (B,T,C,3)
            B = input_x.shape[0]
            T = t_his + t_pred
            inp_flat = input_x.reshape(B, T, C * 3)
            # DCT over the time axis (tiny -> plain jnp; reference uses float64).
            inp_dct = jnp.einsum('ts,bsf->btf', params["dct_m"], inp_flat)
            enc_in = rearr_btcd_to_bc_td(inp_dct.reshape(B, T, C, 3))  # (B,C,T*3)
            # residual add (inp_dct in 'b c (t d)' layout) fused into the kernel
            out_bcf = pallas_branch_step(enc_in, enc_in, pos, bp,
                                         num_heads, num_layers)
            out_flat = rearr_bc_td_to_btcd(out_bcf, T).reshape(B, T, C * 3)
            output = jnp.einsum('ts,bsf->btf', params["idct_m"], out_flat)
            output = output.reshape(B, T, C, 3)
            res = jnp.moveaxis(output, 1, 0)                     # (T,B,C,3)
            out_res_lst.append(res[t_his:])
            out_res_lst2.append(res)
            out_res = res

    if len(out_res_lst) > 1:
        out_res = fusion_apply(out_res_lst, params["fusion_w"], cfg["is_norm"])
    return out_res_lst2, out_res


# ----------------------------- parameter init ---------------------------------

def init_linear(key, fan_in, fan_out):
    k1, k2 = jax.random.split(key)
    w = jax.random.normal(k1, (fan_in, fan_out), jnp.float32) / np.sqrt(fan_in)
    b = jax.random.normal(k2, (1, fan_out), jnp.float32) * 0.01
    return w, b


def init_trans_layer(key, D, F):
    keys = jax.random.split(key, 6)
    wq, bq = init_linear(keys[0], D, D)
    wk, bk = init_linear(keys[1], D, D)
    wv, bv = init_linear(keys[2], D, D)
    wo, bo = init_linear(keys[3], D, D)
    w1, b1 = init_linear(keys[4], D, F)
    w2, b2 = init_linear(keys[5], F, D)
    ones = jnp.ones((1, D), jnp.float32)
    zeros = jnp.zeros((1, D), jnp.float32)
    return dict(wq=wq, bq=bq, wk=wk, bk=bk, wv=wv, bv=bv, wo=wo, bo=bo,
                g1=ones, be1=zeros, w1=w1, b1=b1, w2=w2, b2=b2,
                g2=ones, be2=zeros)


def init_params(key, cfg):
    t_his, t_pred = cfg["t_his"], cfg["t_pred"]
    D, C = cfg["S_model_dims"], cfg["joint_num"]
    L = cfg["num_layers"]
    branches = []
    for k, t_pred_ in enumerate(cfg["t_pred_lst"]):
        bkey = jax.random.fold_in(key, k)
        ks = jax.random.split(bkey, 4 + L)
        f_in = t_his * 3 if t_pred_ < t_pred else (t_his + t_pred) * 3
        f_out = t_pred_ * 3 if t_pred_ < t_pred else (t_his + t_pred) * 3
        ew1, eb1 = init_linear(ks[0], f_in, cfg["T_enc_hiddims"])
        ew2, eb2 = init_linear(ks[1], cfg["T_enc_hiddims"], D)
        dw1, db1 = init_linear(ks[2], D, cfg["T_dec_hiddims"])
        dw2, db2 = init_linear(ks[3], cfg["T_dec_hiddims"], f_out)
        layers = [init_trans_layer(ks[4 + i], D, cfg["S_dim_feedforward"])
                  for i in range(L)]
        layers_stacked = {name: jnp.stack([ly[name] for ly in layers], axis=0)
                          for name in layers[0]}
        branches.append(dict(enc=dict(w1=ew1, b1=eb1, w2=ew2, b2=eb2),
                             dec=dict(w1=dw1, b1=db1, w2=dw2, b2=db2),
                             layers=layers_stacked))
    dct_m, idct_m = get_dct_matrix(t_his + t_pred)
    n = len(cfg["t_pred_lst"])
    fusion_w = jnp.full((t_pred, n), 1.0 / n, jnp.float32)
    pos = position_encoding_1d(C, D, temperature=10000.0, alpha=1.0)
    return dict(branches=branches,
                dct_m=jnp.asarray(dct_m, jnp.float32),
                idct_m=jnp.asarray(idct_m, jnp.float32),
                fusion_w=fusion_w,
                pos=pos)


# ----------------------------- main -------------------------------------------

if __name__ == "__main__":
    cfg = dict(
        t_his=8, t_pred=8, t_pred_lst=[4, 8],
        joint_num=8, batch=2,
        T_enc_hiddims=32, S_model_dims=32, num_heads=4,
        S_dim_feedforward=64, num_layers=2, T_dec_hiddims=32,
        is_norm=True,
    )

    key = jax.random.PRNGKey(0)
    pkey, xkey = jax.random.split(key)
    params = init_params(pkey, cfg)
    x = jax.random.normal(xkey, (cfg["batch"], cfg["t_his"], cfg["joint_num"], 3),
                          jnp.float32)

    forward = jax.jit(lambda xx, pp: afanat_forward(xx, pp, cfg))
    out_res_lst2, out_res = forward(x, params)

    jax.block_until_ready(out_res)
    for o in jax.tree_util.tree_leaves(out_res_lst2):
        jax.block_until_ready(o)

    assert out_res.shape == (cfg["t_pred"], cfg["batch"], cfg["joint_num"], 3)
    assert out_res_lst2[0].shape == (cfg["t_pred"], cfg["batch"], cfg["joint_num"], 3)
    assert out_res_lst2[1].shape == (cfg["t_his"] + cfg["t_pred"], cfg["batch"],
                                     cfg["joint_num"], 3)
    assert bool(jnp.all(jnp.isfinite(out_res)))
    print("KERNEL_OK")
</pallas_src>

<mosaic_0001>
module attributes {stable_mosaic.version = 11 : i64} {
  func.func @_branch_kernel(%arg0: i32, %arg1: memref<16x24xf32, #tpu.memory_space<vmem>>, %arg2: memref<16x12xf32, #tpu.memory_space<vmem>>, %arg3: memref<16x32xf32, #tpu.memory_space<vmem>>, %arg4: memref<24x32xf32, #tpu.memory_space<vmem>>, %arg5: memref<1x32xf32, #tpu.memory_space<vmem>>, %arg6: memref<32x32xf32, #tpu.memory_space<vmem>>, %arg7: memref<1x32xf32, #tpu.memory_space<vmem>>, %arg8: memref<2x32x32xf32, #tpu.memory_space<vmem>>, %arg9: memref<2x1x32xf32, #tpu.memory_space<vmem>>, %arg10: memref<2x32x32xf32, #tpu.memory_space<vmem>>, %arg11: memref<2x1x32xf32, #tpu.memory_space<vmem>>, %arg12: memref<2x32x32xf32, #tpu.memory_space<vmem>>, %arg13: memref<2x1x32xf32, #tpu.memory_space<vmem>>, %arg14: memref<2x32x32xf32, #tpu.memory_space<vmem>>, %arg15: memref<2x1x32xf32, #tpu.memory_space<vmem>>, %arg16: memref<2x1x32xf32, #tpu.memory_space<vmem>>, %arg17: memref<2x1x32xf32, #tpu.memory_space<vmem>>, %arg18: memref<2x32x64xf32, #tpu.memory_space<vmem>>, %arg19: memref<2x1x64xf32, #tpu.memory_space<vmem>>, %arg20: memref<2x64x32xf32, #tpu.memory_space<vmem>>, %arg21: memref<2x1x32xf32, #tpu.memory_space<vmem>>, %arg22: memref<2x1x32xf32, #tpu.memory_space<vmem>>, %arg23: memref<2x1x32xf32, #tpu.memory_space<vmem>>, %arg24: memref<32x32xf32, #tpu.memory_space<vmem>>, %arg25: memref<1x32xf32, #tpu.memory_space<vmem>>, %arg26: memref<32x12xf32, #tpu.memory_space<vmem>>, %arg27: memref<1x12xf32, #tpu.memory_space<vmem>>, %arg28: memref<16x12xf32, #tpu.memory_space<vmem>>) attributes {dimension_semantics = [#tpu.dimension_semantics<arbitrary>], iteration_bounds = array<i64: 1>, scalar_prefetch = 0 : i64, scratch_operands = 0 : i64, tpu.core_type = #tpu.core_type<tc>, window_params = [{pipeline_mode = #tpu.pipeline_mode<synchronous>, transform_indices = @transform_0, window_bounds = array<i64: 16, 24>}, {pipeline_mode = #tpu.pipeline_mode<synchronous>, transform_indices = @transform_1, window_bounds = array<i64: 16, 12>}, {pipeline_mode = #tpu.pipeline_mode<synchronous>, transform_indices = @transform_2, window_bounds = array<i64: 16, 32>}, {pipeline_mode = #tpu.pipeline_mode<synchronous>, transform_indices = @transform_3, window_bounds = array<i64: 24, 32>}, {pipeline_mode = #tpu.pipeline_mode<synchronous>, transform_indices = @transform_4, window_bounds = array<i64: 1, 32>}, {pipeline_mode = #tpu.pipeline_mode<synchronous>, transform_indices = @transform_5, window_bounds = array<i64: 32, 32>}, {pipeline_mode = #tpu.pipeline_mode<synchronous>, transform_indices = @transform_6, window_bounds = array<i64: 1, 32>}, {pipeline_mode = #tpu.pipeline_mode<synchronous>, transform_indices = @transform_7, window_bounds = array<i64: 2, 32, 32>}, {pipeline_mode = #tpu.pipeline_mode<synchronous>, transform_indices = @transform_8, window_bounds = array<i64: 2, 1, 32>}, {pipeline_mode = #tpu.pipeline_mode<synchronous>, transform_indices = @transform_9, window_bounds = array<i64: 2, 32, 32>}, {pipeline_mode = #tpu.pipeline_mode<synchronous>, transform_indices = @transform_10, window_bounds = array<i64: 2, 1, 32>}, {pipeline_mode = #tpu.pipeline_mode<synchronous>, transform_indices = @transform_11, window_bounds = array<i64: 2, 32, 32>}, {pipeline_mode = #tpu.pipeline_mode<synchronous>, transform_indices = @transform_12, window_bounds = array<i64: 2, 1, 32>}, {pipeline_mode = #tpu.pipeline_mode<synchronous>, transform_indices = @transform_13, window_bounds = array<i64: 2, 32, 32>}, {pipeline_mode = #tpu.pipeline_mode<synchronous>, transform_indices = @transform_14, window_bounds = array<i64: 2, 1, 32>}, {pipeline_mode = #tpu.pipeline_mode<synchronous>, transform_indices = @transform_15, window_bounds = array<i64: 2, 1, 32>}, {pipeline_mode = #tpu.pipeline_mode<synchronous>, transform_indices = @transform_16, window_bounds = array<i64: 2, 1, 32>}, {pipeline_mode = #tpu.pipeline_mode<synchronous>, transform_indices = @transform_17, window_bounds = array<i64: 2, 32, 64>}, {pipeline_mode = #tpu.pipeline_mode<synchronous>, transform_indices = @transform_18, window_bounds = array<i64: 2, 1, 64>}, {pipeline_mode = #tpu.pipeline_mode<synchronous>, transform_indices = @transform_19, window_bounds = array<i64: 2, 64, 32>}, {pipeline_mode = #tpu.pipeline_mode<synchronous>, transform_indices = @transform_20, window_bounds = array<i64: 2, 1, 32>}, {pipeline_mode = #tpu.pipeline_mode<synchronous>, transform_indices = @transform_21, window_bounds = array<i64: 2, 1, 32>}, {pipeline_mode = #tpu.pipeline_mode<synchronous>, transform_indices = @transform_22, window_bounds = array<i64: 2, 1, 32>}, {pipeline_mode = #tpu.pipeline_mode<synchronous>, transform_indices = @transform_23, window_bounds = array<i64: 32, 32>}, {pipeline_mode = #tpu.pipeline_mode<synchronous>, transform_indices = @transform_24, window_bounds = array<i64: 1, 32>}, {pipeline_mode = #tpu.pipeline_mode<synchronous>, transform_indices = @transform_25, window_bounds = array<i64: 32, 12>}, {pipeline_mode = #tpu.pipeline_mode<synchronous>, transform_indices = @transform_26, window_bounds = array<i64: 1, 12>}, {pipeline_mode = #tpu.pipeline_mode<synchronous>, transform_indices = @transform_27, window_bounds = array<i64: 16, 12>}]} {
    %c0 = arith.constant 0 : index
    %c0_0 = arith.constant 0 : index
    %0 = vector.load %arg1[%c0, %c0_0] : memref<16x24xf32, #tpu.memory_space<vmem>>, vector<16x24xf32>
    %c0_1 = arith.constant 0 : index
    %c0_2 = arith.constant 0 : index
    %1 = vector.load %arg3[%c0_1, %c0_2] : memref<16x32xf32, #tpu.memory_space<vmem>>, vector<16x32xf32>
    %c0_3 = arith.constant 0 : index
    %c0_4 = arith.constant 0 : index
    %2 = vector.load %arg4[%c0_3, %c0_4] : memref<24x32xf32, #tpu.memory_space<vmem>>, vector<24x32xf32>
    %cst = arith.constant dense<0.000000e+00> : vector<16x32xf32>
    %3 = tpu.matmul %0, %2, %cst {dimension_numbers = #tpu.dot_dimension_numbers<[1], [0], [0], [1], [0, 0, 1, 1], [], []>} : vector<16x24xf32>, vector<24x32xf32>, vector<16x32xf32> -> vector<16x32xf32>
    %c0_5 = arith.constant 0 : index
    %c0_6 = arith.constant 0 : index
    %4 = vector.load %arg5[%c0_5, %c0_6] : memref<1x32xf32, #tpu.memory_space<vmem>>, vector<1x32xf32>
    %5 = vector.broadcast %4 : vector<1x32xf32> to vector<16x32xf32>
    %6 = arith.addf %3, %5 : vector<16x32xf32>
    %7 = math.tanh %6 : vector<16x32xf32>
    %c0_7 = arith.constant 0 : index
    %c0_8 = arith.constant 0 : index
    %8 = vector.load %arg6[%c0_7, %c0_8] : memref<32x32xf32, #tpu.memory_space<vmem>>, vector<32x32xf32>
    %cst_9 = arith.constant dense<0.000000e+00> : vector<16x32xf32>
    %9 = tpu.matmul %7, %8, %cst_9 {dimension_numbers = #tpu.dot_dimension_numbers<[1], [0], [0], [1], [0, 0, 1, 1], [], []>} : vector<16x32xf32>, vector<32x32xf32>, vector<16x32xf32> -> vector<16x32xf32>
    %c0_10 = arith.constant 0 : index
    %c0_11 = arith.constant 0 : index
    %10 = vector.load %arg7[%c0_10, %c0_11] : memref<1x32xf32, #tpu.memory_space<vmem>>, vector<1x32xf32>
    %11 = vector.broadcast %10 : vector<1x32xf32> to vector<16x32xf32>
    %12 = arith.addf %9, %11 : vector<16x32xf32>
    %13 = arith.addf %12, %1 : vector<16x32xf32>
    %c0_12 = arith.constant 0 : index
    %c0_13 = arith.constant 0 : index
    %c0_14 = arith.constant 0 : index
    %14 = vector.load %arg8[%c0_12, %c0_13, %c0_14] : memref<2x32x32xf32, #tpu.memory_space<vmem>>, vector<1x32x32xf32>
    %15 = vector.shape_cast %14 : vector<1x32x32xf32> to vector<32x32xf32>
    %cst_15 = arith.constant dense<0.000000e+00> : vector<16x32xf32>
    %16 = tpu.matmul %13, %15, %cst_15 {dimension_numbers = #tpu.dot_dimension_numbers<[1], [0], [0], [1], [0, 0, 1, 1], [], []>} : vector<16x32xf32>, vector<32x32xf32>, vector<16x32xf32> -> vector<16x32xf32>
    %c0_16 = arith.constant 0 : index
    %c0_17 = arith.constant 0 : index
    %c0_18 = arith.constant 0 : index
    %17 = vector.load %arg9[%c0_16, %c0_17, %c0_18] : memref<2x1x32xf32, #tpu.memory_space<vmem>>, vector<1x1x32xf32>
    %18 = vector.shape_cast %17 : vector<1x1x32xf32> to vector<1x32xf32>
    %19 = vector.broadcast %18 : vector<1x32xf32> to vector<16x32xf32>
    %20 = arith.addf %16, %19 : vector<16x32xf32>
    %c0_19 = arith.constant 0 : index
    %c0_20 = arith.constant 0 : index
    %c0_21 = arith.constant 0 : index
    %21 = vector.load %arg10[%c0_19, %c0_20, %c0_21] : memref<2x32x32xf32, #tpu.memory_space<vmem>>, vector<1x32x32xf32>
    %22 = vector.shape_cast %21 : vector<1x32x32xf32> to vector<32x32xf32>
    %cst_22 = arith.constant dense<0.000000e+00> : vector<16x32xf32>
    %23 = tpu.matmul %13, %22, %cst_22 {dimension_numbers = #tpu.dot_dimension_numbers<[1], [0], [0], [1], [0, 0, 1, 1], [], []>} : vector<16x32xf32>, vector<32x32xf32>, vector<16x32xf32> -> vector<16x32xf32>
    %c0_23 = arith.constant 0 : index
    %c0_24 = arith.constant 0 : index
    %c0_25 = arith.constant 0 : index
    %24 = vector.load %arg11[%c0_23, %c0_24, %c0_25] : memref<2x1x32xf32, #tpu.memory_space<vmem>>, vector<1x1x32xf32>
    %25 = vector.shape_cast %24 : vector<1x1x32xf32> to vector<1x32xf32>
    %26 = vector.broadcast %25 : vector<1x32xf32> to vector<16x32xf32>
    %27 = arith.addf %23, %26 : vector<16x32xf32>
    %c0_26 = arith.constant 0 : index
    %c0_27 = arith.constant 0 : index
    %c0_28 = arith.constant 0 : index
    %28 = vector.load %arg12[%c0_26, %c0_27, %c0_28] : memref<2x32x32xf32, #tpu.memory_space<vmem>>, vector<1x32x32xf32>
    %29 = vector.shape_cast %28 : vector<1x32x32xf32> to vector<32x32xf32>
    %cst_29 = arith.constant dense<0.000000e+00> : vector<16x32xf32>
    %30 = tpu.matmul %12, %29, %cst_29 {dimension_numbers = #tpu.dot_dimension_numbers<[1], [0], [0], [1], [0, 0, 1, 1], [], []>} : vector<16x32xf32>, vector<32x32xf32>, vector<16x32xf32> -> vector<16x32xf32>
    %c0_30 = arith.constant 0 : index
    %c0_31 = arith.constant 0 : index
    %c0_32 = arith.constant 0 : index
    %31 = vector.load %arg13[%c0_30, %c0_31, %c0_32] : memref<2x1x32xf32, #tpu.memory_space<vmem>>, vector<1x1x32xf32>
    %32 = vector.shape_cast %31 : vector<1x1x32xf32> to vector<1x32xf32>
    %33 = vector.broadcast %32 : vector<1x32xf32> to vector<16x32xf32>
    %34 = arith.addf %30, %33 : vector<16x32xf32>
    %35 = vector.shape_cast %20 : vector<16x32xf32> to vector<2x8x32xf32>
    %36 = vector.shape_cast %27 : vector<16x32xf32> to vector<2x8x32xf32>
    %37 = vector.shape_cast %34 : vector<16x32xf32> to vector<2x8x32xf32>
    %c0_33 = arith.constant 0 : index
    %c0_34 = arith.constant 0 : index
    %c0_35 = arith.constant 0 : index
    %38 = vector.load %arg14[%c0_33, %c0_34, %c0_35] : memref<2x32x32xf32, #tpu.memory_space<vmem>>, vector<1x32x32xf32>
    %39 = vector.shape_cast %38 : vector<1x32x32xf32> to vector<32x32xf32>
    %cst_36 = arith.constant 0.000000e+00 : f32
    %40 = vector.broadcast %cst_36 : f32 to vector<16x32xf32>
    %41 = vector.extract_strided_slice %35 {offsets = [0, 0, 0], sizes = [2, 8, 8], strides = [1, 1, 1]} : vector<2x8x32xf32> to vector<2x8x8xf32>
    %42 = vector.extract_strided_slice %36 {offsets = [0, 0, 0], sizes = [2, 8, 8], strides = [1, 1, 1]} : vector<2x8x32xf32> to vector<2x8x8xf32>
    %43 = vector.extract_strided_slice %37 {offsets = [0, 0, 0], sizes = [2, 8, 8], strides = [1, 1, 1]} : vector<2x8x32xf32> to vector<2x8x8xf32>
    "tpu.trace_start"() <{level = 10 : i32, message = "bqd,bkd->bqk"}> : () -> ()
    %cst_37 = arith.constant dense<0.000000e+00> : vector<2x8x8xf32>
    %44 = tpu.matmul %41, %42, %cst_37 {dimension_numbers = #tpu.dot_dimension_numbers<[2], [2], [1], [1], [0, 0, 0, 1, 1, 1], [0], [0]>} : vector<2x8x8xf32>, vector<2x8x8xf32>, vector<2x8x8xf32> -> vector<2x8x8xf32>
    "tpu.trace_stop"() : () -> ()
    %cst_38 = arith.constant 0.353553385 : f32
    %45 = vector.broadcast %cst_38 : f32 to vector<2x8x8xf32>
    %46 = arith.mulf %44, %45 : vector<2x8x8xf32>
    %cst_39 = arith.constant dense<0xFF800000> : vector<2x8xf32>
    %47 = vector.multi_reduction <maximumf>, %46, %cst_39 [2] : vector<2x8x8xf32> to vector<2x8xf32>
    %48 = vector.shape_cast %47 : vector<2x8xf32> to vector<2x8x1xf32>
    %49 = vector.broadcast %48 : vector<2x8x1xf32> to vector<2x8x8xf32>
    %50 = arith.subf %46, %49 : vector<2x8x8xf32>
    %51 = math.exp %50 : vector<2x8x8xf32>
    %cst_40 = arith.constant dense<0.000000e+00> : vector<2x8xf32>
    %52 = vector.multi_reduction <add>, %51, %cst_40 [2] : vector<2x8x8xf32> to vector<2x8xf32>
    %53 = vector.shape_cast %52 : vector<2x8xf32> to vector<2x8x1xf32>
    %54 = vector.broadcast %53 : vector<2x8x1xf32> to vector<2x8x8xf32>
    %55 = arith.divf %51, %54 : vector<2x8x8xf32>
    "tpu.trace_start"() <{level = 10 : i32, message = "bqk,bkd->bqd"}> : () -> ()
    %cst_41 = arith.constant dense<0.000000e+00> : vector<2x8x8xf32>
    %56 = tpu.matmul %55, %43, %cst_41 {dimension_numbers = #tpu.dot_dimension_numbers<[2], [1], [1], [2], [0, 0, 0, 1, 1, 2], [0], [0]>} : vector<2x8x8xf32>, vector<2x8x8xf32>, vector<2x8x8xf32> -> vector<2x8x8xf32>
    "tpu.trace_stop"() : () -> ()
    %57 = vector.shape_cast %56 : vector<2x8x8xf32> to vector<16x8xf32>
    %58 = vector.extract_strided_slice %39 {offsets = [0, 0], sizes = [8, 32], strides = [1, 1]} : vector<32x32xf32> to vector<8x32xf32>
    %cst_42 = arith.constant dense<0.000000e+00> : vector<16x32xf32>
    %59 = tpu.matmul %57, %58, %cst_42 {dimension_numbers = #tpu.dot_dimension_numbers<[1], [0], [0], [1], [0, 0, 1, 1], [], []>} : vector<16x8xf32>, vector<8x32xf32>, vector<16x32xf32> -> vector<16x32xf32>
    %60 = arith.addf %40, %59 : vector<16x32xf32>
    %61 = vector.extract_strided_slice %35 {offsets = [0, 0, 8], sizes = [2, 8, 8], strides = [1, 1, 1]} : vector<2x8x32xf32> to vector<2x8x8xf32>
    %62 = vector.extract_strided_slice %36 {offsets = [0, 0, 8], sizes = [2, 8, 8], strides = [1, 1, 1]} : vector<2x8x32xf32> to vector<2x8x8xf32>
    %63 = vector.extract_strided_slice %37 {offsets = [0, 0, 8], sizes = [2, 8, 8], strides = [1, 1, 1]} : vector<2x8x32xf32> to vector<2x8x8xf32>
    "tpu.trace_start"() <{level = 10 : i32, message = "bqd,bkd->bqk"}> : () -> ()
    %cst_43 = arith.constant dense<0.000000e+00> : vector<2x8x8xf32>
    %64 = tpu.matmul %61, %62, %cst_43 {dimension_numbers = #tpu.dot_dimension_numbers<[2], [2], [1], [1], [0, 0, 0, 1, 1, 1], [0], [0]>} : vector<2x8x8xf32>, vector<2x8x8xf32>, vector<2x8x8xf32> -> vector<2x8x8xf32>
    "tpu.trace_stop"() : () -> ()
    %cst_44 = arith.constant 0.353553385 : f32
    %65 = vector.broadcast %cst_44 : f32 to vector<2x8x8xf32>
    %66 = arith.mulf %64, %65 : vector<2x8x8xf32>
    %cst_45 = arith.constant dense<0xFF800000> : vector<2x8xf32>
    %67 = vector.multi_reduction <maximumf>, %66, %cst_45 [2] : vector<2x8x8xf32> to vector<2x8xf32>
    %68 = vector.shape_cast %67 : vector<2x8xf32> to vector<2x8x1xf32>
    %69 = vector.broadcast %68 : vector<2x8x1xf32> to vector<2x8x8xf32>
    %70 = arith.subf %66, %69 : vector<2x8x8xf32>
    %71 = math.exp %70 : vector<2x8x8xf32>
    %cst_46 = arith.constant dense<0.000000e+00> : vector<2x8xf32>
    %72 = vector.multi_reduction <add>, %71, %cst_46 [2] : vector<2x8x8xf32> to vector<2x8xf32>
    %73 = vector.shape_cast %72 : vector<2x8xf32> to vector<2x8x1xf32>
    %74 = vector.broadcast %73 : vector<2x8x1xf32> to vector<2x8x8xf32>
    %75 = arith.divf %71, %74 : vector<2x8x8xf32>
    "tpu.trace_start"() <{level = 10 : i32, message = "bqk,bkd->bqd"}> : () -> ()
    %cst_47 = arith.constant dense<0.000000e+00> : vector<2x8x8xf32>
    %76 = tpu.matmul %75, %63, %cst_47 {dimension_numbers = #tpu.dot_dimension_numbers<[2], [1], [1], [2], [0, 0, 0, 1, 1, 2], [0], [0]>} : vector<2x8x8xf32>, vector<2x8x8xf32>, vector<2x8x8xf32> -> vector<2x8x8xf32>
    "tpu.trace_stop"() : () -> ()
    %77 = vector.shape_cast %76 : vector<2x8x8xf32> to vector<16x8xf32>
    %78 = vector.extract_strided_slice %39 {offsets = [8, 0], sizes = [8, 32], strides = [1, 1]} : vector<32x32xf32> to vector<8x32xf32>
    %cst_48 = arith.constant dense<0.000000e+00> : vector<16x32xf32>
    %79 = tpu.matmul %77, %78, %cst_48 {dimension_numbers = #tpu.dot_dimension_numbers<[1], [0], [0], [1], [0, 0, 1, 1], [], []>} : vector<16x8xf32>, vector<8x32xf32>, vector<16x32xf32> -> vector<16x32xf32>
    %80 = arith.addf %60, %79 : vector<16x32xf32>
    %81 = vector.extract_strided_slice %35 {offsets = [0, 0, 16], sizes = [2, 8, 8], strides = [1, 1, 1]} : vector<2x8x32xf32> to vector<2x8x8xf32>
    %82 = vector.extract_strided_slice %36 {offsets = [0, 0, 16], sizes = [2, 8, 8], strides = [1, 1, 1]} : vector<2x8x32xf32> to vector<2x8x8xf32>
    %83 = vector.extract_strided_slice %37 {offsets = [0, 0, 16], sizes = [2, 8, 8], strides = [1, 1, 1]} : vector<2x8x32xf32> to vector<2x8x8xf32>
    "tpu.trace_start"() <{level = 10 : i32, message = "bqd,bkd->bqk"}> : () -> ()
    %cst_49 = arith.constant dense<0.000000e+00> : vector<2x8x8xf32>
    %84 = tpu.matmul %81, %82, %cst_49 {dimension_numbers = #tpu.dot_dimension_numbers<[2], [2], [1], [1], [0, 0, 0, 1, 1, 1], [0], [0]>} : vector<2x8x8xf32>, vector<2x8x8xf32>, vector<2x8x8xf32> -> vector<2x8x8xf32>
    "tpu.trace_stop"() : () -> ()
    %cst_50 = arith.constant 0.353553385 : f32
    %85 = vector.broadcast %cst_50 : f32 to vector<2x8x8xf32>
    %86 = arith.mulf %84, %85 : vector<2x8x8xf32>
    %cst_51 = arith.constant dense<0xFF800000> : vector<2x8xf32>
    %87 = vector.multi_reduction <maximumf>, %86, %cst_51 [2] : vector<2x8x8xf32> to vector<2x8xf32>
    %88 = vector.shape_cast %87 : vector<2x8xf32> to vector<2x8x1xf32>
    %89 = vector.broadcast %88 : vector<2x8x1xf32> to vector<2x8x8xf32>
    %90 = arith.subf %86, %89 : vector<2x8x8xf32>
    %91 = math.exp %90 : vector<2x8x8xf32>
    %cst_52 = arith.constant dense<0.000000e+00> : vector<2x8xf32>
    %92 = vector.multi_reduction <add>, %91, %cst_52 [2] : vector<2x8x8xf32> to vector<2x8xf32>
    %93 = vector.shape_cast %92 : vector<2x8xf32> to vector<2x8x1xf32>
    %94 = vector.broadcast %93 : vector<2x8x1xf32> to vector<2x8x8xf32>
    %95 = arith.divf %91, %94 : vector<2x8x8xf32>
    "tpu.trace_start"() <{level = 10 : i32, message = "bqk,bkd->bqd"}> : () -> ()
    %cst_53 = arith.constant dense<0.000000e+00> : vector<2x8x8xf32>
    %96 = tpu.matmul %95, %83, %cst_53 {dimension_numbers = #tpu.dot_dimension_numbers<[2], [1], [1], [2], [0, 0, 0, 1, 1, 2], [0], [0]>} : vector<2x8x8xf32>, vector<2x8x8xf32>, vector<2x8x8xf32> -> vector<2x8x8xf32>
    "tpu.trace_stop"() : () -> ()
    %97 = vector.shape_cast %96 : vector<2x8x8xf32> to vector<16x8xf32>
    %98 = vector.extract_strided_slice %39 {offsets = [16, 0], sizes = [8, 32], strides = [1, 1]} : vector<32x32xf32> to vector<8x32xf32>
    %cst_54 = arith.constant dense<0.000000e+00> : vector<16x32xf32>
    %99 = tpu.matmul %97, %98, %cst_54 {dimension_numbers = #tpu.dot_dimension_numbers<[1], [0], [0], [1], [0, 0, 1, 1], [], []>} : vector<16x8xf32>, vector<8x32xf32>, vector<16x32xf32> -> vector<16x32xf32>
    %100 = arith.addf %80, %99 : vector<16x32xf32>
    %101 = vector.extract_strided_slice %35 {offsets = [0, 0, 24], sizes = [2, 8, 8], strides = [1, 1, 1]} : vector<2x8x32xf32> to vector<2x8x8xf32>
    %102 = vector.extract_strided_slice %36 {offsets = [0, 0, 24], sizes = [2, 8, 8], strides = [1, 1, 1]} : vector<2x8x32xf32> to vector<2x8x8xf32>
    %103 = vector.extract_strided_slice %37 {offsets = [0, 0, 24], sizes = [2, 8, 8], strides = [1, 1, 1]} : vector<2x8x32xf32> to vector<2x8x8xf32>
    "tpu.trace_start"() <{level = 10 : i32, message = "bqd,bkd->bqk"}> : () -> ()
    %cst_55 = arith.constant dense<0.000000e+00> : vector<2x8x8xf32>
    %104 = tpu.matmul %101, %102, %cst_55 {dimension_numbers = #tpu.dot_dimension_numbers<[2], [2], [1], [1], [0, 0, 0, 1, 1, 1], [0], [0]>} : vector<2x8x8xf32>, vector<2x8x8xf32>, vector<2x8x8xf32> -> vector<2x8x8xf32>
    "tpu.trace_stop"() : () -> ()
    %cst_56 = arith.constant 0.353553385 : f32
    %105 = vector.broadcast %cst_56 : f32 to vector<2x8x8xf32>
    %106 = arith.mulf %104, %105 : vector<2x8x8xf32>
    %cst_57 = arith.constant dense<0xFF800000> : vector<2x8xf32>
    %107 = vector.multi_reduction <maximumf>, %106, %cst_57 [2] : vector<2x8x8xf32> to vector<2x8xf32>
    %108 = vector.shape_cast %107 : vector<2x8xf32> to vector<2x8x1xf32>
    %109 = vector.broadcast %108 : vector<2x8x1xf32> to vector<2x8x8xf32>
    %110 = arith.subf %106, %109 : vector<2x8x8xf32>
    %111 = math.exp %110 : vector<2x8x8xf32>
    %cst_58 = arith.constant dense<0.000000e+00> : vector<2x8xf32>
    %112 = vector.multi_reduction <add>, %111, %cst_58 [2] : vector<2x8x8xf32> to vector<2x8xf32>
    %113 = vector.shape_cast %112 : vector<2x8xf32> to vector<2x8x1xf32>
    %114 = vector.broadcast %113 : vector<2x8x1xf32> to vector<2x8x8xf32>
    %115 = arith.divf %111, %114 : vector<2x8x8xf32>
    "tpu.trace_start"() <{level = 10 : i32, message = "bqk,bkd->bqd"}> : () -> ()
    %cst_59 = arith.constant dense<0.000000e+00> : vector<2x8x8xf32>
    %116 = tpu.matmul %115, %103, %cst_59 {dimension_numbers = #tpu.dot_dimension_numbers<[2], [1], [1], [2], [0, 0, 0, 1, 1, 2], [0], [0]>} : vector<2x8x8xf32>, vector<2x8x8xf32>, vector<2x8x8xf32> -> vector<2x8x8xf32>
    "tpu.trace_stop"() : () -> ()
    %117 = vector.shape_cast %116 : vector<2x8x8xf32> to vector<16x8xf32>
    %118 = vector.extract_strided_slice %39 {offsets = [24, 0], sizes = [8, 32], strides = [1, 1]} : vector<32x32xf32> to vector<8x32xf32>
    %cst_60 = arith.constant dense<0.000000e+00> : vector<16x32xf32>
    %119 = tpu.matmul %117, %118, %cst_60 {dimension_numbers = #tpu.dot_dimension_numbers<[1], [0], [0], [1], [0, 0, 1, 1], [], []>} : vector<16x8xf32>, vector<8x32xf32>, vector<16x32xf32> -> vector<16x32xf32>
    %120 = arith.addf %100, %119 : vector<16x32xf32>
    %c0_61 = arith.constant 0 : index
    %c0_62 = arith.constant 0 : index
    %c0_63 = arith.constant 0 : index
    %121 = vector.load %arg15[%c0_61, %c0_62, %c0_63] : memref<2x1x32xf32, #tpu.memory_space<vmem>>, vector<1x1x32xf32>
    %122 = vector.shape_cast %121 : vector<1x1x32xf32> to vector<1x32xf32>
    %123 = vector.broadcast %122 : vector<1x32xf32> to vector<16x32xf32>
    %124 = arith.addf %120, %123 : vector<16x32xf32>
    %125 = arith.addf %12, %124 : vector<16x32xf32>
    %c0_64 = arith.constant 0 : index
    %c0_65 = arith.constant 0 : index
    %c0_66 = arith.constant 0 : index
    %126 = vector.load %arg16[%c0_64, %c0_65, %c0_66] : memref<2x1x32xf32, #tpu.memory_space<vmem>>, vector<1x1x32xf32>
    %127 = vector.shape_cast %126 : vector<1x1x32xf32> to vector<1x32xf32>
    %c0_67 = arith.constant 0 : index
    %c0_68 = arith.constant 0 : index
    %c0_69 = arith.constant 0 : index
    %128 = vector.load %arg17[%c0_67, %c0_68, %c0_69] : memref<2x1x32xf32, #tpu.memory_space<vmem>>, vector<1x1x32xf32>
    %129 = vector.shape_cast %128 : vector<1x1x32xf32> to vector<1x32xf32>
    %cst_70 = arith.constant dense<0.000000e+00> : vector<16xf32>
    %130 = vector.multi_reduction <add>, %125, %cst_70 [1] : vector<16x32xf32> to vector<16xf32>
    %131 = vector.shape_cast %130 : vector<16xf32> to vector<16x1xf32>
    %cst_71 = arith.constant 3.200000e+01 : f32
    %132 = vector.broadcast %cst_71 : f32 to vector<16x1xf32>
    %133 = arith.divf %131, %132 : vector<16x1xf32>
    %134 = vector.broadcast %133 : vector<16x1xf32> to vector<16x32xf32>
    %135 = arith.subf %125, %134 : vector<16x32xf32>
    %136 = arith.mulf %135, %135 : vector<16x32xf32>
    %cst_72 = arith.constant dense<0.000000e+00> : vector<16xf32>
    %137 = vector.multi_reduction <add>, %136, %cst_72 [1] : vector<16x32xf32> to vector<16xf32>
    %138 = vector.shape_cast %137 : vector<16xf32> to vector<16x1xf32>
    %cst_73 = arith.constant 3.200000e+01 : f32
    %139 = vector.broadcast %cst_73 : f32 to vector<16x1xf32>
    %140 = arith.divf %138, %139 : vector<16x1xf32>
    %141 = vector.broadcast %133 : vector<16x1xf32> to vector<16x32xf32>
    %142 = arith.subf %125, %141 : vector<16x32xf32>
    %cst_74 = arith.constant 9.99999974E-6 : f32
    %143 = vector.broadcast %cst_74 : f32 to vector<16x1xf32>
    %144 = arith.addf %140, %143 : vector<16x1xf32>
    %145 = math.rsqrt %144 : vector<16x1xf32>
    %146 = vector.broadcast %145 : vector<16x1xf32> to vector<16x32xf32>
    %147 = arith.mulf %142, %146 : vector<16x32xf32>
    %148 = vector.broadcast %127 : vector<1x32xf32> to vector<16x32xf32>
    %149 = arith.mulf %147, %148 : vector<16x32xf32>
    %150 = vector.broadcast %129 : vector<1x32xf32> to vector<16x32xf32>
    %151 = arith.addf %149, %150 : vector<16x32xf32>
    %c0_75 = arith.constant 0 : index
    %c0_76 = arith.constant 0 : index
    %c0_77 = arith.constant 0 : index
    %152 = vector.load %arg18[%c0_75, %c0_76, %c0_77] : memref<2x32x64xf32, #tpu.memory_space<vmem>>, vector<1x32x64xf32>
    %153 = vector.shape_cast %152 : vector<1x32x64xf32> to vector<32x64xf32>
    %cst_78 = arith.constant dense<0.000000e+00> : vector<16x64xf32>
    %154 = tpu.matmul %151, %153, %cst_78 {dimension_numbers = #tpu.dot_dimension_numbers<[1], [0], [0], [1], [0, 0, 1, 1], [], []>} : vector<16x32xf32>, vector<32x64xf32>, vector<16x64xf32> -> vector<16x64xf32>
    %c0_79 = arith.constant 0 : index
    %c0_80 = arith.constant 0 : index
    %c0_81 = arith.constant 0 : index
    %155 = vector.load %arg19[%c0_79, %c0_80, %c0_81] : memref<2x1x64xf32, #tpu.memory_space<vmem>>, vector<1x1x64xf32>
    %156 = vector.shape_cast %155 : vector<1x1x64xf32> to vector<1x64xf32>
    %157 = vector.broadcast %156 : vector<1x64xf32> to vector<16x64xf32>
    %158 = arith.addf %154, %157 : vector<16x64xf32>
    %cst_82 = arith.constant 0.000000e+00 : f32
    %159 = vector.broadcast %cst_82 : f32 to vector<16x64xf32>
    %160 = arith.maximumf %158, %159 : vector<16x64xf32>
    %c0_83 = arith.constant 0 : index
    %c0_84 = arith.constant 0 : index
    %c0_85 = arith.constant 0 : index
    %161 = vector.load %arg20[%c0_83, %c0_84, %c0_85] : memref<2x64x32xf32, #tpu.memory_space<vmem>>, vector<1x64x32xf32>
    %162 = vector.shape_cast %161 : vector<1x64x32xf32> to vector<64x32xf32>
    %cst_86 = arith.constant dense<0.000000e+00> : vector<16x32xf32>
    %163 = tpu.matmul %160, %162, %cst_86 {dimension_numbers = #tpu.dot_dimension_numbers<[1], [0], [0], [1], [0, 0, 1, 1], [], []>} : vector<16x64xf32>, vector<64x32xf32>, vector<16x32xf32> -> vector<16x32xf32>
    %c0_87 = arith.constant 0 : index
    %c0_88 = arith.constant 0 : index
    %c0_89 = arith.constant 0 : index
    %164 = vector.load %arg21[%c0_87, %c0_88, %c0_89] : memref<2x1x32xf32, #tpu.memory_space<vmem>>, vector<1x1x32xf32>
    %165 = vector.shape_cast %164 : vector<1x1x32xf32> to vector<1x32xf32>
    %166 = vector.broadcast %165 : vector<1x32xf32> to vector<16x32xf32>
    %167 = arith.addf %163, %166 : vector<16x32xf32>
    %168 = arith.addf %151, %167 : vector<16x32xf32>
    %c0_90 = arith.constant 0 : index
    %c0_91 = arith.constant 0 : index
    %c0_92 = arith.constant 0 : index
    %169 = vector.load %arg22[%c0_90, %c0_91, %c0_92] : memref<2x1x32xf32, #tpu.memory_space<vmem>>, vector<1x1x32xf32>
    %170 = vector.shape_cast %169 : vector<1x1x32xf32> to vector<1x32xf32>
    %c0_93 = arith.constant 0 : index
    %c0_94 = arith.constant 0 : index
    %c0_95 = arith.constant 0 : index
    %171 = vector.load %arg23[%c0_93, %c0_94, %c0_95] : memref<2x1x32xf32, #tpu.memory_space<vmem>>, vector<1x1x32xf32>
    %172 = vector.shape_cast %171 : vector<1x1x32xf32> to vector<1x32xf32>
    %cst_96 = arith.constant dense<0.000000e+00> : vector<16xf32>
    %173 = vector.multi_reduction <add>, %168, %cst_96 [1] : vector<16x32xf32> to vector<16xf32>
    %174 = vector.shape_cast %173 : vector<16xf32> to vector<16x1xf32>
    %cst_97 = arith.constant 3.200000e+01 : f32
    %175 = vector.broadcast %cst_97 : f32 to vector<16x1xf32>
    %176 = arith.divf %174, %175 : vector<16x1xf32>
    %177 = vector.broadcast %176 : vector<16x1xf32> to vector<16x32xf32>
    %178 = arith.subf %168, %177 : vector<16x32xf32>
    %179 = arith.mulf %178, %178 : vector<16x32xf32>
    %cst_98 = arith.constant dense<0.000000e+00> : vector<16xf32>
    %180 = vector.multi_reduction <add>, %179, %cst_98 [1] : vector<16x32xf32> to vector<16xf32>
    %181 = vector.shape_cast %180 : vector<16xf32> to vector<16x1xf32>
    %cst_99 = arith.constant 3.200000e+01 : f32
    %182 = vector.broadcast %cst_99 : f32 to vector<16x1xf32>
    %183 = arith.divf %181, %182 : vector<16x1xf32>
    %184 = vector.broadcast %176 : vector<16x1xf32> to vector<16x32xf32>
    %185 = arith.subf %168, %184 : vector<16x32xf32>
    %cst_100 = arith.constant 9.99999974E-6 : f32
    %186 = vector.broadcast %cst_100 : f32 to vector<16x1xf32>
    %187 = arith.addf %183, %186 : vector<16x1xf32>
    %188 = math.rsqrt %187 : vector<16x1xf32>
    %189 = vector.broadcast %188 : vector<16x1xf32> to vector<16x32xf32>
    %190 = arith.mulf %185, %189 : vector<16x32xf32>
    %191 = vector.broadcast %170 : vector<1x32xf32> to vector<16x32xf32>
    %192 = arith.mulf %190, %191 : vector<16x32xf32>
    %193 = vector.broadcast %172 : vector<1x32xf32> to vector<16x32xf32>
    %194 = arith.addf %192, %193 : vector<16x32xf32>
    %195 = arith.addf %194, %1 : vector<16x32xf32>
    %c1 = arith.constant 1 : index
    %c0_101 = arith.constant 0 : index
    %c0_102 = arith.constant 0 : index
    %196 = vector.load %arg8[%c1, %c0_101, %c0_102] : memref<2x32x32xf32, #tpu.memory_space<vmem>>, vector<1x32x32xf32>
    %197 = vector.shape_cast %196 : vector<1x32x32xf32> to vector<32x32xf32>
    %cst_103 = arith.constant dense<0.000000e+00> : vector<16x32xf32>
    %198 = tpu.matmul %195, %197, %cst_103 {dimension_numbers = #tpu.dot_dimension_numbers<[1], [0], [0], [1], [0, 0, 1, 1], [], []>} : vector<16x32xf32>, vector<32x32xf32>, vector<16x32xf32> -> vector<16x32xf32>
    %c1_104 = arith.constant 1 : index
    %c0_105 = arith.constant 0 : index
    %c0_106 = arith.constant 0 : index
    %199 = vector.load %arg9[%c1_104, %c0_105, %c0_106] : memref<2x1x32xf32, #tpu.memory_space<vmem>>, vector<1x1x32xf32>
    %200 = vector.shape_cast %199 : vector<1x1x32xf32> to vector<1x32xf32>
    %201 = vector.broadcast %200 : vector<1x32xf32> to vector<16x32xf32>
    %202 = arith.addf %198, %201 : vector<16x32xf32>
    %c1_107 = arith.constant 1 : index
    %c0_108 = arith.constant 0 : index
    %c0_109 = arith.constant 0 : index
    %203 = vector.load %arg10[%c1_107, %c0_108, %c0_109] : memref<2x32x32xf32, #tpu.memory_space<vmem>>, vector<1x32x32xf32>
    %204 = vector.shape_cast %203 : vector<1x32x32xf32> to vector<32x32xf32>
    %cst_110 = arith.constant dense<0.000000e+00> : vector<16x32xf32>
    %205 = tpu.matmul %195, %204, %cst_110 {dimension_numbers = #tpu.dot_dimension_numbers<[1], [0], [0], [1], [0, 0, 1, 1], [], []>} : vector<16x32xf32>, vector<32x32xf32>, vector<16x32xf32> -> vector<16x32xf32>
    %c1_111 = arith.constant 1 : index
    %c0_112 = arith.constant 0 : index
    %c0_113 = arith.constant 0 : index
    %206 = vector.load %arg11[%c1_111, %c0_112, %c0_113] : memref<2x1x32xf32, #tpu.memory_space<vmem>>, vector<1x1x32xf32>
    %207 = vector.shape_cast %206 : vector<1x1x32xf32> to vector<1x32xf32>
    %208 = vector.broadcast %207 : vector<1x32xf32> to vector<16x32xf32>
    %209 = arith.addf %205, %208 : vector<16x32xf32>
    %c1_114 = arith.constant 1 : index
    %c0_115 = arith.constant 0 : index
    %c0_116 = arith.constant 0 : index
    %210 = vector.load %arg12[%c1_114, %c0_115, %c0_116] : memref<2x32x32xf32, #tpu.memory_space<vmem>>, vector<1x32x32xf32>
    %211 = vector.shape_cast %210 : vector<1x32x32xf32> to vector<32x32xf32>
    %cst_117 = arith.constant dense<0.000000e+00> : vector<16x32xf32>
    %212 = tpu.matmul %194, %211, %cst_117 {dimension_numbers = #tpu.dot_dimension_numbers<[1], [0], [0], [1], [0, 0, 1, 1], [], []>} : vector<16x32xf32>, vector<32x32xf32>, vector<16x32xf32> -> vector<16x32xf32>
    %c1_118 = arith.constant 1 : index
    %c0_119 = arith.constant 0 : index
    %c0_120 = arith.constant 0 : index
    %213 = vector.load %arg13[%c1_118, %c0_119, %c0_120] : memref<2x1x32xf32, #tpu.memory_space<vmem>>, vector<1x1x32xf32>
    %214 = vector.shape_cast %213 : vector<1x1x32xf32> to vector<1x32xf32>
    %215 = vector.broadcast %214 : vector<1x32xf32> to vector<16x32xf32>
    %216 = arith.addf %212, %215 : vector<16x32xf32>
    %217 = vector.shape_cast %202 : vector<16x32xf32> to vector<2x8x32xf32>
    %218 = vector.shape_cast %209 : vector<16x32xf32> to vector<2x8x32xf32>
    %219 = vector.shape_cast %216 : vector<16x32xf32> to vector<2x8x32xf32>
    %c1_121 = arith.constant 1 : index
    %c0_122 = arith.constant 0 : index
    %c0_123 = arith.constant 0 : index
    %220 = vector.load %arg14[%c1_121, %c0_122, %c0_123] : memref<2x32x32xf32, #tpu.memory_space<vmem>>, vector<1x32x32xf32>
    %221 = vector.shape_cast %220 : vector<1x32x32xf32> to vector<32x32xf32>
    %cst_124 = arith.constant 0.000000e+00 : f32
    %222 = vector.broadcast %cst_124 : f32 to vector<16x32xf32>
    %223 = vector.extract_strided_slice %217 {offsets = [0, 0, 0], sizes = [2, 8, 8], strides = [1, 1, 1]} : vector<2x8x32xf32> to vector<2x8x8xf32>
    %224 = vector.extract_strided_slice %218 {offsets = [0, 0, 0], sizes = [2, 8, 8], strides = [1, 1, 1]} : vector<2x8x32xf32> to vector<2x8x8xf32>
    %225 = vector.extract_strided_slice %219 {offsets = [0, 0, 0], sizes = [2, 8, 8], strides = [1, 1, 1]} : vector<2x8x32xf32> to vector<2x8x8xf32>
    "tpu.trace_start"() <{level = 10 : i32, message = "bqd,bkd->bqk"}> : () -> ()
    %cst_125 = arith.constant dense<0.000000e+00> : vector<2x8x8xf32>
    %226 = tpu.matmul %223, %224, %cst_125 {dimension_numbers = #tpu.dot_dimension_numbers<[2], [2], [1], [1], [0, 0, 0, 1, 1, 1], [0], [0]>} : vector<2x8x8xf32>, vector<2x8x8xf32>, vector<2x8x8xf32> -> vector<2x8x8xf32>
    "tpu.trace_stop"() : () -> ()
    %cst_126 = arith.constant 0.353553385 : f32
    %227 = vector.broadcast %cst_126 : f32 to vector<2x8x8xf32>
    %228 = arith.mulf %226, %227 : vector<2x8x8xf32>
    %cst_127 = arith.constant dense<0xFF800000> : vector<2x8xf32>
    %229 = vector.multi_reduction <maximumf>, %228, %cst_127 [2] : vector<2x8x8xf32> to vector<2x8xf32>
    %230 = vector.shape_cast %229 : vector<2x8xf32> to vector<2x8x1xf32>
    %231 = vector.broadcast %230 : vector<2x8x1xf32> to vector<2x8x8xf32>
    %232 = arith.subf %228, %231 : vector<2x8x8xf32>
    %233 = math.exp %232 : vector<2x8x8xf32>
    %cst_128 = arith.constant dense<0.000000e+00> : vector<2x8xf32>
    %234 = vector.multi_reduction <add>, %233, %cst_128 [2] : vector<2x8x8xf32> to vector<2x8xf32>
    %235 = vector.shape_cast %234 : vector<2x8xf32> to vector<2x8x1xf32>
    %236 = vector.broadcast %235 : vector<2x8x1xf32> to vector<2x8x8xf32>
    %237 = arith.divf %233, %236 : vector<2x8x8xf32>
    "tpu.trace_start"() <{level = 10 : i32, message = "bqk,bkd->bqd"}> : () -> ()
    %cst_129 = arith.constant dense<0.000000e+00> : vector<2x8x8xf32>
    %238 = tpu.matmul %237, %225, %cst_129 {dimension_numbers = #tpu.dot_dimension_numbers<[2], [1], [1], [2], [0, 0, 0, 1, 1, 2], [0], [0]>} : vector<2x8x8xf32>, vector<2x8x8xf32>, vector<2x8x8xf32> -> vector<2x8x8xf32>
    "tpu.trace_stop"() : () -> ()
    %239 = vector.shape_cast %238 : vector<2x8x8xf32> to vector<16x8xf32>
    %240 = vector.extract_strided_slice %221 {offsets = [0, 0], sizes = [8, 32], strides = [1, 1]} : vector<32x32xf32> to vector<8x32xf32>
    %cst_130 = arith.constant dense<0.000000e+00> : vector<16x32xf32>
    %241 = tpu.matmul %239, %240, %cst_130 {dimension_numbers = #tpu.dot_dimension_numbers<[1], [0], [0], [1], [0, 0, 1, 1], [], []>} : vector<16x8xf32>, vector<8x32xf32>, vector<16x32xf32> -> vector<16x32xf32>
    %242 = arith.addf %222, %241 : vector<16x32xf32>
    %243 = vector.extract_strided_slice %217 {offsets = [0, 0, 8], sizes = [2, 8, 8], strides = [1, 1, 1]} : vector<2x8x32xf32> to vector<2x8x8xf32>
    %244 = vector.extract_strided_slice %218 {offsets = [0, 0, 8], sizes = [2, 8, 8], strides = [1, 1, 1]} : vector<2x8x32xf32> to vector<2x8x8xf32>
    %245 = vector.extract_strided_slice %219 {offsets = [0, 0, 8], sizes = [2, 8, 8], strides = [1, 1, 1]} : vector<2x8x32xf32> to vector<2x8x8xf32>
    "tpu.trace_start"() <{level = 10 : i32, message = "bqd,bkd->bqk"}> : () -> ()
    %cst_131 = arith.constant dense<0.000000e+00> : vector<2x8x8xf32>
    %246 = tpu.matmul %243, %244, %cst_131 {dimension_numbers = #tpu.dot_dimension_numbers<[2], [2], [1], [1], [0, 0, 0, 1, 1, 1], [0], [0]>} : vector<2x8x8xf32>, vector<2x8x8xf32>, vector<2x8x8xf32> -> vector<2x8x8xf32>
    "tpu.trace_stop"() : () -> ()
    %cst_132 = arith.constant 0.353553385 : f32
    %247 = vector.broadcast %cst_132 : f32 to vector<2x8x8xf32>
    %248 = arith.mulf %246, %247 : vector<2x8x8xf32>
    %cst_133 = arith.constant dense<0xFF800000> : vector<2x8xf32>
    %249 = vector.multi_reduction <maximumf>, %248, %cst_133 [2] : vector<2x8x8xf32> to vector<2x8xf32>
    %250 = vector.shape_cast %249 : vector<2x8xf32> to vector<2x8x1xf32>
    %251 = vector.broadcast %250 : vector<2x8x1xf32> to vector<2x8x8xf32>
    %252 = arith.subf %248, %251 : vector<2x8x8xf32>
    %253 = math.exp %252 : vector<2x8x8xf32>
    %cst_134 = arith.constant dense<0.000000e+00> : vector<2x8xf32>
    %254 = vector.multi_reduction <add>, %253, %cst_134 [2] : vector<2x8x8xf32> to vector<2x8xf32>
    %255 = vector.shape_cast %254 : vector<2x8xf32> to vector<2x8x1xf32>
    %256 = vector.broadcast %255 : vector<2x8x1xf32> to vector<2x8x8xf32>
    %257 = arith.divf %253, %256 : vector<2x8x8xf32>
    "tpu.trace_start"() <{level = 10 : i32, message = "bqk,bkd->bqd"}> : () -> ()
    %cst_135 = arith.constant dense<0.000000e+00> : vector<2x8x8xf32>
    %258 = tpu.matmul %257, %245, %cst_135 {dimension_numbers = #tpu.dot_dimension_numbers<[2], [1], [1], [2], [0, 0, 0, 1, 1, 2], [0], [0]>} : vector<2x8x8xf32>, vector<2x8x8xf32>, vector<2x8x8xf32> -> vector<2x8x8xf32>
    "tpu.trace_stop"() : () -> ()
    %259 = vector.shape_cast %258 : vector<2x8x8xf32> to vector<16x8xf32>
    %260 = vector.extract_strided_slice %221 {offsets = [8, 0], sizes = [8, 32], strides = [1, 1]} : vector<32x32xf32> to vector<8x32xf32>
    %cst_136 = arith.constant dense<0.000000e+00> : vector<16x32xf32>
    %261 = tpu.matmul %259, %260, %cst_136 {dimension_numbers = #tpu.dot_dimension_numbers<[1], [0], [0], [1], [0, 0, 1, 1], [], []>} : vector<16x8xf32>, vector<8x32xf32>, vector<16x32xf32> -> vector<16x32xf32>
    %262 = arith.addf %242, %261 : vector<16x32xf32>
    %263 = vector.extract_strided_slice %217 {offsets = [0, 0, 16], sizes = [2, 8, 8], strides = [1, 1, 1]} : vector<2x8x32xf32> to vector<2x8x8xf32>
    %264 = vector.extract_strided_slice %218 {offsets = [0, 0, 16], sizes = [2, 8, 8], strides = [1, 1, 1]} : vector<2x8x32xf32> to vector<2x8x8xf32>
    %265 = vector.extract_strided_slice %219 {offsets = [0, 0, 16], sizes = [2, 8, 8], strides = [1, 1, 1]} : vector<2x8x32xf32> to vector<2x8x8xf32>
    "tpu.trace_start"() <{level = 10 : i32, message = "bqd,bkd->bqk"}> : () -> ()
    %cst_137 = arith.constant dense<0.000000e+00> : vector<2x8x8xf32>
    %266 = tpu.matmul %263, %264, %cst_137 {dimension_numbers = #tpu.dot_dimension_numbers<[2], [2], [1], [1], [0, 0, 0, 1, 1, 1], [0], [0]>} : vector<2x8x8xf32>, vector<2x8x8xf32>, vector<2x8x8xf32> -> vector<2x8x8xf32>
    "tpu.trace_stop"() : () -> ()
    %cst_138 = arith.constant 0.353553385 : f32
    %267 = vector.broadcast %cst_138 : f32 to vector<2x8x8xf32>
    %268 = arith.mulf %266, %267 : vector<2x8x8xf32>
    %cst_139 = arith.constant dense<0xFF800000> : vector<2x8xf32>
    %269 = vector.multi_reduction <maximumf>, %268, %cst_139 [2] : vector<2x8x8xf32> to vector<2x8xf32>
    %270 = vector.shape_cast %269 : vector<2x8xf32> to vector<2x8x1xf32>
    %271 = vector.broadcast %270 : vector<2x8x1xf32> to vector<2x8x8xf32>
    %272 = arith.subf %268, %271 : vector<2x8x8xf32>
    %273 = math.exp %272 : vector<2x8x8xf32>
    %cst_140 = arith.constant dense<0.000000e+00> : vector<2x8xf32>
    %274 = vector.multi_reduction <add>, %273, %cst_140 [2] : vector<2x8x8xf32> to vector<2x8xf32>
    %275 = vector.shape_cast %274 : vector<2x8xf32> to vector<2x8x1xf32>
    %276 = vector.broadcast %275 : vector<2x8x1xf32> to vector<2x8x8xf32>
    %277 = arith.divf %273, %276 : vector<2x8x8xf32>
    "tpu.trace_start"() <{level = 10 : i32, message = "bqk,bkd->bqd"}> : () -> ()
    %cst_141 = arith.constant dense<0.000000e+00> : vector<2x8x8xf32>
    %278 = tpu.matmul %277, %265, %cst_141 {dimension_numbers = #tpu.dot_dimension_numbers<[2], [1], [1], [2], [0, 0, 0, 1, 1, 2], [0], [0]>} : vector<2x8x8xf32>, vector<2x8x8xf32>, vector<2x8x8xf32> -> vector<2x8x8xf32>
    "tpu.trace_stop"() : () -> ()
    %279 = vector.shape_cast %278 : vector<2x8x8xf32> to vector<16x8xf32>
    %280 = vector.extract_strided_slice %221 {offsets = [16, 0], sizes = [8, 32], strides = [1, 1]} : vector<32x32xf32> to vector<8x32xf32>
    %cst_142 = arith.constant dense<0.000000e+00> : vector<16x32xf32>
    %281 = tpu.matmul %279, %280, %cst_142 {dimension_numbers = #tpu.dot_dimension_numbers<[1], [0], [0], [1], [0, 0, 1, 1], [], []>} : vector<16x8xf32>, vector<8x32xf32>, vector<16x32xf32> -> vector<16x32xf32>
    %282 = arith.addf %262, %281 : vector<16x32xf32>
    %283 = vector.extract_strided_slice %217 {offsets = [0, 0, 24], sizes = [2, 8, 8], strides = [1, 1, 1]} : vector<2x8x32xf32> to vector<2x8x8xf32>
    %284 = vector.extract_strided_slice %218 {offsets = [0, 0, 24], sizes = [2, 8, 8], strides = [1, 1, 1]} : vector<2x8x32xf32> to vector<2x8x8xf32>
    %285 = vector.extract_strided_slice %219 {offsets = [0, 0, 24], sizes = [2, 8, 8], strides = [1, 1, 1]} : vector<2x8x32xf32> to vector<2x8x8xf32>
    "tpu.trace_start"() <{level = 10 : i32, message = "bqd,bkd->bqk"}> : () -> ()
    %cst_143 = arith.constant dense<0.000000e+00> : vector<2x8x8xf32>
    %286 = tpu.matmul %283, %284, %cst_143 {dimension_numbers = #tpu.dot_dimension_numbers<[2], [2], [1], [1], [0, 0, 0, 1, 1, 1], [0], [0]>} : vector<2x8x8xf32>, vector<2x8x8xf32>, vector<2x8x8xf32> -> vector<2x8x8xf32>
    "tpu.trace_stop"() : () -> ()
    %cst_144 = arith.constant 0.353553385 : f32
    %287 = vector.broadcast %cst_144 : f32 to vector<2x8x8xf32>
    %288 = arith.mulf %286, %287 : vector<2x8x8xf32>
    %cst_145 = arith.constant dense<0xFF800000> : vector<2x8xf32>
    %289 = vector.multi_reduction <maximumf>, %288, %cst_145 [2] : vector<2x8x8xf32> to vector<2x8xf32>
    %290 = vector.shape_cast %289 : vector<2x8xf32> to vector<2x8x1xf32>
    %291 = vector.broadcast %290 : vector<2x8x1xf32> to vector<2x8x8xf32>
    %292 = arith.subf %288, %291 : vector<2x8x8xf32>
    %293 = math.exp %292 : vector<2x8x8xf32>
    %cst_146 = arith.constant dense<0.000000e+00> : vector<2x8xf32>
    %294 = vector.multi_reduction <add>, %293, %cst_146 [2] : vector<2x8x8xf32> to vector<2x8xf32>
    %295 = vector.shape_cast %294 : vector<2x8xf32> to vector<2x8x1xf32>
    %296 = vector.broadcast %295 : vector<2x8x1xf32> to vector<2x8x8xf32>
    %297 = arith.divf %293, %296 : vector<2x8x8xf32>
    "tpu.trace_start"() <{level = 10 : i32, message = "bqk,bkd->bqd"}> : () -> ()
    %cst_147 = arith.constant dense<0.000000e+00> : vector<2x8x8xf32>
    %298 = tpu.matmul %297, %285, %cst_147 {dimension_numbers = #tpu.dot_dimension_numbers<[2], [1], [1], [2], [0, 0, 0, 1, 1, 2], [0], [0]>} : vector<2x8x8xf32>, vector<2x8x8xf32>, vector<2x8x8xf32> -> vector<2x8x8xf32>
    "tpu.trace_stop"() : () -> ()
    %299 = vector.shape_cast %298 : vector<2x8x8xf32> to vector<16x8xf32>
    %300 = vector.extract_strided_slice %221 {offsets = [24, 0], sizes = [8, 32], strides = [1, 1]} : vector<32x32xf32> to vector<8x32xf32>
    %cst_148 = arith.constant dense<0.000000e+00> : vector<16x32xf32>
    %301 = tpu.matmul %299, %300, %cst_148 {dimension_numbers = #tpu.dot_dimension_numbers<[1], [0], [0], [1], [0, 0, 1, 1], [], []>} : vector<16x8xf32>, vector<8x32xf32>, vector<16x32xf32> -> vector<16x32xf32>
    %302 = arith.addf %282, %301 : vector<16x32xf32>
    %c1_149 = arith.constant 1 : index
    %c0_150 = arith.constant 0 : index
    %c0_151 = arith.constant 0 : index
    %303 = vector.load %arg15[%c1_149, %c0_150, %c0_151] : memref<2x1x32xf32, #tpu.memory_space<vmem>>, vector<1x1x32xf32>
    %304 = vector.shape_cast %303 : vector<1x1x32xf32> to vector<1x32xf32>
    %305 = vector.broadcast %304 : vector<1x32xf32> to vector<16x32xf32>
    %306 = arith.addf %302, %305 : vector<16x32xf32>
    %307 = arith.addf %194, %306 : vector<16x32xf32>
    %c1_152 = arith.constant 1 : index
    %c0_153 = arith.constant 0 : index
    %c0_154 = arith.constant 0 : index
    %308 = vector.load %arg16[%c1_152, %c0_153, %c0_154] : memref<2x1x32xf32, #tpu.memory_space<vmem>>, vector<1x1x32xf32>
    %309 = vector.shape_cast %308 : vector<1x1x32xf32> to vector<1x32xf32>
    %c1_155 = arith.constant 1 : index
    %c0_156 = arith.constant 0 : index
    %c0_157 = arith.constant 0 : index
    %310 = vector.load %arg17[%c1_155, %c0_156, %c0_157] : memref<2x1x32xf32, #tpu.memory_space<vmem>>, vector<1x1x32xf32>
    %311 = vector.shape_cast %310 : vector<1x1x32xf32> to vector<1x32xf32>
    %cst_158 = arith.constant dense<0.000000e+00> : vector<16xf32>
    %312 = vector.multi_reduction <add>, %307, %cst_158 [1] : vector<16x32xf32> to vector<16xf32>
    %313 = vector.shape_cast %312 : vector<16xf32> to vector<16x1xf32>
    %cst_159 = arith.constant 3.200000e+01 : f32
    %314 = vector.broadcast %cst_159 : f32 to vector<16x1xf32>
    %315 = arith.divf %313, %314 : vector<16x1xf32>
    %316 = vector.broadcast %315 : vector<16x1xf32> to vector<16x32xf32>
    %317 = arith.subf %307, %316 : vector<16x32xf32>
    %318 = arith.mulf %317, %317 : vector<16x32xf32>
    %cst_160 = arith.constant dense<0.000000e+00> : vector<16xf32>
    %319 = vector.multi_reduction <add>, %318, %cst_160 [1] : vector<16x32xf32> to vector<16xf32>
    %320 = vector.shape_cast %319 : vector<16xf32> to vector<16x1xf32>
    %cst_161 = arith.constant 3.200000e+01 : f32
    %321 = vector.broadcast %cst_161 : f32 to vector<16x1xf32>
    %322 = arith.divf %320, %321 : vector<16x1xf32>
    %323 = vector.broadcast %315 : vector<16x1xf32> to vector<16x32xf32>
    %324 = arith.subf %307, %323 : vector<16x32xf32>
    %cst_162 = arith.constant 9.99999974E-6 : f32
    %325 = vector.broadcast %cst_162 : f32 to vector<16x1xf32>
    %326 = arith.addf %322, %325 : vector<16x1xf32>
    %327 = math.rsqrt %326 : vector<16x1xf32>
    %328 = vector.broadcast %327 : vector<16x1xf32> to vector<16x32xf32>
    %329 = arith.mulf %324, %328 : vector<16x32xf32>
    %330 = vector.broadcast %309 : vector<1x32xf32> to vector<16x32xf32>
    %331 = arith.mulf %329, %330 : vector<16x32xf32>
    %332 = vector.broadcast %311 : vector<1x32xf32> to vector<16x32xf32>
    %333 = arith.addf %331, %332 : vector<16x32xf32>
    %c1_163 = arith.constant 1 : index
    %c0_164 = arith.constant 0 : index
    %c0_165 = arith.constant 0 : index
    %334 = vector.load %arg18[%c1_163, %c0_164, %c0_165] : memref<2x32x64xf32, #tpu.memory_space<vmem>>, vector<1x32x64xf32>
    %335 = vector.shape_cast %334 : vector<1x32x64xf32> to vector<32x64xf32>
    %cst_166 = arith.constant dense<0.000000e+00> : vector<16x64xf32>
    %336 = tpu.matmul %333, %335, %cst_166 {dimension_numbers = #tpu.dot_dimension_numbers<[1], [0], [0], [1], [0, 0, 1, 1], [], []>} : vector<16x32xf32>, vector<32x64xf32>, vector<16x64xf32> -> vector<16x64xf32>
    %c1_167 = arith.constant 1 : index
    %c0_168 = arith.constant 0 : index
    %c0_169 = arith.constant 0 : index
    %337 = vector.load %arg19[%c1_167, %c0_168, %c0_169] : memref<2x1x64xf32, #tpu.memory_space<vmem>>, vector<1x1x64xf32>
    %338 = vector.shape_cast %337 : vector<1x1x64xf32> to vector<1x64xf32>
    %339 = vector.broadcast %338 : vector<1x64xf32> to vector<16x64xf32>
    %340 = arith.addf %336, %339 : vector<16x64xf32>
    %cst_170 = arith.constant 0.000000e+00 : f32
    %341 = vector.broadcast %cst_170 : f32 to vector<16x64xf32>
    %342 = arith.maximumf %340, %341 : vector<16x64xf32>
    %c1_171 = arith.constant 1 : index
    %c0_172 = arith.constant 0 : index
    %c0_173 = arith.constant 0 : index
    %343 = vector.load %arg20[%c1_171, %c0_172, %c0_173] : memref<2x64x32xf32, #tpu.memory_space<vmem>>, vector<1x64x32xf32>
    %344 = vector.shape_cast %343 : vector<1x64x32xf32> to vector<64x32xf32>
    %cst_174 = arith.constant dense<0.000000e+00> : vector<16x32xf32>
    %345 = tpu.matmul %342, %344, %cst_174 {dimension_numbers = #tpu.dot_dimension_numbers<[1], [0], [0], [1], [0, 0, 1, 1], [], []>} : vector<16x64xf32>, vector<64x32xf32>, vector<16x32xf32> -> vector<16x32xf32>
    %c1_175 = arith.constant 1 : index
    %c0_176 = arith.constant 0 : index
    %c0_177 = arith.constant 0 : index
    %346 = vector.load %arg21[%c1_175, %c0_176, %c0_177] : memref<2x1x32xf32, #tpu.memory_space<vmem>>, vector<1x1x32xf32>
    %347 = vector.shape_cast %346 : vector<1x1x32xf32> to vector<1x32xf32>
    %348 = vector.broadcast %347 : vector<1x32xf32> to vector<16x32xf32>
    %349 = arith.addf %345, %348 : vector<16x32xf32>
    %350 = arith.addf %333, %349 : vector<16x32xf32>
    %c1_178 = arith.constant 1 : index
    %c0_179 = arith.constant 0 : index
    %c0_180 = arith.constant 0 : index
    %351 = vector.load %arg22[%c1_178, %c0_179, %c0_180] : memref<2x1x32xf32, #tpu.memory_space<vmem>>, vector<1x1x32xf32>
    %352 = vector.shape_cast %351 : vector<1x1x32xf32> to vector<1x32xf32>
    %c1_181 = arith.constant 1 : index
    %c0_182 = arith.constant 0 : index
    %c0_183 = arith.constant 0 : index
    %353 = vector.load %arg23[%c1_181, %c0_182, %c0_183] : memref<2x1x32xf32, #tpu.memory_space<vmem>>, vector<1x1x32xf32>
    %354 = vector.shape_cast %353 : vector<1x1x32xf32> to vector<1x32xf32>
    %cst_184 = arith.constant dense<0.000000e+00> : vector<16xf32>
    %355 = vector.multi_reduction <add>, %350, %cst_184 [1] : vector<16x32xf32> to vector<16xf32>
    %356 = vector.shape_cast %355 : vector<16xf32> to vector<16x1xf32>
    %cst_185 = arith.constant 3.200000e+01 : f32
    %357 = vector.broadcast %cst_185 : f32 to vector<16x1xf32>
    %358 = arith.divf %356, %357 : vector<16x1xf32>
    %359 = vector.broadcast %358 : vector<16x1xf32> to vector<16x32xf32>
    %360 = arith.subf %350, %359 : vector<16x32xf32>
    %361 = arith.mulf %360, %360 : vector<16x32xf32>
    %cst_186 = arith.constant dense<0.000000e+00> : vector<16xf32>
    %362 = vector.multi_reduction <add>, %361, %cst_186 [1] : vector<16x32xf32> to vector<16xf32>
    %363 = vector.shape_cast %362 : vector<16xf32> to vector<16x1xf32>
    %cst_187 = arith.constant 3.200000e+01 : f32
    %364 = vector.broadcast %cst_187 : f32 to vector<16x1xf32>
    %365 = arith.divf %363, %364 : vector<16x1xf32>
    %366 = vector.broadcast %358 : vector<16x1xf32> to vector<16x32xf32>
    %367 = arith.subf %350, %366 : vector<16x32xf32>
    %cst_188 = arith.constant 9.99999974E-6 : f32
    %368 = vector.broadcast %cst_188 : f32 to vector<16x1xf32>
    %369 = arith.addf %365, %368 : vector<16x1xf32>
    %370 = math.rsqrt %369 : vector<16x1xf32>
    %371 = vector.broadcast %370 : vector<16x1xf32> to vector<16x32xf32>
    %372 = arith.mulf %367, %371 : vector<16x32xf32>
    %373 = vector.broadcast %352 : vector<1x32xf32> to vector<16x32xf32>
    %374 = arith.mulf %372, %373 : vector<16x32xf32>
    %375 = vector.broadcast %354 : vector<1x32xf32> to vector<16x32xf32>
    %376 = arith.addf %374, %375 : vector<16x32xf32>
    %c0_189 = arith.constant 0 : index
    %c0_190 = arith.constant 0 : index
    %377 = vector.load %arg24[%c0_189, %c0_190] : memref<32x32xf32, #tpu.memory_space<vmem>>, vector<32x32xf32>
    %cst_191 = arith.constant dense<0.000000e+00> : vector<16x32xf32>
    %378 = tpu.matmul %376, %377, %cst_191 {dimension_numbers = #tpu.dot_dimension_numbers<[1], [0], [0], [1], [0, 0, 1, 1], [], []>} : vector<16x32xf32>, vector<32x32xf32>, vector<16x32xf32> -> vector<16x32xf32>
    %c0_192 = arith.constant 0 : index
    %c0_193 = arith.constant 0 : index
    %379 = vector.load %arg25[%c0_192, %c0_193] : memref<1x32xf32, #tpu.memory_space<vmem>>, vector<1x32xf32>
    %380 = vector.broadcast %379 : vector<1x32xf32> to vector<16x32xf32>
    %381 = arith.addf %378, %380 : vector<16x32xf32>
    %382 = math.tanh %381 : vector<16x32xf32>
    %c0_194 = arith.constant 0 : index
    %c0_195 = arith.constant 0 : index
    %383 = vector.load %arg26[%c0_194, %c0_195] : memref<32x12xf32, #tpu.memory_space<vmem>>, vector<32x12xf32>
    %cst_196 = arith.constant dense<0.000000e+00> : vector<16x12xf32>
    %384 = tpu.matmul %382, %383, %cst_196 {dimension_numbers = #tpu.dot_dimension_numbers<[1], [0], [0], [1], [0, 0, 1, 1], [], []>} : vector<16x32xf32>, vector<32x12xf32>, vector<16x12xf32> -> vector<16x12xf32>
    %c0_197 = arith.constant 0 : index
    %c0_198 = arith.constant 0 : index
    %385 = vector.load %arg27[%c0_197, %c0_198] : memref<1x12xf32, #tpu.memory_space<vmem>>, vector<1x12xf32>
    %386 = vector.broadcast %385 : vector<1x12xf32> to vector<16x12xf32>
    %387 = arith.addf %384, %386 : vector<16x12xf32>
    %c0_199 = arith.constant 0 : index
    %c0_200 = arith.constant 0 : index
    %388 = vector.load %arg2[%c0_199, %c0_200] : memref<16x12xf32, #tpu.memory_space<vmem>>, vector<16x12xf32>
    %389 = arith.addf %387, %388 : vector<16x12xf32>
    %c0_201 = arith.constant 0 : index
    %c0_202 = arith.constant 0 : index
    %390 = vector.load %arg28[%c0_201, %c0_202] : memref<16x12xf32, #tpu.memory_space<vmem>>, vector<16x12xf32>
    tpu.vector_store %arg28[%c0_201, %c0_202], %389 {strides = array<i32>} : memref<16x12xf32, #tpu.memory_space<vmem>>, vector<16x12xf32>,
    return
  }
  func.func @transform_0(%arg0: i32) -> (i32, i32) {
    %c0_i32 = arith.constant 0 : i32
    %c0_i32_0 = arith.constant 0 : i32
    %c0_i32_1 = arith.constant 0 : i32
    return %c0_i32, %c0_i32_0 : i32, i32
  }
  func.func @transform_1(%arg0: i32) -> (i32, i32) {
    %c0_i32 = arith.constant 0 : i32
    %c0_i32_0 = arith.constant 0 : i32
    %c0_i32_1 = arith.constant 0 : i32
    return %c0_i32, %c0_i32_0 : i32, i32
  }
  func.func @transform_2(%arg0: i32) -> (i32, i32) {
    %c0_i32 = arith.constant 0 : i32
    %c0_i32_0 = arith.constant 0 : i32
    %c0_i32_1 = arith.constant 0 : i32
    return %c0_i32, %c0_i32_0 : i32, i32
  }
  func.func @transform_3(%arg0: i32) -> (i32, i32) {
    %c0_i32 = arith.constant 0 : i32
    %c0_i32_0 = arith.constant 0 : i32
    %c0_i32_1 = arith.constant 0 : i32
    return %c0_i32, %c0_i32_0 : i32, i32
  }
  func.func @transform_4(%arg0: i32) -> (i32, i32) {
    %c0_i32 = arith.constant 0 : i32
    %c0_i32_0 = arith.constant 0 : i32
    %c0_i32_1 = arith.constant 0 : i32
    return %c0_i32, %c0_i32_0 : i32, i32
  }
  func.func @transform_5(%arg0: i32) -> (i32, i32) {
    %c0_i32 = arith.constant 0 : i32
    %c0_i32_0 = arith.constant 0 : i32
    %c0_i32_1 = arith.constant 0 : i32
    return %c0_i32, %c0_i32_0 : i32, i32
  }
  func.func @transform_6(%arg0: i32) -> (i32, i32) {
    %c0_i32 = arith.constant 0 : i32
    %c0_i32_0 = arith.constant 0 : i32
    %c0_i32_1 = arith.constant 0 : i32
    return %c0_i32, %c0_i32_0 : i32, i32
  }
  func.func @transform_7(%arg0: i32) -> (i32, i32, i32) {
    %c0_i32 = arith.constant 0 : i32
    %c0_i32_0 = arith.constant 0 : i32
    %c0_i32_1 = arith.constant 0 : i32
    %c0_i32_2 = arith.constant 0 : i32
    return %c0_i32, %c0_i32_0, %c0_i32_1 : i32, i32, i32
  }
  func.func @transform_8(%arg0: i32) -> (i32, i32, i32) {
    %c0_i32 = arith.constant 0 : i32
    %c0_i32_0 = arith.constant 0 : i32
    %c0_i32_1 = arith.constant 0 : i32
    %c0_i32_2 = arith.constant 0 : i32
    return %c0_i32, %c0_i32_0, %c0_i32_1 : i32, i32, i32
  }
  func.func @transform_9(%arg0: i32) -> (i32, i32, i32) {
    %c0_i32 = arith.constant 0 : i32
    %c0_i32_0 = arith.constant 0 : i32
    %c0_i32_1 = arith.constant 0 : i32
    %c0_i32_2 = arith.constant 0 : i32
    return %c0_i32, %c0_i32_0, %c0_i32_1 : i32, i32, i32
  }
  func.func @transform_10(%arg0: i32) -> (i32, i32, i32) {
    %c0_i32 = arith.constant 0 : i32
    %c0_i32_0 = arith.constant 0 : i32
    %c0_i32_1 = arith.constant 0 : i32
    %c0_i32_2 = arith.constant 0 : i32
    return %c0_i32, %c0_i32_0, %c0_i32_1 : i32, i32, i32
  }
  func.func @transform_11(%arg0: i32) -> (i32, i32, i32) {
    %c0_i32 = arith.constant 0 : i32
    %c0_i32_0 = arith.constant 0 : i32
    %c0_i32_1 = arith.constant 0 : i32
    %c0_i32_2 = arith.constant 0 : i32
    return %c0_i32, %c0_i32_0, %c0_i32_1 : i32, i32, i32
  }
  func.func @transform_12(%arg0: i32) -> (i32, i32, i32) {
    %c0_i32 = arith.constant 0 : i32
    %c0_i32_0 = arith.constant 0 : i32
    %c0_i32_1 = arith.constant 0 : i32
    %c0_i32_2 = arith.constant 0 : i32
    return %c0_i32, %c0_i32_0, %c0_i32_1 : i32, i32, i32
  }
  func.func @transform_13(%arg0: i32) -> (i32, i32, i32) {
    %c0_i32 = arith.constant 0 : i32
    %c0_i32_0 = arith.constant 0 : i32
    %c0_i32_1 = arith.constant 0 : i32
    %c0_i32_2 = arith.constant 0 : i32
    return %c0_i32, %c0_i32_0, %c0_i32_1 : i32, i32, i32
  }
  func.func @transform_14(%arg0: i32) -> (i32, i32, i32) {
    %c0_i32 = arith.constant 0 : i32
    %c0_i32_0 = arith.constant 0 : i32
    %c0_i32_1 = arith.constant 0 : i32
    %c0_i32_2 = arith.constant 0 : i32
    return %c0_i32, %c0_i32_0, %c0_i32_1 : i32, i32, i32
  }
  func.func @transform_15(%arg0: i32) -> (i32, i32, i32) {
    %c0_i32 = arith.constant 0 : i32
    %c0_i32_0 = arith.constant 0 : i32
    %c0_i32_1 = arith.constant 0 : i32
    %c0_i32_2 = arith.constant 0 : i32
    return %c0_i32, %c0_i32_0, %c0_i32_1 : i32, i32, i32
  }
  func.func @transform_16(%arg0: i32) -> (i32, i32, i32) {
    %c0_i32 = arith.constant 0 : i32
    %c0_i32_0 = arith.constant 0 : i32
    %c0_i32_1 = arith.constant 0 : i32
    %c0_i32_2 = arith.constant 0 : i32
    return %c0_i32, %c0_i32_0, %c0_i32_1 : i32, i32, i32
  }
  func.func @transform_17(%arg0: i32) -> (i32, i32, i32) {
    %c0_i32 = arith.constant 0 : i32
    %c0_i32_0 = arith.constant 0 : i32
    %c0_i32_1 = arith.constant 0 : i32
    %c0_i32_2 = arith.constant 0 : i32
    return %c0_i32, %c0_i32_0, %c0_i32_1 : i32, i32, i32
  }
  func.func @transform_18(%arg0: i32) -> (i32, i32, i32) {
    %c0_i32 = arith.constant 0 : i32
    %c0_i32_0 = arith.constant 0 : i32
    %c0_i32_1 = arith.constant 0 : i32
    %c0_i32_2 = arith.constant 0 : i32
    return %c0_i32, %c0_i32_0, %c0_i32_1 : i32, i32, i32
  }
  func.func @transform_19(%arg0: i32) -> (i32, i32, i32) {
    %c0_i32 = arith.constant 0 : i32
    %c0_i32_0 = arith.constant 0 : i32
    %c0_i32_1 = arith.constant 0 : i32
    %c0_i32_2 = arith.constant 0 : i32
    return %c0_i32, %c0_i32_0, %c0_i32_1 : i32, i32, i32
  }
  func.func @transform_20(%arg0: i32) -> (i32, i32, i32) {
    %c0_i32 = arith.constant 0 : i32
    %c0_i32_0 = arith.constant 0 : i32
    %c0_i32_1 = arith.constant 0 : i32
    %c0_i32_2 = arith.constant 0 : i32
    return %c0_i32, %c0_i32_0, %c0_i32_1 : i32, i32, i32
  }
  func.func @transform_21(%arg0: i32) -> (i32, i32, i32) {
    %c0_i32 = arith.constant 0 : i32
    %c0_i32_0 = arith.constant 0 : i32
    %c0_i32_1 = arith.constant 0 : i32
    %c0_i32_2 = arith.constant 0 : i32
    return %c0_i32, %c0_i32_0, %c0_i32_1 : i32, i32, i32
  }
  func.func @transform_22(%arg0: i32) -> (i32, i32, i32) {
    %c0_i32 = arith.constant 0 : i32
    %c0_i32_0 = arith.constant 0 : i32
    %c0_i32_1 = arith.constant 0 : i32
    %c0_i32_2 = arith.constant 0 : i32
    return %c0_i32, %c0_i32_0, %c0_i32_1 : i32, i32, i32
  }
  func.func @transform_23(%arg0: i32) -> (i32, i32) {
    %c0_i32 = arith.constant 0 : i32
    %c0_i32_0 = arith.constant 0 : i32
    %c0_i32_1 = arith.constant 0 : i32
    return %c0_i32, %c0_i32_0 : i32, i32
  }
  func.func @transform_24(%arg0: i32) -> (i32, i32) {
    %c0_i32 = arith.constant 0 : i32
    %c0_i32_0 = arith.constant 0 : i32
    %c0_i32_1 = arith.constant 0 : i32
    return %c0_i32, %c0_i32_0 : i32, i32
  }
  func.func @transform_25(%arg0: i32) -> (i32, i32) {
    %c0_i32 = arith.constant 0 : i32
    %c0_i32_0 = arith.constant 0 : i32
    %c0_i32_1 = arith.constant 0 : i32
    return %c0_i32, %c0_i32_0 : i32, i32
  }
  func.func @transform_26(%arg0: i32) -> (i32, i32) {
    %c0_i32 = arith.constant 0 : i32
    %c0_i32_0 = arith.constant 0 : i32
    %c0_i32_1 = arith.constant 0 : i32
    return %c0_i32, %c0_i32_0 : i32, i32
  }
  func.func @transform_27(%arg0: i32) -> (i32, i32) {
    %c0_i32 = arith.constant 0 : i32
    %c0_i32_0 = arith.constant 0 : i32
    %c0_i32_1 = arith.constant 0 : i32
    return %c0_i32, %c0_i32_0 : i32, i32
  }
}

module attributes {stable_mosaic.version = 11 : i64} {
  func.func @_branch_kernel(%arg0: i32, %arg1: memref<16x48xf32, #tpu.memory_space<vmem>>, %arg2: memref<16x48xf32, #tpu.memory_space<vmem>>, %arg3: memref<16x32xf32, #tpu.memory_space<vmem>>, %arg4: memref<48x32xf32, #tpu.memory_space<vmem>>, %arg5: memref<1x32xf32, #tpu.memory_space<vmem>>, %arg6: memref<32x32xf32, #tpu.memory_space<vmem>>, %arg7: memref<1x32xf32, #tpu.memory_space<vmem>>, %arg8: memref<2x32x32xf32, #tpu.memory_space<vmem>>, %arg9: memref<2x1x32xf32, #tpu.memory_space<vmem>>, %arg10: memref<2x32x32xf32, #tpu.memory_space<vmem>>, %arg11: memref<2x1x32xf32, #tpu.memory_space<vmem>>, %arg12: memref<2x32x32xf32, #tpu.memory_space<vmem>>, %arg13: memref<2x1x32xf32, #tpu.memory_space<vmem>>, %arg14: memref<2x32x32xf32, #tpu.memory_space<vmem>>, %arg15: memref<2x1x32xf32, #tpu.memory_space<vmem>>, %arg16: memref<2x1x32xf32, #tpu.memory_space<vmem>>, %arg17: memref<2x1x32xf32, #tpu.memory_space<vmem>>, %arg18: memref<2x32x64xf32, #tpu.memory_space<vmem>>, %arg19: memref<2x1x64xf32, #tpu.memory_space<vmem>>, %arg20: memref<2x64x32xf32, #tpu.memory_space<vmem>>, %arg21: memref<2x1x32xf32, #tpu.memory_space<vmem>>, %arg22: memref<2x1x32xf32, #tpu.memory_space<vmem>>, %arg23: memref<2x1x32xf32, #tpu.memory_space<vmem>>, %arg24: memref<32x32xf32, #tpu.memory_space<vmem>>, %arg25: memref<1x32xf32, #tpu.memory_space<vmem>>, %arg26: memref<32x48xf32, #tpu.memory_space<vmem>>, %arg27: memref<1x48xf32, #tpu.memory_space<vmem>>, %arg28: memref<16x48xf32, #tpu.memory_space<vmem>>) attributes {dimension_semantics = [#tpu.dimension_semantics<arbitrary>], iteration_bounds = array<i64: 1>, scalar_prefetch = 0 : i64, scratch_operands = 0 : i64, tpu.core_type = #tpu.core_type<tc>, window_params = [{pipeline_mode = #tpu.pipeline_mode<synchronous>, transform_indices = @transform_0, window_bounds = array<i64: 16, 48>}, {pipeline_mode = #tpu.pipeline_mode<synchronous>, transform_indices = @transform_1, window_bounds = array<i64: 16, 48>}, {pipeline_mode = #tpu.pipeline_mode<synchronous>, transform_indices = @transform_2, window_bounds = array<i64: 16, 32>}, {pipeline_mode = #tpu.pipeline_mode<synchronous>, transform_indices = @transform_3, window_bounds = array<i64: 48, 32>}, {pipeline_mode = #tpu.pipeline_mode<synchronous>, transform_indices = @transform_4, window_bounds = array<i64: 1, 32>}, {pipeline_mode = #tpu.pipeline_mode<synchronous>, transform_indices = @transform_5, window_bounds = array<i64: 32, 32>}, {pipeline_mode = #tpu.pipeline_mode<synchronous>, transform_indices = @transform_6, window_bounds = array<i64: 1, 32>}, {pipeline_mode = #tpu.pipeline_mode<synchronous>, transform_indices = @transform_7, window_bounds = array<i64: 2, 32, 32>}, {pipeline_mode = #tpu.pipeline_mode<synchronous>, transform_indices = @transform_8, window_bounds = array<i64: 2, 1, 32>}, {pipeline_mode = #tpu.pipeline_mode<synchronous>, transform_indices = @transform_9, window_bounds = array<i64: 2, 32, 32>}, {pipeline_mode = #tpu.pipeline_mode<synchronous>, transform_indices = @transform_10, window_bounds = array<i64: 2, 1, 32>}, {pipeline_mode = #tpu.pipeline_mode<synchronous>, transform_indices = @transform_11, window_bounds = array<i64: 2, 32, 32>}, {pipeline_mode = #tpu.pipeline_mode<synchronous>, transform_indices = @transform_12, window_bounds = array<i64: 2, 1, 32>}, {pipeline_mode = #tpu.pipeline_mode<synchronous>, transform_indices = @transform_13, window_bounds = array<i64: 2, 32, 32>}, {pipeline_mode = #tpu.pipeline_mode<synchronous>, transform_indices = @transform_14, window_bounds = array<i64: 2, 1, 32>}, {pipeline_mode = #tpu.pipeline_mode<synchronous>, transform_indices = @transform_15, window_bounds = array<i64: 2, 1, 32>}, {pipeline_mode = #tpu.pipeline_mode<synchronous>, transform_indices = @transform_16, window_bounds = array<i64: 2, 1, 32>}, {pipeline_mode = #tpu.pipeline_mode<synchronous>, transform_indices = @transform_17, window_bounds = array<i64: 2, 32, 64>}, {pipeline_mode = #tpu.pipeline_mode<synchronous>, transform_indices = @transform_18, window_bounds = array<i64: 2, 1, 64>}, {pipeline_mode = #tpu.pipeline_mode<synchronous>, transform_indices = @transform_19, window_bounds = array<i64: 2, 64, 32>}, {pipeline_mode = #tpu.pipeline_mode<synchronous>, transform_indices = @transform_20, window_bounds = array<i64: 2, 1, 32>}, {pipeline_mode = #tpu.pipeline_mode<synchronous>, transform_indices = @transform_21, window_bounds = array<i64: 2, 1, 32>}, {pipeline_mode = #tpu.pipeline_mode<synchronous>, transform_indices = @transform_22, window_bounds = array<i64: 2, 1, 32>}, {pipeline_mode = #tpu.pipeline_mode<synchronous>, transform_indices = @transform_23, window_bounds = array<i64: 32, 32>}, {pipeline_mode = #tpu.pipeline_mode<synchronous>, transform_indices = @transform_24, window_bounds = array<i64: 1, 32>}, {pipeline_mode = #tpu.pipeline_mode<synchronous>, transform_indices = @transform_25, window_bounds = array<i64: 32, 48>}, {pipeline_mode = #tpu.pipeline_mode<synchronous>, transform_indices = @transform_26, window_bounds = array<i64: 1, 48>}, {pipeline_mode = #tpu.pipeline_mode<synchronous>, transform_indices = @transform_27, window_bounds = array<i64: 16, 48>}]} {
    %c0 = arith.constant 0 : index
    %c0_0 = arith.constant 0 : index
    %0 = vector.load %arg1[%c0, %c0_0] : memref<16x48xf32, #tpu.memory_space<vmem>>, vector<16x48xf32>
    %c0_1 = arith.constant 0 : index
    %c0_2 = arith.constant 0 : index
    %1 = vector.load %arg3[%c0_1, %c0_2] : memref<16x32xf32, #tpu.memory_space<vmem>>, vector<16x32xf32>
    %c0_3 = arith.constant 0 : index
    %c0_4 = arith.constant 0 : index
    %2 = vector.load %arg4[%c0_3, %c0_4] : memref<48x32xf32, #tpu.memory_space<vmem>>, vector<48x32xf32>
    %cst = arith.constant dense<0.000000e+00> : vector<16x32xf32>
    %3 = tpu.matmul %0, %2, %cst {dimension_numbers = #tpu.dot_dimension_numbers<[1], [0], [0], [1], [0, 0, 1, 1], [], []>} : vector<16x48xf32>, vector<48x32xf32>, vector<16x32xf32> -> vector<16x32xf32>
    %c0_5 = arith.constant 0 : index
    %c0_6 = arith.constant 0 : index
    %4 = vector.load %arg5[%c0_5, %c0_6] : memref<1x32xf32, #tpu.memory_space<vmem>>, vector<1x32xf32>
    %5 = vector.broadcast %4 : vector<1x32xf32> to vector<16x32xf32>
    %6 = arith.addf %3, %5 : vector<16x32xf32>
    %7 = math.tanh %6 : vector<16x32xf32>
    %c0_7 = arith.constant 0 : index
    %c0_8 = arith.constant 0 : index
    %8 = vector.load %arg6[%c0_7, %c0_8] : memref<32x32xf32, #tpu.memory_space<vmem>>, vector<32x32xf32>
    %cst_9 = arith.constant dense<0.000000e+00> : vector<16x32xf32>
    %9 = tpu.matmul %7, %8, %cst_9 {dimension_numbers = #tpu.dot_dimension_numbers<[1], [0], [0], [1], [0, 0, 1, 1], [], []>} : vector<16x32xf32>, vector<32x32xf32>, vector<16x32xf32> -> vector<16x32xf32>
    %c0_10 = arith.constant 0 : index
    %c0_11 = arith.constant 0 : index
    %10 = vector.load %arg7[%c0_10, %c0_11] : memref<1x32xf32, #tpu.memory_space<vmem>>, vector<1x32xf32>
    %11 = vector.broadcast %10 : vector<1x32xf32> to vector<16x32xf32>
    %12 = arith.addf %9, %11 : vector<16x32xf32>
    %13 = arith.addf %12, %1 : vector<16x32xf32>
    %c0_12 = arith.constant 0 : index
    %c0_13 = arith.constant 0 : index
    %c0_14 = arith.constant 0 : index
    %14 = vector.load %arg8[%c0_12, %c0_13, %c0_14] : memref<2x32x32xf32, #tpu.memory_space<vmem>>, vector<1x32x32xf32>
    %15 = vector.shape_cast %14 : vector<1x32x32xf32> to vector<32x32xf32>
    %cst_15 = arith.constant dense<0.000000e+00> : vector<16x32xf32>
    %16 = tpu.matmul %13, %15, %cst_15 {dimension_numbers = #tpu.dot_dimension_numbers<[1], [0], [0], [1], [0, 0, 1, 1], [], []>} : vector<16x32xf32>, vector<32x32xf32>, vector<16x32xf32> -> vector<16x32xf32>
    %c0_16 = arith.constant 0 : index
    %c0_17 = arith.constant 0 : index
    %c0_18 = arith.constant 0 : index
    %17 = vector.load %arg9[%c0_16, %c0_17, %c0_18] : memref<2x1x32xf32, #tpu.memory_space<vmem>>, vector<1x1x32xf32>
    %18 = vector.shape_cast %17 : vector<1x1x32xf32> to vector<1x32xf32>
    %19 = vector.broadcast %18 : vector<1x32xf32> to vector<16x32xf32>
    %20 = arith.addf %16, %19 : vector<16x32xf32>
    %c0_19 = arith.constant 0 : index
    %c0_20 = arith.constant 0 : index
    %c0_21 = arith.constant 0 : index
    %21 = vector.load %arg10[%c0_19, %c0_20, %c0_21] : memref<2x32x32xf32, #tpu.memory_space<vmem>>, vector<1x32x32xf32>
    %22 = vector.shape_cast %21 : vector<1x32x32xf32> to vector<32x32xf32>
    %cst_22 = arith.constant dense<0.000000e+00> : vector<16x32xf32>
    %23 = tpu.matmul %13, %22, %cst_22 {dimension_numbers = #tpu.dot_dimension_numbers<[1], [0], [0], [1], [0, 0, 1, 1], [], []>} : vector<16x32xf32>, vector<32x32xf32>, vector<16x32xf32> -> vector<16x32xf32>
    %c0_23 = arith.constant 0 : index
    %c0_24 = arith.constant 0 : index
    %c0_25 = arith.constant 0 : index
    %24 = vector.load %arg11[%c0_23, %c0_24, %c0_25] : memref<2x1x32xf32, #tpu.memory_space<vmem>>, vector<1x1x32xf32>
    %25 = vector.shape_cast %24 : vector<1x1x32xf32> to vector<1x32xf32>
    %26 = vector.broadcast %25 : vector<1x32xf32> to vector<16x32xf32>
    %27 = arith.addf %23, %26 : vector<16x32xf32>
    %c0_26 = arith.constant 0 : index
    %c0_27 = arith.constant 0 : index
    %c0_28 = arith.constant 0 : index
    %28 = vector.load %arg12[%c0_26, %c0_27, %c0_28] : memref<2x32x32xf32, #tpu.memory_space<vmem>>, vector<1x32x32xf32>
    %29 = vector.shape_cast %28 : vector<1x32x32xf32> to vector<32x32xf32>
    %cst_29 = arith.constant dense<0.000000e+00> : vector<16x32xf32>
    %30 = tpu.matmul %12, %29, %cst_29 {dimension_numbers = #tpu.dot_dimension_numbers<[1], [0], [0], [1], [0, 0, 1, 1], [], []>} : vector<16x32xf32>, vector<32x32xf32>, vector<16x32xf32> -> vector<16x32xf32>
    %c0_30 = arith.constant 0 : index
    %c0_31 = arith.constant 0 : index
    %c0_32 = arith.constant 0 : index
    %31 = vector.load %arg13[%c0_30, %c0_31, %c0_32] : memref<2x1x32xf32, #tpu.memory_space<vmem>>, vector<1x1x32xf32>
    %32 = vector.shape_cast %31 : vector<1x1x32xf32> to vector<1x32xf32>
    %33 = vector.broadcast %32 : vector<1x32xf32> to vector<16x32xf32>
    %34 = arith.addf %30, %33 : vector<16x32xf32>
    %35 = vector.shape_cast %20 : vector<16x32xf32> to vector<2x8x32xf32>
    %36 = vector.shape_cast %27 : vector<16x32xf32> to vector<2x8x32xf32>
    %37 = vector.shape_cast %34 : vector<16x32xf32> to vector<2x8x32xf32>
    %c0_33 = arith.constant 0 : index
    %c0_34 = arith.constant 0 : index
    %c0_35 = arith.constant 0 : index
    %38 = vector.load %arg14[%c0_33, %c0_34, %c0_35] : memref<2x32x32xf32, #tpu.memory_space<vmem>>, vector<1x32x32xf32>
    %39 = vector.shape_cast %38 : vector<1x32x32xf32> to vector<32x32xf32>
    %cst_36 = arith.constant 0.000000e+00 : f32
    %40 = vector.broadcast %cst_36 : f32 to vector<16x32xf32>
    %41 = vector.extract_strided_slice %35 {offsets = [0, 0, 0], sizes = [2, 8, 8], strides = [1, 1, 1]} : vector<2x8x32xf32> to vector<2x8x8xf32>
    %42 = vector.extract_strided_slice %36 {offsets = [0, 0, 0], sizes = [2, 8, 8], strides = [1, 1, 1]} : vector<2x8x32xf32> to vector<2x8x8xf32>
    %43 = vector.extract_strided_slice %37 {offsets = [0, 0, 0], sizes = [2, 8, 8], strides = [1, 1, 1]} : vector<2x8x32xf32> to vector<2x8x8xf32>
    "tpu.trace_start"() <{level = 10 : i32, message = "bqd,bkd->bqk"}> : () -> ()
    %cst_37 = arith.constant dense<0.000000e+00> : vector<2x8x8xf32>
    %44 = tpu.matmul %41, %42, %cst_37 {dimension_numbers = #tpu.dot_dimension_numbers<[2], [2], [1], [1], [0, 0, 0, 1, 1, 1], [0], [0]>} : vector<2x8x8xf32>, vector<2x8x8xf32>, vector<2x8x8xf32> -> vector<2x8x8xf32>
    "tpu.trace_stop"() : () -> ()
    %cst_38 = arith.constant 0.353553385 : f32
    %45 = vector.broadcast %cst_38 : f32 to vector<2x8x8xf32>
    %46 = arith.mulf %44, %45 : vector<2x8x8xf32>
    %cst_39 = arith.constant dense<0xFF800000> : vector<2x8xf32>
    %47 = vector.multi_reduction <maximumf>, %46, %cst_39 [2] : vector<2x8x8xf32> to vector<2x8xf32>
    %48 = vector.shape_cast %47 : vector<2x8xf32> to vector<2x8x1xf32>
    %49 = vector.broadcast %48 : vector<2x8x1xf32> to vector<2x8x8xf32>
    %50 = arith.subf %46, %49 : vector<2x8x8xf32>
    %51 = math.exp %50 : vector<2x8x8xf32>
    %cst_40 = arith.constant dense<0.000000e+00> : vector<2x8xf32>
    %52 = vector.multi_reduction <add>, %51, %cst_40 [2] : vector<2x8x8xf32> to vector<2x8xf32>
    %53 = vector.shape_cast %52 : vector<2x8xf32> to vector<2x8x1xf32>
    %54 = vector.broadcast %53 : vector<2x8x1xf32> to vector<2x8x8xf32>
    %55 = arith.divf %51, %54 : vector<2x8x8xf32>
    "tpu.trace_start"() <{level = 10 : i32, message = "bqk,bkd->bqd"}> : () -> ()
    %cst_41 = arith.constant dense<0.000000e+00> : vector<2x8x8xf32>
    %56 = tpu.matmul %55, %43, %cst_41 {dimension_numbers = #tpu.dot_dimension_numbers<[2], [1], [1], [2], [0, 0, 0, 1, 1, 2], [0], [0]>} : vector<2x8x8xf32>, vector<2x8x8xf32>, vector<2x8x8xf32> -> vector<2x8x8xf32>
    "tpu.trace_stop"() : () -> ()
    %57 = vector.shape_cast %56 : vector<2x8x8xf32> to vector<16x8xf32>
    %58 = vector.extract_strided_slice %39 {offsets = [0, 0], sizes = [8, 32], strides = [1, 1]} : vector<32x32xf32> to vector<8x32xf32>
    %cst_42 = arith.constant dense<0.000000e+00> : vector<16x32xf32>
    %59 = tpu.matmul %57, %58, %cst_42 {dimension_numbers = #tpu.dot_dimension_numbers<[1], [0], [0], [1], [0, 0, 1, 1], [], []>} : vector<16x8xf32>, vector<8x32xf32>, vector<16x32xf32> -> vector<16x32xf32>
    %60 = arith.addf %40, %59 : vector<16x32xf32>
    %61 = vector.extract_strided_slice %35 {offsets = [0, 0, 8], sizes = [2, 8, 8], strides = [1, 1, 1]} : vector<2x8x32xf32> to vector<2x8x8xf32>
    %62 = vector.extract_strided_slice %36 {offsets = [0, 0, 8], sizes = [2, 8, 8], strides = [1, 1, 1]} : vector<2x8x32xf32> to vector<2x8x8xf32>
    %63 = vector.extract_strided_slice %37 {offsets = [0, 0, 8], sizes = [2, 8, 8], strides = [1, 1, 1]} : vector<2x8x32xf32> to vector<2x8x8xf32>
    "tpu.trace_start"() <{level = 10 : i32, message = "bqd,bkd->bqk"}> : () -> ()
    %cst_43 = arith.constant dense<0.000000e+00> : vector<2x8x8xf32>
    %64 = tpu.matmul %61, %62, %cst_43 {dimension_numbers = #tpu.dot_dimension_numbers<[2], [2], [1], [1], [0, 0, 0, 1, 1, 1], [0], [0]>} : vector<2x8x8xf32>, vector<2x8x8xf32>, vector<2x8x8xf32> -> vector<2x8x8xf32>
    "tpu.trace_stop"() : () -> ()
    %cst_44 = arith.constant 0.353553385 : f32
    %65 = vector.broadcast %cst_44 : f32 to vector<2x8x8xf32>
    %66 = arith.mulf %64, %65 : vector<2x8x8xf32>
    %cst_45 = arith.constant dense<0xFF800000> : vector<2x8xf32>
    %67 = vector.multi_reduction <maximumf>, %66, %cst_45 [2] : vector<2x8x8xf32> to vector<2x8xf32>
    %68 = vector.shape_cast %67 : vector<2x8xf32> to vector<2x8x1xf32>
    %69 = vector.broadcast %68 : vector<2x8x1xf32> to vector<2x8x8xf32>
    %70 = arith.subf %66, %69 : vector<2x8x8xf32>
    %71 = math.exp %70 : vector<2x8x8xf32>
    %cst_46 = arith.constant dense<0.000000e+00> : vector<2x8xf32>
    %72 = vector.multi_reduction <add>, %71, %cst_46 [2] : vector<2x8x8xf32> to vector<2x8xf32>
    %73 = vector.shape_cast %72 : vector<2x8xf32> to vector<2x8x1xf32>
    %74 = vector.broadcast %73 : vector<2x8x1xf32> to vector<2x8x8xf32>
    %75 = arith.divf %71, %74 : vector<2x8x8xf32>
    "tpu.trace_start"() <{level = 10 : i32, message = "bqk,bkd->bqd"}> : () -> ()
    %cst_47 = arith.constant dense<0.000000e+00> : vector<2x8x8xf32>
    %76 = tpu.matmul %75, %63, %cst_47 {dimension_numbers = #tpu.dot_dimension_numbers<[2], [1], [1], [2], [0, 0, 0, 1, 1, 2], [0], [0]>} : vector<2x8x8xf32>, vector<2x8x8xf32>, vector<2x8x8xf32> -> vector<2x8x8xf32>
    "tpu.trace_stop"() : () -> ()
    %77 = vector.shape_cast %76 : vector<2x8x8xf32> to vector<16x8xf32>
    %78 = vector.extract_strided_slice %39 {offsets = [8, 0], sizes = [8, 32], strides = [1, 1]} : vector<32x32xf32> to vector<8x32xf32>
    %cst_48 = arith.constant dense<0.000000e+00> : vector<16x32xf32>
    %79 = tpu.matmul %77, %78, %cst_48 {dimension_numbers = #tpu.dot_dimension_numbers<[1], [0], [0], [1], [0, 0, 1, 1], [], []>} : vector<16x8xf32>, vector<8x32xf32>, vector<16x32xf32> -> vector<16x32xf32>
    %80 = arith.addf %60, %79 : vector<16x32xf32>
    %81 = vector.extract_strided_slice %35 {offsets = [0, 0, 16], sizes = [2, 8, 8], strides = [1, 1, 1]} : vector<2x8x32xf32> to vector<2x8x8xf32>
    %82 = vector.extract_strided_slice %36 {offsets = [0, 0, 16], sizes = [2, 8, 8], strides = [1, 1, 1]} : vector<2x8x32xf32> to vector<2x8x8xf32>
    %83 = vector.extract_strided_slice %37 {offsets = [0, 0, 16], sizes = [2, 8, 8], strides = [1, 1, 1]} : vector<2x8x32xf32> to vector<2x8x8xf32>
    "tpu.trace_start"() <{level = 10 : i32, message = "bqd,bkd->bqk"}> : () -> ()
    %cst_49 = arith.constant dense<0.000000e+00> : vector<2x8x8xf32>
    %84 = tpu.matmul %81, %82, %cst_49 {dimension_numbers = #tpu.dot_dimension_numbers<[2], [2], [1], [1], [0, 0, 0, 1, 1, 1], [0], [0]>} : vector<2x8x8xf32>, vector<2x8x8xf32>, vector<2x8x8xf32> -> vector<2x8x8xf32>
    "tpu.trace_stop"() : () -> ()
    %cst_50 = arith.constant 0.353553385 : f32
    %85 = vector.broadcast %cst_50 : f32 to vector<2x8x8xf32>
    %86 = arith.mulf %84, %85 : vector<2x8x8xf32>
    %cst_51 = arith.constant dense<0xFF800000> : vector<2x8xf32>
    %87 = vector.multi_reduction <maximumf>, %86, %cst_51 [2] : vector<2x8x8xf32> to vector<2x8xf32>
    %88 = vector.shape_cast %87 : vector<2x8xf32> to vector<2x8x1xf32>
    %89 = vector.broadcast %88 : vector<2x8x1xf32> to vector<2x8x8xf32>
    %90 = arith.subf %86, %89 : vector<2x8x8xf32>
    %91 = math.exp %90 : vector<2x8x8xf32>
    %cst_52 = arith.constant dense<0.000000e+00> : vector<2x8xf32>
    %92 = vector.multi_reduction <add>, %91, %cst_52 [2] : vector<2x8x8xf32> to vector<2x8xf32>
    %93 = vector.shape_cast %92 : vector<2x8xf32> to vector<2x8x1xf32>
    %94 = vector.broadcast %93 : vector<2x8x1xf32> to vector<2x8x8xf32>
    %95 = arith.divf %91, %94 : vector<2x8x8xf32>
    "tpu.trace_start"() <{level = 10 : i32, message = "bqk,bkd->bqd"}> : () -> ()
    %cst_53 = arith.constant dense<0.000000e+00> : vector<2x8x8xf32>
    %96 = tpu.matmul %95, %83, %cst_53 {dimension_numbers = #tpu.dot_dimension_numbers<[2], [1], [1], [2], [0, 0, 0, 1, 1, 2], [0], [0]>} : vector<2x8x8xf32>, vector<2x8x8xf32>, vector<2x8x8xf32> -> vector<2x8x8xf32>
    "tpu.trace_stop"() : () -> ()
    %97 = vector.shape_cast %96 : vector<2x8x8xf32> to vector<16x8xf32>
    %98 = vector.extract_strided_slice %39 {offsets = [16, 0], sizes = [8, 32], strides = [1, 1]} : vector<32x32xf32> to vector<8x32xf32>
    %cst_54 = arith.constant dense<0.000000e+00> : vector<16x32xf32>
    %99 = tpu.matmul %97, %98, %cst_54 {dimension_numbers = #tpu.dot_dimension_numbers<[1], [0], [0], [1], [0, 0, 1, 1], [], []>} : vector<16x8xf32>, vector<8x32xf32>, vector<16x32xf32> -> vector<16x32xf32>
    %100 = arith.addf %80, %99 : vector<16x32xf32>
    %101 = vector.extract_strided_slice %35 {offsets = [0, 0, 24], sizes = [2, 8, 8], strides = [1, 1, 1]} : vector<2x8x32xf32> to vector<2x8x8xf32>
    %102 = vector.extract_strided_slice %36 {offsets = [0, 0, 24], sizes = [2, 8, 8], strides = [1, 1, 1]} : vector<2x8x32xf32> to vector<2x8x8xf32>
    %103 = vector.extract_strided_slice %37 {offsets = [0, 0, 24], sizes = [2, 8, 8], strides = [1, 1, 1]} : vector<2x8x32xf32> to vector<2x8x8xf32>
    "tpu.trace_start"() <{level = 10 : i32, message = "bqd,bkd->bqk"}> : () -> ()
    %cst_55 = arith.constant dense<0.000000e+00> : vector<2x8x8xf32>
    %104 = tpu.matmul %101, %102, %cst_55 {dimension_numbers = #tpu.dot_dimension_numbers<[2], [2], [1], [1], [0, 0, 0, 1, 1, 1], [0], [0]>} : vector<2x8x8xf32>, vector<2x8x8xf32>, vector<2x8x8xf32> -> vector<2x8x8xf32>
    "tpu.trace_stop"() : () -> ()
    %cst_56 = arith.constant 0.353553385 : f32
    %105 = vector.broadcast %cst_56 : f32 to vector<2x8x8xf32>
    %106 = arith.mulf %104, %105 : vector<2x8x8xf32>
    %cst_57 = arith.constant dense<0xFF800000> : vector<2x8xf32>
    %107 = vector.multi_reduction <maximumf>, %106, %cst_57 [2] : vector<2x8x8xf32> to vector<2x8xf32>
    %108 = vector.shape_cast %107 : vector<2x8xf32> to vector<2x8x1xf32>
    %109 = vector.broadcast %108 : vector<2x8x1xf32> to vector<2x8x8xf32>
    %110 = arith.subf %106, %109 : vector<2x8x8xf32>
    %111 = math.exp %110 : vector<2x8x8xf32>
    %cst_58 = arith.constant dense<0.000000e+00> : vector<2x8xf32>
    %112 = vector.multi_reduction <add>, %111, %cst_58 [2] : vector<2x8x8xf32> to vector<2x8xf32>
    %113 = vector.shape_cast %112 : vector<2x8xf32> to vector<2x8x1xf32>
    %114 = vector.broadcast %113 : vector<2x8x1xf32> to vector<2x8x8xf32>
    %115 = arith.divf %111, %114 : vector<2x8x8xf32>
    "tpu.trace_start"() <{level = 10 : i32, message = "bqk,bkd->bqd"}> : () -> ()
    %cst_59 = arith.constant dense<0.000000e+00> : vector<2x8x8xf32>
    %116 = tpu.matmul %115, %103, %cst_59 {dimension_numbers = #tpu.dot_dimension_numbers<[2], [1], [1], [2], [0, 0, 0, 1, 1, 2], [0], [0]>} : vector<2x8x8xf32>, vector<2x8x8xf32>, vector<2x8x8xf32> -> vector<2x8x8xf32>
    "tpu.trace_stop"() : () -> ()
    %117 = vector.shape_cast %116 : vector<2x8x8xf32> to vector<16x8xf32>
    %118 = vector.extract_strided_slice %39 {offsets = [24, 0], sizes = [8, 32], strides = [1, 1]} : vector<32x32xf32> to vector<8x32xf32>
    %cst_60 = arith.constant dense<0.000000e+00> : vector<16x32xf32>
    %119 = tpu.matmul %117, %118, %cst_60 {dimension_numbers = #tpu.dot_dimension_numbers<[1], [0], [0], [1], [0, 0, 1, 1], [], []>} : vector<16x8xf32>, vector<8x32xf32>, vector<16x32xf32> -> vector<16x32xf32>
    %120 = arith.addf %100, %119 : vector<16x32xf32>
    %c0_61 = arith.constant 0 : index
    %c0_62 = arith.constant 0 : index
    %c0_63 = arith.constant 0 : index
    %121 = vector.load %arg15[%c0_61, %c0_62, %c0_63] : memref<2x1x32xf32, #tpu.memory_space<vmem>>, vector<1x1x32xf32>
    %122 = vector.shape_cast %121 : vector<1x1x32xf32> to vector<1x32xf32>
    %123 = vector.broadcast %122 : vector<1x32xf32> to vector<16x32xf32>
    %124 = arith.addf %120, %123 : vector<16x32xf32>
    %125 = arith.addf %12, %124 : vector<16x32xf32>
    %c0_64 = arith.constant 0 : index
    %c0_65 = arith.constant 0 : index
    %c0_66 = arith.constant 0 : index
    %126 = vector.load %arg16[%c0_64, %c0_65, %c0_66] : memref<2x1x32xf32, #tpu.memory_space<vmem>>, vector<1x1x32xf32>
    %127 = vector.shape_cast %126 : vector<1x1x32xf32> to vector<1x32xf32>
    %c0_67 = arith.constant 0 : index
    %c0_68 = arith.constant 0 : index
    %c0_69 = arith.constant 0 : index
    %128 = vector.load %arg17[%c0_67, %c0_68, %c0_69] : memref<2x1x32xf32, #tpu.memory_space<vmem>>, vector<1x1x32xf32>
    %129 = vector.shape_cast %128 : vector<1x1x32xf32> to vector<1x32xf32>
    %cst_70 = arith.constant dense<0.000000e+00> : vector<16xf32>
    %130 = vector.multi_reduction <add>, %125, %cst_70 [1] : vector<16x32xf32> to vector<16xf32>
    %131 = vector.shape_cast %130 : vector<16xf32> to vector<16x1xf32>
    %cst_71 = arith.constant 3.200000e+01 : f32
    %132 = vector.broadcast %cst_71 : f32 to vector<16x1xf32>
    %133 = arith.divf %131, %132 : vector<16x1xf32>
    %134 = vector.broadcast %133 : vector<16x1xf32> to vector<16x32xf32>
    %135 = arith.subf %125, %134 : vector<16x32xf32>
    %136 = arith.mulf %135, %135 : vector<16x32xf32>
    %cst_72 = arith.constant dense<0.000000e+00> : vector<16xf32>
    %137 = vector.multi_reduction <add>, %136, %cst_72 [1] : vector<16x32xf32> to vector<16xf32>
    %138 = vector.shape_cast %137 : vector<16xf32> to vector<16x1xf32>
    %cst_73 = arith.constant 3.200000e+01 : f32
    %139 = vector.broadcast %cst_73 : f32 to vector<16x1xf32>
    %140 = arith.divf %138, %139 : vector<16x1xf32>
    %141 = vector.broadcast %133 : vector<16x1xf32> to vector<16x32xf32>
    %142 = arith.subf %125, %141 : vector<16x32xf32>
    %cst_74 = arith.constant 9.99999974E-6 : f32
    %143 = vector.broadcast %cst_74 : f32 to vector<16x1xf32>
    %144 = arith.addf %140, %143 : vector<16x1xf32>
    %145 = math.rsqrt %144 : vector<16x1xf32>
    %146 = vector.broadcast %145 : vector<16x1xf32> to vector<16x32xf32>
    %147 = arith.mulf %142, %146 : vector<16x32xf32>
    %148 = vector.broadcast %127 : vector<1x32xf32> to vector<16x32xf32>
    %149 = arith.mulf %147, %148 : vector<16x32xf32>
    %150 = vector.broadcast %129 : vector<1x32xf32> to vector<16x32xf32>
    %151 = arith.addf %149, %150 : vector<16x32xf32>
    %c0_75 = arith.constant 0 : index
    %c0_76 = arith.constant 0 : index
    %c0_77 = arith.constant 0 : index
    %152 = vector.load %arg18[%c0_75, %c0_76, %c0_77] : memref<2x32x64xf32, #tpu.memory_space<vmem>>, vector<1x32x64xf32>
    %153 = vector.shape_cast %152 : vector<1x32x64xf32> to vector<32x64xf32>
    %cst_78 = arith.constant dense<0.000000e+00> : vector<16x64xf32>
    %154 = tpu.matmul %151, %153, %cst_78 {dimension_numbers = #tpu.dot_dimension_numbers<[1], [0], [0], [1], [0, 0, 1, 1], [], []>} : vector<16x32xf32>, vector<32x64xf32>, vector<16x64xf32> -> vector<16x64xf32>
    %c0_79 = arith.constant 0 : index
    %c0_80 = arith.constant 0 : index
    %c0_81 = arith.constant 0 : index
    %155 = vector.load %arg19[%c0_79, %c0_80, %c0_81] : memref<2x1x64xf32, #tpu.memory_space<vmem>>, vector<1x1x64xf32>
    %156 = vector.shape_cast %155 : vector<1x1x64xf32> to vector<1x64xf32>
    %157 = vector.broadcast %156 : vector<1x64xf32> to vector<16x64xf32>
    %158 = arith.addf %154, %157 : vector<16x64xf32>
    %cst_82 = arith.constant 0.000000e+00 : f32
    %159 = vector.broadcast %cst_82 : f32 to vector<16x64xf32>
    %160 = arith.maximumf %158, %159 : vector<16x64xf32>
    %c0_83 = arith.constant 0 : index
    %c0_84 = arith.constant 0 : index
    %c0_85 = arith.constant 0 : index
    %161 = vector.load %arg20[%c0_83, %c0_84, %c0_85] : memref<2x64x32xf32, #tpu.memory_space<vmem>>, vector<1x64x32xf32>
    %162 = vector.shape_cast %161 : vector<1x64x32xf32> to vector<64x32xf32>
    %cst_86 = arith.constant dense<0.000000e+00> : vector<16x32xf32>
    %163 = tpu.matmul %160, %162, %cst_86 {dimension_numbers = #tpu.dot_dimension_numbers<[1], [0], [0], [1], [0, 0, 1, 1], [], []>} : vector<16x64xf32>, vector<64x32xf32>, vector<16x32xf32> -> vector<16x32xf32>
    %c0_87 = arith.constant 0 : index
    %c0_88 = arith.constant 0 : index
    %c0_89 = arith.constant 0 : index
    %164 = vector.load %arg21[%c0_87, %c0_88, %c0_89] : memref<2x1x32xf32, #tpu.memory_space<vmem>>, vector<1x1x32xf32>
    %165 = vector.shape_cast %164 : vector<1x1x32xf32> to vector<1x32xf32>
    %166 = vector.broadcast %165 : vector<1x32xf32> to vector<16x32xf32>
    %167 = arith.addf %163, %166 : vector<16x32xf32>
    %168 = arith.addf %151, %167 : vector<16x32xf32>
    %c0_90 = arith.constant 0 : index
    %c0_91 = arith.constant 0 : index
    %c0_92 = arith.constant 0 : index
    %169 = vector.load %arg22[%c0_90, %c0_91, %c0_92] : memref<2x1x32xf32, #tpu.memory_space<vmem>>, vector<1x1x32xf32>
    %170 = vector.shape_cast %169 : vector<1x1x32xf32> to vector<1x32xf32>
    %c0_93 = arith.constant 0 : index
    %c0_94 = arith.constant 0 : index
    %c0_95 = arith.constant 0 : index
    %171 = vector.load %arg23[%c0_93, %c0_94, %c0_95] : memref<2x1x32xf32, #tpu.memory_space<vmem>>, vector<1x1x32xf32>
    %172 = vector.shape_cast %171 : vector<1x1x32xf32> to vector<1x32xf32>
    %cst_96 = arith.constant dense<0.000000e+00> : vector<16xf32>
    %173 = vector.multi_reduction <add>, %168, %cst_96 [1] : vector<16x32xf32> to vector<16xf32>
    %174 = vector.shape_cast %173 : vector<16xf32> to vector<16x1xf32>
    %cst_97 = arith.constant 3.200000e+01 : f32
    %175 = vector.broadcast %cst_97 : f32 to vector<16x1xf32>
    %176 = arith.divf %174, %175 : vector<16x1xf32>
    %177 = vector.broadcast %176 : vector<16x1xf32> to vector<16x32xf32>
    %178 = arith.subf %168, %177 : vector<16x32xf32>
    %179 = arith.mulf %178, %178 : vector<16x32xf32>
    %cst_98 = arith.constant dense<0.000000e+00> : vector<16xf32>
    %180 = vector.multi_reduction <add>, %179, %cst_98 [1] : vector<16x32xf32> to vector<16xf32>
    %181 = vector.shape_cast %180 : vector<16xf32> to vector<16x1xf32>
    %cst_99 = arith.constant 3.200000e+01 : f32
    %182 = vector.broadcast %cst_99 : f32 to vector<16x1xf32>
    %183 = arith.divf %181, %182 : vector<16x1xf32>
    %184 = vector.broadcast %176 : vector<16x1xf32> to vector<16x32xf32>
    %185 = arith.subf %168, %184 : vector<16x32xf32>
    %cst_100 = arith.constant 9.99999974E-6 : f32
    %186 = vector.broadcast %cst_100 : f32 to vector<16x1xf32>
    %187 = arith.addf %183, %186 : vector<16x1xf32>
    %188 = math.rsqrt %187 : vector<16x1xf32>
    %189 = vector.broadcast %188 : vector<16x1xf32> to vector<16x32xf32>
    %190 = arith.mulf %185, %189 : vector<16x32xf32>
    %191 = vector.broadcast %170 : vector<1x32xf32> to vector<16x32xf32>
    %192 = arith.mulf %190, %191 : vector<16x32xf32>
    %193 = vector.broadcast %172 : vector<1x32xf32> to vector<16x32xf32>
    %194 = arith.addf %192, %193 : vector<16x32xf32>
    %195 = arith.addf %194, %1 : vector<16x32xf32>
    %c1 = arith.constant 1 : index
    %c0_101 = arith.constant 0 : index
    %c0_102 = arith.constant 0 : index
    %196 = vector.load %arg8[%c1, %c0_101, %c0_102] : memref<2x32x32xf32, #tpu.memory_space<vmem>>, vector<1x32x32xf32>
    %197 = vector.shape_cast %196 : vector<1x32x32xf32> to vector<32x32xf32>
    %cst_103 = arith.constant dense<0.000000e+00> : vector<16x32xf32>
    %198 = tpu.matmul %195, %197, %cst_103 {dimension_numbers = #tpu.dot_dimension_numbers<[1], [0], [0], [1], [0, 0, 1, 1], [], []>} : vector<16x32xf32>, vector<32x32xf32>, vector<16x32xf32> -> vector<16x32xf32>
    %c1_104 = arith.constant 1 : index
    %c0_105 = arith.constant 0 : index
    %c0_106 = arith.constant 0 : index
    %199 = vector.load %arg9[%c1_104, %c0_105, %c0_106] : memref<2x1x32xf32, #tpu.memory_space<vmem>>, vector<1x1x32xf32>
    %200 = vector.shape_cast %199 : vector<1x1x32xf32> to vector<1x32xf32>
    %201 = vector.broadcast %200 : vector<1x32xf32> to vector<16x32xf32>
    %202 = arith.addf %198, %201 : vector<16x32xf32>
    %c1_107 = arith.constant 1 : index
    %c0_108 = arith.constant 0 : index
    %c0_109 = arith.constant 0 : index
    %203 = vector.load %arg10[%c1_107, %c0_108, %c0_109] : memref<2x32x32xf32, #tpu.memory_space<vmem>>, vector<1x32x32xf32>
    %204 = vector.shape_cast %203 : vector<1x32x32xf32> to vector<32x32xf32>
    %cst_110 = arith.constant dense<0.000000e+00> : vector<16x32xf32>
    %205 = tpu.matmul %195, %204, %cst_110 {dimension_numbers = #tpu.dot_dimension_numbers<[1], [0], [0], [1], [0, 0, 1, 1], [], []>} : vector<16x32xf32>, vector<32x32xf32>, vector<16x32xf32> -> vector<16x32xf32>
    %c1_111 = arith.constant 1 : index
    %c0_112 = arith.constant 0 : index
    %c0_113 = arith.constant 0 : index
    %206 = vector.load %arg11[%c1_111, %c0_112, %c0_113] : memref<2x1x32xf32, #tpu.memory_space<vmem>>, vector<1x1x32xf32>
    %207 = vector.shape_cast %206 : vector<1x1x32xf32> to vector<1x32xf32>
    %208 = vector.broadcast %207 : vector<1x32xf32> to vector<16x32xf32>
    %209 = arith.addf %205, %208 : vector<16x32xf32>
    %c1_114 = arith.constant 1 : index
    %c0_115 = arith.constant 0 : index
    %c0_116 = arith.constant 0 : index
    %210 = vector.load %arg12[%c1_114, %c0_115, %c0_116] : memref<2x32x32xf32, #tpu.memory_space<vmem>>, vector<1x32x32xf32>
    %211 = vector.shape_cast %210 : vector<1x32x32xf32> to vector<32x32xf32>
    %cst_117 = arith.constant dense<0.000000e+00> : vector<16x32xf32>
    %212 = tpu.matmul %194, %211, %cst_117 {dimension_numbers = #tpu.dot_dimension_numbers<[1], [0], [0], [1], [0, 0, 1, 1], [], []>} : vector<16x32xf32>, vector<32x32xf32>, vector<16x32xf32> -> vector<16x32xf32>
    %c1_118 = arith.constant 1 : index
    %c0_119 = arith.constant 0 : index
    %c0_120 = arith.constant 0 : index
    %213 = vector.load %arg13[%c1_118, %c0_119, %c0_120] : memref<2x1x32xf32, #tpu.memory_space<vmem>>, vector<1x1x32xf32>
    %214 = vector.shape_cast %213 : vector<1x1x32xf32> to vector<1x32xf32>
    %215 = vector.broadcast %214 : vector<1x32xf32> to vector<16x32xf32>
    %216 = arith.addf %212, %215 : vector<16x32xf32>
    %217 = vector.shape_cast %202 : vector<16x32xf32> to vector<2x8x32xf32>
    %218 = vector.shape_cast %209 : vector<16x32xf32> to vector<2x8x32xf32>
    %219 = vector.shape_cast %216 : vector<16x32xf32> to vector<2x8x32xf32>
    %c1_121 = arith.constant 1 : index
    %c0_122 = arith.constant 0 : index
    %c0_123 = arith.constant 0 : index
    %220 = vector.load %arg14[%c1_121, %c0_122, %c0_123] : memref<2x32x32xf32, #tpu.memory_space<vmem>>, vector<1x32x32xf32>
    %221 = vector.shape_cast %220 : vector<1x32x32xf32> to vector<32x32xf32>
    %cst_124 = arith.constant 0.000000e+00 : f32
    %222 = vector.broadcast %cst_124 : f32 to vector<16x32xf32>
    %223 = vector.extract_strided_slice %217 {offsets = [0, 0, 0], sizes = [2, 8, 8], strides = [1, 1, 1]} : vector<2x8x32xf32> to vector<2x8x8xf32>
    %224 = vector.extract_strided_slice %218 {offsets = [0, 0, 0], sizes = [2, 8, 8], strides = [1, 1, 1]} : vector<2x8x32xf32> to vector<2x8x8xf32>
    %225 = vector.extract_strided_slice %219 {offsets = [0, 0, 0], sizes = [2, 8, 8], strides = [1, 1, 1]} : vector<2x8x32xf32> to vector<2x8x8xf32>
    "tpu.trace_start"() <{level = 10 : i32, message = "bqd,bkd->bqk"}> : () -> ()
    %cst_125 = arith.constant dense<0.000000e+00> : vector<2x8x8xf32>
    %226 = tpu.matmul %223, %224, %cst_125 {dimension_numbers = #tpu.dot_dimension_numbers<[2], [2], [1], [1], [0, 0, 0, 1, 1, 1], [0], [0]>} : vector<2x8x8xf32>, vector<2x8x8xf32>, vector<2x8x8xf32> -> vector<2x8x8xf32>
    "tpu.trace_stop"() : () -> ()
    %cst_126 = arith.constant 0.353553385 : f32
    %227 = vector.broadcast %cst_126 : f32 to vector<2x8x8xf32>
    %228 = arith.mulf %226, %227 : vector<2x8x8xf32>
    %cst_127 = arith.constant dense<0xFF800000> : vector<2x8xf32>
    %229 = vector.multi_reduction <maximumf>, %228, %cst_127 [2] : vector<2x8x8xf32> to vector<2x8xf32>
    %230 = vector.shape_cast %229 : vector<2x8xf32> to vector<2x8x1xf32>
    %231 = vector.broadcast %230 : vector<2x8x1xf32> to vector<2x8x8xf32>
    %232 = arith.subf %228, %231 : vector<2x8x8xf32>
    %233 = math.exp %232 : vector<2x8x8xf32>
    %cst_128 = arith.constant dense<0.000000e+00> : vector<2x8xf32>
    %234 = vector.multi_reduction <add>, %233, %cst_128 [2] : vector<2x8x8xf32> to vector<2x8xf32>
    %235 = vector.shape_cast %234 : vector<2x8xf32> to vector<2x8x1xf32>
    %236 = vector.broadcast %235 : vector<2x8x1xf32> to vector<2x8x8xf32>
    %237 = arith.divf %233, %236 : vector<2x8x8xf32>
    "tpu.trace_start"() <{level = 10 : i32, message = "bqk,bkd->bqd"}> : () -> ()
    %cst_129 = arith.constant dense<0.000000e+00> : vector<2x8x8xf32>
    %238 = tpu.matmul %237, %225, %cst_129 {dimension_numbers = #tpu.dot_dimension_numbers<[2], [1], [1], [2], [0, 0, 0, 1, 1, 2], [0], [0]>} : vector<2x8x8xf32>, vector<2x8x8xf32>, vector<2x8x8xf32> -> vector<2x8x8xf32>
    "tpu.trace_stop"() : () -> ()
    %239 = vector.shape_cast %238 : vector<2x8x8xf32> to vector<16x8xf32>
    %240 = vector.extract_strided_slice %221 {offsets = [0, 0], sizes = [8, 32], strides = [1, 1]} : vector<32x32xf32> to vector<8x32xf32>
    %cst_130 = arith.constant dense<0.000000e+00> : vector<16x32xf32>
    %241 = tpu.matmul %239, %240, %cst_130 {dimension_numbers = #tpu.dot_dimension_numbers<[1], [0], [0], [1], [0, 0, 1, 1], [], []>} : vector<16x8xf32>, vector<8x32xf32>, vector<16x32xf32> -> vector<16x32xf32>
    %242 = arith.addf %222, %241 : vector<16x32xf32>
    %243 = vector.extract_strided_slice %217 {offsets = [0, 0, 8], sizes = [2, 8, 8], strides = [1, 1, 1]} : vector<2x8x32xf32> to vector<2x8x8xf32>
    %244 = vector.extract_strided_slice %218 {offsets = [0, 0, 8], sizes = [2, 8, 8], strides = [1, 1, 1]} : vector<2x8x32xf32> to vector<2x8x8xf32>
    %245 = vector.extract_strided_slice %219 {offsets = [0, 0, 8], sizes = [2, 8, 8], strides = [1, 1, 1]} : vector<2x8x32xf32> to vector<2x8x8xf32>
    "tpu.trace_start"() <{level = 10 : i32, message = "bqd,bkd->bqk"}> : () -> ()
    %cst_131 = arith.constant dense<0.000000e+00> : vector<2x8x8xf32>
    %246 = tpu.matmul %243, %244, %cst_131 {dimension_numbers = #tpu.dot_dimension_numbers<[2], [2], [1], [1], [0, 0, 0, 1, 1, 1], [0], [0]>} : vector<2x8x8xf32>, vector<2x8x8xf32>, vector<2x8x8xf32> -> vector<2x8x8xf32>
    "tpu.trace_stop"() : () -> ()
    %cst_132 = arith.constant 0.353553385 : f32
    %247 = vector.broadcast %cst_132 : f32 to vector<2x8x8xf32>
    %248 = arith.mulf %246, %247 : vector<2x8x8xf32>
    %cst_133 = arith.constant dense<0xFF800000> : vector<2x8xf32>
    %249 = vector.multi_reduction <maximumf>, %248, %cst_133 [2] : vector<2x8x8xf32> to vector<2x8xf32>
    %250 = vector.shape_cast %249 : vector<2x8xf32> to vector<2x8x1xf32>
    %251 = vector.broadcast %250 : vector<2x8x1xf32> to vector<2x8x8xf32>
    %252 = arith.subf %248, %251 : vector<2x8x8xf32>
    %253 = math.exp %252 : vector<2x8x8xf32>
    %cst_134 = arith.constant dense<0.000000e+00> : vector<2x8xf32>
    %254 = vector.multi_reduction <add>, %253, %cst_134 [2] : vector<2x8x8xf32> to vector<2x8xf32>
    %255 = vector.shape_cast %254 : vector<2x8xf32> to vector<2x8x1xf32>
    %256 = vector.broadcast %255 : vector<2x8x1xf32> to vector<2x8x8xf32>
    %257 = arith.divf %253, %256 : vector<2x8x8xf32>
    "tpu.trace_start"() <{level = 10 : i32, message = "bqk,bkd->bqd"}> : () -> ()
    %cst_135 = arith.constant dense<0.000000e+00> : vector<2x8x8xf32>
    %258 = tpu.matmul %257, %245, %cst_135 {dimension_numbers = #tpu.dot_dimension_numbers<[2], [1], [1], [2], [0, 0, 0, 1, 1, 2], [0], [0]>} : vector<2x8x8xf32>, vector<2x8x8xf32>, vector<2x8x8xf32> -> vector<2x8x8xf32>
    "tpu.trace_stop"() : () -> ()
    %259 = vector.shape_cast %258 : vector<2x8x8xf32> to vector<16x8xf32>
    %260 = vector.extract_strided_slice %221 {offsets = [8, 0], sizes = [8, 32], strides = [1, 1]} : vector<32x32xf32> to vector<8x32xf32>
    %cst_136 = arith.constant dense<0.000000e+00> : vector<16x32xf32>
    %261 = tpu.matmul %259, %260, %cst_136 {dimension_numbers = #tpu.dot_dimension_numbers<[1], [0], [0], [1], [0, 0, 1, 1], [], []>} : vector<16x8xf32>, vector<8x32xf32>, vector<16x32xf32> -> vector<16x32xf32>
    %262 = arith.addf %242, %261 : vector<16x32xf32>
    %263 = vector.extract_strided_slice %217 {offsets = [0, 0, 16], sizes = [2, 8, 8], strides = [1, 1, 1]} : vector<2x8x32xf32> to vector<2x8x8xf32>
    %264 = vector.extract_strided_slice %218 {offsets = [0, 0, 16], sizes = [2, 8, 8], strides = [1, 1, 1]} : vector<2x8x32xf32> to vector<2x8x8xf32>
    %265 = vector.extract_strided_slice %219 {offsets = [0, 0, 16], sizes = [2, 8, 8], strides = [1, 1, 1]} : vector<2x8x32xf32> to vector<2x8x8xf32>
    "tpu.trace_start"() <{level = 10 : i32, message = "bqd,bkd->bqk"}> : () -> ()
    %cst_137 = arith.constant dense<0.000000e+00> : vector<2x8x8xf32>
    %266 = tpu.matmul %263, %264, %cst_137 {dimension_numbers = #tpu.dot_dimension_numbers<[2], [2], [1], [1], [0, 0, 0, 1, 1, 1], [0], [0]>} : vector<2x8x8xf32>, vector<2x8x8xf32>, vector<2x8x8xf32> -> vector<2x8x8xf32>
    "tpu.trace_stop"() : () -> ()
    %cst_138 = arith.constant 0.353553385 : f32
    %267 = vector.broadcast %cst_138 : f32 to vector<2x8x8xf32>
    %268 = arith.mulf %266, %267 : vector<2x8x8xf32>
    %cst_139 = arith.constant dense<0xFF800000> : vector<2x8xf32>
    %269 = vector.multi_reduction <maximumf>, %268, %cst_139 [2] : vector<2x8x8xf32> to vector<2x8xf32>
    %270 = vector.shape_cast %269 : vector<2x8xf32> to vector<2x8x1xf32>
    %271 = vector.broadcast %270 : vector<2x8x1xf32> to vector<2x8x8xf32>
    %272 = arith.subf %268, %271 : vector<2x8x8xf32>
    %273 = math.exp %272 : vector<2x8x8xf32>
    %cst_140 = arith.constant dense<0.000000e+00> : vector<2x8xf32>
    %274 = vector.multi_reduction <add>, %273, %cst_140 [2] : vector<2x8x8xf32> to vector<2x8xf32>
    %275 = vector.shape_cast %274 : vector<2x8xf32> to vector<2x8x1xf32>
    %276 = vector.broadcast %275 : vector<2x8x1xf32> to vector<2x8x8xf32>
    %277 = arith.divf %273, %276 : vector<2x8x8xf32>
    "tpu.trace_start"() <{level = 10 : i32, message = "bqk,bkd->bqd"}> : () -> ()
    %cst_141 = arith.constant dense<0.000000e+00> : vector<2x8x8xf32>
    %278 = tpu.matmul %277, %265, %cst_141 {dimension_numbers = #tpu.dot_dimension_numbers<[2], [1], [1], [2], [0, 0, 0, 1, 1, 2], [0], [0]>} : vector<2x8x8xf32>, vector<2x8x8xf32>, vector<2x8x8xf32> -> vector<2x8x8xf32>
    "tpu.trace_stop"() : () -> ()
    %279 = vector.shape_cast %278 : vector<2x8x8xf32> to vector<16x8xf32>
    %280 = vector.extract_strided_slice %221 {offsets = [16, 0], sizes = [8, 32], strides = [1, 1]} : vector<32x32xf32> to vector<8x32xf32>
    %cst_142 = arith.constant dense<0.000000e+00> : vector<16x32xf32>
    %281 = tpu.matmul %279, %280, %cst_142 {dimension_numbers = #tpu.dot_dimension_numbers<[1], [0], [0], [1], [0, 0, 1, 1], [], []>} : vector<16x8xf32>, vector<8x32xf32>, vector<16x32xf32> -> vector<16x32xf32>
    %282 = arith.addf %262, %281 : vector<16x32xf32>
    %283 = vector.extract_strided_slice %217 {offsets = [0, 0, 24], sizes = [2, 8, 8], strides = [1, 1, 1]} : vector<2x8x32xf32> to vector<2x8x8xf32>
    %284 = vector.extract_strided_slice %218 {offsets = [0, 0, 24], sizes = [2, 8, 8], strides = [1, 1, 1]} : vector<2x8x32xf32> to vector<2x8x8xf32>
    %285 = vector.extract_strided_slice %219 {offsets = [0, 0, 24], sizes = [2, 8, 8], strides = [1, 1, 1]} : vector<2x8x32xf32> to vector<2x8x8xf32>
    "tpu.trace_start"() <{level = 10 : i32, message = "bqd,bkd->bqk"}> : () -> ()
    %cst_143 = arith.constant dense<0.000000e+00> : vector<2x8x8xf32>
    %286 = tpu.matmul %283, %284, %cst_143 {dimension_numbers = #tpu.dot_dimension_numbers<[2], [2], [1], [1], [0, 0, 0, 1, 1, 1], [0], [0]>} : vector<2x8x8xf32>, vector<2x8x8xf32>, vector<2x8x8xf32> -> vector<2x8x8xf32>
    "tpu.trace_stop"() : () -> ()
    %cst_144 = arith.constant 0.353553385 : f32
    %287 = vector.broadcast %cst_144 : f32 to vector<2x8x8xf32>
    %288 = arith.mulf %286, %287 : vector<2x8x8xf32>
    %cst_145 = arith.constant dense<0xFF800000> : vector<2x8xf32>
    %289 = vector.multi_reduction <maximumf>, %288, %cst_145 [2] : vector<2x8x8xf32> to vector<2x8xf32>
    %290 = vector.shape_cast %289 : vector<2x8xf32> to vector<2x8x1xf32>
    %291 = vector.broadcast %290 : vector<2x8x1xf32> to vector<2x8x8xf32>
    %292 = arith.subf %288, %291 : vector<2x8x8xf32>
    %293 = math.exp %292 : vector<2x8x8xf32>
    %cst_146 = arith.constant dense<0.000000e+00> : vector<2x8xf32>
    %294 = vector.multi_reduction <add>, %293, %cst_146 [2] : vector<2x8x8xf32> to vector<2x8xf32>
    %295 = vector.shape_cast %294 : vector<2x8xf32> to vector<2x8x1xf32>
    %296 = vector.broadcast %295 : vector<2x8x1xf32> to vector<2x8x8xf32>
    %297 = arith.divf %293, %296 : vector<2x8x8xf32>
    "tpu.trace_start"() <{level = 10 : i32, message = "bqk,bkd->bqd"}> : () -> ()
    %cst_147 = arith.constant dense<0.000000e+00> : vector<2x8x8xf32>
    %298 = tpu.matmul %297, %285, %cst_147 {dimension_numbers = #tpu.dot_dimension_numbers<[2], [1], [1], [2], [0, 0, 0, 1, 1, 2], [0], [0]>} : vector<2x8x8xf32>, vector<2x8x8xf32>, vector<2x8x8xf32> -> vector<2x8x8xf32>
    "tpu.trace_stop"() : () -> ()
    %299 = vector.shape_cast %298 : vector<2x8x8xf32> to vector<16x8xf32>
    %300 = vector.extract_strided_slice %221 {offsets = [24, 0], sizes = [8, 32], strides = [1, 1]} : vector<32x32xf32> to vector<8x32xf32>
    %cst_148 = arith.constant dense<0.000000e+00> : vector<16x32xf32>
    %301 = tpu.matmul %299, %300, %cst_148 {dimension_numbers = #tpu.dot_dimension_numbers<[1], [0], [0], [1], [0, 0, 1, 1], [], []>} : vector<16x8xf32>, vector<8x32xf32>, vector<16x32xf32> -> vector<16x32xf32>
    %302 = arith.addf %282, %301 : vector<16x32xf32>
    %c1_149 = arith.constant 1 : index
    %c0_150 = arith.constant 0 : index
    %c0_151 = arith.constant 0 : index
    %303 = vector.load %arg15[%c1_149, %c0_150, %c0_151] : memref<2x1x32xf32, #tpu.memory_space<vmem>>, vector<1x1x32xf32>
    %304 = vector.shape_cast %303 : vector<1x1x32xf32> to vector<1x32xf32>
    %305 = vector.broadcast %304 : vector<1x32xf32> to vector<16x32xf32>
    %306 = arith.addf %302, %305 : vector<16x32xf32>
    %307 = arith.addf %194, %306 : vector<16x32xf32>
    %c1_152 = arith.constant 1 : index
    %c0_153 = arith.constant 0 : index
    %c0_154 = arith.constant 0 : index
    %308 = vector.load %arg16[%c1_152, %c0_153, %c0_154] : memref<2x1x32xf32, #tpu.memory_space<vmem>>, vector<1x1x32xf32>
    %309 = vector.shape_cast %308 : vector<1x1x32xf32> to vector<1x32xf32>
    %c1_155 = arith.constant 1 : index
    %c0_156 = arith.constant 0 : index
    %c0_157 = arith.constant 0 : index
    %310 = vector.load %arg17[%c1_155, %c0_156, %c0_157] : memref<2x1x32xf32, #tpu.memory_space<vmem>>, vector<1x1x32xf32>
    %311 = vector.shape_cast %310 : vector<1x1x32xf32> to vector<1x32xf32>
    %cst_158 = arith.constant dense<0.000000e+00> : vector<16xf32>
    %312 = vector.multi_reduction <add>, %307, %cst_158 [1] : vector<16x32xf32> to vector<16xf32>
    %313 = vector.shape_cast %312 : vector<16xf32> to vector<16x1xf32>
    %cst_159 = arith.constant 3.200000e+01 : f32
    %314 = vector.broadcast %cst_159 : f32 to vector<16x1xf32>
    %315 = arith.divf %313, %314 : vector<16x1xf32>
    %316 = vector.broadcast %315 : vector<16x1xf32> to vector<16x32xf32>
    %317 = arith.subf %307, %316 : vector<16x32xf32>
    %318 = arith.mulf %317, %317 : vector<16x32xf32>
    %cst_160 = arith.constant dense<0.000000e+00> : vector<16xf32>
    %319 = vector.multi_reduction <add>, %318, %cst_160 [1] : vector<16x32xf32> to vector<16xf32>
    %320 = vector.shape_cast %319 : vector<16xf32> to vector<16x1xf32>
    %cst_161 = arith.constant 3.200000e+01 : f32
    %321 = vector.broadcast %cst_161 : f32 to vector<16x1xf32>
    %322 = arith.divf %320, %321 : vector<16x1xf32>
    %323 = vector.broadcast %315 : vector<16x1xf32> to vector<16x32xf32>
    %324 = arith.subf %307, %323 : vector<16x32xf32>
    %cst_162 = arith.constant 9.99999974E-6 : f32
    %325 = vector.broadcast %cst_162 : f32 to vector<16x1xf32>
    %326 = arith.addf %322, %325 : vector<16x1xf32>
    %327 = math.rsqrt %326 : vector<16x1xf32>
    %328 = vector.broadcast %327 : vector<16x1xf32> to vector<16x32xf32>
    %329 = arith.mulf %324, %328 : vector<16x32xf32>
    %330 = vector.broadcast %309 : vector<1x32xf32> to vector<16x32xf32>
    %331 = arith.mulf %329, %330 : vector<16x32xf32>
    %332 = vector.broadcast %311 : vector<1x32xf32> to vector<16x32xf32>
    %333 = arith.addf %331, %332 : vector<16x32xf32>
    %c1_163 = arith.constant 1 : index
    %c0_164 = arith.constant 0 : index
    %c0_165 = arith.constant 0 : index
    %334 = vector.load %arg18[%c1_163, %c0_164, %c0_165] : memref<2x32x64xf32, #tpu.memory_space<vmem>>, vector<1x32x64xf32>
    %335 = vector.shape_cast %334 : vector<1x32x64xf32> to vector<32x64xf32>
    %cst_166 = arith.constant dense<0.000000e+00> : vector<16x64xf32>
    %336 = tpu.matmul %333, %335, %cst_166 {dimension_numbers = #tpu.dot_dimension_numbers<[1], [0], [0], [1], [0, 0, 1, 1], [], []>} : vector<16x32xf32>, vector<32x64xf32>, vector<16x64xf32> -> vector<16x64xf32>
    %c1_167 = arith.constant 1 : index
    %c0_168 = arith.constant 0 : index
    %c0_169 = arith.constant 0 : index
    %337 = vector.load %arg19[%c1_167, %c0_168, %c0_169] : memref<2x1x64xf32, #tpu.memory_space<vmem>>, vector<1x1x64xf32>
    %338 = vector.shape_cast %337 : vector<1x1x64xf32> to vector<1x64xf32>
    %339 = vector.broadcast %338 : vector<1x64xf32> to vector<16x64xf32>
    %340 = arith.addf %336, %339 : vector<16x64xf32>
    %cst_170 = arith.constant 0.000000e+00 : f32
    %341 = vector.broadcast %cst_170 : f32 to vector<16x64xf32>
    %342 = arith.maximumf %340, %341 : vector<16x64xf32>
    %c1_171 = arith.constant 1 : index
    %c0_172 = arith.constant 0 : index
    %c0_173 = arith.constant 0 : index
    %343 = vector.load %arg20[%c1_171, %c0_172, %c0_173] : memref<2x64x32xf32, #tpu.memory_space<vmem>>, vector<1x64x32xf32>
    %344 = vector.shape_cast %343 : vector<1x64x32xf32> to vector<64x32xf32>
    %cst_174 = arith.constant dense<0.000000e+00> : vector<16x32xf32>
    %345 = tpu.matmul %342, %344, %cst_174 {dimension_numbers = #tpu.dot_dimension_numbers<[1], [0], [0], [1], [0, 0, 1, 1], [], []>} : vector<16x64xf32>, vector<64x32xf32>, vector<16x32xf32> -> vector<16x32xf32>
    %c1_175 = arith.constant 1 : index
    %c0_176 = arith.constant 0 : index
    %c0_177 = arith.constant 0 : index
    %346 = vector.load %arg21[%c1_175, %c0_176, %c0_177] : memref<2x1x32xf32, #tpu.memory_space<vmem>>, vector<1x1x32xf32>
    %347 = vector.shape_cast %346 : vector<1x1x32xf32> to vector<1x32xf32>
    %348 = vector.broadcast %347 : vector<1x32xf32> to vector<16x32xf32>
    %349 = arith.addf %345, %348 : vector<16x32xf32>
    %350 = arith.addf %333, %349 : vector<16x32xf32>
    %c1_178 = arith.constant 1 : index
    %c0_179 = arith.constant 0 : index
    %c0_180 = arith.constant 0 : index
    %351 = vector.load %arg22[%c1_178, %c0_179, %c0_180] : memref<2x1x32xf32, #tpu.memory_space<vmem>>, vector<1x1x32xf32>
    %352 = vector.shape_cast %351 : vector<1x1x32xf32> to vector<1x32xf32>
    %c1_181 = arith.constant 1 : index
    %c0_182 = arith.constant 0 : index
    %c0_183 = arith.constant 0 : index
    %353 = vector.load %arg23[%c1_181, %c0_182, %c0_183] : memref<2x1x32xf32, #tpu.memory_space<vmem>>, vector<1x1x32xf32>
    %354 = vector.shape_cast %353 : vector<1x1x32xf32> to vector<1x32xf32>
    %cst_184 = arith.constant dense<0.000000e+00> : vector<16xf32>
    %355 = vector.multi_reduction <add>, %350, %cst_184 [1] : vector<16x32xf32> to vector<16xf32>
    %356 = vector.shape_cast %355 : vector<16xf32> to vector<16x1xf32>
    %cst_185 = arith.constant 3.200000e+01 : f32
    %357 = vector.broadcast %cst_185 : f32 to vector<16x1xf32>
    %358 = arith.divf %356, %357 : vector<16x1xf32>
    %359 = vector.broadcast %358 : vector<16x1xf32> to vector<16x32xf32>
    %360 = arith.subf %350, %359 : vector<16x32xf32>
    %361 = arith.mulf %360, %360 : vector<16x32xf32>
    %cst_186 = arith.constant dense<0.000000e+00> : vector<16xf32>
    %362 = vector.multi_reduction <add>, %361, %cst_186 [1] : vector<16x32xf32> to vector<16xf32>
    %363 = vector.shape_cast %362 : vector<16xf32> to vector<16x1xf32>
    %cst_187 = arith.constant 3.200000e+01 : f32
    %364 = vector.broadcast %cst_187 : f32 to vector<16x1xf32>
    %365 = arith.divf %363, %364 : vector<16x1xf32>
    %366 = vector.broadcast %358 : vector<16x1xf32> to vector<16x32xf32>
    %367 = arith.subf %350, %366 : vector<16x32xf32>
    %cst_188 = arith.constant 9.99999974E-6 : f32
    %368 = vector.broadcast %cst_188 : f32 to vector<16x1xf32>
    %369 = arith.addf %365, %368 : vector<16x1xf32>
    %370 = math.rsqrt %369 : vector<16x1xf32>
    %371 = vector.broadcast %370 : vector<16x1xf32> to vector<16x32xf32>
    %372 = arith.mulf %367, %371 : vector<16x32xf32>
    %373 = vector.broadcast %352 : vector<1x32xf32> to vector<16x32xf32>
    %374 = arith.mulf %372, %373 : vector<16x32xf32>
    %375 = vector.broadcast %354 : vector<1x32xf32> to vector<16x32xf32>
    %376 = arith.addf %374, %375 : vector<16x32xf32>
    %c0_189 = arith.constant 0 : index
    %c0_190 = arith.constant 0 : index
    %377 = vector.load %arg24[%c0_189, %c0_190] : memref<32x32xf32, #tpu.memory_space<vmem>>, vector<32x32xf32>
    %cst_191 = arith.constant dense<0.000000e+00> : vector<16x32xf32>
    %378 = tpu.matmul %376, %377, %cst_191 {dimension_numbers = #tpu.dot_dimension_numbers<[1], [0], [0], [1], [0, 0, 1, 1], [], []>} : vector<16x32xf32>, vector<32x32xf32>, vector<16x32xf32> -> vector<16x32xf32>
    %c0_192 = arith.constant 0 : index
    %c0_193 = arith.constant 0 : index
    %379 = vector.load %arg25[%c0_192, %c0_193] : memref<1x32xf32, #tpu.memory_space<vmem>>, vector<1x32xf32>
    %380 = vector.broadcast %379 : vector<1x32xf32> to vector<16x32xf32>
    %381 = arith.addf %378, %380 : vector<16x32xf32>
    %382 = math.tanh %381 : vector<16x32xf32>
    %c0_194 = arith.constant 0 : index
    %c0_195 = arith.constant 0 : index
    %383 = vector.load %arg26[%c0_194, %c0_195] : memref<32x48xf32, #tpu.memory_space<vmem>>, vector<32x48xf32>
    %cst_196 = arith.constant dense<0.000000e+00> : vector<16x48xf32>
    %384 = tpu.matmul %382, %383, %cst_196 {dimension_numbers = #tpu.dot_dimension_numbers<[1], [0], [0], [1], [0, 0, 1, 1], [], []>} : vector<16x32xf32>, vector<32x48xf32>, vector<16x48xf32> -> vector<16x48xf32>
    %c0_197 = arith.constant 0 : index
    %c0_198 = arith.constant 0 : index
    %385 = vector.load %arg27[%c0_197, %c0_198] : memref<1x48xf32, #tpu.memory_space<vmem>>, vector<1x48xf32>
    %386 = vector.broadcast %385 : vector<1x48xf32> to vector<16x48xf32>
    %387 = arith.addf %384, %386 : vector<16x48xf32>
    %c0_199 = arith.constant 0 : index
    %c0_200 = arith.constant 0 : index
    %388 = vector.load %arg2[%c0_199, %c0_200] : memref<16x48xf32, #tpu.memory_space<vmem>>, vector<16x48xf32>
    %389 = arith.addf %387, %388 : vector<16x48xf32>
    %c0_201 = arith.constant 0 : index
    %c0_202 = arith.constant 0 : index
    %390 = vector.load %arg28[%c0_201, %c0_202] : memref<16x48xf32, #tpu.memory_space<vmem>>, vector<16x48xf32>
    tpu.vector_store %arg28[%c0_201, %c0_202], %389 {strides = array<i32>} : memref<16x48xf32, #tpu.memory_space<vmem>>, vector<16x48xf32>,
    return
  }
  func.func @transform_0(%arg0: i32) -> (i32, i32) {
    %c0_i32 = arith.constant 0 : i32
    %c0_i32_0 = arith.constant 0 : i32
    %c0_i32_1 = arith.constant 0 : i32
    return %c0_i32, %c0_i32_0 : i32, i32
  }
  func.func @transform_1(%arg0: i32) -> (i32, i32) {
    %c0_i32 = arith.constant 0 : i32
    %c0_i32_0 = arith.constant 0 : i32
    %c0_i32_1 = arith.constant 0 : i32
    return %c0_i32, %c0_i32_0 : i32, i32
  }
  func.func @transform_2(%arg0: i32) -> (i32, i32) {
    %c0_i32 = arith.constant 0 : i32
    %c0_i32_0 = arith.constant 0 : i32
    %c0_i32_1 = arith.constant 0 : i32
    return %c0_i32, %c0_i32_0 : i32, i32
  }
  func.func @transform_3(%arg0: i32) -> (i32, i32) {
    %c0_i32 = arith.constant 0 : i32
    %c0_i32_0 = arith.constant 0 : i32
    %c0_i32_1 = arith.constant 0 : i32
    return %c0_i32, %c0_i32_0 : i32, i32
  }
  func.func @transform_4(%arg0: i32) -> (i32, i32) {
    %c0_i32 = arith.constant 0 : i32
    %c0_i32_0 = arith.constant 0 : i32
    %c0_i32_1 = arith.constant 0 : i32
    return %c0_i32, %c0_i32_0 : i32, i32
  }
  func.func @transform_5(%arg0: i32) -> (i32, i32) {
    %c0_i32 = arith.constant 0 : i32
    %c0_i32_0 = arith.constant 0 : i32
    %c0_i32_1 = arith.constant 0 : i32
    return %c0_i32, %c0_i32_0 : i32, i32
  }
  func.func @transform_6(%arg0: i32) -> (i32, i32) {
    %c0_i32 = arith.constant 0 : i32
    %c0_i32_0 = arith.constant 0 : i32
    %c0_i32_1 = arith.constant 0 : i32
    return %c0_i32, %c0_i32_0 : i32, i32
  }
  func.func @transform_7(%arg0: i32) -> (i32, i32, i32) {
    %c0_i32 = arith.constant 0 : i32
    %c0_i32_0 = arith.constant 0 : i32
    %c0_i32_1 = arith.constant 0 : i32
    %c0_i32_2 = arith.constant 0 : i32
    return %c0_i32, %c0_i32_0, %c0_i32_1 : i32, i32, i32
  }
  func.func @transform_8(%arg0: i32) -> (i32, i32, i32) {
    %c0_i32 = arith.constant 0 : i32
    %c0_i32_0 = arith.constant 0 : i32
    %c0_i32_1 = arith.constant 0 : i32
    %c0_i32_2 = arith.constant 0 : i32
    return %c0_i32, %c0_i32_0, %c0_i32_1 : i32, i32, i32
  }
  func.func @transform_9(%arg0: i32) -> (i32, i32, i32) {
    %c0_i32 = arith.constant 0 : i32
    %c0_i32_0 = arith.constant 0 : i32
    %c0_i32_1 = arith.constant 0 : i32
    %c0_i32_2 = arith.constant 0 : i32
    return %c0_i32, %c0_i32_0, %c0_i32_1 : i32, i32, i32
  }
  func.func @transform_10(%arg0: i32) -> (i32, i32, i32) {
    %c0_i32 = arith.constant 0 : i32
    %c0_i32_0 = arith.constant 0 : i32
    %c0_i32_1 = arith.constant 0 : i32
    %c0_i32_2 = arith.constant 0 : i32
    return %c0_i32, %c0_i32_0, %c0_i32_1 : i32, i32, i32
  }
  func.func @transform_11(%arg0: i32) -> (i32, i32, i32) {
    %c0_i32 = arith.constant 0 : i32
    %c0_i32_0 = arith.constant 0 : i32
    %c0_i32_1 = arith.constant 0 : i32
    %c0_i32_2 = arith.constant 0 : i32
    return %c0_i32, %c0_i32_0, %c0_i32_1 : i32, i32, i32
  }
  func.func @transform_12(%arg0: i32) -> (i32, i32, i32) {
    %c0_i32 = arith.constant 0 : i32
    %c0_i32_0 = arith.constant 0 : i32
    %c0_i32_1 = arith.constant 0 : i32
    %c0_i32_2 = arith.constant 0 : i32
    return %c0_i32, %c0_i32_0, %c0_i32_1 : i32, i32, i32
  }
  func.func @transform_13(%arg0: i32) -> (i32, i32, i32) {
    %c0_i32 = arith.constant 0 : i32
    %c0_i32_0 = arith.constant 0 : i32
    %c0_i32_1 = arith.constant 0 : i32
    %c0_i32_2 = arith.constant 0 : i32
    return %c0_i32, %c0_i32_0, %c0_i32_1 : i32, i32, i32
  }
  func.func @transform_14(%arg0: i32) -> (i32, i32, i32) {
    %c0_i32 = arith.constant 0 : i32
    %c0_i32_0 = arith.constant 0 : i32
    %c0_i32_1 = arith.constant 0 : i32
    %c0_i32_2 = arith.constant 0 : i32
    return %c0_i32, %c0_i32_0, %c0_i32_1 : i32, i32, i32
  }
  func.func @transform_15(%arg0: i32) -> (i32, i32, i32) {
    %c0_i32 = arith.constant 0 : i32
    %c0_i32_0 = arith.constant 0 : i32
    %c0_i32_1 = arith.constant 0 : i32
    %c0_i32_2 = arith.constant 0 : i32
    return %c0_i32, %c0_i32_0, %c0_i32_1 : i32, i32, i32
  }
  func.func @transform_16(%arg0: i32) -> (i32, i32, i32) {
    %c0_i32 = arith.constant 0 : i32
    %c0_i32_0 = arith.constant 0 : i32
    %c0_i32_1 = arith.constant 0 : i32
    %c0_i32_2 = arith.constant 0 : i32
    return %c0_i32, %c0_i32_0, %c0_i32_1 : i32, i32, i32
  }
  func.func @transform_17(%arg0: i32) -> (i32, i32, i32) {
    %c0_i32 = arith.constant 0 : i32
    %c0_i32_0 = arith.constant 0 : i32
    %c0_i32_1 = arith.constant 0 : i32
    %c0_i32_2 = arith.constant 0 : i32
    return %c0_i32, %c0_i32_0, %c0_i32_1 : i32, i32, i32
  }
  func.func @transform_18(%arg0: i32) -> (i32, i32, i32) {
    %c0_i32 = arith.constant 0 : i32
    %c0_i32_0 = arith.constant 0 : i32
    %c0_i32_1 = arith.constant 0 : i32
    %c0_i32_2 = arith.constant 0 : i32
    return %c0_i32, %c0_i32_0, %c0_i32_1 : i32, i32, i32
  }
  func.func @transform_19(%arg0: i32) -> (i32, i32, i32) {
    %c0_i32 = arith.constant 0 : i32
    %c0_i32_0 = arith.constant 0 : i32
    %c0_i32_1 = arith.constant 0 : i32
    %c0_i32_2 = arith.constant 0 : i32
    return %c0_i32, %c0_i32_0, %c0_i32_1 : i32, i32, i32
  }
  func.func @transform_20(%arg0: i32) -> (i32, i32, i32) {
    %c0_i32 = arith.constant 0 : i32
    %c0_i32_0 = arith.constant 0 : i32
    %c0_i32_1 = arith.constant 0 : i32
    %c0_i32_2 = arith.constant 0 : i32
    return %c0_i32, %c0_i32_0, %c0_i32_1 : i32, i32, i32
  }
  func.func @transform_21(%arg0: i32) -> (i32, i32, i32) {
    %c0_i32 = arith.constant 0 : i32
    %c0_i32_0 = arith.constant 0 : i32
    %c0_i32_1 = arith.constant 0 : i32
    %c0_i32_2 = arith.constant 0 : i32
    return %c0_i32, %c0_i32_0, %c0_i32_1 : i32, i32, i32
  }
  func.func @transform_22(%arg0: i32) -> (i32, i32, i32) {
    %c0_i32 = arith.constant 0 : i32
    %c0_i32_0 = arith.constant 0 : i32
    %c0_i32_1 = arith.constant 0 : i32
    %c0_i32_2 = arith.constant 0 : i32
    return %c0_i32, %c0_i32_0, %c0_i32_1 : i32, i32, i32
  }
  func.func @transform_23(%arg0: i32) -> (i32, i32) {
    %c0_i32 = arith.constant 0 : i32
    %c0_i32_0 = arith.constant 0 : i32
    %c0_i32_1 = arith.constant 0 : i32
    return %c0_i32, %c0_i32_0 : i32, i32
  }
  func.func @transform_24(%arg0: i32) -> (i32, i32) {
    %c0_i32 = arith.constant 0 : i32
    %c0_i32_0 = arith.constant 0 : i32
    %c0_i32_1 = arith.constant 0 : i32
    return %c0_i32, %c0_i32_0 : i32, i32
  }
  func.func @transform_25(%arg0: i32) -> (i32, i32) {
    %c0_i32 = arith.constant 0 : i32
    %c0_i32_0 = arith.constant 0 : i32
    %c0_i32_1 = arith.constant 0 : i32
    return %c0_i32, %c0_i32_0 : i32, i32
  }
  func.func @transform_26(%arg0: i32) -> (i32, i32) {
    %c0_i32 = arith.constant 0 : i32
    %c0_i32_0 = arith.constant 0 : i32
    %c0_i32_1 = arith.constant 0 : i32
    return %c0_i32, %c0_i32_0 : i32, i32
  }
  func.func @transform_27(%arg0: i32) -> (i32, i32) {
    %c0_i32 = arith.constant 0 : i32
    %c0_i32_0 = arith.constant 0 : i32
    %c0_i32_1 = arith.constant 0 : i32
    return %c0_i32, %c0_i32_0 : i32, i32
  }
}

</mosaic_0001>

<bundles_post_ra>
// kernel: tile.26
= control target key start
LH: loop header
LB: loop body
LE: loop exit
PB: predicated region body
PF: predicated region fallthrough
CT: control target
= control target key end

     0   :  { %vm52_vm0 = vcmask 1047556   ;;  %vm54_vm1 = vcmask 64512   ;;  %vm69_vm2 = vcmask 130112   ;;  %s151_s0 = inlined_call_operand.vmem [shape: f32[2,1,8,4,3], index: 0, kind: input, shape index: {}]   ;;  %s152_s1 = inlined_call_operand.vmem [shape: f32[16,12], index: 1, kind: output, shape index: {}]  }
   0x1   :  { %v82_v0 = vld [vmem:[%s151_s0 + $0xe] sm:$0x3]  ;;  %v83_v1 = vld [vmem:[%s151_s0 + $0xc] sm:$0x3]  ;;  %v84_v2 = vld [vmem:[%s151_s0 + $0xa] sm:$0x3] }
   0x2   :  { %23 = vst [vmem:[#allocation0 + $0x38] sm:$0x3] %v82_v0  ;;  %v85_v3 = vld [vmem:[%s151_s0 + $0x8] sm:$0x3]  ;;  %v86_v4 = vld [vmem:[%s151_s0 + $0x6] sm:$0x3] }
   0x3   :  { %27 = vst [vmem:[#allocation0 + $0x30] sm:$0x3] %v83_v1  ;;  %v87_v5 = vld [vmem:[%s151_s0 + $0x4] sm:$0x3]  ;;  %v88_v6 = vld [vmem:[%s151_s0 + $0x2] sm:$0x3] }
   0x4   :  { %31 = vst [vmem:[#allocation0 + $0x28] sm:$0x3] %v84_v2  ;;  %v48_v7 = vld [vmem:[%s151_s0] sm:$0x3]  ;;  %v78_v8 = vld [vmem:[%s151_s0 + $0x16] sm:$0x3] }
   0x5   :  { %35 = vst [vmem:[#allocation0 + $0x20] sm:$0x3] %v85_v3  ;;  %v79_v9 = vld [vmem:[%s151_s0 + $0x14] sm:$0x3]  ;;  %v80_v10 = vld [vmem:[%s151_s0 + $0x12] sm:$0x3] }
   0x6   :  { %39 = vst [vmem:[#allocation0 + $0x18] sm:$0x3] %v86_v4  ;;  %v81_v11 = vld [vmem:[%s151_s0 + $0x10] sm:$0x3]  ;;  %s92_s0 = smov 8  }
   0x7   :  { %43 = vst [vmem:[#allocation0 + $0x10] sm:$0x3] %v87_v5 }
   0x8   :  { %47 = vst [vmem:[#allocation0 + $0x8] sm:$0x3] %v88_v6 }
   0x9   :  { %49 = vst [vmem:[#allocation0] sm:$0x3] %v48_v7 }
   0xa   :  { %7 = vst [vmem:[#allocation0 + $0x58] sm:$0x3] %v78_v8 }
   0xb   :  { %11 = vst [vmem:[#allocation0 + $0x50] sm:$0x3] %v79_v9 }
   0xc   :  { %v64_v12 = vld [vmem:[#allocation0 + $0x1] ss:$8 sm:$0xf0]   ;;  %15 = vst [vmem:[#allocation0 + $0x48] sm:$0x3] %v80_v10 }
   0xd   :  { %v51_v13 = vld [vmem:[#allocation0] ss:$8 sm:$0xf0]   ;;  %19 = vst [vmem:[#allocation0 + $0x40] sm:$0x3] %v81_v11 }
  0x10   :  { %v50_v14 = vld [vmem:[#allocation0] ss:$8 sm:$0xf]   ;;  %v62_v15 = vld [vmem:[#allocation0 + $0x1] ss:$8 sm:$0xf]  }
  0x11   :  { %v66_v16 = vsel %vm52_vm0, %v64_v12, %v62_v15  ;;  %v53_v17 = vsel %vm52_vm0, %v51_v13, %v50_v14 }
  0x12   :  { %67 = vrot.lane.b32.xlu0 %v66_v16, %s92_s0  ;;  %55 = vst.msk [vmem:[%s152_s1] sm:$0xff] %vm54_vm1, %v53_v17  }
  0x14   :  { %v72_v18 = vld [vmem:[#allocation0 + $0x41] ss:$8 sm:$0xf]   ;;  %v57_v19 = vld [vmem:[#allocation0 + $0x40] ss:$8 sm:$0xf]  }
  0x15   :  { %89 = vst.msk [vmem:[%s152_s1 + $0x8] sm:$0xf] %vm54_vm1, %v57_v19  }
  0x1a   :  { %73 = vrot.lane.b32.xlu0 %v72_v18, %s92_s0 }
  0x84   :  { %v68_v20 = vpop.permute.xlu0 %67  }
  0x85   :  { %70 = vst.msk [vmem:[%s152_s1] sm:$0xff] %vm69_vm2, %v68_v20  }
  0x8c   :  { %v74_v21 = vpop.permute.xlu0 %73  }
  0x8d   :  { %90 = vst.msk [vmem:[%s152_s1 + $0x8] sm:$0xf] %vm69_vm2, %v74_v21  }

// kernel: _lambda_.3
= control target key start
LH: loop header
LB: loop body
LE: loop exit
PB: predicated region body
PF: predicated region fallthrough
CT: control target
= control target key end

     0   :  { %vm97_vm0 = vcmask 195584   ;;  %vm137_vm1 = vcmask 261120   ;;  %vm278_vm2 = vcmask 64512   ;;  %s3446_s30 = smov 112   ;;  %s3406_s3 = inlined_call_operand.vmem [shape: f32[24,32], index: 3, kind: input, shape index: {}]   ;;  %s3407_s0 = inlined_call_operand.vmem [shape: f32[16,24], index: 0, kind: input, shape index: {}]   ;;  %s3408_s4 = inlined_call_operand.vmem [shape: f32[1,32], index: 4, kind: input, shape index: {}]   ;;  %s3409_s6 = inlined_call_operand.vmem [shape: f32[1,32], index: 6, kind: input, shape index: {}]   ;;  %s3410_s5 = inlined_call_operand.vmem [shape: f32[32,32], index: 5, kind: input, shape index: {}]   ;;  %s3411_s11 = inlined_call_operand.vmem [shape: f32[2,32,32], index: 11, kind: input, shape index: {}]   ;;  %s3412_s7 = inlined_call_operand.vmem [shape: f32[2,32,32], index: 7, kind: input, shape index: {}]   ;;  %s3413_s12 = inlined_call_operand.vmem [shape: f32[2,1,32], index: 12, kind: input, shape index: {}]   ;;  %s3414_s9 = inlined_call_operand.vmem [shape: f32[2,32,32], index: 9, kind: input, shape index: {}]   ;;  %s3415_s2 = inlined_call_operand.vmem [shape: f32[16,32], index: 2, kind: input, shape index: {}]   ;;  %s3416_s8 = inlined_call_operand.vmem [shape: f32[2,1,32], index: 8, kind: input, shape index: {}]   ;;  %s3417_s10 = inlined_call_operand.vmem [shape: f32[2,1,32], index: 10, kind: input, shape index: {}]   ;;  %s3418_s13 = inlined_call_operand.vmem [shape: f32[2,32,32], index: 13, kind: input, shape index: {}]   ;;  %s3419_s14 = inlined_call_operand.vmem [shape: f32[2,1,32], index: 14, kind: input, shape index: {}]   ;;  %s3420_s15 = inlined_call_operand.vmem [shape: f32[2,1,32], index: 15, kind: input, shape index: {}]   ;;  %s3421_s16 = inlined_call_operand.vmem [shape: f32[2,1,32], index: 16, kind: input, shape index: {}]   ;;  %s3422_s17 = inlined_call_operand.vmem [shape: f32[2,32,64], index: 17, kind: input, shape index: {}]   ;;  %s3423_s18 = inlined_call_operand.vmem [shape: f32[2,1,64], index: 18, kind: input, shape index: {}]   ;;  %s3424_s19 = inlined_call_operand.vmem [shape: f32[2,64,32], index: 19, kind: input, shape index: {}]   ;;  %s3425_s20 = inlined_call_operand.vmem [shape: f32[2,1,32], index: 20, kind: input, shape index: {}]   ;;  %s3426_s21 = inlined_call_operand.vmem [shape: f32[2,1,32], index: 21, kind: input, shape index: {}]   ;;  %s3427_s22 = inlined_call_operand.vmem [shape: f32[2,1,32], index: 22, kind: input, shape index: {}]   ;;  %s3428_s24 = inlined_call_operand.vmem [shape: f32[1,32], index: 24, kind: input, shape index: {}]   ;;  %s3429_s23 = inlined_call_operand.vmem [shape: f32[32,32], index: 23, kind: input, shape index: {}]   ;;  %s3430_s26 = inlined_call_operand.vmem [shape: f32[1,12], index: 26, kind: input, shape index: {}]   ;;  %s3431_s25 = inlined_call_operand.vmem [shape: f32[32,12], index: 25, kind: input, shape index: {}]   ;;  %s3432_s1 = inlined_call_operand.vmem [shape: f32[16,12], index: 1, kind: input, shape index: {}]   ;;  %s3433_s27 = inlined_call_operand.vmem [shape: f32[16,12], index: 27, kind: output, shape index: {}]  }
   0x1   :  { %3452 = sst [smem:[#allocation2_spill]] %s3406_s3 }
   0x2   :  { %3453 = sst [smem:[#allocation3_spill]] %s3407_s0  ;;  %s3444_s0 = smov 104  }
   0x3   :  { %3454 = sst [smem:[#allocation4_spill]] %s3408_s4 }
   0x4   :  { %3455 = sst [smem:[#allocation5_spill]] %s3409_s6 }
   0x5   :  { %3456 = sst [smem:[#allocation6_spill]] %s3410_s5 }
   0x6   :  { %3457 = sst [smem:[#allocation7_spill]] %s3411_s11 }
   0x7   :  { %3458 = sst [smem:[#allocation8_spill]] %s3412_s7 }
   0x8   :  { %3459 = sst [smem:[#allocation9_spill]] %s3413_s12 }
   0x9   :  { %3460 = sst [smem:[#allocation10_spill]] %s3414_s9 }
   0xa   :  { %3461 = sst [smem:[#allocation11_spill]] %s3415_s2 }
   0xb   :  { %3462 = sst [smem:[#allocation12_spill]] %s3416_s8 }
   0xc   :  { %3463 = sst [smem:[#allocation13_spill]] %s3417_s10 }
   0xd   :  { %3464 = sst [smem:[#allocation14_spill]] %s3432_s1 }
   0xe   :  { %3465 = sst [smem:[#allocation15_spill]] %s3433_s27 }
   0xf   :  { %s3466_s9 = sld [smem:[#allocation2_spill]] }
  0x10   :  { %s3467_s29 = sld [smem:[#allocation3_spill]] }
  0x11   :  { %s3468_s6 = sld [smem:[#allocation6_spill]] }
  0x12   :  { %s3469_s8 = sld [smem:[#allocation7_spill]] }
  0x13   :  { %s3470_s7 = sld [smem:[#allocation8_spill]] }
  0x14   :  { %s3473_s10 = sld [smem:[#allocation5_spill]] }
  0x15   :  { %v92_v0 = vld [vmem:[%s3466_s9 + $0x10] sm:$0xff]  ;;  %v91_v1 = vld [vmem:[%s3466_s9 + $0x8] sm:$0xff]  ;;  %v90_v2 = vld [vmem:[%s3466_s9] sm:$0xff]  ;;  %s3474_s5 = sld [smem:[#allocation11_spill]]  ;;  %s3448_s9 = smov 120  }
  0x16   :  { %117 = vmatpush.msra.mxu0 %v92_v0  ;;  %v86_v3 = vld [vmem:[%s3467_s29] sm:$0xff]  ;;  %v87_v4 = vld [vmem:[%s3467_s29 + $0x8] sm:$0xff]  ;;  %s3475_s28 = sld [smem:[#allocation9_spill]] }
  0x17   :  { %v132_v5 = vld [vmem:[%s3468_s6 + $0x18] sm:$0xff]  ;;  %v131_v6 = vld [vmem:[%s3468_s6 + $0x10] sm:$0xff]  ;;  %v130_v7 = vld [vmem:[%s3468_s6 + $0x8] sm:$0xff]  ;;  %s3476_s3 = sld [smem:[#allocation13_spill]] }
  0x18   :  { %118 = vmatpush.msra.mxu0 %v91_v1  ;;  %156 = vmatpush.msra.mxu1 %v132_v5  ;;  %v129_v8 = vld [vmem:[%s3468_s6] sm:$0xff]  ;;  %v240_v9 = vld [vmem:[%s3469_s8 + $0x18] sm:$0xff]  ;;  %v239_v11 = vld [vmem:[%s3469_s8 + $0x10] sm:$0xff]  ;;  %s3471_s6 = sld [smem:[#allocation4_spill]] }
  0x19   :  { %v172_v10 = vld [vmem:[%s3470_s7 + $0x18] sm:$0xff]  ;;  %v171_v19 = vld [vmem:[%s3470_s7 + $0x10] sm:$0xff]  ;;  %v238_v20 = vld [vmem:[%s3469_s8 + $0x8] sm:$0xff]  ;;  %s3477_s12 = sld [smem:[#allocation12_spill]] }
  0x1a   :  { %119 = vmatpush.msra.mxu0 %v90_v2  ;;  %157 = vmatpush.msra.mxu1 %v131_v6  ;;  %v170_v21 = vld [vmem:[%s3470_s7 + $0x8] sm:$0xff]  ;;  %v237_v22 = vld [vmem:[%s3469_s8] sm:$0xff] }
  0x1b   :  { %2393 = vmatmul.msk.f32.vlgmr.msra.gmra.mxu0 %vm97_vm0, %v86_v3  ;;  %195 = vmatpush.msra.mxu2 %v172_v10  ;;  %v169_v23 = vld [vmem:[%s3470_s7] sm:$0xff]  ;;  %v89_v34 = vld [vmem:[%s3474_s5 + $0x8] sm:$0xff] }
  0x1c   :  { %158 = vmatpush.msra.mxu1 %v130_v7  ;;  %263 = vmatpush.msrb.mxu0 %v240_v9  ;;  %v2532_v28 = vld [vmem:[%s3473_s10] ss:$0 sm:$0xff] }
  0x1d   :  { %2523 = vmatpush.msra.mxu3 %v172_v10  ;;  %196 = vmatpush.msra.mxu2 %v171_v19  ;;  %v88_v30 = vld [vmem:[%s3474_s5] sm:$0xff] }
  0x1e   :  { %159 = vmatpush.msra.mxu1 %v129_v8  ;;  %264 = vmatpush.msrb.mxu0 %v239_v11  ;;  %v2531_v12 = vld [vmem:[%s3471_s6] ss:$0 sm:$0xff]  ;;  %s3472_s6 = sld [smem:[#allocation10_spill]] }
  0x1f   :  { %2524 = vmatpush.msra.mxu3 %v171_v19  ;;  %197 = vmatpush.msra.mxu2 %v170_v21  ;;  %v2533_v37 = vld [vmem:[%s3475_s28] ss:$0 sm:$0xff] }
  0x20   :  { %265 = vmatpush.msrb.mxu0 %v238_v20  ;;  %v2535_v41 = vld [vmem:[%s3476_s3] ss:$0 sm:$0xff] }
  0x21   :  { %2525 = vmatpush.msra.mxu3 %v170_v21  ;;  %198 = vmatpush.msra.mxu2 %v169_v23  ;;  %v2534_v43 = vld [vmem:[%s3477_s12] ss:$0 sm:$0xff] }
  0x22   :  { %266 = vmatpush.msrb.mxu0 %v237_v22 }
  0x23   :  { %2394 = vmatmul.msk.f32.gmra.mxu0 %vm97_vm0, %v87_v4  ;;  %2526 = vmatpush.msra.mxu3 %v169_v23 }
  0x24   :  { %v209_v24 = vld [vmem:[%s3472_s6 + $0x18] sm:$0xff]  ;;  %v208_v25 = vld [vmem:[%s3472_s6 + $0x10] sm:$0xff]  ;;  %v207_v26 = vld [vmem:[%s3472_s6 + $0x8] sm:$0xff] }
  0x25   :  { %226 = vmatpush.msrb.mxu3 %v209_v24  ;;  %v206_v27 = vld [vmem:[%s3472_s6] sm:$0xff] }
  0x27   :  { %227 = vmatpush.msrb.mxu3 %v208_v25 }
  0x29   :  { %228 = vmatpush.msrb.mxu3 %v207_v26 }
  0x2b   :  { %229 = vmatpush.msrb.mxu3 %v206_v27 }
  0x98   :  { %v121_v13 = vpop.f32.mrf.mxu0 }
  0x99   :  { %v122_v14 = vadd.f32 %v2531_v12, %v121_v13 }
  0x9b   :  { %2555 = vtanh.f32 %v122_v14 }
  0xa0   :  { %v124_v15 = vpop.f32.mrf.mxu0 }
  0xa1   :  { %v2556_v16 = vpop.eup %2555  ;;  %v125_v17 = vadd.f32 %v2531_v12, %v124_v15 }
  0xa2   :  { %2395 = vmatmul.msk.f32.vlgmr.msra.gmra.mxu1 %vm137_vm1, %v2556_v16 }
  0xa3   :  { %2557 = vtanh.f32 %v125_v17 }
  0xa9   :  { %v2558_v18 = vpop.eup %2557 }
  0xaa   :  { %2396 = vmatmul.msk.f32.gmra.mxu1 %vm137_vm1, %v2558_v18 }
 0x11f   :  { %v161_v29 = vpop.f32.mrf.mxu1 }
 0x120   :  { %v2865_v31 = vadd.f32 %v2532_v28, %v161_v29 }
 0x122   :  { %2401 = vmatmul.msk.f32.vlgmr.msrb.gmra.mxu0 %vm137_vm1, %v2865_v31  ;;  %v167_v32 = vadd.f32 %v2865_v31, %v88_v30 }
 0x124   :  { %2397 = vmatmul.msk.f32.vlgmr.msra.gmra.mxu2 %vm137_vm1, %v167_v32 }
 0x127   :  { %v164_v33 = vpop.f32.mrf.mxu1 }
 0x128   :  { %v2874_v35 = vadd.f32 %v2532_v28, %v164_v33 }
 0x12a   :  { %2402 = vmatmul.msk.f32.gmra.mxu0 %vm137_vm1, %v2874_v35  ;;  %v168_v36 = vadd.f32 %v2874_v35, %v89_v34 }
 0x12c   :  { %2398 = vmatmul.msk.f32.vlgmr.msra.gmra.mxu3 %vm137_vm1, %v168_v36 }
 0x134   :  { %2399 = vmatmul.msk.f32.vlgmr.msrb.gmra.mxu3 %vm137_vm1, %v167_v32 }
 0x13c   :  { %2400 = vmatmul.msk.f32.gmra.mxu3 %vm137_vm1, %v168_v36 }
 0x19f   :  { %v268_v38 = vpop.f32.mrf.mxu0 }
 0x1a0   :  { %v2885_v39 = vadd.f32 %v2533_v37, %v268_v38 }
 0x1a2   :  { %399 = vmatpush.msra.mxu3 %v2885_v39 }
 0x1a7   :  { %v271_v42 = vpop.f32.mrf.mxu0  ;;  %v200_v45 = vpop.f32.mrf.mxu2 }
 0x1a8   :  { %v2896_v47 = vadd.f32 %v2533_v37, %v271_v42  ;;  %v2902_v48 = vadd.f32 %v2534_v43, %v200_v45 }
 0x1af   :  { %v203_v40 = vpop.f32.mrf.mxu3 }
 0x1b0   :  { %v2913_v51 = vadd.f32 %v2534_v43, %v203_v40 }
 0x1b7   :  { %v231_v44 = vpop.f32.mrf.mxu3 }
 0x1b8   :  { %v2894_v46 = vadd.f32 %v2535_v41, %v231_v44  ;;  %v274_v44 = vld [vmem:[%s3418_s13] sm:$0xff] }
 0x1ba   :  { %429 = vrot.lane.b32.xlu0 %v2894_v46, %s3448_s9  ;;  %2403 = vmatpush.xpose.msk.msrb.mxu1 %vm278_vm2, %v2894_v46 }
 0x1bd   :  { %2404 = vmatmul.msk.f32.vlgmr.msrb.gmra.mxu1 %vm278_vm2, %v2902_v48 }
 0x1be   :  { %422 = vmatpush.msra.mxu1 %v2896_v47 }
 0x1bf   :  { %v234_v49 = vpop.f32.mrf.mxu3 }
 0x1c0   :  { %v2907_v50 = vadd.f32 %v2535_v41, %v234_v49 }
 0x1c2   :  { %457 = vrot.lane.b32.xlu2 %v2907_v50, %s3448_s9  ;;  %2405 = vmatpush.xpose.msk.msrb.mxu2 %vm278_vm2, %v2907_v50 }
 0x1c3   :  { %427 = vrot.lane.b32.xlu0 %v2902_v48, %s3448_s9 }
 0x1c5   :  { %2406 = vmatmul.msk.f32.vlgmr.msrb.gmra.mxu2 %vm278_vm2, %v2913_v51 }
 0x1ca   :  { %455 = vrot.lane.b32.xlu2 %v2913_v51, %s3448_s9 }
 0x21c   :  { %v458_v52 = vpop.permute.xlu2 %457 }
 0x21d   :  { %2411 = vmatpush.xpose.msk.msrb.mxu3 %vm278_vm2, %v458_v52 }
 0x224   :  { %v456_v11 = vpop.permute.xlu2 %455 }
 0x22c   :  { %v430_v53 = vpop.permute.xlu0 %429 }
 0x22d   :  { %2409 = vmatpush.xpose.msk.msra.mxu2 %vm278_vm2, %v430_v53 }
 0x235   :  { %v428_v54 = vpop.permute.xlu0 %427 }
 0x236   :  { %2410 = vmatmul.msk.f32.vlgmr.msra.gmra.mxu2 %vm278_vm2, %v428_v54 }
 0x23a   :  { %v302_v55 = vpop.f32.mrf.mxu1 }
 0x23b   :  { %v331_v56 = vmul.f32 0.35355338, %v302_v55 }
 0x23d   :  { %v333_v57 = vsel %vm278_vm2, %v331_v56, -inf }
 0x23e   :  { %334 = vmax.xlane.f32.xlu1 %v333_v57 }
 0x248   :  { %v328_v58 = vpop.f32.mrf.mxu2 }
 0x249   :  { %v332_v59 = vmul.f32 0.35355338, %v328_v58 }
 0x24b   :  { %v336_v60 = vsel %vm278_vm2, %v332_v59, -inf }
 0x24c   :  { %337 = vmax.xlane.f32.xlu0 %v336_v60 }
 0x2b1   :  { %v335_v61 = vpop.xlane.xlu1 %334 }
 0x2b2   :  { %v339_v62 = vsub.f32 %v331_v56, %v335_v61 }
 0x2b4   :  { %v341_v63 = vmul.f32 1.442695, %v339_v62 }
 0x2b6   :  { %2559 = vpow2.f32 %v341_v63 }
 0x2b9   :  { %v452_v2 = vpop.f32.mrf.mxu2 }
 0x2ba   :  { %v483_v5 = vmul.f32 0.35355338, %v452_v2 }
 0x2bc   :  { %v2560_v0 = vpop.eup %2559  ;;  %v485_v7 = vsel %vm278_vm2, %v483_v5, -inf }
 0x2bd   :  { %v345_v1 = vsel %vm278_vm2, %v2560_v0, 0.0 }
 0x2be   :  { %346 = vadd.xlane.f32.xlu1 %v345_v1 }
 0x2bf   :  { %v338_v3 = vpop.xlane.xlu0 %337 }
 0x2c0   :  { %v340_v4 = vsub.f32 %v332_v59, %v338_v3 }
 0x2c2   :  { %v343_v6 = vmul.f32 1.442695, %v340_v4 }
 0x2c4   :  { %2561 = vpow2.f32 %v343_v6 }
 0x2c6   :  { %486 = vmax.xlane.f32.xlu1 %v485_v7 }
 0x2ca   :  { %v2562_v8 = vpop.eup %2561 }
 0x2cb   :  { %v348_v9 = vsel %vm278_vm2, %v2562_v8, 0.0 }
 0x2cc   :  { %349 = vadd.xlane.f32.xlu2 %v348_v9 }
 0x2df   :  { %534 = vrot.lane.b32.xlu1 %v2885_v39, %s3448_s9 }
 0x2e4   :  { %645 = vrot.lane.b32.xlu2 %v2902_v48, %s3446_s30 }
 0x2ec   :  { %675 = vrot.lane.b32.xlu2 %v2907_v50, %s3446_s30 }
 0x2f4   :  { %673 = vrot.lane.b32.xlu2 %v2913_v51, %s3446_s30 }
 0x331   :  { %v347_v10 = vpop.xlane.xlu1 %346 }
 0x332   :  { %2563 = vrcp.f32 %v347_v10  ;;  %v362_v17 = vand.u32 2147483648, %v347_v10  ;;  %v360_v20 = vand.u32 2147483647, %v347_v10  ;;  %vm356_vm4 = vweird.f32 %v347_v10 }
 0x334   :  { %v363_v23 = vor.u32 1.1754944e-38, %v362_v17  ;;  %vm361_vm6 = vcmp.eq.f32.partialorder %v360_v20, 8.507059e+37 }
 0x338   :  { %v2564_v12 = vpop.eup %2563 }
 0x339   :  { %v352_v13 = vmul.f32 %v2564_v12, %v347_v10  ;;  %v487_v14 = vpop.xlane.xlu1 %486  ;;  %vm357_vm3 = vweird.f32 %v2564_v12 }
 0x33a   :  { %v491_v15 = vsub.f32 %v483_v5, %v487_v14  ;;  %vm358_vm5 = vmor %vm356_vm4, %vm357_vm3  ;;  %v275_v5 = vld [vmem:[%s3418_s13 + $0x8] sm:$0xff] }
 0x33b   :  { %v353_v16 = vsub.f32 1.0, %v352_v13  ;;  %608 = vmatpush.msrb.mxu2 %v275_v5 }
 0x33c   :  { %v493_v18 = vmul.f32 1.442695, %v491_v15 }
 0x33d   :  { %v354_v19 = vmul.f32 %v2564_v12, %v353_v16 }
 0x33e   :  { %2565 = vpow2.f32 %v493_v18 }
 0x33f   :  { %v355_v21 = vadd.f32 %v2564_v12, %v354_v19  ;;  %v350_v22 = vpop.xlane.xlu2 %349 }
 0x340   :  { %2567 = vrcp.f32 %v350_v22  ;;  %v377_v33 = vand.u32 2147483648, %v350_v22  ;;  %v375_v36 = vand.u32 2147483647, %v350_v22  ;;  %vm371_vm8 = vweird.f32 %v350_v22 }
 0x341   :  { %v359_v24 = vsel %vm358_vm5, %v2564_v12, %v355_v21 }
 0x342   :  { %v364_v25 = vsel %vm361_vm6, %v363_v23, %v359_v24  ;;  %v378_v38 = vor.u32 1.1754944e-38, %v377_v33  ;;  %vm376_vm10 = vcmp.eq.f32.partialorder %v375_v36, 8.507059e+37 }
 0x343   :  { %v365_v26 = vmul.f32 %v2560_v0, %v364_v25 }
 0x344   :  { %v2566_v27 = vpop.eup %2565 }
 0x345   :  { %2407 = vmatmul.msk.f32.vlgmr.msra.gmra.mxu3 %vm278_vm2, %v365_v26  ;;  %v497_v28 = vsel %vm278_vm2, %v2566_v27, 0.0 }
 0x346   :  { %v2568_v29 = vpop.eup %2567  ;;  %498 = vadd.xlane.f32.xlu1 %v497_v28  ;;  %637 = vmatpush.msra.mxu3 %v274_v44 }
 0x347   :  { %v367_v30 = vmul.f32 %v2568_v29, %v350_v22  ;;  %vm372_vm7 = vweird.f32 %v2568_v29  ;;  %v646_v4 = vpop.permute.xlu2 %645 }
 0x348   :  { %vm373_vm9 = vmor %vm371_vm8, %vm372_vm7 }
 0x349   :  { %v368_v32 = vsub.f32 1.0, %v367_v30 }
 0x34b   :  { %v369_v34 = vmul.f32 %v2568_v29, %v368_v32 }
 0x34d   :  { %v370_v37 = vadd.f32 %v2568_v29, %v369_v34  ;;  %2412 = vmatmul.msk.f32.vlgmr.msrb.gmra.mxu3 %vm278_vm2, %v456_v11 }
 0x34f   :  { %v374_v40 = vsel %vm373_vm9, %v2568_v29, %v370_v37  ;;  %v676_v14 = vpop.permute.xlu2 %675 }
 0x350   :  { %v379_v41 = vsel %vm376_vm10, %v378_v38, %v374_v40 }
 0x351   :  { %v535_v42 = vpop.permute.xlu1 %534  ;;  %v380_v43 = vmul.f32 %v2562_v8, %v379_v41 }
 0x352   :  { %555 = vmatpush.msra.mxu0 %v535_v42 }
 0x353   :  { %2408 = vmatmul.msk.f32.vlgmr.msra.gmra.mxu1 %vm278_vm2, %v380_v43 }
 0x357   :  { %v674_v17 = vpop.permute.xlu2 %673 }
 0x35f   :  { %647 = vrot.lane.b32.xlu1 %v2894_v46, %s3446_s30 }
 0x3b9   :  { %v499_v45 = vpop.xlane.xlu1 %498 }
 0x3ba   :  { %2569 = vrcp.f32 %v499_v45  ;;  %v514_v54 = vand.u32 2147483648, %v499_v45  ;;  %v512_v56 = vand.u32 2147483647, %v499_v45  ;;  %vm508_vm12 = vweird.f32 %v499_v45 }
 0x3bc   :  { %v515_v58 = vor.u32 1.1754944e-38, %v514_v54  ;;  %vm513_vm14 = vcmp.eq.f32.partialorder %v512_v56, 8.507059e+37 }
 0x3c0   :  { %v2570_v49 = vpop.eup %2569 }
 0x3c1   :  { %v504_v52 = vmul.f32 %v2570_v49, %v499_v45  ;;  %vm509_vm11 = vweird.f32 %v2570_v49 }
 0x3c2   :  { %vm510_vm13 = vmor %vm508_vm12, %vm509_vm11 }
 0x3c3   :  { %v505_v53 = vsub.f32 1.0, %v504_v52 }
 0x3c5   :  { %v506_v55 = vmul.f32 %v2570_v49, %v505_v53 }
 0x3c7   :  { %v507_v57 = vadd.f32 %v2570_v49, %v506_v55 }
 0x3c8   :  { %v401_v59 = vpop.f32.mrf.mxu3 }
 0x3c9   :  { %v511_v60 = vsel %vm510_vm13, %v2570_v49, %v507_v57  ;;  %2417 = vmatmul.msk.f32.vlgmr.msra.gmra.mxu3 %vm278_vm2, %v401_v59 }
 0x3ca   :  { %v516_v61 = vsel %vm513_vm14, %v515_v58, %v511_v60 }
 0x3cb   :  { %v517_v62 = vmul.f32 %v2566_v27, %v516_v61 }
 0x3cd   :  { %2413 = vmatmul.msk.f32.vlgmr.msra.gmra.mxu0 %vm278_vm2, %v517_v62 }
 0x3d0   :  { %v424_v63 = vpop.f32.mrf.mxu1  ;;  %v480_v0 = vpop.f32.mrf.mxu3 }
 0x3d1   :  { %v484_v1 = vmul.f32 0.35355338, %v480_v0  ;;  %2418 = vmatmul.msk.f32.gmra.mxu3 %vm278_vm2, %v424_v63  ;;  %v648_v2 = vpop.permute.xlu1 %647 }
 0x3d2   :  { %2419 = vmatpush.xpose.msk.msrb.mxu0 %vm278_vm2, %v648_v2 }
 0x3d3   :  { %v488_v3 = vsel %vm278_vm2, %v484_v1, -inf }
 0x3d4   :  { %489 = vmax.xlane.f32.xlu0 %v488_v3 }
 0x3d5   :  { %2420 = vmatmul.msk.f32.vlgmr.msrb.gmra.mxu0 %vm278_vm2, %v646_v4 }
 0x3e8   :  { %561 = vrot.lane.b32.xlu0 %v2896_v47, %s3448_s9 }
 0x3f0   :  { %836 = vrot.lane.b32.xlu0 %v2894_v46, %s3444_s0 }
 0x3f8   :  { %834 = vrot.lane.b32.xlu0 %v2902_v48, %s3444_s0 }
 0x447   :  { %v490_v6 = vpop.xlane.xlu0 %489 }
 0x448   :  { %v492_v7 = vsub.f32 %v484_v1, %v490_v6 }
 0x44a   :  { %v495_v8 = vmul.f32 1.442695, %v492_v7  ;;  %v557_v9 = vpop.f32.mrf.mxu0  ;;  %v276_v7 = vld [vmem:[%s3418_s13 + $0x10] sm:$0xff] }
 0x44b   :  { %2415 = vmatmul.msk.f32.vlgmr.msrb.gmra.mxu2 %vm278_vm2, %v557_v9 }
 0x44c   :  { %2571 = vpow2.f32 %v495_v8  ;;  %v2977_v37 = vpop.f32.mrf.mxu3  ;;  %824 = vmatpush.msra.mxu2 %v276_v7 }
 0x452   :  { %v2572_v10 = vpop.eup %2571  ;;  %v670_v11 = vpop.f32.mrf.mxu0 }
 0x453   :  { %v701_v12 = vmul.f32 0.35355338, %v670_v11  ;;  %v500_v46 = vsel %vm278_vm2, %v2572_v10, 0.0 }
 0x454   :  { %501 = vadd.xlane.f32.xlu1 %v500_v46  ;;  %v2980_v40 = vpop.f32.mrf.mxu3 }
 0x455   :  { %v703_v48 = vsel %vm278_vm2, %v701_v12, -inf }
 0x456   :  { %704 = vmax.xlane.f32.xlu2 %v703_v48 }
 0x45a   :  { %v562_v13 = vpop.permute.xlu0 %561 }
 0x45b   :  { %582 = vmatpush.msrb.mxu1 %v562_v13 }
 0x45d   :  { %2421 = vmatpush.xpose.msk.msra.mxu1 %vm278_vm2, %v676_v14 }
 0x462   :  { %v837_v15 = vpop.permute.xlu0 %836 }
 0x463   :  { %2427 = vmatpush.xpose.msk.msrb.mxu3 %vm278_vm2, %v837_v15 }
 0x46a   :  { %v835_v16 = vpop.permute.xlu0 %834 }
 0x46b   :  { %2428 = vmatmul.msk.f32.vlgmr.msrb.gmra.mxu3 %vm278_vm2, %v835_v16 }
 0x46d   :  { %751 = vrot.lane.b32.xlu1 %v2885_v39, %s3446_s30 }
 0x46e   :  { %862 = vrot.lane.b32.xlu2 %v2913_v51, %s3444_s0 }
 0x475   :  { %864 = vrot.lane.b32.xlu1 %v2907_v50, %s3444_s0 }
 0x476   :  { %777 = vrot.lane.b32.xlu2 %v2896_v47, %s3446_s30 }
 0x4c7   :  { %v502_v18 = vpop.xlane.xlu1 %501 }
 0x4c8   :  { %2573 = vrcp.f32 %v502_v18  ;;  %v529_v26 = vand.u32 2147483648, %v502_v18  ;;  %v527_v51 = vand.u32 2147483647, %v502_v18  ;;  %vm523_vm0 = vweird.f32 %v502_v18 }
 0x4c9   :  { %v705_v19 = vpop.xlane.xlu2 %704 }
 0x4ca   :  { %v709_v20 = vsub.f32 %v701_v12, %v705_v19  ;;  %v530_v30 = vor.u32 1.1754944e-38, %v529_v26  ;;  %vm528_vm4 = vcmp.eq.f32.partialorder %v527_v51, 8.507059e+37 }
 0x4cc   :  { %v711_v21 = vmul.f32 1.442695, %v709_v20 }
 0x4ce   :  { %v2574_v22 = vpop.eup %2573  ;;  %2575 = vpow2.f32 %v711_v21 }
 0x4cf   :  { %v519_v23 = vmul.f32 %v2574_v22, %v502_v18  ;;  %vm524_vm15 = vweird.f32 %v2574_v22 }
 0x4d0   :  { %vm525_vm3 = vmor %vm523_vm0, %vm524_vm15 }
 0x4d1   :  { %v520_v24 = vsub.f32 1.0, %v519_v23  ;;  %v863_v25 = vpop.permute.xlu2 %862 }
 0x4d3   :  { %v521_v27 = vmul.f32 %v2574_v22, %v520_v24 }
 0x4d4   :  { %v2576_v28 = vpop.eup %2575 }
 0x4d5   :  { %v522_v50 = vadd.f32 %v2574_v22, %v521_v27  ;;  %v715_v29 = vsel %vm278_vm2, %v2576_v28, 0.0 }
 0x4d6   :  { %716 = vadd.xlane.f32.xlu0 %v715_v29 }
 0x4d7   :  { %v526_v32 = vsel %vm525_vm3, %v2574_v22, %v522_v50 }
 0x4d8   :  { %v531_v33 = vsel %vm528_vm4, %v530_v30, %v526_v32 }
 0x4d9   :  { %v778_v34 = vpop.permute.xlu2 %777  ;;  %v532_v36 = vmul.f32 %v2572_v10, %v531_v33 }
 0x4db   :  { %2414 = vmatmul.msk.f32.vlgmr.msrb.gmra.mxu1 %vm278_vm2, %v532_v36 }
 0x4dc   :  { %798 = vmatpush.msrb.mxu1 %v778_v34 }
 0x4df   :  { %v752_v38 = vpop.permute.xlu1 %751 }
 0x4e0   :  { %772 = vmatpush.msra.mxu0 %v752_v38 }
 0x4e3   :  { %2422 = vmatmul.msk.f32.vlgmr.msra.gmra.mxu1 %vm278_vm2, %v674_v17 }
 0x4e7   :  { %v865_v41 = vpop.permute.xlu1 %864 }
 0x4e8   :  { %2429 = vmatpush.xpose.msk.msrb.mxu0 %vm278_vm2, %v865_v41 }
 0x4ee   :  { %v859_v42 = vpop.f32.mrf.mxu3 }
 0x4ef   :  { %v890_v43 = vmul.f32 0.35355338, %v859_v42 }
 0x4f1   :  { %v892_v44 = vsel %vm278_vm2, %v890_v43, -inf }
 0x4f2   :  { %893 = vmax.xlane.f32.xlu0 %v892_v44 }
 0x549   :  { %v717_v45 = vpop.xlane.xlu0 %716 }
 0x54a   :  { %2577 = vrcp.f32 %v717_v45  ;;  %v732_v54 = vand.u32 2147483648, %v717_v45  ;;  %v730_v56 = vand.u32 2147483647, %v717_v45  ;;  %vm726_vm6 = vweird.f32 %v717_v45 }
 0x54c   :  { %v733_v58 = vor.u32 1.1754944e-38, %v732_v54  ;;  %vm731_vm8 = vcmp.eq.f32.partialorder %v730_v56, 8.507059e+37 }
 0x550   :  { %v2578_v49 = vpop.eup %2577 }
 0x551   :  { %v722_v52 = vmul.f32 %v2578_v49, %v717_v45  ;;  %vm727_vm5 = vweird.f32 %v2578_v49 }
 0x552   :  { %vm728_vm7 = vmor %vm726_vm6, %vm727_vm5 }
 0x553   :  { %v723_v53 = vsub.f32 1.0, %v722_v52  ;;  %v277_v52 = vld [vmem:[%s3418_s13 + $0x18] sm:$0xff] }
 0x555   :  { %v724_v55 = vmul.f32 %v2578_v49, %v723_v53 }
 0x557   :  { %v725_v57 = vadd.f32 %v2578_v49, %v724_v55 }
 0x558   :  { %v584_v59 = vpop.f32.mrf.mxu1 }
 0x559   :  { %v729_v60 = vsel %vm728_vm7, %v2578_v49, %v725_v57  ;;  %2416 = vmatmul.msk.f32.gmra.mxu2 %vm278_vm2, %v584_v59 }
 0x55a   :  { %v734_v61 = vsel %vm731_vm8, %v733_v58, %v729_v60 }
 0x55b   :  { %v735_v62 = vmul.f32 %v2576_v28, %v734_v61 }
 0x55d   :  { %2423 = vmatmul.msk.f32.vlgmr.msra.gmra.mxu0 %vm278_vm2, %v735_v62 }
 0x55e   :  { %1013 = vmatpush.msra.mxu0 %v277_v52 }
 0x560   :  { %v698_v63 = vpop.f32.mrf.mxu1 }
 0x561   :  { %v702_v0 = vmul.f32 0.35355338, %v698_v63 }
 0x563   :  { %v706_v1 = vsel %vm278_vm2, %v702_v0, -inf }
 0x564   :  { %707 = vmax.xlane.f32.xlu1 %v706_v1 }
 0x565   :  { %v894_v2 = vpop.xlane.xlu0 %893  ;;  %2430 = vmatmul.msk.f32.vlgmr.msrb.gmra.mxu0 %vm278_vm2, %v863_v25 }
 0x566   :  { %v898_v3 = vsub.f32 %v890_v43, %v894_v2 }
 0x568   :  { %v900_v4 = vmul.f32 1.442695, %v898_v3  ;;  %v610_v3 = vpop.f32.mrf.mxu2 }
 0x56a   :  { %2579 = vpow2.f32 %v900_v4 }
 0x570   :  { %v2988_v5 = vpop.eup %2579 }
 0x571   :  { %v904_v6 = vsel %vm278_vm2, %v2988_v5, 0.0 }
 0x572   :  { %905 = vadd.xlane.f32.xlu0 %v904_v6  ;;  %v640_v6 = vadd.f32 %v2977_v37, %v610_v3 }
 0x5d7   :  { %v708_v8 = vpop.xlane.xlu1 %707 }
 0x5d8   :  { %v710_v9 = vsub.f32 %v702_v0, %v708_v8  ;;  %v2536_v8 = vld [vmem:[%s3419_s14] ss:$0 sm:$0xff] }
 0x5da   :  { %v713_v10 = vmul.f32 1.442695, %v710_v9  ;;  %v774_v11 = vpop.f32.mrf.mxu0 }
 0x5db   :  { %2425 = vmatmul.msk.f32.vlgmr.msra.gmra.mxu2 %vm278_vm2, %v774_v11 }
 0x5dc   :  { %2581 = vpow2.f32 %v713_v10  ;;  %v613_v4 = vpop.f32.mrf.mxu2 }
 0x5e2   :  { %v2582_v12 = vpop.eup %2581  ;;  %v887_v46 = vpop.f32.mrf.mxu0 }
 0x5e3   :  { %v891_v48 = vmul.f32 0.35355338, %v887_v46  ;;  %v718_v13 = vsel %vm278_vm2, %v2582_v12, 0.0 }
 0x5e4   :  { %719 = vadd.xlane.f32.xlu0 %v718_v13  ;;  %v2650_v13 = vmov 32.0  }
 0x5e5   :  { %v895_v14 = vsel %vm278_vm2, %v891_v48, -inf  ;;  %v906_v15 = vpop.xlane.xlu0 %905 }
 0x5e6   :  { %896 = vmax.xlane.f32.xlu2 %v895_v14  ;;  %2583 = vrcp.f32 %v906_v15  ;;  %v921_v33 = vand.u32 2147483648, %v906_v15  ;;  %vm915_vm14 = vweird.f32 %v906_v15  ;;  %v919_v36 = vand.u32 2147483647, %v906_v15 }
 0x5e8   :  { %v922_v43 = vor.u32 1.1754944e-38, %v921_v33  ;;  %vm920_vm0 = vcmp.eq.f32.partialorder %v919_v36, 8.507059e+37 }
 0x5ec   :  { %v2584_v17 = vpop.eup %2583 }
 0x5ed   :  { %v911_v20 = vmul.f32 %v2584_v17, %v906_v15  ;;  %vm916_vm12 = vweird.f32 %v2584_v17 }
 0x5ee   :  { %vm917_vm15 = vmor %vm915_vm14, %vm916_vm12  ;;  %vm1145_vm14 = vcmask 523264  }
 0x5ef   :  { %v912_v23 = vsub.f32 1.0, %v911_v20 }
 0x5f1   :  { %v913_v27 = vmul.f32 %v2584_v17, %v912_v23 }
 0x5f3   :  { %v914_v30 = vadd.f32 %v2584_v17, %v913_v27 }
 0x5f5   :  { %v918_v42 = vsel %vm917_vm15, %v2584_v17, %v914_v30 }
 0x5f6   :  { %v923_v44 = vsel %vm920_vm0, %v922_v43, %v918_v42 }
 0x5f7   :  { %v924_v45 = vmul.f32 %v2988_v5, %v923_v44 }
 0x5f8   :  { %940 = vrot.lane.b32.xlu0 %v2885_v39, %s3444_s0 }
 0x600   :  { %966 = vrot.lane.b32.xlu0 %v2896_v47, %s3444_s0 }
 0x657   :  { %v720_v16 = vpop.xlane.xlu0 %719 }
 0x658   :  { %2585 = vrcp.f32 %v720_v16  ;;  %v747_v26 = vand.u32 2147483648, %v720_v16  ;;  %v745_v51 = vand.u32 2147483647, %v720_v16  ;;  %vm741_vm10 = vweird.f32 %v720_v16 }
 0x659   :  { %v897_v18 = vpop.xlane.xlu2 %896 }
 0x65a   :  { %v899_v19 = vsub.f32 %v891_v48, %v897_v18  ;;  %v748_v29 = vor.u32 1.1754944e-38, %v747_v26  ;;  %vm746_vm13 = vcmp.eq.f32.partialorder %v745_v51, 8.507059e+37 }
 0x65c   :  { %v902_v21 = vmul.f32 1.442695, %v899_v19 }
 0x65e   :  { %v2586_v22 = vpop.eup %2585  ;;  %2587 = vpow2.f32 %v902_v21  ;;  %v826_v5 = vpop.f32.mrf.mxu2 }
 0x65f   :  { %v737_v24 = vmul.f32 %v2586_v22, %v720_v16  ;;  %vm742_vm9 = vweird.f32 %v2586_v22  ;;  %v832_v7 = vadd.f32 %v826_v5, %v640_v6 }
 0x660   :  { %vm743_vm11 = vmor %vm741_vm10, %vm742_vm9 }
 0x661   :  { %v738_v25 = vsub.f32 1.0, %v737_v24 }
 0x663   :  { %v739_v39 = vmul.f32 %v2586_v22, %v738_v25 }
 0x664   :  { %v2588_v47 = vpop.eup %2587 }
 0x665   :  { %v740_v28 = vadd.f32 %v2586_v22, %v739_v39  ;;  %v907_v50 = vsel %vm278_vm2, %v2588_v47, 0.0 }
 0x666   :  { %908 = vadd.xlane.f32.xlu1 %v907_v50  ;;  %v1095_v50 = vld [vmem:[%s3422_s17 + $0x8] sm:$0xff] }
 0x667   :  { %v744_v32 = vsel %vm743_vm11, %v2586_v22, %v740_v28  ;;  %v643_v22 = vadd.f32 %v2980_v40, %v613_v4  ;;  %v1097_v28 = vld [vmem:[%s3422_s17 + $0x18] sm:$0xff]  ;;  %v1096_v40 = vld [vmem:[%s3422_s17 + $0x10] sm:$0xff] }
 0x668   :  { %v749_v34 = vsel %vm746_vm13, %v748_v29, %v744_v32 }
 0x669   :  { %v750_v38 = vmul.f32 %v2582_v12, %v749_v34 }
 0x66a   :  { %v941_v41 = vpop.permute.xlu0 %940 }
 0x66b   :  { %2424 = vmatmul.msk.f32.vlgmr.msrb.gmra.mxu1 %vm278_vm2, %v750_v38 }
 0x66c   :  { %961 = vmatpush.msra.mxu1 %v941_v41 }
 0x66e   :  { %1120 = vmatpush.msrb.mxu1 %v1097_v28 }
 0x670   :  { %1121 = vmatpush.msrb.mxu1 %v1096_v40 }
 0x672   :  { %v967_v49 = vpop.permute.xlu0 %966  ;;  %1122 = vmatpush.msrb.mxu1 %v1095_v50 }
 0x673   :  { %2431 = vmatmul.msk.f32.vlgmr.msra.gmra.mxu1 %vm278_vm2, %v924_v45  ;;  %987 = vmatpush.msra.mxu3 %v967_v49 }
 0x6d9   :  { %v909_v53 = vpop.xlane.xlu1 %908 }
 0x6da   :  { %2589 = vrcp.f32 %v909_v53  ;;  %v936_v57 = vand.u32 2147483648, %v909_v53  ;;  %v934_v59 = vand.u32 2147483647, %v909_v53  ;;  %vm930_vm4 = vweird.f32 %v909_v53 }
 0x6db   :  { %2591 = vrcp.f32 %v2650_v13 }
 0x6dc   :  { %v937_v61 = vor.u32 1.1754944e-38, %v936_v57  ;;  %vm935_vm6 = vcmp.eq.f32.partialorder %v934_v59, 8.507059e+37  ;;  %v1140_v59 = vld [vmem:[%s3424_s19 + $0x38] sm:$0xff] }
 0x6dd   :  { %1160 = vmatpush.msrb.mxu2 %v1140_v59 }
 0x6e0   :  { %v2590_v54 = vpop.eup %2589 }
 0x6e1   :  { %v926_v55 = vmul.f32 %v2590_v54, %v909_v53  ;;  %vm931_vm3 = vweird.f32 %v2590_v54  ;;  %v2592_v14 = vpop.eup %2591  ;;  %v2537_v53 = vld [vmem:[%s3420_s15] ss:$0 sm:$0xff] }
 0x6e2   :  { %vm932_vm5 = vmor %vm930_vm4, %vm931_vm3  ;;  %v1040_v37 = vmul.f32 32.0, %v2592_v14  ;;  %vm1044_vm7 = vweird.f32 %v2592_v14 }
 0x6e3   :  { %v927_v56 = vsub.f32 1.0, %v926_v55 }
 0x6e4   :  { %v1041_v15 = vsub.f32 1.0, %v1040_v37 }
 0x6e5   :  { %v928_v58 = vmul.f32 %v2590_v54, %v927_v56  ;;  %v2538_v56 = vld [vmem:[%s3421_s16] ss:$0 sm:$0xff] }
 0x6e6   :  { %v1042_v16 = vmul.f32 %v2592_v14, %v1041_v15 }
 0x6e7   :  { %v929_v60 = vadd.f32 %v2590_v54, %v928_v58 }
 0x6e8   :  { %v800_v62 = vpop.f32.mrf.mxu1  ;;  %v1043_v17 = vadd.f32 %v2592_v14, %v1042_v16 }
 0x6e9   :  { %v933_v63 = vsel %vm932_vm5, %v2590_v54, %v929_v60  ;;  %2426 = vmatmul.msk.f32.gmra.mxu2 %vm278_vm2, %v800_v62  ;;  %v1139_v60 = vld [vmem:[%s3424_s19 + $0x30] sm:$0xff]  ;;  %v1137_v62 = vld [vmem:[%s3424_s19 + $0x20] sm:$0xff] }
 0x6ea   :  { %v938_v0 = vsel %vm935_vm6, %v937_v61, %v933_v63  ;;  %v3019_v18 = vsel %vm1044_vm7, %v2592_v14, %v1043_v17  ;;  %1161 = vmatpush.msrb.mxu2 %v1139_v60  ;;  %v1138_v61 = vld [vmem:[%s3424_s19 + $0x28] sm:$0xff]  ;;  %v1136_v63 = vld [vmem:[%s3424_s19 + $0x18] sm:$0xff] }
 0x6eb   :  { %v939_v1 = vmul.f32 %v2588_v47, %v938_v0  ;;  %v1135_v0 = vld [vmem:[%s3424_s19 + $0x10] sm:$0xff] }
 0x6ec   :  { %1162 = vmatpush.msrb.mxu2 %v1138_v61 }
 0x6ed   :  { %2432 = vmatmul.msk.f32.vlgmr.msra.gmra.mxu3 %vm278_vm2, %v939_v1  ;;  %v1134_v1 = vld [vmem:[%s3424_s19 + $0x8] sm:$0xff] }
 0x6ee   :  { %1163 = vmatpush.msrb.mxu2 %v1137_v62 }
 0x6f0   :  { %v963_v2 = vpop.f32.mrf.mxu1  ;;  %1164 = vmatpush.msrb.mxu2 %v1136_v63 }
 0x6f1   :  { %2433 = vmatmul.msk.f32.vlgmr.msra.gmra.mxu0 %vm278_vm2, %v963_v2  ;;  %v1133_v2 = vld [vmem:[%s3424_s19] sm:$0xff] }
 0x6f2   :  { %1165 = vmatpush.msrb.mxu2 %v1135_v0  ;;  %v2541_v0 = vld [vmem:[%s3426_s21] ss:$0 sm:$0xff] }
 0x6f4   :  { %1166 = vmatpush.msrb.mxu2 %v1134_v1 }
 0x6f6   :  { %1167 = vmatpush.msrb.mxu2 %v1133_v2 }
 0x76c   :  { %v829_v20 = vpop.f32.mrf.mxu2 }
 0x76d   :  { %v833_v23 = vadd.f32 %v829_v20, %v643_v22 }
 0x76e   :  { %v1015_v9 = vpop.f32.mrf.mxu0 }
 0x76f   :  { %v1021_v10 = vadd.f32 %v1015_v9, %v832_v7 }
 0x770   :  { %v989_v11 = vpop.f32.mrf.mxu3 }
 0x771   :  { %v1027_v12 = vadd.f32 %v2536_v8, %v1021_v10  ;;  %2434 = vmatmul.msk.f32.gmra.mxu0 %vm278_vm2, %v989_v11 }
 0x773   :  { %v1029_v46 = vadd.f32 %v1027_v12, %v2865_v31 }
 0x775   :  { %v1033_v48 = vsel %vm137_vm1, %v1029_v46, 0.0 }
 0x776   :  { %1034 = vadd.xlane.f32.xlu1 %v1033_v48 }
 0x7e9   :  { %v1035_v19 = vpop.xlane.xlu1 %1034 }
 0x7ea   :  { %v1046_v21 = vmul.f32 %v3019_v18, %v1035_v19 }
 0x7ec   :  { %v1048_v31 = vsub.f32 %v1029_v46, %v1046_v21  ;;  %v2539_v46 = vld [vmem:[%s3423_s18] ss:$0 sm:$0xff] }
 0x7ed   :  { %v2540_v21 = vld [vmem:[%s3425_s20] ss:$0 sm:$0xff] }
 0x7ee   :  { %v1018_v24 = vpop.f32.mrf.mxu0  ;;  %v1050_v25 = vmul.f32 %v1048_v31, %v1048_v31 }
 0x7ef   :  { %v1022_v26 = vadd.f32 %v1018_v24, %v833_v23 }
 0x7f0   :  { %v1052_v27 = vsel %vm137_vm1, %v1050_v25, 0.0 }
 0x7f1   :  { %v1028_v39 = vadd.f32 %v2536_v8, %v1022_v26  ;;  %1053 = vadd.xlane.f32.xlu0 %v1052_v27 }
 0x7f3   :  { %v1030_v51 = vadd.f32 %v1028_v39, %v2874_v35  ;;  %v1094_v35 = vld [vmem:[%s3422_s17] sm:$0xff] }
 0x7f4   :  { %1123 = vmatpush.msrb.mxu1 %v1094_v35  ;;  %v2456_v35 = vld [vmem:[%s3469_s8 + $0x38] sm:$0xff] }
 0x7f5   :  { %v1036_v47 = vsel %vm137_vm1, %v1030_v51, 0.0 }
 0x7f6   :  { %1037 = vadd.xlane.f32.xlu1 %v1036_v47  ;;  %1335 = vmatpush.msra.mxu1 %v2456_v35 }
 0x864   :  { %v1054_v29 = vpop.xlane.xlu0 %1053 }
 0x865   :  { %v1058_v30 = vmul.f32 %v1054_v29, %v3019_v18  ;;  %v2442_v29 = vld [vmem:[%s3470_s7 + $0x38] sm:$0xff] }
 0x866   :  { %1263 = vmatpush.msrb.mxu3 %v2442_v29 }
 0x867   :  { %v1060_v32 = vadd.f32 1e-05, %v1058_v30  ;;  %v2449_v30 = vld [vmem:[%s3472_s6 + $0x38] sm:$0xff] }
 0x868   :  { %1296 = vmatpush.msrb.mxu0 %v2449_v30 }
 0x869   :  { %2593 = vrsqrt.f32 %v1060_v32  ;;  %v1038_v33 = vpop.xlane.xlu1 %1037  ;;  %vm1068_vm9 = vweird.f32 %v1060_v32 }
 0x86a   :  { %v1047_v34 = vmul.f32 %v3019_v18, %v1038_v33  ;;  %v2441_v33 = vld [vmem:[%s3470_s7 + $0x30] sm:$0xff] }
 0x86b   :  { %1264 = vmatpush.msrb.mxu3 %v2441_v33 }
 0x86c   :  { %v1049_v36 = vsub.f32 %v1030_v51, %v1047_v34  ;;  %v2448_v34 = vld [vmem:[%s3472_s6 + $0x30] sm:$0xff] }
 0x86d   :  { %1297 = vmatpush.msrb.mxu0 %v2448_v34 }
 0x86e   :  { %v1051_v38 = vmul.f32 %v1049_v36, %v1049_v36 }
 0x86f   :  { %v2594_v41 = vpop.eup %2593 }
 0x870   :  { %v1063_v42 = vmul.f32 %v2594_v41, %v1060_v32  ;;  %v1055_v43 = vsel %vm137_vm1, %v1051_v38, 0.0  ;;  %vm1069_vm8 = vweird.f32 %v2594_v41  ;;  %v2455_v32 = vld [vmem:[%s3469_s8 + $0x30] sm:$0xff]  ;;  %v2440_v38 = vld [vmem:[%s3470_s7 + $0x28] sm:$0xff] }
 0x871   :  { %1056 = vadd.xlane.f32.xlu1 %v1055_v43  ;;  %vm1070_vm10 = vmor %vm1068_vm9, %vm1069_vm8  ;;  %1336 = vmatpush.msra.mxu1 %v2455_v32  ;;  %v2439_v43 = vld [vmem:[%s3470_s7 + $0x20] sm:$0xff]  ;;  %s3480_s7 = smov 104  }
 0x872   :  { %v1064_v44 = vmul.f32 %v2594_v41, %v1063_v42  ;;  %v2453_v42 = vld [vmem:[%s3469_s8 + $0x20] sm:$0xff]  ;;  %1265 = vmatpush.msrb.mxu3 %v2440_v38 }
 0x874   :  { %v1065_v45 = vmul.f32 0.5, %v1064_v44  ;;  %v2446_v44 = vld [vmem:[%s3472_s6 + $0x20] sm:$0xff]  ;;  %1266 = vmatpush.msrb.mxu3 %v2439_v43 }
 0x876   :  { %v1066_v49 = vsub.f32 1.5, %v1065_v45 }
 0x878   :  { %v1067_v52 = vmul.f32 %v2594_v41, %v1066_v49 }
 0x87a   :  { %v1071_v54 = vsel %vm1070_vm10, %v2594_v41, %v1067_v52  ;;  %v2447_v41 = vld [vmem:[%s3472_s6 + $0x28] sm:$0xff] }
 0x87b   :  { %v1082_v55 = vmul.f32 %v1071_v54, %v1048_v31  ;;  %1298 = vmatpush.msrb.mxu0 %v2447_v41 }
 0x87d   :  { %v1087_v57 = vmul.f32 %v2537_v53, %v1082_v55  ;;  %1299 = vmatpush.msrb.mxu0 %v2446_v44 }
 0x87f   :  { %v1092_v58 = vadd.f32 %v2538_v56, %v1087_v57 }
 0x881   :  { %2435 = vmatmul.msk.f32.vlgmr.msrb.gmra.mxu1 %vm137_vm1, %v1092_v58 }
 0x8e4   :  { %v1057_v3 = vpop.xlane.xlu1 %1056 }
 0x8e5   :  { %v1059_v4 = vmul.f32 %v1057_v3, %v3019_v18  ;;  %v2542_v3 = vld [vmem:[%s3427_s22] ss:$0 sm:$0xff] }
 0x8e7   :  { %v1061_v5 = vadd.f32 1e-05, %v1059_v4 }
 0x8e9   :  { %2595 = vrsqrt.f32 %v1061_v5  ;;  %vm1078_vm12 = vweird.f32 %v1061_v5 }
 0x8ef   :  { %v2596_v6 = vpop.eup %2595 }
 0x8f0   :  { %v1073_v7 = vmul.f32 %v2596_v6, %v1061_v5  ;;  %vm1079_vm11 = vweird.f32 %v2596_v6 }
 0x8f1   :  { %vm1080_vm13 = vmor %vm1078_vm12, %vm1079_vm11 }
 0x8f2   :  { %v1074_v8 = vmul.f32 %v2596_v6, %v1073_v7 }
 0x8f4   :  { %v1075_v9 = vmul.f32 0.5, %v1074_v8 }
 0x8f6   :  { %v1076_v10 = vsub.f32 1.5, %v1075_v9 }
 0x8f8   :  { %v1077_v11 = vmul.f32 %v2596_v6, %v1076_v10 }
 0x8fa   :  { %v1081_v12 = vsel %vm1080_vm13, %v2596_v6, %v1077_v11  ;;  %v2645_v6 = vld [vmem:[%s3474_s5] sm:$0xff] }
 0x8fb   :  { %v1083_v48 = vmul.f32 %v1081_v12, %v1049_v36  ;;  %v2454_v36 = vld [vmem:[%s3469_s8 + $0x28] sm:$0xff]  ;;  %s3482_s8 = sld [smem:[#allocation15_spill]] }
 0x8fc   :  { %1337 = vmatpush.msra.mxu1 %v2454_v36 }
 0x8fd   :  { %v1088_v13 = vmul.f32 %v2537_v53, %v1083_v48 }
 0x8fe   :  { %v1125_v14 = vpop.f32.mrf.mxu1  ;;  %1338 = vmatpush.msra.mxu1 %v2453_v42 }
 0x8ff   :  { %v1126_v37 = vadd.f32 %v2539_v46, %v1125_v14  ;;  %v1093_v15 = vadd.f32 %v2538_v56, %v1088_v13 }
 0x901   :  { %v1131_v16 = vmax.f32 %v1126_v37, 0.0  ;;  %2436 = vmatmul.msk.f32.gmra.mxu1 %vm137_vm1, %v1093_v15 }
 0x903   :  { %2437 = vmatmul.msk.f32.vlgmr.msrb.gmra.mxu2 %vm1145_vm14, %v1131_v16  ;;  %v2544_v16 = vld [vmem:[%s3476_s3 + $0x1] ss:$0 sm:$0xff]  ;;  %s3478_s3 = smov 120  }
 0x97e   :  { %v1128_v17 = vpop.f32.mrf.mxu1 }
 0x97f   :  { %v1129_v19 = vadd.f32 %v2539_v46, %v1128_v17 }
 0x981   :  { %v1132_v20 = vmax.f32 %v1129_v19, 0.0  ;;  %v2543_v19 = vld [vmem:[%s3475_s28 + $0x1] ss:$0 sm:$0xff] }
 0x983   :  { %2438 = vmatmul.msk.f32.gmra.mxu2 %vm1145_vm14, %v1132_v20 }
 0x986   :  { %v1169_v22 = vpop.f32.mrf.mxu2 }
 0x987   :  { %v1170_v31 = vadd.f32 %v2540_v21, %v1169_v22 }
 0x989   :  { %v1175_v23 = vadd.f32 %v1170_v31, %v1092_v58 }
 0x98b   :  { %v1179_v24 = vsel %vm137_vm1, %v1175_v23, 0.0 }
 0x98c   :  { %1180 = vadd.xlane.f32.xlu2 %v1179_v24 }
 0x9ff   :  { %v1181_v25 = vpop.xlane.xlu2 %1180 }
 0xa00   :  { %v1185_v26 = vmul.f32 %v1181_v25, %v3019_v18 }
 0xa02   :  { %v1187_v27 = vsub.f32 %v1175_v23, %v1185_v26  ;;  %v2646_v23 = vld [vmem:[%s3474_s5 + $0x8] sm:$0xff]  ;;  %v2545_v26 = vld [vmem:[%s3477_s12 + $0x1] ss:$0 sm:$0xff]  ;;  %s3479_s5 = smov 112  }
 0xa04   :  { %v1189_v39 = vmul.f32 %v1187_v27, %v1187_v27 }
 0xa06   :  { %v1172_v51 = vpop.f32.mrf.mxu2  ;;  %v1191_v47 = vsel %vm137_vm1, %v1189_v39, 0.0 }
 0xa07   :  { %v1173_v28 = vadd.f32 %v2540_v21, %v1172_v51  ;;  %1192 = vadd.xlane.f32.xlu1 %v1191_v47 }
 0xa09   :  { %v1176_v40 = vadd.f32 %v1173_v28, %v1093_v15 }
 0xa0b   :  { %v1182_v50 = vsel %vm137_vm1, %v1176_v40, 0.0 }
 0xa0c   :  { %1183 = vadd.xlane.f32.xlu2 %v1182_v50 }
 0xa7a   :  { %v1193_v45 = vpop.xlane.xlu1 %1192 }
 0xa7b   :  { %v1197_v49 = vmul.f32 %v1193_v45, %v3019_v18 }
 0xa7d   :  { %v1199_v52 = vadd.f32 1e-05, %v1197_v49 }
 0xa7f   :  { %2597 = vrsqrt.f32 %v1199_v52  ;;  %v1184_v53 = vpop.xlane.xlu2 %1183  ;;  %vm1207_vm0 = vweird.f32 %v1199_v52 }
 0xa80   :  { %v1186_v54 = vmul.f32 %v1184_v53, %v3019_v18 }
 0xa82   :  { %v1188_v55 = vsub.f32 %v1176_v40, %v1186_v54 }
 0xa84   :  { %v1190_v56 = vmul.f32 %v1188_v55, %v1188_v55 }
 0xa85   :  { %v2598_v57 = vpop.eup %2597 }
 0xa86   :  { %v1202_v58 = vmul.f32 %v2598_v57, %v1199_v52  ;;  %v1194_v59 = vsel %vm137_vm1, %v1190_v56, 0.0  ;;  %vm1208_vm15 = vweird.f32 %v2598_v57 }
 0xa87   :  { %1195 = vadd.xlane.f32.xlu1 %v1194_v59  ;;  %vm1209_vm3 = vmor %vm1207_vm0, %vm1208_vm15 }
 0xa88   :  { %v1203_v60 = vmul.f32 %v2598_v57, %v1202_v58 }
 0xa8a   :  { %v1204_v61 = vmul.f32 0.5, %v1203_v60 }
 0xa8c   :  { %v1205_v62 = vsub.f32 1.5, %v1204_v61 }
 0xa8e   :  { %v1206_v63 = vmul.f32 %v2598_v57, %v1205_v62 }
 0xa90   :  { %v1210_v1 = vsel %vm1209_vm3, %v2598_v57, %v1206_v63 }
 0xa91   :  { %v1221_v2 = vmul.f32 %v1210_v1, %v1187_v27 }
 0xa93   :  { %v1226_v4 = vmul.f32 %v2541_v0, %v1221_v2 }
 0xa95   :  { %v3131_v5 = vadd.f32 %v2542_v3, %v1226_v4 }
 0xa97   :  { %2458 = vmatmul.msk.f32.vlgmr.msra.gmra.mxu1 %vm137_vm1, %v3131_v5  ;;  %v1233_v7 = vadd.f32 %v2645_v6, %v3131_v5 }
 0xa99   :  { %2444 = vmatmul.msk.f32.vlgmr.msrb.gmra.mxu3 %vm137_vm1, %v1233_v7  ;;  %2451 = vmatmul.msk.f32.vlgmr.msrb.gmra.mxu0 %vm137_vm1, %v1233_v7 }
 0xafa   :  { %v1196_v8 = vpop.xlane.xlu1 %1195 }
 0xafb   :  { %v1198_v9 = vmul.f32 %v1196_v8, %v3019_v18 }
 0xafd   :  { %v1200_v10 = vadd.f32 1e-05, %v1198_v9 }
 0xaff   :  { %2599 = vrsqrt.f32 %v1200_v10  ;;  %vm1217_vm5 = vweird.f32 %v1200_v10 }
 0xb05   :  { %v2600_v11 = vpop.eup %2599 }
 0xb06   :  { %v1212_v12 = vmul.f32 %v2600_v11, %v1200_v10  ;;  %vm1218_vm4 = vweird.f32 %v2600_v11 }
 0xb07   :  { %vm1219_vm6 = vmor %vm1217_vm5, %vm1218_vm4 }
 0xb08   :  { %v1213_v46 = vmul.f32 %v2600_v11, %v1212_v12 }
 0xb0a   :  { %v1214_v48 = vmul.f32 0.5, %v1213_v46 }
 0xb0c   :  { %v1215_v13 = vsub.f32 1.5, %v1214_v48 }
 0xb0e   :  { %v1216_v14 = vmul.f32 %v2600_v11, %v1215_v13 }
 0xb10   :  { %v1220_v37 = vsel %vm1219_vm6, %v2600_v11, %v1216_v14  ;;  %v2460_v14 = vld [vmem:[%s3418_s13 + $0x20] sm:$0xff] }
 0xb11   :  { %v1222_v15 = vmul.f32 %v1220_v37, %v1188_v55 }
 0xb13   :  { %v1227_v17 = vmul.f32 %v2541_v0, %v1222_v15 }
 0xb14   :  { %v1340_v21 = vpop.f32.mrf.mxu1 }
 0xb15   :  { %v3148_v20 = vadd.f32 %v2542_v3, %v1227_v17  ;;  %v3158_v25 = vadd.f32 %v2543_v19, %v1340_v21 }
 0xb16   :  { %v1301_v22 = vpop.f32.mrf.mxu0 }
 0xb17   :  { %v3150_v31 = vadd.f32 %v2544_v16, %v1301_v22  ;;  %2459 = vmatmul.msk.f32.gmra.mxu1 %vm137_vm1, %v3148_v20  ;;  %v1234_v24 = vadd.f32 %v2646_v23, %v3148_v20 }
 0xb19   :  { %1501 = vrot.lane.b32.xlu2 %v3150_v31, %s3478_s3  ;;  %2445 = vmatmul.msk.f32.gmra.mxu3 %vm137_vm1, %v1234_v24 }
 0xb1a   :  { %2452 = vmatmul.msk.f32.gmra.mxu0 %vm137_vm1, %v1234_v24  ;;  %2464 = vmatpush.xpose.msk.msra.mxu2 %vm278_vm2, %v3150_v31 }
 0xb1c   :  { %v1268_v27 = vpop.f32.mrf.mxu3 }
 0xb1d   :  { %v3170_v39 = vadd.f32 %v2545_v26, %v1268_v27 }
 0xb1e   :  { %1471 = vmatpush.msrb.mxu2 %v3158_v25 }
 0xb1f   :  { %1499 = vrot.lane.b32.xlu1 %v3170_v39, %s3478_s3  ;;  %2465 = vmatmul.msk.f32.vlgmr.msra.gmra.mxu2 %vm278_vm2, %v3170_v39 }
 0xb73   :  { %v1502_v51 = vpop.permute.xlu2 %1501 }
 0xb74   :  { %2470 = vmatpush.xpose.msk.msra.mxu0 %vm278_vm2, %v1502_v51 }
 0xb91   :  { %v1500_v47 = vpop.permute.xlu1 %1499 }
 0xb92   :  { %2471 = vmatmul.msk.f32.vlgmr.msra.gmra.mxu0 %vm278_vm2, %v1500_v47 }
 0xb94   :  { %v1343_v28 = vpop.f32.mrf.mxu1 }
 0xb95   :  { %v3180_v35 = vadd.f32 %v2543_v19, %v1343_v28 }
 0xb97   :  { %v1304_v40 = vpop.f32.mrf.mxu0 }
 0xb98   :  { %v3178_v50 = vadd.f32 %v2544_v16, %v1304_v40 }
 0xb9a   :  { %1529 = vrot.lane.b32.xlu1 %v3178_v50, %s3478_s3  ;;  %2466 = vmatpush.xpose.msk.msra.mxu3 %vm278_vm2, %v3178_v50 }
 0xb9c   :  { %v1271_v29 = vpop.f32.mrf.mxu3 }
 0xb9d   :  { %v3187_v30 = vadd.f32 %v2545_v26, %v1271_v29 }
 0xb9e   :  { %1494 = vmatpush.msrb.mxu3 %v3180_v35 }
 0xb9f   :  { %2467 = vmatmul.msk.f32.vlgmr.msra.gmra.mxu3 %vm278_vm2, %v3187_v30 }
 0xba2   :  { %1606 = vrot.lane.b32.xlu1 %v3158_v25, %s3478_s3  ;;  %v1374_v32 = vpop.f32.mrf.mxu2 }
 0xba3   :  { %v1403_v33 = vmul.f32 0.35355338, %v1374_v32  ;;  %v2461_v32 = vld [vmem:[%s3418_s13 + $0x28] sm:$0xff] }
 0xba4   :  { %1680 = vmatpush.msrb.mxu0 %v2461_v32 }
 0xba5   :  { %v1405_v34 = vsel %vm278_vm2, %v1403_v33, -inf }
 0xba6   :  { %1406 = vmax.xlane.f32.xlu0 %v1405_v34 }
 0xbaa   :  { %1719 = vrot.lane.b32.xlu1 %v3150_v31, %s3479_s5 }
 0xbb2   :  { %1717 = vrot.lane.b32.xlu1 %v3170_v39, %s3479_s5 }
 0xc0c   :  { %v1530_v36 = vpop.permute.xlu1 %1529 }
 0xc0d   :  { %2472 = vmatpush.xpose.msk.msrb.mxu1 %vm278_vm2, %v1530_v36 }
 0xc0f   :  { %v1524_v38 = vpop.f32.mrf.mxu0 }
 0xc10   :  { %v1555_v41 = vmul.f32 0.35355338, %v1524_v38 }
 0xc11   :  { %1709 = vmatpush.msra.mxu1 %v2460_v14 }
 0xc12   :  { %v1557_v42 = vsel %vm278_vm2, %v1555_v41, -inf }
 0xc13   :  { %1558 = vmax.xlane.f32.xlu0 %v1557_v42 }
 0xc14   :  { %v1607_v43 = vpop.permute.xlu1 %1606 }
 0xc15   :  { %1627 = vmatpush.msra.mxu2 %v1607_v43 }
 0xc19   :  { %v1407_v44 = vpop.xlane.xlu0 %1406 }
 0xc1a   :  { %v1411_v45 = vsub.f32 %v1403_v33, %v1407_v44 }
 0xc1c   :  { %v1413_v49 = vmul.f32 1.442695, %v1411_v45  ;;  %v1720_v8 = vpop.permute.xlu1 %1719 }
 0xc1e   :  { %2601 = vpow2.f32 %v1413_v49 }
 0xc22   :  { %v1400_v9 = vpop.f32.mrf.mxu3 }
 0xc23   :  { %v1404_v10 = vmul.f32 0.35355338, %v1400_v9 }
 0xc24   :  { %v2602_v52 = vpop.eup %2601  ;;  %v1718_v26 = vpop.permute.xlu1 %1717 }
 0xc25   :  { %v1417_v53 = vsel %vm278_vm2, %v2602_v52, 0.0  ;;  %v1408_v11 = vsel %vm278_vm2, %v1404_v10, -inf }
 0xc26   :  { %1418 = vadd.xlane.f32.xlu2 %v1417_v53 }
 0xc86   :  { %v1559_v54 = vpop.xlane.xlu0 %1558 }
 0xc87   :  { %v1563_v55 = vsub.f32 %v1555_v41, %v1559_v54 }
 0xc89   :  { %v1565_v56 = vmul.f32 1.442695, %v1563_v55 }
 0xc8b   :  { %2603 = vpow2.f32 %v1565_v56 }
 0xc91   :  { %v2604_v57 = vpop.eup %2603 }
 0xc92   :  { %v1569_v58 = vsel %vm278_vm2, %v2604_v57, 0.0 }
 0xc93   :  { %1570 = vadd.xlane.f32.xlu0 %v1569_v58 }
 0xc99   :  { %v1419_v59 = vpop.xlane.xlu2 %1418 }
 0xc9a   :  { %2605 = vrcp.f32 %v1419_v59  ;;  %v1434_v63 = vand.u32 2147483648, %v1419_v59  ;;  %v1432_v1 = vand.u32 2147483647, %v1419_v59  ;;  %vm1428_vm8 = vweird.f32 %v1419_v59 }
 0xc9c   :  { %v1435_v3 = vor.u32 1.1754944e-38, %v1434_v63  ;;  %vm1433_vm10 = vcmp.eq.f32.partialorder %v1432_v1, 8.507059e+37 }
 0xca0   :  { %v2606_v60 = vpop.eup %2605 }
 0xca1   :  { %v1424_v61 = vmul.f32 %v2606_v60, %v1419_v59  ;;  %vm1429_vm7 = vweird.f32 %v2606_v60 }
 0xca2   :  { %vm1430_vm9 = vmor %vm1428_vm8, %vm1429_vm7 }
 0xca3   :  { %v1425_v62 = vsub.f32 1.0, %v1424_v61 }
 0xca5   :  { %v1426_v0 = vmul.f32 %v2606_v60, %v1425_v62 }
 0xca7   :  { %v1427_v2 = vadd.f32 %v2606_v60, %v1426_v0  ;;  %1527 = vrot.lane.b32.xlu0 %v3187_v30, %s3478_s3 }
 0xca9   :  { %v1431_v4 = vsel %vm1430_vm9, %v2606_v60, %v1427_v2 }
 0xcaa   :  { %v1436_v6 = vsel %vm1433_vm10, %v1435_v3, %v1431_v4 }
 0xcab   :  { %v1437_v7 = vmul.f32 %v2602_v52, %v1436_v6 }
 0xcad   :  { %2468 = vmatmul.msk.f32.vlgmr.msrb.gmra.mxu2 %vm278_vm2, %v1437_v7 }
 0xcae   :  { %2480 = vmatpush.xpose.msk.msrb.mxu2 %vm278_vm2, %v1720_v8 }
 0xcd1   :  { %1409 = vmax.xlane.f32.xlu0 %v1408_v11 }
 0xce5   :  { %1745 = vrot.lane.b32.xlu0 %v3187_v30, %s3479_s5 }
 0xd06   :  { %v1571_v12 = vpop.xlane.xlu0 %1570 }
 0xd07   :  { %2607 = vrcp.f32 %v1571_v12  ;;  %v1586_v37 = vand.u32 2147483648, %v1571_v12  ;;  %v1584_v16 = vand.u32 2147483647, %v1571_v12  ;;  %vm1580_vm12 = vweird.f32 %v1571_v12 }
 0xd09   :  { %v1587_v19 = vor.u32 1.1754944e-38, %v1586_v37  ;;  %vm1585_vm15 = vcmp.eq.f32.partialorder %v1584_v16, 8.507059e+37 }
 0xd0d   :  { %v2608_v46 = vpop.eup %2607 }
 0xd0e   :  { %v1576_v48 = vmul.f32 %v2608_v46, %v1571_v12  ;;  %vm1581_vm11 = vweird.f32 %v2608_v46 }
 0xd0f   :  { %vm1582_vm13 = vmor %vm1580_vm12, %vm1581_vm11 }
 0xd10   :  { %v1577_v13 = vsub.f32 1.0, %v1576_v48 }
 0xd12   :  { %v1578_v15 = vmul.f32 %v2608_v46, %v1577_v13 }
 0xd14   :  { %v1579_v17 = vadd.f32 %v2608_v46, %v1578_v15 }
 0xd16   :  { %v1583_v21 = vsel %vm1582_vm13, %v2608_v46, %v1579_v17 }
 0xd17   :  { %v1588_v22 = vsel %vm1585_vm15, %v1587_v19, %v1583_v21 }
 0xd18   :  { %v1589_v23 = vmul.f32 %v2604_v57, %v1588_v22 }
 0xd19   :  { %v1528_v24 = vpop.permute.xlu0 %1527 }
 0xd1a   :  { %2473 = vmatmul.msk.f32.vlgmr.msrb.gmra.mxu1 %vm278_vm2, %v1528_v24  ;;  %2474 = vmatmul.msk.f32.vlgmr.msra.gmra.mxu2 %vm278_vm2, %v1589_v23 }
 0xd22   :  { %2481 = vmatmul.msk.f32.vlgmr.msrb.gmra.mxu2 %vm278_vm2, %v1718_v26 }
 0xd30   :  { %v1473_v27 = vpop.f32.mrf.mxu2 }
 0xd31   :  { %2478 = vmatmul.msk.f32.vlgmr.msra.gmra.mxu1 %vm278_vm2, %v1473_v27 }
 0xd44   :  { %v1410_v51 = vpop.xlane.xlu0 %1409 }
 0xd45   :  { %v1412_v47 = vsub.f32 %v1404_v10, %v1410_v51 }
 0xd47   :  { %v1415_v28 = vmul.f32 1.442695, %v1412_v47 }
 0xd49   :  { %2609 = vpow2.f32 %v1415_v28 }
 0xd4f   :  { %v2610_v40 = vpop.eup %2609 }
 0xd50   :  { %v1420_v29 = vsel %vm278_vm2, %v2610_v40, 0.0 }
 0xd51   :  { %1421 = vadd.xlane.f32.xlu1 %v1420_v29 }
 0xd57   :  { %v1746_v9 = vpop.permute.xlu0 %1745 }
 0xd6a   :  { %1747 = vrot.lane.b32.xlu1 %v3178_v50, %s3479_s5 }
 0xd72   :  { %1936 = vrot.lane.b32.xlu1 %v3178_v50, %s3480_s7 }
 0xd97   :  { %v1552_v33 = vpop.f32.mrf.mxu1 }
 0xd98   :  { %v1556_v34 = vmul.f32 0.35355338, %v1552_v33 }
 0xd9a   :  { %v1560_v36 = vsel %vm278_vm2, %v1556_v34, -inf }
 0xd9b   :  { %1561 = vmax.xlane.f32.xlu2 %v1560_v36 }
 0xd9d   :  { %v1629_v38 = vpop.f32.mrf.mxu2 }
 0xd9e   :  { %2476 = vmatmul.msk.f32.vlgmr.msrb.gmra.mxu0 %vm278_vm2, %v1629_v38  ;;  %v2462_v38 = vld [vmem:[%s3418_s13 + $0x30] sm:$0xff] }
 0xd9f   :  { %1896 = vmatpush.msra.mxu0 %v2462_v38 }
 0xda5   :  { %v1742_v41 = vpop.f32.mrf.mxu2 }
 0xda6   :  { %v1773_v42 = vmul.f32 0.35355338, %v1742_v41 }
 0xda8   :  { %v1775_v43 = vsel %vm278_vm2, %v1773_v42, -inf }
 0xda9   :  { %1776 = vmax.xlane.f32.xlu2 %v1775_v43 }
 0xdae   :  { %v3252_v41 = vpop.f32.mrf.mxu1 }
 0xdc4   :  { %v1422_v44 = vpop.xlane.xlu1 %1421 }
 0xdc5   :  { %2611 = vrcp.f32 %v1422_v44  ;;  %v1449_v52 = vand.u32 2147483648, %v1422_v44  ;;  %v1447_v54 = vand.u32 2147483647, %v1422_v44  ;;  %vm1443_vm3 = vweird.f32 %v1422_v44 }
 0xdc7   :  { %v1450_v56 = vor.u32 1.1754944e-38, %v1449_v52  ;;  %vm1448_vm5 = vcmp.eq.f32.partialorder %v1447_v54, 8.507059e+37 }
 0xdcb   :  { %v2612_v50 = vpop.eup %2611 }
 0xdcc   :  { %v1439_v45 = vmul.f32 %v2612_v50, %v1422_v44  ;;  %vm1444_vm0 = vweird.f32 %v2612_v50 }
 0xdcd   :  { %vm1445_vm4 = vmor %vm1443_vm3, %vm1444_vm0 }
 0xdce   :  { %v1440_v49 = vsub.f32 1.0, %v1439_v45 }
 0xdd0   :  { %v1441_v53 = vmul.f32 %v2612_v50, %v1440_v49 }
 0xdd2   :  { %v1442_v55 = vadd.f32 %v2612_v50, %v1441_v53 }
 0xdd4   :  { %v1446_v57 = vsel %vm1445_vm4, %v2612_v50, %v1442_v55 }
 0xdd5   :  { %v1451_v58 = vsel %vm1448_vm5, %v1450_v56, %v1446_v57 }
 0xdd6   :  { %v1452_v59 = vmul.f32 %v2610_v40, %v1451_v58 }
 0xdd8   :  { %2469 = vmatmul.msk.f32.vlgmr.msrb.gmra.mxu3 %vm278_vm2, %v1452_v59 }
 0xddc   :  { %v1748_v46 = vpop.permute.xlu1 %1747 }
 0xde4   :  { %v1937_v26 = vpop.permute.xlu1 %1936 }
 0xe0e   :  { %v1562_v60 = vpop.xlane.xlu2 %1561 }
 0xe0f   :  { %v1564_v61 = vsub.f32 %v1556_v34, %v1562_v60 }
 0xe11   :  { %v1567_v62 = vmul.f32 1.442695, %v1564_v61 }
 0xe13   :  { %2613 = vpow2.f32 %v1567_v62 }
 0xe19   :  { %v2614_v63 = vpop.eup %2613 }
 0xe1a   :  { %v1572_v0 = vsel %vm278_vm2, %v2614_v63, 0.0 }
 0xe1b   :  { %1573 = vadd.xlane.f32.xlu2 %v1572_v0 }
 0xe1c   :  { %v1777_v1 = vpop.xlane.xlu2 %1776 }
 0xe1d   :  { %v1781_v2 = vsub.f32 %v1773_v42, %v1777_v1 }
 0xe1f   :  { %v1783_v3 = vmul.f32 1.442695, %v1781_v2 }
 0xe21   :  { %2615 = vpow2.f32 %v1783_v3 }
 0xe27   :  { %v2616_v4 = vpop.eup %2615 }
 0xe28   :  { %v1787_v6 = vsel %vm278_vm2, %v2616_v4, 0.0 }
 0xe29   :  { %1788 = vadd.xlane.f32.xlu0 %v1787_v6 }
 0xe33   :  { %1633 = vrot.lane.b32.xlu2 %v3180_v35, %s3478_s3 }
 0xe3b   :  { %1908 = vrot.lane.b32.xlu2 %v3150_v31, %s3480_s7 }
 0xe3d   :  { %1906 = vrot.lane.b32.xlu0 %v3170_v39, %s3480_s7 }
 0xe43   :  { %1823 = vrot.lane.b32.xlu2 %v3158_v25, %s3479_s5 }
 0xe4b   :  { %1934 = vrot.lane.b32.xlu2 %v3187_v30, %s3480_s7 }
 0xe5b   :  { %v1496_v7 = vpop.f32.mrf.mxu3 }
 0xe5c   :  { %2479 = vmatmul.msk.f32.gmra.mxu1 %vm278_vm2, %v1496_v7 }
 0xe8e   :  { %v1574_v8 = vpop.xlane.xlu2 %1573 }
 0xe8f   :  { %2617 = vrcp.f32 %v1574_v8  ;;  %v1601_v39 = vand.u32 2147483648, %v1574_v8  ;;  %v1599_v13 = vand.u32 2147483647, %v1574_v8  ;;  %vm1595_vm7 = vweird.f32 %v1574_v8 }
 0xe91   :  { %v1602_v37 = vor.u32 1.1754944e-38, %v1601_v39  ;;  %vm1600_vm9 = vcmp.eq.f32.partialorder %v1599_v13, 8.507059e+37 }
 0xe95   :  { %v2618_v10 = vpop.eup %2617 }
 0xe96   :  { %v1591_v11 = vmul.f32 %v2618_v10, %v1574_v8  ;;  %v1634_v12 = vpop.permute.xlu2 %1633  ;;  %vm1596_vm6 = vweird.f32 %v2618_v10 }
 0xe97   :  { %1654 = vmatpush.msra.mxu3 %v1634_v12  ;;  %vm1597_vm8 = vmor %vm1595_vm7, %vm1596_vm6 }
 0xe98   :  { %v1592_v31 = vsub.f32 1.0, %v1591_v11 }
 0xe99   :  { %2482 = vmatpush.xpose.msk.msrb.mxu3 %vm278_vm2, %v1748_v46 }
 0xe9a   :  { %v1593_v48 = vmul.f32 %v2618_v10, %v1592_v31 }
 0xe9c   :  { %v1594_v14 = vadd.f32 %v2618_v10, %v1593_v48  ;;  %v1789_v30 = vpop.xlane.xlu0 %1788 }
 0xe9d   :  { %2619 = vrcp.f32 %v1789_v30  ;;  %v1804_v27 = vand.u32 2147483648, %v1789_v30  ;;  %v1802_v47 = vand.u32 2147483647, %v1789_v30  ;;  %vm1798_vm11 = vweird.f32 %v1789_v30 }
 0xe9e   :  { %v1598_v15 = vsel %vm1597_vm8, %v2618_v10, %v1594_v14  ;;  %v1909_v16 = vpop.permute.xlu2 %1908 }
 0xe9f   :  { %v1603_v17 = vsel %vm1600_vm9, %v1602_v37, %v1598_v15  ;;  %2488 = vmatpush.xpose.msk.msrb.mxu1 %vm278_vm2, %v1909_v16  ;;  %v1805_v40 = vor.u32 1.1754944e-38, %v1804_v27  ;;  %vm1803_vm13 = vcmp.eq.f32.partialorder %v1802_v47, 8.507059e+37 }
 0xea0   :  { %v1604_v19 = vmul.f32 %v2614_v63, %v1603_v17 }
 0xea2   :  { %2475 = vmatmul.msk.f32.vlgmr.msra.gmra.mxu3 %vm278_vm2, %v1604_v19 }
 0xea3   :  { %v2620_v21 = vpop.eup %2619 }
 0xea4   :  { %v1794_v22 = vmul.f32 %v2620_v21, %v1789_v30  ;;  %vm1799_vm10 = vweird.f32 %v2620_v21 }
 0xea5   :  { %vm1800_vm12 = vmor %vm1798_vm11, %vm1799_vm10 }
 0xea6   :  { %v1795_v23 = vsub.f32 1.0, %v1794_v22  ;;  %v1824_v24 = vpop.permute.xlu2 %1823 }
 0xea7   :  { %1844 = vmatpush.msra.mxu2 %v1824_v24 }
 0xea8   :  { %v1796_v51 = vmul.f32 %v2620_v21, %v1795_v23 }
 0xea9   :  { %2490 = vmatpush.xpose.msk.msrb.mxu2 %vm278_vm2, %v1937_v26 }
 0xeaa   :  { %v1797_v28 = vadd.f32 %v2620_v21, %v1796_v51  ;;  %2483 = vmatmul.msk.f32.vlgmr.msrb.gmra.mxu3 %vm278_vm2, %v1746_v9 }
 0xeac   :  { %v1801_v29 = vsel %vm1800_vm12, %v2620_v21, %v1797_v28 }
 0xead   :  { %v1806_v32 = vsel %vm1803_vm13, %v1805_v40, %v1801_v29 }
 0xeae   :  { %v1807_v33 = vmul.f32 %v2616_v4, %v1806_v32  ;;  %v1935_v36 = vpop.permute.xlu2 %1934 }
 0xeaf   :  { %v1907_v34 = vpop.permute.xlu0 %1906 }
 0xeb0   :  { %2484 = vmatmul.msk.f32.vlgmr.msra.gmra.mxu2 %vm278_vm2, %v1807_v33  ;;  %2489 = vmatmul.msk.f32.vlgmr.msrb.gmra.mxu1 %vm278_vm2, %v1907_v34 }
 0xeb8   :  { %2491 = vmatmul.msk.f32.vlgmr.msrb.gmra.mxu2 %vm278_vm2, %v1935_v36 }
 0xed9   :  { %v3254_v42 = vpop.f32.mrf.mxu1 }
 0xf25   :  { %v1656_v43 = vpop.f32.mrf.mxu3 }
 0xf26   :  { %2477 = vmatmul.msk.f32.gmra.mxu0 %vm278_vm2, %v1656_v43 }
 0xf2d   :  { %v1770_v44 = vpop.f32.mrf.mxu3  ;;  %v1931_v50 = vpop.f32.mrf.mxu1 }
 0xf2e   :  { %v1774_v45 = vmul.f32 0.35355338, %v1770_v44  ;;  %v1962_v49 = vmul.f32 0.35355338, %v1931_v50 }
 0xf30   :  { %v1964_v52 = vsel %vm278_vm2, %v1962_v49, -inf  ;;  %v1778_v53 = vsel %vm278_vm2, %v1774_v45, -inf }
 0xf31   :  { %1965 = vmax.xlane.f32.xlu1 %v1964_v52  ;;  %1779 = vmax.xlane.f32.xlu0 %v1778_v53  ;;  %v2463_v53 = vld [vmem:[%s3418_s13 + $0x38] sm:$0xff] }
 0xf32   :  { %2085 = vmatpush.msra.mxu2 %v2463_v53 }
 0xf33   :  { %v1846_v54 = vpop.f32.mrf.mxu2 }
 0xf34   :  { %2486 = vmatmul.msk.f32.vlgmr.msra.gmra.mxu0 %vm278_vm2, %v1846_v54 }
 0xf3b   :  { %v1959_v55 = vpop.f32.mrf.mxu2 }
 0xf3c   :  { %v1963_v56 = vmul.f32 0.35355338, %v1959_v55 }
 0xf3e   :  { %v1967_v57 = vsel %vm278_vm2, %v1963_v56, -inf }
 0xf3f   :  { %1968 = vmax.xlane.f32.xlu2 %v1967_v57  ;;  %v1682_v57 = vpop.f32.mrf.mxu0 }
 0xf57   :  { %1849 = vrot.lane.b32.xlu2 %v3180_v35, %s3479_s5 }
 0xfa4   :  { %v1780_v58 = vpop.xlane.xlu0 %1779  ;;  %v1966_v59 = vpop.xlane.xlu1 %1965 }
 0xfa5   :  { %v1782_v60 = vsub.f32 %v1774_v45, %v1780_v58  ;;  %v1970_v61 = vsub.f32 %v1962_v49, %v1966_v59  ;;  %v1685_v58 = vpop.f32.mrf.mxu0 }
 0xfa7   :  { %v1785_v62 = vmul.f32 1.442695, %v1782_v60  ;;  %v1972_v63 = vmul.f32 1.442695, %v1970_v61  ;;  %v1712_v60 = vadd.f32 %v3252_v41, %v1682_v57 }
 0xfa9   :  { %2621 = vpow2.f32 %v1785_v62  ;;  %v2546_v62 = vld [vmem:[%s3419_s14 + $0x1] ss:$0 sm:$0xff] }
 0xfaa   :  { %2623 = vpow2.f32 %v1972_v63 }
 0xfaf   :  { %v2622_v0 = vpop.eup %2621 }
 0xfb0   :  { %v2624_v1 = vpop.eup %2623  ;;  %v1790_v2 = vsel %vm278_vm2, %v2622_v0, 0.0 }
 0xfb1   :  { %1791 = vadd.xlane.f32.xlu0 %v1790_v2  ;;  %v1976_v3 = vsel %vm278_vm2, %v2624_v1, 0.0  ;;  %v1898_v59 = vpop.f32.mrf.mxu0 }
 0xfb2   :  { %1977 = vadd.xlane.f32.xlu1 %v1976_v3  ;;  %v1969_v4 = vpop.xlane.xlu2 %1968  ;;  %v1904_v61 = vadd.f32 %v1898_v59, %v1712_v60  ;;  %v1715_v3 = vadd.f32 %v3254_v42, %v1685_v58  ;;  %v2508_v60 = vld [vmem:[%s3424_s19 + $0x50] sm:$0xff] }
 0xfb3   :  { %v1971_v6 = vsub.f32 %v1963_v56, %v1969_v4 }
 0xfb5   :  { %v1974_v7 = vmul.f32 1.442695, %v1971_v6 }
 0xfb7   :  { %2625 = vpow2.f32 %v1974_v7 }
 0xfba   :  { %v1850_v8 = vpop.permute.xlu2 %1849 }
 0xfbb   :  { %1870 = vmatpush.msra.mxu3 %v1850_v8 }
 0xfbd   :  { %v2626_v9 = vpop.eup %2625 }
 0xfbe   :  { %v1979_v10 = vsel %vm278_vm2, %v2626_v9, 0.0 }
 0xfbf   :  { %1980 = vadd.xlane.f32.xlu0 %v1979_v10 }
 0xfcb   :  { %2012 = vrot.lane.b32.xlu1 %v3158_v25, %s3480_s7 }
 0xfd3   :  { %2038 = vrot.lane.b32.xlu0 %v3180_v35, %s3480_s7 }
0x1024   :  { %v1792_v11 = vpop.xlane.xlu0 %1791 }
0x1025   :  { %2627 = vrcp.f32 %v1792_v11  ;;  %v1978_v12 = vpop.xlane.xlu1 %1977  ;;  %v1819_v14 = vand.u32 2147483648, %v1792_v11  ;;  %v1817_v15 = vand.u32 2147483647, %v1792_v11  ;;  %vm1813_vm0 = vweird.f32 %v1792_v11 }
0x1026   :  { %2629 = vrcp.f32 %v1978_v12  ;;  %v1993_v23 = vand.u32 2147483648, %v1978_v12  ;;  %vm1987_vm6 = vweird.f32 %v1978_v12  ;;  %v1991_v24 = vand.u32 2147483647, %v1978_v12 }
0x1027   :  { %v1820_v35 = vor.u32 1.1754944e-38, %v1819_v14  ;;  %vm1818_vm4 = vcmp.eq.f32.partialorder %v1817_v15, 8.507059e+37  ;;  %v2500_v15 = vld [vmem:[%s3422_s17 + $0x28] sm:$0xff] }
0x1028   :  { %v1994_v47 = vor.u32 1.1754944e-38, %v1993_v23  ;;  %vm1992_vm8 = vcmp.eq.f32.partialorder %v1991_v24, 8.507059e+37 }
0x102b   :  { %v2628_v46 = vpop.eup %2627 }
0x102c   :  { %v2630_v31 = vpop.eup %2629  ;;  %v1809_v39 = vmul.f32 %v2628_v46, %v1792_v11  ;;  %vm1814_vm15 = vweird.f32 %v2628_v46 }
0x102d   :  { %v1983_v48 = vmul.f32 %v2630_v31, %v1978_v12  ;;  %vm1815_vm3 = vmor %vm1813_vm0, %vm1814_vm15  ;;  %vm1988_vm5 = vweird.f32 %v2630_v31 }
0x102e   :  { %v1810_v13 = vsub.f32 1.0, %v1809_v39  ;;  %vm1989_vm7 = vmor %vm1987_vm6, %vm1988_vm5 }
0x102f   :  { %v1984_v30 = vsub.f32 1.0, %v1983_v48 }
0x1030   :  { %v1811_v37 = vmul.f32 %v2628_v46, %v1810_v13 }
0x1031   :  { %v1985_v16 = vmul.f32 %v2630_v31, %v1984_v30 }
0x1032   :  { %v1812_v17 = vadd.f32 %v2628_v46, %v1811_v37  ;;  %v1981_v25 = vpop.xlane.xlu0 %1980  ;;  %v2501_v37 = vld [vmem:[%s3422_s17 + $0x30] sm:$0xff] }
0x1033   :  { %2631 = vrcp.f32 %v1981_v25  ;;  %v1986_v21 = vadd.f32 %v2630_v31, %v1985_v16  ;;  %v2008_v32 = vand.u32 2147483648, %v1981_v25  ;;  %v2006_v36 = vand.u32 2147483647, %v1981_v25  ;;  %v2499_v16 = vld [vmem:[%s3422_s17 + $0x20] sm:$0xff] }
0x1034   :  { %v1816_v19 = vsel %vm1815_vm3, %v2628_v46, %v1812_v17  ;;  %vm2002_vm10 = vweird.f32 %v1981_v25 }
0x1035   :  { %v1821_v22 = vsel %vm1818_vm4, %v1820_v35, %v1816_v19  ;;  %v1990_v27 = vsel %vm1989_vm7, %v2630_v31, %v1986_v21  ;;  %v2009_v44 = vor.u32 1.1754944e-38, %v2008_v32  ;;  %vm2007_vm12 = vcmp.eq.f32.partialorder %v2006_v36, 8.507059e+37  ;;  %v2513_v19 = vld [vmem:[%s3424_s19 + $0x78] sm:$0xff]  ;;  %v2512_v21 = vld [vmem:[%s3424_s19 + $0x70] sm:$0xff] }
0x1036   :  { %v1822_v26 = vmul.f32 %v2622_v0, %v1821_v22  ;;  %v1995_v40 = vsel %vm1992_vm8, %v1994_v47, %v1990_v27  ;;  %2231 = vmatpush.msrb.mxu0 %v2513_v19  ;;  %v2511_v22 = vld [vmem:[%s3424_s19 + $0x68] sm:$0xff]  ;;  %v2509_v47 = vld [vmem:[%s3424_s19 + $0x58] sm:$0xff] }
0x1037   :  { %v1996_v38 = vmul.f32 %v2624_v1, %v1995_v40 }
0x1038   :  { %2485 = vmatmul.msk.f32.vlgmr.msra.gmra.mxu3 %vm278_vm2, %v1822_v26  ;;  %2232 = vmatpush.msrb.mxu0 %v2512_v21  ;;  %v2510_v26 = vld [vmem:[%s3424_s19 + $0x60] sm:$0xff] }
0x1039   :  { %v2632_v51 = vpop.eup %2631 }
0x103a   :  { %v1998_v28 = vmul.f32 %v2632_v51, %v1981_v25  ;;  %vm2003_vm9 = vweird.f32 %v2632_v51  ;;  %2233 = vmatpush.msrb.mxu0 %v2511_v22 }
0x103b   :  { %vm2004_vm11 = vmor %vm2002_vm10, %vm2003_vm9  ;;  %vm2386_vm10 = vcmask 97280  }
0x103c   :  { %v1999_v29 = vsub.f32 1.0, %v1998_v28  ;;  %2234 = vmatpush.msrb.mxu0 %v2510_v26 }
0x103d   :  { %v2013_v33 = vpop.permute.xlu1 %2012 }
0x103e   :  { %v2000_v34 = vmul.f32 %v2632_v51, %v1999_v29  ;;  %2033 = vmatpush.msrb.mxu3 %v2013_v33  ;;  %2235 = vmatpush.msrb.mxu0 %v2509_v47 }
0x1040   :  { %v2001_v43 = vadd.f32 %v2632_v51, %v2000_v34  ;;  %2492 = vmatmul.msk.f32.vlgmr.msrb.gmra.mxu3 %vm278_vm2, %v1996_v38  ;;  %v2547_v38 = vld [vmem:[%s3420_s15 + $0x1] ss:$0 sm:$0xff]  ;;  %2236 = vmatpush.msrb.mxu0 %v2508_v60 }
0x1041   :  { %v2345_v60 = vld [vmem:[%s3431_s25] sm:$0xff] }
0x1042   :  { %v2005_v50 = vsel %vm2004_vm11, %v2632_v51, %v2001_v43 }
0x1043   :  { %v2010_v45 = vsel %vm2007_vm12, %v2009_v44, %v2005_v50 }
0x1044   :  { %v2011_v49 = vmul.f32 %v2626_v9, %v2010_v45  ;;  %v2548_v45 = vld [vmem:[%s3421_s16 + $0x1] ss:$0 sm:$0xff] }
0x1045   :  { %v2039_v52 = vpop.permute.xlu0 %2038 }
0x1046   :  { %2059 = vmatpush.msra.mxu1 %v2039_v52 }
0x1047   :  { %2493 = vmatmul.msk.f32.vlgmr.msra.gmra.mxu1 %vm278_vm2, %v2011_v49 }
0x10bb   :  { %v1872_v54 = vpop.f32.mrf.mxu3 }
0x10bc   :  { %2487 = vmatmul.msk.f32.gmra.mxu0 %vm278_vm2, %v1872_v54 }
0x10c3   :  { %v2035_v55 = vpop.f32.mrf.mxu3 }
0x10c4   :  { %2494 = vmatmul.msk.f32.vlgmr.msra.gmra.mxu2 %vm278_vm2, %v2035_v55  ;;  %v2061_v56 = vpop.f32.mrf.mxu1 }
0x10cc   :  { %2495 = vmatmul.msk.f32.gmra.mxu2 %vm278_vm2, %v2061_v56 }
0x1139   :  { %v1901_v2 = vpop.f32.mrf.mxu0 }
0x113a   :  { %v1905_v6 = vadd.f32 %v1901_v2, %v1715_v3 }
0x1147   :  { %v2087_v63 = vpop.f32.mrf.mxu2 }
0x1148   :  { %v2093_v0 = vadd.f32 %v2087_v63, %v1904_v61  ;;  %v2507_v61 = vld [vmem:[%s3424_s19 + $0x48] sm:$0xff]  ;;  %v2549_v63 = vld [vmem:[%s3423_s18 + $0x1] ss:$0 sm:$0xff] }
0x1149   :  { %2237 = vmatpush.msrb.mxu0 %v2507_v61  ;;  %v2553_v61 = vld [vmem:[%s3428_s24] ss:$0 sm:$0xff]  ;;  %s3481_s24 = sld [smem:[#allocation14_spill]] }
0x114a   :  { %v2100_v1 = vadd.f32 %v2546_v62, %v2093_v0 }
0x114c   :  { %v2102_v4 = vadd.f32 %v2100_v1, %v3131_v5 }
0x114e   :  { %v2108_v7 = vsel %vm137_vm1, %v2102_v4, 0.0 }
0x114f   :  { %2109 = vadd.xlane.f32.xlu2 %v2108_v7  ;;  %v2090_v8 = vpop.f32.mrf.mxu2  ;;  %v2550_v7 = vld [vmem:[%s3425_s20 + $0x1] ss:$0 sm:$0xff] }
0x1150   :  { %v2094_v9 = vadd.f32 %v2090_v8, %v1905_v6 }
0x1152   :  { %v2101_v41 = vadd.f32 %v2546_v62, %v2094_v9  ;;  %v2506_v62 = vld [vmem:[%s3424_s19 + $0x40] sm:$0xff] }
0x1153   :  { %2238 = vmatpush.msrb.mxu0 %v2506_v62 }
0x1154   :  { %v2103_v10 = vadd.f32 %v2101_v41, %v3148_v20  ;;  %v2502_v20 = vld [vmem:[%s3422_s17 + $0x38] sm:$0xff] }
0x1155   :  { %2190 = vmatpush.msra.mxu3 %v2502_v20 }
0x1156   :  { %v2111_v11 = vsel %vm137_vm1, %v2103_v10, 0.0 }
0x1157   :  { %2112 = vadd.xlane.f32.xlu1 %v2111_v11  ;;  %2191 = vmatpush.msra.mxu3 %v2501_v37 }
0x1159   :  { %2192 = vmatpush.msra.mxu3 %v2500_v15 }
0x115b   :  { %2193 = vmatpush.msra.mxu3 %v2499_v16  ;;  %v2309_v16 = vld [vmem:[%s3429_s23 + $0x18] sm:$0xff] }
0x115c   :  { %2332 = vmatpush.msrb.mxu1 %v2309_v16 }
0x11c2   :  { %v2110_v12 = vpop.xlane.xlu2 %2109 }
0x11c3   :  { %v2114_v46 = vmul.f32 %v2110_v12, %v3019_v18 }
0x11c5   :  { %v2116_v31 = vsub.f32 %v2102_v4, %v2114_v46 }
0x11c7   :  { %v2118_v39 = vmul.f32 %v2116_v31, %v2116_v31 }
0x11c9   :  { %v2120_v42 = vsel %vm137_vm1, %v2118_v39, 0.0 }
0x11ca   :  { %2121 = vadd.xlane.f32.xlu0 %v2120_v42  ;;  %v2113_v5 = vpop.xlane.xlu1 %2112 }
0x11cb   :  { %v2115_v48 = vmul.f32 %v2113_v5, %v3019_v18 }
0x11cd   :  { %v2117_v13 = vsub.f32 %v2103_v10, %v2115_v48 }
0x11cf   :  { %v2119_v14 = vmul.f32 %v2117_v13, %v2117_v13 }
0x11d1   :  { %v2123_v30 = vsel %vm137_vm1, %v2119_v14, 0.0 }
0x11d2   :  { %2124 = vadd.xlane.f32.xlu2 %v2123_v30 }
0x123d   :  { %v2122_v17 = vpop.xlane.xlu0 %2121 }
0x123e   :  { %v2126_v25 = vmul.f32 %v2122_v17, %v3019_v18  ;;  %v2308_v17 = vld [vmem:[%s3429_s23 + $0x10] sm:$0xff] }
0x123f   :  { %2333 = vmatpush.msrb.mxu1 %v2308_v17 }
0x1240   :  { %v2128_v35 = vadd.f32 1e-05, %v2126_v25  ;;  %v2307_v25 = vld [vmem:[%s3429_s23 + $0x8] sm:$0xff] }
0x1241   :  { %2334 = vmatpush.msrb.mxu1 %v2307_v25 }
0x1242   :  { %2633 = vrsqrt.f32 %v2128_v35  ;;  %vm2136_vm13 = vweird.f32 %v2128_v35 }
0x1245   :  { %v2125_v23 = vpop.xlane.xlu2 %2124 }
0x1246   :  { %v2127_v24 = vmul.f32 %v2125_v23, %v3019_v18 }
0x1248   :  { %v2634_v27 = vpop.eup %2633  ;;  %v2129_v51 = vadd.f32 1e-05, %v2127_v24 }
0x1249   :  { %v2131_v28 = vmul.f32 %v2634_v27, %v2128_v35  ;;  %vm2137_vm2 = vweird.f32 %v2634_v27  ;;  %v2306_v35 = vld [vmem:[%s3429_s23] sm:$0xff] }
0x124a   :  { %2635 = vrsqrt.f32 %v2129_v51  ;;  %vm2138_vm15 = vmor %vm2136_vm13, %vm2137_vm2  ;;  %vm2146_vm3 = vweird.f32 %v2129_v51  ;;  %2335 = vmatpush.msrb.mxu1 %v2306_v35 }
0x124b   :  { %v2132_v40 = vmul.f32 %v2634_v27, %v2131_v28 }
0x124d   :  { %v2133_v29 = vmul.f32 0.5, %v2132_v40 }
0x124f   :  { %v2134_v32 = vsub.f32 1.5, %v2133_v29 }
0x1250   :  { %v2636_v33 = vpop.eup %2635 }
0x1251   :  { %v2135_v34 = vmul.f32 %v2634_v27, %v2134_v32  ;;  %v2141_v36 = vmul.f32 %v2636_v33, %v2129_v51  ;;  %vm2147_vm0 = vweird.f32 %v2636_v33 }
0x1252   :  { %vm2148_vm4 = vmor %vm2146_vm3, %vm2147_vm0 }
0x1253   :  { %v2139_v43 = vsel %vm2138_vm15, %v2634_v27, %v2135_v34  ;;  %v2142_v44 = vmul.f32 %v2636_v33, %v2141_v36  ;;  %v2551_v34 = vld [vmem:[%s3426_s21 + $0x1] ss:$0 sm:$0xff] }
0x1254   :  { %v2150_v50 = vmul.f32 %v2139_v43, %v2116_v31  ;;  %v2552_v43 = vld [vmem:[%s3427_s22 + $0x1] ss:$0 sm:$0xff] }
0x1255   :  { %v2143_v49 = vmul.f32 0.5, %v2142_v44 }
0x1256   :  { %v2155_v52 = vmul.f32 %v2547_v38, %v2150_v50 }
0x1257   :  { %v2144_v53 = vsub.f32 1.5, %v2143_v49 }
0x1258   :  { %v2160_v54 = vadd.f32 %v2548_v45, %v2155_v52 }
0x1259   :  { %v2145_v55 = vmul.f32 %v2636_v33, %v2144_v53 }
0x125a   :  { %2504 = vmatmul.msk.f32.vlgmr.msra.gmra.mxu3 %vm137_vm1, %v2160_v54 }
0x125b   :  { %v2149_v56 = vsel %vm2148_vm4, %v2636_v33, %v2145_v55 }
0x125c   :  { %v2151_v57 = vmul.f32 %v2149_v56, %v2117_v13 }
0x125e   :  { %v2156_v58 = vmul.f32 %v2547_v38, %v2151_v57  ;;  %v2348_v57 = vld [vmem:[%s3431_s25 + $0x18] sm:$0xff] }
0x125f   :  { %2371 = vmatpush.msrb.mxu2 %v2348_v57 }
0x1260   :  { %v2161_v59 = vadd.f32 %v2548_v45, %v2156_v58  ;;  %v2347_v58 = vld [vmem:[%s3431_s25 + $0x10] sm:$0xff] }
0x1261   :  { %2372 = vmatpush.msrb.mxu2 %v2347_v58 }
0x1262   :  { %2505 = vmatmul.msk.f32.gmra.mxu3 %vm137_vm1, %v2161_v59 }
0x12dd   :  { %v2195_v0 = vpop.f32.mrf.mxu3 }
0x12de   :  { %v2196_v1 = vadd.f32 %v2549_v63, %v2195_v0 }
0x12e0   :  { %v2201_v2 = vmax.f32 %v2196_v1, 0.0 }
0x12e2   :  { %2515 = vmatmul.msk.f32.vlgmr.msrb.gmra.mxu0 %vm1145_vm14, %v2201_v2 }
0x12e5   :  { %v2198_v3 = vpop.f32.mrf.mxu3 }
0x12e6   :  { %v2199_v4 = vadd.f32 %v2549_v63, %v2198_v3 }
0x12e8   :  { %v2202_v6 = vmax.f32 %v2199_v4, 0.0  ;;  %v2554_v4 = vld [vmem:[%s3430_s26] ss:$0 sm:$0xff] }
0x12ea   :  { %2516 = vmatmul.msk.f32.gmra.mxu0 %vm1145_vm14, %v2202_v6 }
0x135f   :  { %v2240_v8 = vpop.f32.mrf.mxu0 }
0x1360   :  { %v2241_v9 = vadd.f32 %v2550_v7, %v2240_v8 }
0x1362   :  { %v2246_v41 = vadd.f32 %v2241_v9, %v2160_v54 }
0x1364   :  { %v2252_v10 = vsel %vm137_vm1, %v2246_v41, 0.0 }
0x1365   :  { %2253 = vadd.xlane.f32.xlu2 %v2252_v10  ;;  %v2383_v10 = vld [vmem:[%s3481_s24 + $0x8] sm:$0xff] }
0x1367   :  { %v2243_v11 = vpop.f32.mrf.mxu0 }
0x1368   :  { %v2244_v12 = vadd.f32 %v2550_v7, %v2243_v11  ;;  %v2382_v7 = vld [vmem:[%s3481_s24] sm:$0xff] }
0x136a   :  { %v2247_v46 = vadd.f32 %v2244_v12, %v2161_v59  ;;  %v2346_v59 = vld [vmem:[%s3431_s25 + $0x8] sm:$0xff] }
0x136b   :  { %2373 = vmatpush.msrb.mxu2 %v2346_v59 }
0x136c   :  { %v2255_v31 = vsel %vm137_vm1, %v2247_v46, 0.0 }
0x136d   :  { %2256 = vadd.xlane.f32.xlu1 %v2255_v31  ;;  %2374 = vmatpush.msrb.mxu2 %v2345_v60 }
0x13d8   :  { %v2254_v39 = vpop.xlane.xlu2 %2253 }
0x13d9   :  { %v2258_v42 = vmul.f32 %v2254_v39, %v3019_v18 }
0x13db   :  { %v2260_v5 = vsub.f32 %v2246_v41, %v2258_v42 }
0x13dd   :  { %v2262_v48 = vmul.f32 %v2260_v5, %v2260_v5 }
0x13df   :  { %v2264_v13 = vsel %vm137_vm1, %v2262_v48, 0.0 }
0x13e0   :  { %v2257_v14 = vpop.xlane.xlu1 %2256  ;;  %2265 = vadd.xlane.f32.xlu0 %v2264_v13 }
0x13e1   :  { %v2259_v30 = vmul.f32 %v2257_v14, %v3019_v18 }
0x13e3   :  { %v2261_v20 = vsub.f32 %v2247_v46, %v2259_v30 }
0x13e5   :  { %v2263_v37 = vmul.f32 %v2261_v20, %v2261_v20 }
0x13e7   :  { %v2267_v15 = vsel %vm137_vm1, %v2263_v37, 0.0 }
0x13e8   :  { %2268 = vadd.xlane.f32.xlu2 %v2267_v15 }
0x1453   :  { %v2266_v19 = vpop.xlane.xlu0 %2265 }
0x1454   :  { %v2270_v21 = vmul.f32 %v2266_v19, %v3019_v18 }
0x1456   :  { %v2272_v22 = vadd.f32 1e-05, %v2270_v21 }
0x1458   :  { %2637 = vrsqrt.f32 %v2272_v22  ;;  %vm2280_vm5 = vweird.f32 %v2272_v22 }
0x145b   :  { %v2269_v23 = vpop.xlane.xlu2 %2268 }
0x145c   :  { %v2271_v24 = vmul.f32 %v2269_v23, %v3019_v18 }
0x145e   :  { %v2638_v26 = vpop.eup %2637  ;;  %v2273_v27 = vadd.f32 1e-05, %v2271_v24 }
0x145f   :  { %v2275_v51 = vmul.f32 %v2638_v26, %v2272_v22  ;;  %vm2281_vm14 = vweird.f32 %v2638_v26 }
0x1460   :  { %2639 = vrsqrt.f32 %v2273_v27  ;;  %vm2282_vm6 = vmor %vm2280_vm5, %vm2281_vm14  ;;  %vm2290_vm8 = vweird.f32 %v2273_v27 }
0x1461   :  { %v2276_v47 = vmul.f32 %v2638_v26, %v2275_v51 }
0x1463   :  { %v2277_v28 = vmul.f32 0.5, %v2276_v47 }
0x1465   :  { %v2278_v40 = vsub.f32 1.5, %v2277_v28 }
0x1466   :  { %v2640_v29 = vpop.eup %2639 }
0x1467   :  { %v2279_v32 = vmul.f32 %v2638_v26, %v2278_v40  ;;  %v2285_v33 = vmul.f32 %v2640_v29, %v2273_v27  ;;  %vm2291_vm7 = vweird.f32 %v2640_v29 }
0x1468   :  { %vm2292_vm9 = vmor %vm2290_vm8, %vm2291_vm7 }
0x1469   :  { %v2283_v36 = vsel %vm2282_vm6, %v2638_v26, %v2279_v32  ;;  %v2286_v38 = vmul.f32 %v2640_v29, %v2285_v33 }
0x146a   :  { %v2294_v18 = vmul.f32 %v2283_v36, %v2260_v5 }
0x146b   :  { %v2287_v44 = vmul.f32 0.5, %v2286_v38 }
0x146c   :  { %v2299_v50 = vmul.f32 %v2551_v34, %v2294_v18 }
0x146d   :  { %v2288_v45 = vsub.f32 1.5, %v2287_v44 }
0x146e   :  { %v2304_v49 = vadd.f32 %v2552_v43, %v2299_v50 }
0x146f   :  { %v2289_v52 = vmul.f32 %v2640_v29, %v2288_v45 }
0x1470   :  { %2519 = vmatmul.msk.f32.vlgmr.msrb.gmra.mxu1 %vm137_vm1, %v2304_v49 }
0x1471   :  { %v2293_v53 = vsel %vm2292_vm9, %v2640_v29, %v2289_v52 }
0x1472   :  { %v2295_v54 = vmul.f32 %v2293_v53, %v2261_v20 }
0x1474   :  { %v2300_v55 = vmul.f32 %v2551_v34, %v2295_v54 }
0x1476   :  { %v2305_v56 = vadd.f32 %v2552_v43, %v2300_v55 }
0x1478   :  { %2520 = vmatmul.msk.f32.gmra.mxu1 %vm137_vm1, %v2305_v56 }
0x14ed   :  { %v2337_v62 = vpop.f32.mrf.mxu1 }
0x14ee   :  { %v2338_v63 = vadd.f32 %v2553_v61, %v2337_v62 }
0x14f0   :  { %2641 = vtanh.f32 %v2338_v63 }
0x14f5   :  { %v2340_v0 = vpop.f32.mrf.mxu1 }
0x14f6   :  { %v2642_v1 = vpop.eup %2641  ;;  %v2341_v2 = vadd.f32 %v2553_v61, %v2340_v0 }
0x14f7   :  { %2521 = vmatmul.msk.f32.vlgmr.msrb.gmra.mxu2 %vm137_vm1, %v2642_v1 }
0x14f8   :  { %2643 = vtanh.f32 %v2341_v2 }
0x14fe   :  { %v2644_v3 = vpop.eup %2643 }
0x14ff   :  { %2522 = vmatmul.msk.f32.gmra.mxu2 %vm137_vm1, %v2644_v3 }
0x157a   :  { %v2376_v6 = vpop.f32.mrf.mxu2 }
0x157b   :  { %v2377_v8 = vadd.f32 %v2554_v4, %v2376_v6 }
0x157d   :  { %v2384_v9 = vadd.f32 %v2382_v7, %v2377_v8 }
0x157f   :  { %2387 = vst.msk [vmem:[%s3482_s8] sm:$0xff] %vm2386_vm10, %v2384_v9 }
0x1582   :  { %v2379_v41 = vpop.f32.mrf.mxu2 }
0x1583   :  { %v2380_v11 = vadd.f32 %v2554_v4, %v2379_v41 }
0x1585   :  { %v2385_v12 = vadd.f32 %v2383_v10, %v2380_v11 }
0x1587   :  { %2388 = vst.msk [vmem:[%s3482_s8 + $0x8] sm:$0xff] %vm2386_vm10, %v2385_v12 }

// kernel: _lambda_.5
= control target key start
LH: loop header
LB: loop body
LE: loop exit
PB: predicated region body
PF: predicated region fallthrough
CT: control target
= control target key end

     0   :  { %vm100_vm0 = vcmask 392192   ;;  %vm140_vm1 = vcmask 261120   ;;  %vm281_vm2 = vcmask 64512   ;;  %s3457_s29 = smov 120   ;;  %s3415_s3 = inlined_call_operand.vmem [shape: f32[48,32], index: 3, kind: input, shape index: {}]   ;;  %s3416_s4 = inlined_call_operand.vmem [shape: f32[1,32], index: 4, kind: input, shape index: {}]   ;;  %s3417_s0 = inlined_call_operand.vmem [shape: f32[16,48], index: 0, kind: input, shape index: {}, may-alias: {0,1}]   ;;  %s3418_s6 = inlined_call_operand.vmem [shape: f32[1,32], index: 6, kind: input, shape index: {}]   ;;  %s3419_s5 = inlined_call_operand.vmem [shape: f32[32,32], index: 5, kind: input, shape index: {}]   ;;  %s3420_s11 = inlined_call_operand.vmem [shape: f32[2,32,32], index: 11, kind: input, shape index: {}]   ;;  %s3421_s7 = inlined_call_operand.vmem [shape: f32[2,32,32], index: 7, kind: input, shape index: {}]   ;;  %s3422_s9 = inlined_call_operand.vmem [shape: f32[2,32,32], index: 9, kind: input, shape index: {}]   ;;  %s3423_s12 = inlined_call_operand.vmem [shape: f32[2,1,32], index: 12, kind: input, shape index: {}]   ;;  %s3424_s2 = inlined_call_operand.vmem [shape: f32[16,32], index: 2, kind: input, shape index: {}]   ;;  %s3425_s10 = inlined_call_operand.vmem [shape: f32[2,1,32], index: 10, kind: input, shape index: {}]   ;;  %s3426_s8 = inlined_call_operand.vmem [shape: f32[2,1,32], index: 8, kind: input, shape index: {}]   ;;  %s3427_s13 = inlined_call_operand.vmem [shape: f32[2,32,32], index: 13, kind: input, shape index: {}]   ;;  %s3428_s14 = inlined_call_operand.vmem [shape: f32[2,1,32], index: 14, kind: input, shape index: {}]   ;;  %s3429_s15 = inlined_call_operand.vmem [shape: f32[2,1,32], index: 15, kind: input, shape index: {}]   ;;  %s3430_s16 = inlined_call_operand.vmem [shape: f32[2,1,32], index: 16, kind: input, shape index: {}]   ;;  %s3431_s17 = inlined_call_operand.vmem [shape: f32[2,32,64], index: 17, kind: input, shape index: {}]   ;;  %s3432_s18 = inlined_call_operand.vmem [shape: f32[2,1,64], index: 18, kind: input, shape index: {}]   ;;  %s3433_s19 = inlined_call_operand.vmem [shape: f32[2,64,32], index: 19, kind: input, shape index: {}]   ;;  %s3434_s20 = inlined_call_operand.vmem [shape: f32[2,1,32], index: 20, kind: input, shape index: {}]   ;;  %s3435_s21 = inlined_call_operand.vmem [shape: f32[2,1,32], index: 21, kind: input, shape index: {}]   ;;  %s3436_s22 = inlined_call_operand.vmem [shape: f32[2,1,32], index: 22, kind: input, shape index: {}]   ;;  %s3437_s24 = inlined_call_operand.vmem [shape: f32[1,32], index: 24, kind: input, shape index: {}]   ;;  %s3438_s23 = inlined_call_operand.vmem [shape: f32[32,32], index: 23, kind: input, shape index: {}]   ;;  %s3439_s26 = inlined_call_operand.vmem [shape: f32[1,48], index: 26, kind: input, shape index: {}]   ;;  %s3440_s25 = inlined_call_operand.vmem [shape: f32[32,48], index: 25, kind: input, shape index: {}]   ;;  %s3441_s1 = inlined_call_operand.vmem [shape: f32[16,48], index: 1, kind: input, shape index: {}, may-alias: {0,1}]   ;;  %s3442_s27 = inlined_call_operand.vmem [shape: f32[16,48], index: 27, kind: output, shape index: {}]  }
   0x1   :  { %3461 = sst [smem:[#allocation2_spill]] %s3415_s3  ;;  %s3487_s3 = smov 120  }
   0x2   :  { %3462 = sst [smem:[#allocation3_spill]] %s3416_s4 }
   0x3   :  { %3463 = sst [smem:[#allocation4_spill]] %s3417_s0 }
   0x4   :  { %3464 = sst [smem:[#allocation5_spill]] %s3418_s6 }
   0x5   :  { %3465 = sst [smem:[#allocation6_spill]] %s3419_s5 }
   0x6   :  { %3466 = sst [smem:[#allocation7_spill]] %s3420_s11 }
   0x7   :  { %3467 = sst [smem:[#allocation8_spill]] %s3421_s7  ;;  %s3453_s7 = smov 104  }
   0x8   :  { %3468 = sst [smem:[#allocation9_spill]] %s3422_s9 }
   0x9   :  { %3469 = sst [smem:[#allocation10_spill]] %s3423_s12 }
   0xa   :  { %3470 = sst [smem:[#allocation11_spill]] %s3424_s2 }
   0xb   :  { %3471 = sst [smem:[#allocation12_spill]] %s3425_s10 }
   0xc   :  { %3472 = sst [smem:[#allocation13_spill]] %s3426_s8 }
   0xd   :  { %3473 = sst [smem:[#allocation14_spill]] %s3441_s1 }
   0xe   :  { %3474 = sst [smem:[#allocation15_spill]] %s3442_s27 }
   0xf   :  { %s3475_s12 = sld [smem:[#allocation2_spill]] }
  0x10   :  { %s3476_s9 = sld [smem:[#allocation4_spill]] }
  0x11   :  { %s3477_s28 = sld [smem:[#allocation6_spill]] }
  0x12   :  { %s3478_s6 = sld [smem:[#allocation7_spill]] }
  0x13   :  { %s3479_s30 = sld [smem:[#allocation8_spill]] }
  0x14   :  { %s3481_s4 = sld [smem:[#allocation3_spill]] }
  0x15   :  { %v95_v0 = vld [vmem:[%s3475_s12 + $0x28] sm:$0xff]  ;;  %v94_v1 = vld [vmem:[%s3475_s12 + $0x20] sm:$0xff]  ;;  %v93_v2 = vld [vmem:[%s3475_s12 + $0x18] sm:$0xff]  ;;  %s3482_s11 = sld [smem:[#allocation5_spill]] }
  0x16   :  { %117 = vmatpush.msra.mxu0 %v95_v0  ;;  %v92_v3 = vld [vmem:[%s3475_s12 + $0x10] sm:$0xff]  ;;  %v91_v4 = vld [vmem:[%s3475_s12 + $0x8] sm:$0xff]  ;;  %v90_v5 = vld [vmem:[%s3475_s12] sm:$0xff]  ;;  %s3480_s12 = sld [smem:[#allocation9_spill]] }
  0x17   :  { %v86_v6 = vld [vmem:[%s3476_s9] sm:$0xff]  ;;  %v87_v7 = vld [vmem:[%s3476_s9 + $0x8] sm:$0xff]  ;;  %v135_v8 = vld [vmem:[%s3477_s28 + $0x18] sm:$0xff]  ;;  %s3484_s0 = sld [smem:[#allocation10_spill]] }
  0x18   :  { %118 = vmatpush.msra.mxu0 %v94_v1  ;;  %159 = vmatpush.msra.mxu1 %v135_v8  ;;  %v134_v9 = vld [vmem:[%s3477_s28 + $0x10] sm:$0xff]  ;;  %v133_v10 = vld [vmem:[%s3477_s28 + $0x8] sm:$0xff]  ;;  %v132_v11 = vld [vmem:[%s3477_s28] sm:$0xff]  ;;  %s3483_s28 = sld [smem:[#allocation11_spill]] }
  0x19   :  { %v243_v12 = vld [vmem:[%s3478_s6 + $0x18] sm:$0xff]  ;;  %v242_v15 = vld [vmem:[%s3478_s6 + $0x10] sm:$0xff]  ;;  %v241_v25 = vld [vmem:[%s3478_s6 + $0x8] sm:$0xff]  ;;  %s3485_s2 = sld [smem:[#allocation12_spill]] }
  0x1a   :  { %119 = vmatpush.msra.mxu0 %v93_v2  ;;  %160 = vmatpush.msra.mxu1 %v134_v9  ;;  %v175_v13 = vld [vmem:[%s3479_s30 + $0x18] sm:$0xff]  ;;  %v2538_v16 = vld [vmem:[%s3481_s4] ss:$0 sm:$0xff]  ;;  %v174_v23 = vld [vmem:[%s3479_s30 + $0x10] sm:$0xff]  ;;  %s3486_s10 = sld [smem:[#allocation13_spill]]  ;;  %s3455_s4 = smov 112  }
  0x1b   :  { %198 = vmatpush.msra.mxu2 %v175_v13  ;;  %v173_v26 = vld [vmem:[%s3479_s30 + $0x8] sm:$0xff]  ;;  %v240_v28 = vld [vmem:[%s3478_s6] sm:$0xff] }
  0x1c   :  { %120 = vmatpush.msra.mxu0 %v92_v3  ;;  %161 = vmatpush.msra.mxu1 %v133_v10  ;;  %v212_v14 = vld [vmem:[%s3480_s12 + $0x18] sm:$0xff]  ;;  %v211_v24 = vld [vmem:[%s3480_s12 + $0x10] sm:$0xff]  ;;  %v210_v27 = vld [vmem:[%s3480_s12 + $0x8] sm:$0xff] }
  0x1d   :  { %2525 = vmatpush.msra.mxu3 %v212_v14  ;;  %199 = vmatpush.msra.mxu2 %v174_v23  ;;  %v172_v29 = vld [vmem:[%s3479_s30] sm:$0xff] }
  0x1e   :  { %121 = vmatpush.msra.mxu0 %v91_v4  ;;  %162 = vmatpush.msra.mxu1 %v132_v11  ;;  %v209_v30 = vld [vmem:[%s3480_s12] sm:$0xff]  ;;  %v89_v37 = vld [vmem:[%s3483_s28 + $0x8] sm:$0xff] }
  0x1f   :  { %2526 = vmatpush.msra.mxu3 %v211_v24  ;;  %200 = vmatpush.msra.mxu2 %v173_v26  ;;  %v2539_v31 = vld [vmem:[%s3482_s11] ss:$0 sm:$0xff] }
  0x20   :  { %122 = vmatpush.msra.mxu0 %v90_v5  ;;  %266 = vmatpush.msrb.mxu1 %v243_v12  ;;  %v88_v33 = vld [vmem:[%s3483_s28] sm:$0xff] }
  0x21   :  { %2395 = vmatmul.msk.f32.vlgmr.msra.gmra.mxu0 %vm100_vm0, %v86_v6  ;;  %2527 = vmatpush.msra.mxu3 %v210_v27  ;;  %v2540_v40 = vld [vmem:[%s3484_s0] ss:$0 sm:$0xff] }
  0x22   :  { %229 = vmatpush.msrb.mxu0 %v212_v14  ;;  %267 = vmatpush.msrb.mxu1 %v242_v15  ;;  %v2541_v41 = vld [vmem:[%s3485_s2] ss:$0 sm:$0xff] }
  0x23   :  { %201 = vmatpush.msra.mxu2 %v172_v29  ;;  %2528 = vmatpush.msra.mxu3 %v209_v30  ;;  %v2542_v46 = vld [vmem:[%s3486_s10] ss:$0 sm:$0xff] }
  0x24   :  { %230 = vmatpush.msrb.mxu0 %v211_v24  ;;  %268 = vmatpush.msrb.mxu1 %v241_v25 }
  0x26   :  { %231 = vmatpush.msrb.mxu0 %v210_v27  ;;  %269 = vmatpush.msrb.mxu1 %v240_v28 }
  0x28   :  { %232 = vmatpush.msrb.mxu0 %v209_v30 }
  0x29   :  { %2396 = vmatmul.msk.f32.gmra.mxu0 %vm100_vm0, %v87_v7 }
  0x9e   :  { %v124_v17 = vpop.f32.mrf.mxu0 }
  0x9f   :  { %v125_v18 = vadd.f32 %v2538_v16, %v124_v17 }
  0xa1   :  { %2562 = vtanh.f32 %v125_v18 }
  0xa6   :  { %v127_v19 = vpop.f32.mrf.mxu0 }
  0xa7   :  { %v2563_v20 = vpop.eup %2562  ;;  %v128_v21 = vadd.f32 %v2538_v16, %v127_v19 }
  0xa8   :  { %2397 = vmatmul.msk.f32.vlgmr.msra.gmra.mxu1 %vm140_vm1, %v2563_v20 }
  0xa9   :  { %2564 = vtanh.f32 %v128_v21 }
  0xaf   :  { %v2565_v22 = vpop.eup %2564 }
  0xb0   :  { %2398 = vmatmul.msk.f32.gmra.mxu1 %vm140_vm1, %v2565_v22 }
 0x125   :  { %v164_v32 = vpop.f32.mrf.mxu1 }
 0x126   :  { %v2883_v34 = vadd.f32 %v2539_v31, %v164_v32 }
 0x128   :  { %2403 = vmatmul.msk.f32.vlgmr.msrb.gmra.mxu1 %vm140_vm1, %v2883_v34  ;;  %v170_v35 = vadd.f32 %v2883_v34, %v88_v33 }
 0x12a   :  { %2399 = vmatmul.msk.f32.vlgmr.msra.gmra.mxu2 %vm140_vm1, %v170_v35  ;;  %2401 = vmatmul.msk.f32.vlgmr.msrb.gmra.mxu0 %vm140_vm1, %v170_v35 }
 0x12d   :  { %v167_v36 = vpop.f32.mrf.mxu1 }
 0x12e   :  { %v2893_v38 = vadd.f32 %v2539_v31, %v167_v36 }
 0x130   :  { %v171_v39 = vadd.f32 %v2893_v38, %v89_v37  ;;  %2404 = vmatmul.msk.f32.gmra.mxu1 %vm140_vm1, %v2893_v38 }
 0x132   :  { %2402 = vmatmul.msk.f32.vlgmr.msra.gmra.mxu3 %vm140_vm1, %v171_v39  ;;  %2400 = vmatmul.msk.f32.gmra.mxu2 %vm140_vm1, %v171_v39 }
 0x1a5   :  { %v271_v42 = vpop.f32.mrf.mxu1 }
 0x1a6   :  { %v2906_v43 = vadd.f32 %v2540_v40, %v271_v42  ;;  %v277_v42 = vld [vmem:[%s3427_s13] sm:$0xff] }
 0x1a7   :  { %v234_v44 = vpop.f32.mrf.mxu0 }
 0x1a8   :  { %v2908_v45 = vadd.f32 %v2541_v41, %v234_v44  ;;  %402 = vmatpush.msra.mxu0 %v2906_v43 }
 0x1aa   :  { %2405 = vmatpush.xpose.msk.msrb.mxu2 %vm281_vm2, %v2908_v45 }
 0x1ad   :  { %v203_v47 = vpop.f32.mrf.mxu2  ;;  %v274_v53 = vpop.f32.mrf.mxu1 }
 0x1ae   :  { %v204_v48 = vadd.f32 %v2542_v46, %v203_v47  ;;  %v2930_v54 = vadd.f32 %v2540_v40, %v274_v53 }
 0x1b0   :  { %430 = vrot.lane.b32.xlu1 %v204_v48, %s3457_s29  ;;  %2406 = vmatmul.msk.f32.vlgmr.msrb.gmra.mxu2 %vm281_vm2, %v204_v48 }
 0x1b1   :  { %425 = vmatpush.msra.mxu2 %v2930_v54 }
 0x1b5   :  { %v237_v49 = vpop.f32.mrf.mxu3  ;;  %v206_v50 = vpop.f32.mrf.mxu2 }
 0x1b6   :  { %v2918_v51 = vadd.f32 %v2541_v41, %v237_v49  ;;  %v2920_v52 = vadd.f32 %v2542_v46, %v206_v50 }
 0x1b8   :  { %2407 = vmatpush.xpose.msk.msrb.mxu3 %vm281_vm2, %v2918_v51  ;;  %460 = vrot.lane.b32.xlu2 %v2918_v51, %s3457_s29 }
 0x1bb   :  { %2408 = vmatmul.msk.f32.vlgmr.msrb.gmra.mxu3 %vm281_vm2, %v2920_v52 }
 0x1c0   :  { %458 = vrot.lane.b32.xlu2 %v2920_v52, %s3457_s29 }
 0x212   :  { %v461_v55 = vpop.permute.xlu2 %460 }
 0x213   :  { %2413 = vmatpush.xpose.msk.msrb.mxu0 %vm281_vm2, %v461_v55 }
 0x21a   :  { %v459_v0 = vpop.permute.xlu2 %458 }
 0x222   :  { %v431_v9 = vpop.permute.xlu1 %430 }
 0x233   :  { %v305_v56 = vpop.f32.mrf.mxu2 }
 0x234   :  { %v334_v57 = vmul.f32 0.35355338, %v305_v56 }
 0x236   :  { %v336_v58 = vsel %vm281_vm2, %v334_v57, -inf }
 0x237   :  { %337 = vmax.xlane.f32.xlu0 %v336_v58 }
 0x23e   :  { %v331_v59 = vpop.f32.mrf.mxu3 }
 0x23f   :  { %v335_v60 = vmul.f32 0.35355338, %v331_v59 }
 0x241   :  { %v339_v61 = vsel %vm281_vm2, %v335_v60, -inf }
 0x242   :  { %340 = vmax.xlane.f32.xlu2 %v339_v61 }
 0x24b   :  { %432 = vrot.lane.b32.xlu0 %v2908_v45, %s3457_s29 }
 0x2aa   :  { %v338_v62 = vpop.xlane.xlu0 %337 }
 0x2ab   :  { %v342_v63 = vsub.f32 %v334_v57, %v338_v62 }
 0x2ad   :  { %v344_v1 = vmul.f32 1.442695, %v342_v63 }
 0x2af   :  { %2566 = vpow2.f32 %v344_v1 }
 0x2b5   :  { %v2567_v2 = vpop.eup %2566  ;;  %v341_v3 = vpop.xlane.xlu2 %340 }
 0x2b6   :  { %v343_v4 = vsub.f32 %v335_v60, %v341_v3  ;;  %v348_v5 = vsel %vm281_vm2, %v2567_v2, 0.0 }
 0x2b7   :  { %349 = vadd.xlane.f32.xlu1 %v348_v5 }
 0x2b8   :  { %v346_v6 = vmul.f32 1.442695, %v343_v4 }
 0x2ba   :  { %2568 = vpow2.f32 %v346_v6 }
 0x2bd   :  { %v433_v7 = vpop.permute.xlu0 %432 }
 0x2be   :  { %2411 = vmatpush.xpose.msk.msra.mxu3 %vm281_vm2, %v433_v7 }
 0x2c0   :  { %v2569_v8 = vpop.eup %2568 }
 0x2c1   :  { %2412 = vmatmul.msk.f32.vlgmr.msra.gmra.mxu3 %vm281_vm2, %v431_v9  ;;  %v351_v10 = vsel %vm281_vm2, %v2569_v8, 0.0 }
 0x2c2   :  { %352 = vadd.xlane.f32.xlu0 %v351_v10 }
 0x2d6   :  { %648 = vrot.lane.b32.xlu0 %v204_v48, %s3455_s4 }
 0x2de   :  { %564 = vrot.lane.b32.xlu0 %v2930_v54, %s3457_s29 }
 0x2e6   :  { %676 = vrot.lane.b32.xlu0 %v2920_v52, %s3455_s4 }
 0x2ee   :  { %837 = vrot.lane.b32.xlu0 %v204_v48, %s3453_s7 }
 0x32a   :  { %v350_v11 = vpop.xlane.xlu1 %349 }
 0x32b   :  { %2570 = vrcp.f32 %v350_v11  ;;  %v365_v15 = vand.u32 2147483648, %v350_v11  ;;  %v363_v18 = vand.u32 2147483647, %v350_v11  ;;  %vm359_vm4 = vweird.f32 %v350_v11 }
 0x32d   :  { %v366_v20 = vor.u32 1.1754944e-38, %v365_v15  ;;  %vm364_vm6 = vcmp.eq.f32.partialorder %v363_v18, 8.507059e+37 }
 0x331   :  { %v2571_v12 = vpop.eup %2570 }
 0x332   :  { %v355_v13 = vmul.f32 %v2571_v12, %v350_v11  ;;  %vm360_vm3 = vweird.f32 %v2571_v12 }
 0x333   :  { %vm361_vm5 = vmor %vm359_vm4, %vm360_vm3 }
 0x334   :  { %v356_v14 = vsub.f32 1.0, %v355_v13 }
 0x335   :  { %v353_v16 = vpop.xlane.xlu0 %352 }
 0x336   :  { %v357_v17 = vmul.f32 %v2571_v12, %v356_v14  ;;  %2572 = vrcp.f32 %v353_v16  ;;  %v380_v27 = vand.u32 2147483648, %v353_v16  ;;  %v378_v29 = vand.u32 2147483647, %v353_v16 }
 0x337   :  { %vm374_vm8 = vweird.f32 %v353_v16 }
 0x338   :  { %v358_v19 = vadd.f32 %v2571_v12, %v357_v17  ;;  %v381_v31 = vor.u32 1.1754944e-38, %v380_v27  ;;  %vm379_vm10 = vcmp.eq.f32.partialorder %v378_v29, 8.507059e+37 }
 0x33a   :  { %v362_v21 = vsel %vm361_vm5, %v2571_v12, %v358_v19 }
 0x33b   :  { %v367_v22 = vsel %vm364_vm6, %v366_v20, %v362_v21 }
 0x33c   :  { %v2573_v23 = vpop.eup %2572  ;;  %v368_v24 = vmul.f32 %v2567_v2, %v367_v22 }
 0x33d   :  { %v370_v25 = vmul.f32 %v2573_v23, %v353_v16  ;;  %vm375_vm7 = vweird.f32 %v2573_v23  ;;  %v278_v16 = vld [vmem:[%s3427_s13 + $0x8] sm:$0xff] }
 0x33e   :  { %2409 = vmatmul.msk.f32.vlgmr.msra.gmra.mxu0 %vm281_vm2, %v368_v24  ;;  %vm376_vm9 = vmor %vm374_vm8, %vm375_vm7  ;;  %611 = vmatpush.msrb.mxu3 %v278_v16 }
 0x33f   :  { %v371_v26 = vsub.f32 1.0, %v370_v25  ;;  %640 = vmatpush.msra.mxu0 %v277_v42 }
 0x341   :  { %v372_v28 = vmul.f32 %v2573_v23, %v371_v26 }
 0x343   :  { %v373_v30 = vadd.f32 %v2573_v23, %v372_v28 }
 0x344   :  { %v455_v32 = vpop.f32.mrf.mxu3 }
 0x345   :  { %v377_v33 = vsel %vm376_vm9, %v2573_v23, %v373_v30  ;;  %v486_v35 = vmul.f32 0.35355338, %v455_v32 }
 0x346   :  { %v382_v36 = vsel %vm379_vm10, %v381_v31, %v377_v33  ;;  %2414 = vmatmul.msk.f32.vlgmr.msrb.gmra.mxu0 %vm281_vm2, %v459_v0 }
 0x347   :  { %v488_v37 = vsel %vm281_vm2, %v486_v35, -inf  ;;  %v383_v39 = vmul.f32 %v2569_v8, %v382_v36 }
 0x348   :  { %489 = vmax.xlane.f32.xlu1 %v488_v37  ;;  %v649_v40 = vpop.permute.xlu0 %648 }
 0x349   :  { %2410 = vmatmul.msk.f32.vlgmr.msra.gmra.mxu2 %vm281_vm2, %v383_v39 }
 0x350   :  { %v565_v41 = vpop.permute.xlu0 %564 }
 0x351   :  { %585 = vmatpush.msrb.mxu2 %v565_v41 }
 0x358   :  { %v677_v13 = vpop.permute.xlu0 %676 }
 0x360   :  { %v838_v15 = vpop.permute.xlu0 %837 }
 0x3bb   :  { %v404_v44 = vpop.f32.mrf.mxu0  ;;  %v490_v46 = vpop.xlane.xlu1 %489 }
 0x3bc   :  { %v494_v47 = vsub.f32 %v486_v35, %v490_v46  ;;  %2419 = vmatmul.msk.f32.vlgmr.msra.gmra.mxu0 %vm281_vm2, %v404_v44 }
 0x3be   :  { %v496_v48 = vmul.f32 1.442695, %v494_v47 }
 0x3c0   :  { %2574 = vpow2.f32 %v496_v48 }
 0x3c3   :  { %v483_v49 = vpop.f32.mrf.mxu0 }
 0x3c4   :  { %v487_v50 = vmul.f32 0.35355338, %v483_v49 }
 0x3c6   :  { %v2575_v53 = vpop.eup %2574  ;;  %v491_v55 = vsel %vm281_vm2, %v487_v50, -inf }
 0x3c7   :  { %492 = vmax.xlane.f32.xlu1 %v491_v55  ;;  %v500_v56 = vsel %vm281_vm2, %v2575_v53, 0.0 }
 0x3c8   :  { %501 = vadd.xlane.f32.xlu2 %v500_v56 }
 0x3cc   :  { %v427_v57 = vpop.f32.mrf.mxu2 }
 0x3cd   :  { %2420 = vmatmul.msk.f32.gmra.mxu0 %vm281_vm2, %v427_v57 }
 0x3e0   :  { %650 = vrot.lane.b32.xlu1 %v2908_v45, %s3455_s4  ;;  %537 = vrot.lane.b32.xlu2 %v2906_v43, %s3457_s29 }
 0x3e8   :  { %678 = vrot.lane.b32.xlu1 %v2918_v51, %s3455_s4 }
 0x3f0   :  { %839 = vrot.lane.b32.xlu1 %v2908_v45, %s3453_s7 }
 0x439   :  { %v2986_v37 = vpop.f32.mrf.mxu0 }
 0x43a   :  { %v493_v58 = vpop.xlane.xlu1 %492 }
 0x43b   :  { %v495_v59 = vsub.f32 %v487_v50, %v493_v58  ;;  %v502_v60 = vpop.xlane.xlu2 %501 }
 0x43c   :  { %2576 = vrcp.f32 %v502_v60  ;;  %v517_v3 = vand.u32 2147483648, %v502_v60  ;;  %v515_v6 = vand.u32 2147483647, %v502_v60  ;;  %vm511_vm12 = vweird.f32 %v502_v60 }
 0x43d   :  { %v498_v61 = vmul.f32 1.442695, %v495_v59 }
 0x43e   :  { %v518_v7 = vor.u32 1.1754944e-38, %v517_v3  ;;  %vm516_vm14 = vcmp.eq.f32.partialorder %v515_v6, 8.507059e+37 }
 0x43f   :  { %2578 = vpow2.f32 %v498_v61 }
 0x442   :  { %v2577_v62 = vpop.eup %2576 }
 0x443   :  { %v507_v63 = vmul.f32 %v2577_v62, %v502_v60  ;;  %v538_v0 = vpop.permute.xlu2 %537  ;;  %vm512_vm11 = vweird.f32 %v2577_v62 }
 0x444   :  { %558 = vmatpush.msra.mxu1 %v538_v0  ;;  %vm513_vm13 = vmor %vm511_vm12, %vm512_vm11 }
 0x445   :  { %v2579_v1 = vpop.eup %2578  ;;  %v508_v2 = vsub.f32 1.0, %v507_v63 }
 0x446   :  { %v503_v4 = vsel %vm281_vm2, %v2579_v1, 0.0 }
 0x447   :  { %v509_v5 = vmul.f32 %v2577_v62, %v508_v2  ;;  %504 = vadd.xlane.f32.xlu2 %v503_v4 }
 0x449   :  { %v510_v45 = vadd.f32 %v2577_v62, %v509_v5 }
 0x44a   :  { %v2989_v41 = vpop.f32.mrf.mxu0 }
 0x44b   :  { %v514_v8 = vsel %vm513_vm13, %v2577_v62, %v510_v45 }
 0x44c   :  { %v519_v9 = vsel %vm516_vm14, %v518_v7, %v514_v8 }
 0x44d   :  { %v520_v10 = vmul.f32 %v2575_v53, %v519_v9 }
 0x44f   :  { %2415 = vmatmul.msk.f32.vlgmr.msra.gmra.mxu1 %vm281_vm2, %v520_v10 }
 0x452   :  { %v651_v11 = vpop.permute.xlu1 %650 }
 0x453   :  { %2421 = vmatpush.xpose.msk.msrb.mxu1 %vm281_vm2, %v651_v11  ;;  %v279_v11 = vld [vmem:[%s3427_s13 + $0x10] sm:$0xff] }
 0x454   :  { %827 = vmatpush.msra.mxu3 %v279_v11 }
 0x457   :  { %2422 = vmatmul.msk.f32.vlgmr.msrb.gmra.mxu1 %vm281_vm2, %v649_v40 }
 0x45a   :  { %v679_v12 = vpop.permute.xlu1 %678 }
 0x45b   :  { %2423 = vmatpush.xpose.msk.msra.mxu2 %vm281_vm2, %v679_v12 }
 0x45f   :  { %754 = vrot.lane.b32.xlu2 %v2906_v43, %s3455_s4 }
 0x462   :  { %v840_v14 = vpop.permute.xlu1 %839 }
 0x463   :  { %2429 = vmatpush.xpose.msk.msrb.mxu0 %vm281_vm2, %v840_v14 }
 0x466   :  { %2430 = vmatmul.msk.f32.vlgmr.msrb.gmra.mxu0 %vm281_vm2, %v838_v15 }
 0x467   :  { %867 = vrot.lane.b32.xlu2 %v2918_v51, %s3453_s7 }
 0x4ba   :  { %v505_v17 = vpop.xlane.xlu2 %504 }
 0x4bb   :  { %2580 = vrcp.f32 %v505_v17  ;;  %v532_v22 = vand.u32 2147483648, %v505_v17  ;;  %v530_v24 = vand.u32 2147483647, %v505_v17  ;;  %vm526_vm3 = vweird.f32 %v505_v17 }
 0x4bd   :  { %v533_v51 = vor.u32 1.1754944e-38, %v532_v22  ;;  %vm531_vm5 = vcmp.eq.f32.partialorder %v530_v24, 8.507059e+37 }
 0x4c1   :  { %v2581_v18 = vpop.eup %2580 }
 0x4c2   :  { %v522_v19 = vmul.f32 %v2581_v18, %v505_v17  ;;  %v755_v20 = vpop.permute.xlu2 %754  ;;  %vm527_vm15 = vweird.f32 %v2581_v18 }
 0x4c3   :  { %775 = vmatpush.msra.mxu1 %v755_v20  ;;  %vm528_vm4 = vmor %vm526_vm3, %vm527_vm15 }
 0x4c4   :  { %v523_v21 = vsub.f32 1.0, %v522_v19 }
 0x4c6   :  { %v524_v23 = vmul.f32 %v2581_v18, %v523_v21 }
 0x4c8   :  { %v525_v25 = vadd.f32 %v2581_v18, %v524_v23 }
 0x4ca   :  { %v529_v26 = vsel %vm528_vm4, %v2581_v18, %v525_v25  ;;  %v868_v27 = vpop.permute.xlu2 %867 }
 0x4cb   :  { %v534_v28 = vsel %vm531_vm5, %v533_v51, %v529_v26  ;;  %2431 = vmatpush.xpose.msk.msrb.mxu1 %vm281_vm2, %v868_v27 }
 0x4cc   :  { %v560_v29 = vpop.f32.mrf.mxu1  ;;  %v535_v30 = vmul.f32 %v2579_v1, %v534_v28 }
 0x4cd   :  { %2417 = vmatmul.msk.f32.vlgmr.msrb.gmra.mxu3 %vm281_vm2, %v560_v29 }
 0x4ce   :  { %2416 = vmatmul.msk.f32.vlgmr.msrb.gmra.mxu2 %vm281_vm2, %v535_v30 }
 0x4d4   :  { %v673_v31 = vpop.f32.mrf.mxu1 }
 0x4d5   :  { %v704_v32 = vmul.f32 0.35355338, %v673_v31 }
 0x4d6   :  { %2424 = vmatmul.msk.f32.vlgmr.msra.gmra.mxu2 %vm281_vm2, %v677_v13 }
 0x4d7   :  { %v706_v33 = vsel %vm281_vm2, %v704_v32, -inf }
 0x4d8   :  { %707 = vmax.xlane.f32.xlu1 %v706_v33 }
 0x4e3   :  { %v862_v49 = vpop.f32.mrf.mxu0 }
 0x4e4   :  { %v893_v50 = vmul.f32 0.35355338, %v862_v49  ;;  %v280_v49 = vld [vmem:[%s3427_s13 + $0x18] sm:$0xff] }
 0x4e6   :  { %v895_v53 = vsel %vm281_vm2, %v893_v50, -inf }
 0x54b   :  { %v708_v35 = vpop.xlane.xlu1 %707 }
 0x54c   :  { %v712_v36 = vsub.f32 %v704_v32, %v708_v35 }
 0x54e   :  { %v714_v39 = vmul.f32 1.442695, %v712_v36 }
 0x550   :  { %2582 = vpow2.f32 %v714_v39 }
 0x551   :  { %v587_v40 = vpop.f32.mrf.mxu2 }
 0x552   :  { %2418 = vmatmul.msk.f32.gmra.mxu3 %vm281_vm2, %v587_v40 }
 0x556   :  { %v2583_v42 = vpop.eup %2582 }
 0x557   :  { %v718_v44 = vsel %vm281_vm2, %v2583_v42, 0.0 }
 0x558   :  { %719 = vadd.xlane.f32.xlu0 %v718_v44 }
 0x559   :  { %v701_v46 = vpop.f32.mrf.mxu2 }
 0x55a   :  { %v705_v47 = vmul.f32 0.35355338, %v701_v46 }
 0x55c   :  { %v709_v48 = vsel %vm281_vm2, %v705_v47, -inf }
 0x55d   :  { %710 = vmax.xlane.f32.xlu1 %v709_v48 }
 0x565   :  { %896 = vmax.xlane.f32.xlu1 %v895_v53 }
 0x56c   :  { %865 = vrot.lane.b32.xlu0 %v2920_v52, %s3453_s7 }
 0x574   :  { %943 = vrot.lane.b32.xlu0 %v2906_v43, %s3453_s7 }
 0x5cb   :  { %v720_v55 = vpop.xlane.xlu0 %719 }
 0x5cc   :  { %2584 = vrcp.f32 %v720_v55  ;;  %v735_v62 = vand.u32 2147483648, %v720_v55  ;;  %v733_v0 = vand.u32 2147483647, %v720_v55  ;;  %vm729_vm7 = vweird.f32 %v720_v55 }
 0x5ce   :  { %v736_v3 = vor.u32 1.1754944e-38, %v735_v62  ;;  %vm734_vm9 = vcmp.eq.f32.partialorder %v733_v0, 8.507059e+37 }
 0x5d0   :  { %v711_v56 = vpop.xlane.xlu1 %710 }
 0x5d1   :  { %v713_v57 = vsub.f32 %v705_v47, %v711_v56 }
 0x5d2   :  { %v2585_v58 = vpop.eup %2584 }
 0x5d3   :  { %v725_v59 = vmul.f32 %v2585_v58, %v720_v55  ;;  %v716_v60 = vmul.f32 1.442695, %v713_v57  ;;  %vm730_vm6 = vweird.f32 %v2585_v58 }
 0x5d4   :  { %vm731_vm8 = vmor %vm729_vm7, %vm730_vm6 }
 0x5d5   :  { %v726_v61 = vsub.f32 1.0, %v725_v59  ;;  %2586 = vpow2.f32 %v716_v60 }
 0x5d7   :  { %v727_v63 = vmul.f32 %v2585_v58, %v726_v61 }
 0x5d8   :  { %v897_v1 = vpop.xlane.xlu1 %896 }
 0x5d9   :  { %v728_v2 = vadd.f32 %v2585_v58, %v727_v63  ;;  %v901_v52 = vsub.f32 %v893_v50, %v897_v1  ;;  %v613_v63 = vpop.f32.mrf.mxu3 }
 0x5db   :  { %v2587_v43 = vpop.eup %2586  ;;  %v732_v4 = vsel %vm731_vm8, %v2585_v58, %v728_v2  ;;  %v903_v5 = vmul.f32 1.442695, %v901_v52 }
 0x5dc   :  { %v737_v6 = vsel %vm734_vm9, %v736_v3, %v732_v4  ;;  %v721_v45 = vsel %vm281_vm2, %v2587_v43, 0.0 }
 0x5dd   :  { %2588 = vpow2.f32 %v903_v5  ;;  %722 = vadd.xlane.f32.xlu2 %v721_v45  ;;  %v738_v7 = vmul.f32 %v2583_v42, %v737_v6  ;;  %v643_v45 = vadd.f32 %v2986_v37, %v613_v63 }
 0x5de   :  { %v866_v10 = vpop.permute.xlu0 %865 }
 0x5df   :  { %2425 = vmatmul.msk.f32.vlgmr.msra.gmra.mxu1 %vm281_vm2, %v738_v7 }
 0x5e0   :  { %1016 = vmatpush.msra.mxu1 %v280_v49 }
 0x5e1   :  { %v616_v5 = vpop.f32.mrf.mxu3 }
 0x5e3   :  { %v2589_v8 = vpop.eup %2588 }
 0x5e4   :  { %v907_v9 = vsel %vm281_vm2, %v2589_v8, 0.0 }
 0x5e5   :  { %908 = vadd.xlane.f32.xlu1 %v907_v9 }
 0x5e6   :  { %v944_v39 = vpop.permute.xlu0 %943 }
 0x5e7   :  { %2432 = vmatmul.msk.f32.vlgmr.msrb.gmra.mxu1 %vm281_vm2, %v866_v10 }
 0x5f5   :  { %969 = vrot.lane.b32.xlu2 %v2930_v54, %s3453_s7 }
 0x5fe   :  { %780 = vrot.lane.b32.xlu1 %v2930_v54, %s3455_s4 }
 0x650   :  { %v723_v12 = vpop.xlane.xlu2 %722 }
 0x651   :  { %2590 = vrcp.f32 %v723_v12  ;;  %v750_v25 = vand.u32 2147483648, %v723_v12  ;;  %vm744_vm11 = vweird.f32 %v723_v12  ;;  %v748_v26 = vand.u32 2147483647, %v723_v12 }
 0x653   :  { %v751_v29 = vor.u32 1.1754944e-38, %v750_v25  ;;  %vm749_vm13 = vcmp.eq.f32.partialorder %v748_v26, 8.507059e+37  ;;  %v646_v25 = vadd.f32 %v2989_v41, %v616_v5  ;;  %v1097_v41 = vld [vmem:[%s3431_s17] sm:$0xff] }
 0x657   :  { %v2591_v13 = vpop.eup %2590 }
 0x658   :  { %v970_v14 = vpop.permute.xlu2 %969  ;;  %v909_v15 = vpop.xlane.xlu1 %908  ;;  %v740_v16 = vmul.f32 %v2591_v13, %v723_v12  ;;  %vm745_vm10 = vweird.f32 %v2591_v13 }
 0x659   :  { %2592 = vrcp.f32 %v909_v15  ;;  %990 = vmatpush.msra.mxu0 %v970_v14  ;;  %vm746_vm12 = vmor %vm744_vm11, %vm745_vm10  ;;  %v924_v32 = vand.u32 2147483648, %v909_v15  ;;  %vm918_vm15 = vweird.f32 %v909_v15  ;;  %v922_v33 = vand.u32 2147483647, %v909_v15 }
 0x65a   :  { %v741_v18 = vsub.f32 1.0, %v740_v16  ;;  %v2657_v14 = vmov 32.0  }
 0x65b   :  { %v925_v42 = vor.u32 1.1754944e-38, %v924_v32  ;;  %vm923_vm4 = vcmp.eq.f32.partialorder %v922_v33, 8.507059e+37 }
 0x65c   :  { %v777_v17 = vpop.f32.mrf.mxu1  ;;  %v742_v20 = vmul.f32 %v2591_v13, %v741_v18 }
 0x65d   :  { %2427 = vmatmul.msk.f32.vlgmr.msra.gmra.mxu3 %vm281_vm2, %v777_v17 }
 0x65e   :  { %v743_v23 = vadd.f32 %v2591_v13, %v742_v20 }
 0x65f   :  { %v2593_v19 = vpop.eup %2592 }
 0x660   :  { %v914_v54 = vmul.f32 %v2593_v19, %v909_v15  ;;  %v747_v27 = vsel %vm746_vm12, %v2591_v13, %v743_v23  ;;  %vm919_vm14 = vweird.f32 %v2593_v19 }
 0x661   :  { %v752_v30 = vsel %vm749_vm13, %v751_v29, %v747_v27  ;;  %vm920_vm3 = vmor %vm918_vm15, %vm919_vm14  ;;  %v1099_v27 = vld [vmem:[%s3431_s17 + $0x10] sm:$0xff]  ;;  %v1098_v29 = vld [vmem:[%s3431_s17 + $0x8] sm:$0xff]  ;;  %vm1148_vm13 = vcmask 523264  }
 0x662   :  { %v915_v24 = vsub.f32 1.0, %v914_v54  ;;  %v753_v36 = vmul.f32 %v2587_v43, %v752_v30 }
 0x664   :  { %v890_v21 = vpop.f32.mrf.mxu1  ;;  %v916_v28 = vmul.f32 %v2593_v19, %v915_v24 }
 0x665   :  { %v894_v22 = vmul.f32 0.35355338, %v890_v21 }
 0x666   :  { %v917_v31 = vadd.f32 %v2593_v19, %v916_v28 }
 0x667   :  { %v898_v51 = vsel %vm281_vm2, %v894_v22, -inf }
 0x668   :  { %899 = vmax.xlane.f32.xlu0 %v898_v51  ;;  %v921_v40 = vsel %vm920_vm3, %v2593_v19, %v917_v31  ;;  %v1100_v51 = vld [vmem:[%s3431_s17 + $0x18] sm:$0xff] }
 0x669   :  { %v926_v44 = vsel %vm923_vm4, %v925_v42, %v921_v40 }
 0x66a   :  { %v927_v46 = vmul.f32 %v2589_v8, %v926_v44  ;;  %v2543_v8 = vld [vmem:[%s3428_s14] ss:$0 sm:$0xff] }
 0x670   :  { %v781_v35 = vpop.permute.xlu1 %780 }
 0x671   :  { %801 = vmatpush.msrb.mxu2 %v781_v35 }
 0x672   :  { %2426 = vmatmul.msk.f32.vlgmr.msrb.gmra.mxu2 %vm281_vm2, %v753_v36 }
 0x673   :  { %964 = vmatpush.msra.mxu2 %v944_v39 }
 0x675   :  { %1123 = vmatpush.msrb.mxu2 %v1100_v51 }
 0x677   :  { %1124 = vmatpush.msrb.mxu2 %v1099_v27 }
 0x679   :  { %1125 = vmatpush.msrb.mxu2 %v1098_v29 }
 0x67a   :  { %2433 = vmatmul.msk.f32.vlgmr.msra.gmra.mxu2 %vm281_vm2, %v927_v46 }
 0x67b   :  { %1126 = vmatpush.msrb.mxu2 %v1097_v41  ;;  %v2444_v41 = vld [vmem:[%s3479_s30 + $0x38] sm:$0xff] }
 0x67c   :  { %1266 = vmatpush.msrb.mxu0 %v2444_v41 }
 0x6db   :  { %v900_v47 = vpop.xlane.xlu0 %899 }
 0x6dc   :  { %v902_v48 = vsub.f32 %v894_v22, %v900_v47 }
 0x6de   :  { %v905_v50 = vmul.f32 1.442695, %v902_v48 }
 0x6e0   :  { %2594 = vpow2.f32 %v905_v50  ;;  %v829_v6 = vpop.f32.mrf.mxu3 }
 0x6e1   :  { %v835_v7 = vadd.f32 %v829_v6, %v643_v45 }
 0x6e6   :  { %v2595_v53 = vpop.eup %2594 }
 0x6e7   :  { %v910_v55 = vsel %vm281_vm2, %v2595_v53, 0.0 }
 0x6e8   :  { %911 = vadd.xlane.f32.xlu1 %v910_v55 }
 0x6f5   :  { %v803_v56 = vpop.f32.mrf.mxu2 }
 0x6f6   :  { %2428 = vmatmul.msk.f32.gmra.mxu3 %vm281_vm2, %v803_v56 }
 0x6fd   :  { %v966_v57 = vpop.f32.mrf.mxu2 }
 0x6fe   :  { %2435 = vmatmul.msk.f32.vlgmr.msra.gmra.mxu1 %vm281_vm2, %v966_v57  ;;  %v1143_v57 = vld [vmem:[%s3433_s19 + $0x38] sm:$0xff] }
 0x6ff   :  { %1163 = vmatpush.msrb.mxu3 %v1143_v57 }
 0x75b   :  { %v912_v58 = vpop.xlane.xlu1 %911 }
 0x75c   :  { %2596 = vrcp.f32 %v912_v58  ;;  %v939_v62 = vand.u32 2147483648, %v912_v58  ;;  %v937_v1 = vand.u32 2147483647, %v912_v58  ;;  %vm933_vm6 = vweird.f32 %v912_v58 }
 0x75d   :  { %2598 = vrcp.f32 %v2657_v14 }
 0x75e   :  { %v940_v52 = vor.u32 1.1754944e-38, %v939_v62  ;;  %vm938_vm8 = vcmp.eq.f32.partialorder %v937_v1, 8.507059e+37 }
 0x762   :  { %v2597_v59 = vpop.eup %2596 }
 0x763   :  { %v929_v60 = vmul.f32 %v2597_v59, %v912_v58  ;;  %vm934_vm5 = vweird.f32 %v2597_v59  ;;  %v2599_v15 = vpop.eup %2598  ;;  %v1142_v58 = vld [vmem:[%s3433_s19 + $0x30] sm:$0xff] }
 0x764   :  { %vm935_vm7 = vmor %vm933_vm6, %vm934_vm5  ;;  %v1043_v16 = vmul.f32 32.0, %v2599_v15  ;;  %vm1047_vm9 = vweird.f32 %v2599_v15  ;;  %1164 = vmatpush.msrb.mxu3 %v1142_v58 }
 0x765   :  { %v930_v61 = vsub.f32 1.0, %v929_v60  ;;  %v1140_v60 = vld [vmem:[%s3433_s19 + $0x20] sm:$0xff] }
 0x766   :  { %v1044_v17 = vsub.f32 1.0, %v1043_v16 }
 0x767   :  { %v931_v0 = vmul.f32 %v2597_v59, %v930_v61  ;;  %v1139_v61 = vld [vmem:[%s3433_s19 + $0x18] sm:$0xff] }
 0x768   :  { %v1045_v37 = vmul.f32 %v2599_v15, %v1044_v17 }
 0x769   :  { %v932_v2 = vadd.f32 %v2597_v59, %v931_v0 }
 0x76a   :  { %v1046_v19 = vadd.f32 %v2599_v15, %v1045_v37 }
 0x76b   :  { %v936_v3 = vsel %vm935_vm7, %v2597_v59, %v932_v2  ;;  %v1141_v59 = vld [vmem:[%s3433_s19 + $0x28] sm:$0xff] }
 0x76c   :  { %v941_v43 = vsel %vm938_vm8, %v940_v52, %v936_v3  ;;  %v3027_v20 = vsel %vm1047_vm9, %v2599_v15, %v1046_v19  ;;  %1165 = vmatpush.msrb.mxu3 %v1141_v59  ;;  %v1138_v52 = vld [vmem:[%s3433_s19 + $0x10] sm:$0xff]  ;;  %v1137_v3 = vld [vmem:[%s3433_s19 + $0x8] sm:$0xff]  ;;  %v2547_v19 = vld [vmem:[%s3434_s20] ss:$0 sm:$0xff] }
 0x76d   :  { %v942_v4 = vmul.f32 %v2595_v53, %v941_v43  ;;  %v2545_v53 = vld [vmem:[%s3430_s16] ss:$0 sm:$0xff] }
 0x76e   :  { %1166 = vmatpush.msrb.mxu3 %v1140_v60  ;;  %v1136_v43 = vld [vmem:[%s3433_s19] sm:$0xff] }
 0x76f   :  { %2434 = vmatmul.msk.f32.vlgmr.msra.gmra.mxu0 %vm281_vm2, %v942_v4  ;;  %v2546_v4 = vld [vmem:[%s3432_s18] ss:$0 sm:$0xff] }
 0x770   :  { %1167 = vmatpush.msrb.mxu3 %v1139_v61 }
 0x772   :  { %1168 = vmatpush.msrb.mxu3 %v1138_v52 }
 0x774   :  { %1169 = vmatpush.msrb.mxu3 %v1137_v3  ;;  %v2652_v3 = vld [vmem:[%s3483_s28] sm:$0xff] }
 0x776   :  { %1170 = vmatpush.msrb.mxu3 %v1136_v43 }
 0x779   :  { %v832_v24 = vpop.f32.mrf.mxu3 }
 0x77a   :  { %v836_v26 = vadd.f32 %v832_v24, %v646_v25 }
 0x77b   :  { %v1018_v9 = vpop.f32.mrf.mxu1 }
 0x77c   :  { %v1024_v10 = vadd.f32 %v1018_v9, %v835_v7 }
 0x77e   :  { %v1030_v11 = vadd.f32 %v2543_v8, %v1024_v10 }
 0x780   :  { %v1032_v12 = vadd.f32 %v1030_v11, %v2883_v34 }
 0x782   :  { %v1036_v13 = vsel %vm140_vm1, %v1032_v12, 0.0 }
 0x783   :  { %1037 = vadd.xlane.f32.xlu0 %v1036_v13 }
 0x7ec   :  { %v992_v18 = vpop.f32.mrf.mxu0 }
 0x7ed   :  { %2436 = vmatmul.msk.f32.gmra.mxu1 %vm281_vm2, %v992_v18 }
 0x7f6   :  { %v1038_v54 = vpop.xlane.xlu0 %1037 }
 0x7f7   :  { %v1049_v21 = vmul.f32 %v3027_v20, %v1038_v54 }
 0x7f9   :  { %v1051_v34 = vsub.f32 %v1032_v12, %v1049_v21 }
 0x7fb   :  { %v1053_v22 = vmul.f32 %v1051_v34, %v1051_v34 }
 0x7fd   :  { %v1055_v23 = vsel %vm140_vm1, %v1053_v22, 0.0 }
 0x7fe   :  { %1056 = vadd.xlane.f32.xlu2 %v1055_v23 }
 0x86a   :  { %v1021_v28 = vpop.f32.mrf.mxu1 }
 0x86b   :  { %v1025_v30 = vadd.f32 %v1021_v28, %v836_v26 }
 0x86d   :  { %v1031_v31 = vadd.f32 %v2543_v8, %v1025_v30  ;;  %v2458_v30 = vld [vmem:[%s3478_s6 + $0x38] sm:$0xff] }
 0x86e   :  { %1338 = vmatpush.msra.mxu2 %v2458_v30 }
 0x86f   :  { %v1033_v32 = vadd.f32 %v1031_v31, %v2893_v38  ;;  %v2544_v38 = vld [vmem:[%s3429_s15] ss:$0 sm:$0xff]  ;;  %v2451_v31 = vld [vmem:[%s3480_s12 + $0x38] sm:$0xff] }
 0x870   :  { %1299 = vmatpush.msrb.mxu1 %v2451_v31 }
 0x871   :  { %v1057_v33 = vpop.xlane.xlu2 %1056  ;;  %v1039_v35 = vsel %vm140_vm1, %v1033_v32, 0.0 }
 0x872   :  { %v1061_v36 = vmul.f32 %v1057_v33, %v3027_v20  ;;  %1040 = vadd.xlane.f32.xlu0 %v1039_v35  ;;  %v2443_v33 = vld [vmem:[%s3479_s30 + $0x30] sm:$0xff] }
 0x873   :  { %v2450_v35 = vld [vmem:[%s3480_s12 + $0x30] sm:$0xff]  ;;  %1267 = vmatpush.msrb.mxu0 %v2443_v33 }
 0x874   :  { %v1063_v39 = vadd.f32 1e-05, %v1061_v36  ;;  %v2456_v36 = vld [vmem:[%s3478_s6 + $0x28] sm:$0xff]  ;;  %1300 = vmatpush.msrb.mxu1 %v2450_v35 }
 0x876   :  { %2600 = vrsqrt.f32 %v1063_v39  ;;  %vm1071_vm11 = vweird.f32 %v1063_v39 }
 0x87c   :  { %v2601_v40 = vpop.eup %2600 }
 0x87d   :  { %v1066_v42 = vmul.f32 %v2601_v40, %v1063_v39  ;;  %vm1072_vm10 = vweird.f32 %v2601_v40  ;;  %v2442_v39 = vld [vmem:[%s3479_s30 + $0x28] sm:$0xff] }
 0x87e   :  { %vm1073_vm12 = vmor %vm1071_vm11, %vm1072_vm10  ;;  %1268 = vmatpush.msrb.mxu0 %v2442_v39 }
 0x87f   :  { %v1067_v44 = vmul.f32 %v2601_v40, %v1066_v42 }
 0x881   :  { %v1068_v46 = vmul.f32 0.5, %v1067_v44  ;;  %v2455_v44 = vld [vmem:[%s3478_s6 + $0x20] sm:$0xff] }
 0x883   :  { %v1069_v47 = vsub.f32 1.5, %v1068_v46 }
 0x885   :  { %v1070_v48 = vmul.f32 %v2601_v40, %v1069_v47  ;;  %v2441_v47 = vld [vmem:[%s3479_s30 + $0x20] sm:$0xff] }
 0x886   :  { %1269 = vmatpush.msrb.mxu0 %v2441_v47 }
 0x887   :  { %v1074_v49 = vsel %vm1073_vm12, %v2601_v40, %v1070_v48  ;;  %v2449_v40 = vld [vmem:[%s3480_s12 + $0x28] sm:$0xff]  ;;  %v2448_v48 = vld [vmem:[%s3480_s12 + $0x20] sm:$0xff] }
 0x888   :  { %v1085_v50 = vmul.f32 %v1074_v49, %v1051_v34  ;;  %1301 = vmatpush.msrb.mxu1 %v2449_v40 }
 0x88a   :  { %v1090_v55 = vmul.f32 %v2544_v38, %v1085_v50  ;;  %1302 = vmatpush.msrb.mxu1 %v2448_v48 }
 0x88c   :  { %v1095_v56 = vadd.f32 %v2545_v53, %v1090_v55 }
 0x88e   :  { %2437 = vmatmul.msk.f32.vlgmr.msrb.gmra.mxu2 %vm140_vm1, %v1095_v56 }
 0x8e5   :  { %v1041_v62 = vpop.xlane.xlu0 %1040 }
 0x8e6   :  { %v1050_v63 = vmul.f32 %v3027_v20, %v1041_v62  ;;  %v2548_v62 = vld [vmem:[%s3435_s21] ss:$0 sm:$0xff] }
 0x8e8   :  { %v1052_v0 = vsub.f32 %v1033_v32, %v1050_v63  ;;  %v2457_v32 = vld [vmem:[%s3478_s6 + $0x30] sm:$0xff]  ;;  %s3491_s6 = sld [smem:[#allocation15_spill]] }
 0x8e9   :  { %1339 = vmatpush.msra.mxu2 %v2457_v32 }
 0x8ea   :  { %v1054_v1 = vmul.f32 %v1052_v0, %v1052_v0 }
 0x8eb   :  { %1340 = vmatpush.msra.mxu2 %v2456_v36 }
 0x8ec   :  { %v1058_v2 = vsel %vm140_vm1, %v1054_v1, 0.0  ;;  %v2549_v1 = vld [vmem:[%s3436_s22] ss:$0 sm:$0xff] }
 0x8ed   :  { %1059 = vadd.xlane.f32.xlu1 %v1058_v2  ;;  %1341 = vmatpush.msra.mxu2 %v2455_v44 }
 0x911   :  { %v1128_v5 = vpop.f32.mrf.mxu2 }
 0x912   :  { %v1129_v6 = vadd.f32 %v2546_v4, %v1128_v5 }
 0x914   :  { %v1134_v45 = vmax.f32 %v1129_v6, 0.0 }
 0x916   :  { %2439 = vmatmul.msk.f32.vlgmr.msrb.gmra.mxu3 %vm1148_vm13, %v1134_v45 }
 0x960   :  { %v1060_v7 = vpop.xlane.xlu1 %1059 }
 0x961   :  { %v1062_v8 = vmul.f32 %v1060_v7, %v3027_v20 }
 0x963   :  { %v1064_v9 = vadd.f32 1e-05, %v1062_v8  ;;  %v2550_v8 = vld [vmem:[%s3486_s10 + $0x1] ss:$0 sm:$0xff]  ;;  %s3489_s10 = smov 104  }
 0x965   :  { %2602 = vrsqrt.f32 %v1064_v9  ;;  %vm1081_vm15 = vweird.f32 %v1064_v9 }
 0x96b   :  { %v2603_v10 = vpop.eup %2602 }
 0x96c   :  { %v1076_v11 = vmul.f32 %v2603_v10, %v1064_v9  ;;  %vm1082_vm14 = vweird.f32 %v2603_v10  ;;  %v2551_v9 = vld [vmem:[%s3485_s2 + $0x1] ss:$0 sm:$0xff] }
 0x96d   :  { %vm1083_vm3 = vmor %vm1081_vm15, %vm1082_vm14 }
 0x96e   :  { %v1077_v12 = vmul.f32 %v2603_v10, %v1076_v11 }
 0x970   :  { %v1078_v13 = vmul.f32 0.5, %v1077_v12 }
 0x972   :  { %v1079_v14 = vsub.f32 1.5, %v1078_v13 }
 0x974   :  { %v1080_v15 = vmul.f32 %v2603_v10, %v1079_v14  ;;  %v2552_v14 = vld [vmem:[%s3484_s0 + $0x1] ss:$0 sm:$0xff] }
 0x976   :  { %v1084_v16 = vsel %vm1083_vm3, %v2603_v10, %v1080_v15 }
 0x977   :  { %v1086_v17 = vmul.f32 %v1084_v16, %v1052_v0 }
 0x979   :  { %v1091_v18 = vmul.f32 %v2544_v38, %v1086_v17 }
 0x97b   :  { %v1096_v37 = vadd.f32 %v2545_v53, %v1091_v18 }
 0x97d   :  { %2438 = vmatmul.msk.f32.gmra.mxu2 %vm140_vm1, %v1096_v37 }
 0x999   :  { %v1172_v54 = vpop.f32.mrf.mxu3 }
 0x99a   :  { %v1173_v21 = vadd.f32 %v2547_v19, %v1172_v54 }
 0x99c   :  { %v1178_v34 = vadd.f32 %v1173_v21, %v1095_v56 }
 0x99e   :  { %v1182_v22 = vsel %vm140_vm1, %v1178_v34, 0.0 }
 0x99f   :  { %1183 = vadd.xlane.f32.xlu0 %v1182_v22 }
 0xa00   :  { %v1131_v23 = vpop.f32.mrf.mxu2 }
 0xa01   :  { %v1132_v24 = vadd.f32 %v2546_v4, %v1131_v23 }
 0xa03   :  { %v1135_v25 = vmax.f32 %v1132_v24, 0.0 }
 0xa05   :  { %2440 = vmatmul.msk.f32.gmra.mxu3 %vm1148_vm13, %v1135_v25 }
 0xa12   :  { %v1184_v51 = vpop.xlane.xlu0 %1183 }
 0xa13   :  { %v1188_v26 = vmul.f32 %v1184_v51, %v3027_v20 }
 0xa15   :  { %v1190_v27 = vsub.f32 %v1178_v34, %v1188_v26 }
 0xa17   :  { %v1192_v28 = vmul.f32 %v1190_v27, %v1190_v27 }
 0xa19   :  { %v1194_v29 = vsel %vm140_vm1, %v1192_v28, 0.0 }
 0xa1a   :  { %1195 = vadd.xlane.f32.xlu1 %v1194_v29 }
 0xa88   :  { %v1175_v42 = vpop.f32.mrf.mxu3 }
 0xa89   :  { %v1176_v46 = vadd.f32 %v2547_v19, %v1175_v42 }
 0xa8b   :  { %v1179_v38 = vadd.f32 %v1176_v46, %v1096_v37 }
 0xa8d   :  { %v1196_v49 = vpop.xlane.xlu1 %1195  ;;  %v1185_v50 = vsel %vm140_vm1, %v1179_v38, 0.0 }
 0xa8e   :  { %v1200_v53 = vmul.f32 %v1196_v49, %v3027_v20  ;;  %1186 = vadd.xlane.f32.xlu0 %v1185_v50 }
 0xa90   :  { %v1202_v55 = vadd.f32 1e-05, %v1200_v53 }
 0xa92   :  { %2604 = vrsqrt.f32 %v1202_v55  ;;  %vm1210_vm5 = vweird.f32 %v1202_v55 }
 0xa98   :  { %v2605_v56 = vpop.eup %2604 }
 0xa99   :  { %v1205_v57 = vmul.f32 %v2605_v56, %v1202_v55  ;;  %vm1211_vm4 = vweird.f32 %v2605_v56 }
 0xa9a   :  { %vm1212_vm6 = vmor %vm1210_vm5, %vm1211_vm4 }
 0xa9b   :  { %v1206_v58 = vmul.f32 %v2605_v56, %v1205_v57 }
 0xa9d   :  { %v1207_v59 = vmul.f32 0.5, %v1206_v58 }
 0xa9f   :  { %v1208_v60 = vsub.f32 1.5, %v1207_v59 }
 0xaa1   :  { %v1209_v61 = vmul.f32 %v2605_v56, %v1208_v60 }
 0xaa3   :  { %v1213_v63 = vsel %vm1212_vm6, %v2605_v56, %v1209_v61 }
 0xaa4   :  { %v1224_v0 = vmul.f32 %v1213_v63, %v1190_v27  ;;  %v2653_v27 = vld [vmem:[%s3483_s28 + $0x8] sm:$0xff]  ;;  %s3488_s28 = smov 112  }
 0xaa6   :  { %v1229_v2 = vmul.f32 %v2548_v62, %v1224_v0 }
 0xaa8   :  { %v3137_v52 = vadd.f32 %v2549_v1, %v1229_v2 }
 0xaaa   :  { %2460 = vmatmul.msk.f32.vlgmr.msra.gmra.mxu2 %vm140_vm1, %v3137_v52  ;;  %v1236_v43 = vadd.f32 %v2652_v3, %v3137_v52 }
 0xaac   :  { %2446 = vmatmul.msk.f32.vlgmr.msrb.gmra.mxu0 %vm140_vm1, %v1236_v43  ;;  %2453 = vmatmul.msk.f32.vlgmr.msrb.gmra.mxu1 %vm140_vm1, %v1236_v43 }
 0xb01   :  { %v1187_v4 = vpop.xlane.xlu0 %1186 }
 0xb02   :  { %v1189_v5 = vmul.f32 %v1187_v4, %v3027_v20 }
 0xb04   :  { %v1191_v6 = vsub.f32 %v1179_v38, %v1189_v5 }
 0xb06   :  { %v1193_v45 = vmul.f32 %v1191_v6, %v1191_v6 }
 0xb08   :  { %v1197_v7 = vsel %vm140_vm1, %v1193_v45, 0.0 }
 0xb09   :  { %1198 = vadd.xlane.f32.xlu1 %v1197_v7 }
 0xb29   :  { %v1271_v10 = vpop.f32.mrf.mxu0  ;;  %v1304_v11 = vpop.f32.mrf.mxu1 }
 0xb2a   :  { %v3155_v12 = vadd.f32 %v2550_v8, %v1271_v10  ;;  %v3157_v13 = vadd.f32 %v2551_v9, %v1304_v11 }
 0xb2c   :  { %1504 = vrot.lane.b32.xlu0 %v3157_v13, %s3487_s3  ;;  %2466 = vmatpush.xpose.msk.msra.mxu3 %vm281_vm2, %v3157_v13 }
 0xb2d   :  { %1502 = vrot.lane.b32.xlu1 %v3155_v12, %s3487_s3  ;;  %v1343_v15 = vpop.f32.mrf.mxu2 }
 0xb2e   :  { %v3168_v16 = vadd.f32 %v2552_v14, %v1343_v15 }
 0xb2f   :  { %2467 = vmatmul.msk.f32.vlgmr.msra.gmra.mxu3 %vm281_vm2, %v3155_v12 }
 0xb30   :  { %1474 = vmatpush.msrb.mxu3 %v3168_v16 }
 0xb35   :  { %1609 = vrot.lane.b32.xlu1 %v3168_v16, %s3487_s3 }
 0xb7c   :  { %v1199_v17 = vpop.xlane.xlu1 %1198 }
 0xb7d   :  { %v1201_v18 = vmul.f32 %v1199_v17, %v3027_v20 }
 0xb7f   :  { %v1203_v37 = vadd.f32 1e-05, %v1201_v18 }
 0xb81   :  { %2606 = vrsqrt.f32 %v1203_v37  ;;  %vm1220_vm8 = vweird.f32 %v1203_v37 }
 0xb87   :  { %v2607_v19 = vpop.eup %2606 }
 0xb88   :  { %v1215_v54 = vmul.f32 %v2607_v19, %v1203_v37  ;;  %vm1221_vm7 = vweird.f32 %v2607_v19  ;;  %v2462_v37 = vld [vmem:[%s3427_s13 + $0x20] sm:$0xff] }
 0xb89   :  { %vm1222_vm9 = vmor %vm1220_vm8, %vm1221_vm7 }
 0xb8a   :  { %v1216_v21 = vmul.f32 %v2607_v19, %v1215_v54 }
 0xb8c   :  { %v1217_v34 = vmul.f32 0.5, %v1216_v21 }
 0xb8e   :  { %v1218_v22 = vsub.f32 1.5, %v1217_v34 }
 0xb90   :  { %v1219_v23 = vmul.f32 %v2607_v19, %v1218_v22 }
 0xb92   :  { %v1223_v24 = vsel %vm1222_vm9, %v2607_v19, %v1219_v23 }
 0xb93   :  { %v1225_v25 = vmul.f32 %v1223_v24, %v1191_v6 }
 0xb95   :  { %v1230_v51 = vmul.f32 %v2548_v62, %v1225_v25 }
 0xb97   :  { %v3176_v26 = vadd.f32 %v2549_v1, %v1230_v51 }
 0xb99   :  { %2461 = vmatmul.msk.f32.gmra.mxu2 %vm140_vm1, %v3176_v26  ;;  %v1237_v28 = vadd.f32 %v2653_v27, %v3176_v26 }
 0xb9b   :  { %2447 = vmatmul.msk.f32.gmra.mxu0 %vm140_vm1, %v1237_v28  ;;  %2454 = vmatmul.msk.f32.gmra.mxu1 %vm140_vm1, %v1237_v28 }
 0xb9e   :  { %v1505_v29 = vpop.permute.xlu0 %1504 }
 0xb9f   :  { %v1503_v30 = vpop.permute.xlu1 %1502  ;;  %2472 = vmatpush.xpose.msk.msra.mxu1 %vm281_vm2, %v1505_v29 }
 0xba3   :  { %2473 = vmatmul.msk.f32.vlgmr.msra.gmra.mxu1 %vm281_vm2, %v1503_v30 }
 0xba7   :  { %v1610_v41 = vpop.permute.xlu1 %1609 }
 0xba8   :  { %1630 = vmatpush.msra.mxu3 %v1610_v41 }
 0xbb2   :  { %v1377_v31 = vpop.f32.mrf.mxu3 }
 0xbb3   :  { %v1406_v32 = vmul.f32 0.35355338, %v1377_v31 }
 0xbb5   :  { %v1408_v33 = vsel %vm281_vm2, %v1406_v32, -inf }
 0xbb6   :  { %1409 = vmax.xlane.f32.xlu2 %v1408_v33 }
 0xc18   :  { %v1274_v35 = vpop.f32.mrf.mxu0  ;;  %v1307_v36 = vpop.f32.mrf.mxu1 }
 0xc19   :  { %v3189_v39 = vadd.f32 %v2550_v8, %v1274_v35  ;;  %v3191_v40 = vadd.f32 %v2551_v9, %v1307_v36  ;;  %v2463_v36 = vld [vmem:[%s3427_s13 + $0x28] sm:$0xff] }
 0xc1a   :  { %1683 = vmatpush.msrb.mxu1 %v2463_v36 }
 0xc1b   :  { %2468 = vmatpush.xpose.msk.msra.mxu0 %vm281_vm2, %v3191_v40  ;;  %1530 = vrot.lane.b32.xlu1 %v3189_v39, %s3487_s3 }
 0xc1c   :  { %v1346_v42 = vpop.f32.mrf.mxu2 }
 0xc1d   :  { %v3197_v44 = vadd.f32 %v2552_v14, %v1346_v42 }
 0xc1e   :  { %2469 = vmatmul.msk.f32.vlgmr.msra.gmra.mxu0 %vm281_vm2, %v3189_v39 }
 0xc1f   :  { %1497 = vmatpush.msrb.mxu0 %v3197_v44 }
 0xc20   :  { %v1527_v46 = vpop.f32.mrf.mxu1 }
 0xc21   :  { %v1558_v47 = vmul.f32 0.35355338, %v1527_v46 }
 0xc23   :  { %1722 = vrot.lane.b32.xlu1 %v3157_v13, %s3488_s28  ;;  %v1560_v48 = vsel %vm281_vm2, %v1558_v47, -inf }
 0xc24   :  { %1561 = vmax.xlane.f32.xlu2 %v1560_v48 }
 0xc29   :  { %v1410_v38 = vpop.xlane.xlu2 %1409 }
 0xc2a   :  { %v1414_v49 = vsub.f32 %v1406_v32, %v1410_v38 }
 0xc2b   :  { %1720 = vrot.lane.b32.xlu1 %v3155_v12, %s3488_s28 }
 0xc2c   :  { %v1416_v50 = vmul.f32 1.442695, %v1414_v49 }
 0xc2e   :  { %2608 = vpow2.f32 %v1416_v50 }
 0xc34   :  { %v2609_v53 = vpop.eup %2608 }
 0xc35   :  { %v1420_v55 = vsel %vm281_vm2, %v2609_v53, 0.0 }
 0xc36   :  { %1421 = vadd.xlane.f32.xlu0 %v1420_v55 }
 0xc8d   :  { %v1531_v0 = vpop.permute.xlu1 %1530 }
 0xc95   :  { %v1723_v8 = vpop.permute.xlu1 %1722 }
 0xc97   :  { %v1562_v56 = vpop.xlane.xlu2 %1561 }
 0xc98   :  { %v1566_v57 = vsub.f32 %v1558_v47, %v1562_v56 }
 0xc9a   :  { %v1568_v58 = vmul.f32 1.442695, %v1566_v57 }
 0xc9b   :  { %v1403_v9 = vpop.f32.mrf.mxu0 }
 0xc9c   :  { %2610 = vpow2.f32 %v1568_v58  ;;  %v1407_v10 = vmul.f32 0.35355338, %v1403_v9 }
 0xc9d   :  { %v1721_v27 = vpop.permute.xlu1 %1720 }
 0xc9e   :  { %v1411_v11 = vsel %vm281_vm2, %v1407_v10, -inf }
 0xca2   :  { %v2611_v59 = vpop.eup %2610 }
 0xca3   :  { %v1572_v60 = vsel %vm281_vm2, %v2611_v59, 0.0 }
 0xca4   :  { %1573 = vadd.xlane.f32.xlu2 %v1572_v60 }
 0xca9   :  { %v1422_v61 = vpop.xlane.xlu0 %1421 }
 0xcaa   :  { %2612 = vrcp.f32 %v1422_v61  ;;  %v1437_v2 = vand.u32 2147483648, %v1422_v61  ;;  %v1435_v43 = vand.u32 2147483647, %v1422_v61  ;;  %vm1431_vm11 = vweird.f32 %v1422_v61 }
 0xcac   :  { %v1438_v5 = vor.u32 1.1754944e-38, %v1437_v2  ;;  %vm1436_vm14 = vcmp.eq.f32.partialorder %v1435_v43, 8.507059e+37 }
 0xcb0   :  { %v2613_v62 = vpop.eup %2612 }
 0xcb1   :  { %v1427_v63 = vmul.f32 %v2613_v62, %v1422_v61  ;;  %vm1432_vm10 = vweird.f32 %v2613_v62 }
 0xcb2   :  { %vm1433_vm12 = vmor %vm1431_vm11, %vm1432_vm10 }
 0xcb3   :  { %v1428_v1 = vsub.f32 1.0, %v1427_v63 }
 0xcb5   :  { %v1429_v3 = vmul.f32 %v2613_v62, %v1428_v1 }
 0xcb7   :  { %v1430_v4 = vadd.f32 %v2613_v62, %v1429_v3 }
 0xcb9   :  { %v1434_v6 = vsel %vm1433_vm12, %v2613_v62, %v1430_v4 }
 0xcba   :  { %v1439_v45 = vsel %vm1436_vm14, %v1438_v5, %v1434_v6 }
 0xcbb   :  { %v1440_v7 = vmul.f32 %v2609_v53, %v1439_v45 }
 0xcbc   :  { %1532 = vrot.lane.b32.xlu2 %v3191_v40, %s3487_s3 }
 0xcbd   :  { %2470 = vmatmul.msk.f32.vlgmr.msrb.gmra.mxu3 %vm281_vm2, %v1440_v7 }
 0xcbe   :  { %2482 = vmatpush.xpose.msk.msrb.mxu3 %vm281_vm2, %v1723_v8 }
 0xce5   :  { %1412 = vmax.xlane.f32.xlu2 %v1411_v11 }
 0xcfd   :  { %1826 = vrot.lane.b32.xlu2 %v3168_v16, %s3488_s28 }
 0xd05   :  { %1939 = vrot.lane.b32.xlu2 %v3191_v40, %s3489_s10 }
 0xd17   :  { %v1574_v14 = vpop.xlane.xlu2 %1573 }
 0xd18   :  { %2614 = vrcp.f32 %v1574_v14  ;;  %v1589_v54 = vand.u32 2147483648, %v1574_v14  ;;  %v1587_v34 = vand.u32 2147483647, %v1574_v14  ;;  %vm1583_vm3 = vweird.f32 %v1574_v14 }
 0xd1a   :  { %v1590_v23 = vor.u32 1.1754944e-38, %v1589_v54  ;;  %vm1588_vm5 = vcmp.eq.f32.partialorder %v1587_v34, 8.507059e+37 }
 0xd1e   :  { %v2615_v15 = vpop.eup %2614 }
 0xd1f   :  { %v1579_v17 = vmul.f32 %v2615_v15, %v1574_v14  ;;  %v1533_v18 = vpop.permute.xlu2 %1532  ;;  %vm1584_vm15 = vweird.f32 %v2615_v15 }
 0xd20   :  { %2474 = vmatpush.xpose.msk.msrb.mxu2 %vm281_vm2, %v1533_v18  ;;  %vm1585_vm4 = vmor %vm1583_vm3, %vm1584_vm15 }
 0xd21   :  { %v1580_v19 = vsub.f32 1.0, %v1579_v17 }
 0xd23   :  { %v1581_v21 = vmul.f32 %v2615_v15, %v1580_v19  ;;  %2475 = vmatmul.msk.f32.vlgmr.msrb.gmra.mxu2 %vm281_vm2, %v1531_v0 }
 0xd24   :  { %1712 = vmatpush.msra.mxu2 %v2462_v37 }
 0xd25   :  { %v1582_v22 = vadd.f32 %v2615_v15, %v1581_v21 }
 0xd27   :  { %v1586_v24 = vsel %vm1585_vm4, %v2615_v15, %v1582_v22 }
 0xd28   :  { %v1591_v25 = vsel %vm1588_vm5, %v1590_v23, %v1586_v24 }
 0xd29   :  { %v1592_v51 = vmul.f32 %v2611_v59, %v1591_v25 }
 0xd2b   :  { %2476 = vmatmul.msk.f32.vlgmr.msra.gmra.mxu3 %vm281_vm2, %v1592_v51 }
 0xd33   :  { %2483 = vmatmul.msk.f32.vlgmr.msrb.gmra.mxu3 %vm281_vm2, %v1721_v27 }
 0xd40   :  { %v1476_v28 = vpop.f32.mrf.mxu3 }
 0xd41   :  { %2480 = vmatmul.msk.f32.vlgmr.msra.gmra.mxu2 %vm281_vm2, %v1476_v28 }
 0xd58   :  { %v1413_v29 = vpop.xlane.xlu2 %1412 }
 0xd59   :  { %v1415_v30 = vsub.f32 %v1407_v10, %v1413_v29 }
 0xd5b   :  { %v1418_v41 = vmul.f32 1.442695, %v1415_v30 }
 0xd5d   :  { %2616 = vpow2.f32 %v1418_v41 }
 0xd60   :  { %v1827_v31 = vpop.permute.xlu2 %1826 }
 0xd61   :  { %1847 = vmatpush.msra.mxu3 %v1827_v31 }
 0xd63   :  { %v2617_v32 = vpop.eup %2616 }
 0xd64   :  { %v1423_v33 = vsel %vm281_vm2, %v2617_v32, 0.0 }
 0xd65   :  { %1424 = vadd.xlane.f32.xlu0 %v1423_v33 }
 0xd68   :  { %v1940_v35 = vpop.permute.xlu2 %1939 }
 0xd69   :  { %2492 = vmatpush.xpose.msk.msrb.mxu3 %vm281_vm2, %v1940_v35 }
 0xd79   :  { %1636 = vrot.lane.b32.xlu0 %v3197_v44, %s3487_s3 }
 0xd81   :  { %1911 = vrot.lane.b32.xlu0 %v3157_v13, %s3489_s10 }
 0xda6   :  { %v1555_v42 = vpop.f32.mrf.mxu2 }
 0xda7   :  { %v1559_v46 = vmul.f32 0.35355338, %v1555_v42 }
 0xda9   :  { %v1563_v47 = vsel %vm281_vm2, %v1559_v46, -inf }
 0xdaa   :  { %1564 = vmax.xlane.f32.xlu1 %v1563_v47 }
 0xdae   :  { %v1632_v48 = vpop.f32.mrf.mxu3 }
 0xdaf   :  { %2478 = vmatmul.msk.f32.vlgmr.msrb.gmra.mxu1 %vm281_vm2, %v1632_v48 }
 0xdb6   :  { %v1745_v43 = vpop.f32.mrf.mxu3 }
 0xdb7   :  { %v1776_v4 = vmul.f32 0.35355338, %v1745_v43 }
 0xdb9   :  { %v1778_v5 = vsel %vm281_vm2, %v1776_v4, -inf }
 0xdc3   :  { %1750 = vrot.lane.b32.xlu1 %v3191_v40, %s3488_s28 }
 0xdcb   :  { %1937 = vrot.lane.b32.xlu1 %v3189_v39, %s3489_s10 }
 0xdd8   :  { %v1425_v13 = vpop.xlane.xlu0 %1424 }
 0xdd9   :  { %2618 = vrcp.f32 %v1425_v13  ;;  %v1452_v53 = vand.u32 2147483648, %v1425_v13  ;;  %v1450_v56 = vand.u32 2147483647, %v1425_v13  ;;  %vm1446_vm7 = vweird.f32 %v1425_v13 }
 0xddb   :  { %v1453_v58 = vor.u32 1.1754944e-38, %v1452_v53  ;;  %vm1451_vm9 = vcmp.eq.f32.partialorder %v1450_v56, 8.507059e+37 }
 0xddf   :  { %v2619_v38 = vpop.eup %2618 }
 0xde0   :  { %v1442_v49 = vmul.f32 %v2619_v38, %v1425_v13  ;;  %vm1447_vm6 = vweird.f32 %v2619_v38 }
 0xde1   :  { %vm1448_vm8 = vmor %vm1446_vm7, %vm1447_vm6 }
 0xde2   :  { %v1443_v50 = vsub.f32 1.0, %v1442_v49  ;;  %v3262_v49 = vpop.f32.mrf.mxu2 }
 0xde4   :  { %v1444_v55 = vmul.f32 %v2619_v38, %v1443_v50 }
 0xde6   :  { %v1445_v57 = vadd.f32 %v2619_v38, %v1444_v55 }
 0xde8   :  { %v1449_v59 = vsel %vm1448_vm8, %v2619_v38, %v1445_v57  ;;  %v2464_v38 = vld [vmem:[%s3427_s13 + $0x30] sm:$0xff] }
 0xde9   :  { %v1454_v60 = vsel %vm1451_vm9, %v1453_v58, %v1449_v59  ;;  %1899 = vmatpush.msra.mxu1 %v2464_v38 }
 0xdea   :  { %v1455_v40 = vmul.f32 %v2617_v32, %v1454_v60 }
 0xdeb   :  { %v1637_v61 = vpop.permute.xlu0 %1636 }
 0xdec   :  { %2471 = vmatmul.msk.f32.vlgmr.msrb.gmra.mxu0 %vm281_vm2, %v1455_v40 }
 0xded   :  { %1657 = vmatpush.msra.mxu0 %v1637_v61 }
 0xdf3   :  { %v1912_v62 = vpop.permute.xlu0 %1911 }
 0xdf4   :  { %2490 = vmatpush.xpose.msk.msrb.mxu2 %vm281_vm2, %v1912_v62 }
 0xe1d   :  { %v1565_v63 = vpop.xlane.xlu1 %1564 }
 0xe1e   :  { %v1567_v0 = vsub.f32 %v1559_v46, %v1565_v63 }
 0xe20   :  { %v1570_v1 = vmul.f32 1.442695, %v1567_v0 }
 0xe22   :  { %2620 = vpow2.f32 %v1570_v1 }
 0xe28   :  { %v2621_v2 = vpop.eup %2620 }
 0xe29   :  { %v1575_v3 = vsel %vm281_vm2, %v2621_v2, 0.0 }
 0xe2a   :  { %1576 = vadd.xlane.f32.xlu0 %v1575_v3 }
 0xe32   :  { %1779 = vmax.xlane.f32.xlu0 %v1778_v5 }
 0xe35   :  { %v1751_v6 = vpop.permute.xlu1 %1750 }
 0xe36   :  { %2484 = vmatpush.xpose.msk.msrb.mxu0 %vm281_vm2, %v1751_v6 }
 0xe3d   :  { %v1938_v13 = vpop.permute.xlu1 %1937 }
 0xe46   :  { %1748 = vrot.lane.b32.xlu0 %v3189_v39, %s3488_s28 }
 0xe69   :  { %v1499_v45 = vpop.f32.mrf.mxu0 }
 0xe6a   :  { %2481 = vmatmul.msk.f32.gmra.mxu2 %vm281_vm2, %v1499_v45 }
 0xe9d   :  { %v1577_v7 = vpop.xlane.xlu0 %1576 }
 0xe9e   :  { %2622 = vrcp.f32 %v1577_v7  ;;  %v1604_v15 = vand.u32 2147483648, %v1577_v7  ;;  %v1602_v37 = vand.u32 2147483647, %v1577_v7  ;;  %vm1598_vm11 = vweird.f32 %v1577_v7 }
 0xea0   :  { %v1605_v39 = vor.u32 1.1754944e-38, %v1604_v15  ;;  %vm1603_vm14 = vcmp.eq.f32.partialorder %v1602_v37, 8.507059e+37 }
 0xea4   :  { %v2623_v8 = vpop.eup %2622 }
 0xea5   :  { %v1594_v9 = vmul.f32 %v2623_v8, %v1577_v7  ;;  %v1780_v10 = vpop.xlane.xlu0 %1779  ;;  %vm1599_vm10 = vweird.f32 %v2623_v8 }
 0xea6   :  { %v1784_v11 = vsub.f32 %v1776_v4, %v1780_v10  ;;  %vm1600_vm12 = vmor %vm1598_vm11, %vm1599_vm10 }
 0xea7   :  { %v1595_v14 = vsub.f32 1.0, %v1594_v9 }
 0xea8   :  { %v1786_v17 = vmul.f32 1.442695, %v1784_v11 }
 0xea9   :  { %v1596_v18 = vmul.f32 %v2623_v8, %v1595_v14 }
 0xeaa   :  { %2624 = vpow2.f32 %v1786_v17 }
 0xeab   :  { %v1597_v19 = vadd.f32 %v2623_v8, %v1596_v18 }
 0xead   :  { %v1601_v54 = vsel %vm1600_vm12, %v2623_v8, %v1597_v19 }
 0xeae   :  { %v1606_v21 = vsel %vm1603_vm14, %v1605_v39, %v1601_v54 }
 0xeaf   :  { %v1607_v34 = vmul.f32 %v2621_v2, %v1606_v21 }
 0xeb0   :  { %v2625_v22 = vpop.eup %2624 }
 0xeb1   :  { %2477 = vmatmul.msk.f32.vlgmr.msra.gmra.mxu0 %vm281_vm2, %v1607_v34  ;;  %v1790_v23 = vsel %vm281_vm2, %v2625_v22, 0.0 }
 0xeb2   :  { %1791 = vadd.xlane.f32.xlu0 %v1790_v23 }
 0xeb8   :  { %v1749_v24 = vpop.permute.xlu0 %1748 }
 0xeb9   :  { %2485 = vmatmul.msk.f32.vlgmr.msrb.gmra.mxu0 %vm281_vm2, %v1749_v24 }
 0xec6   :  { %1909 = vrot.lane.b32.xlu0 %v3155_v12, %s3489_s10 }
 0xeed   :  { %v3264_v56 = vpop.f32.mrf.mxu2 }
 0xf25   :  { %v1792_v25 = vpop.xlane.xlu0 %1791 }
 0xf26   :  { %2626 = vrcp.f32 %v1792_v25  ;;  %v1807_v30 = vand.u32 2147483648, %v1792_v25  ;;  %v1805_v31 = vand.u32 2147483647, %v1792_v25  ;;  %vm1801_vm3 = vweird.f32 %v1792_v25 }
 0xf28   :  { %v1808_v33 = vor.u32 1.1754944e-38, %v1807_v30  ;;  %vm1806_vm5 = vcmp.eq.f32.partialorder %v1805_v31, 8.507059e+37 }
 0xf2c   :  { %v2627_v51 = vpop.eup %2626 }
 0xf2d   :  { %v1797_v27 = vmul.f32 %v2627_v51, %v1792_v25  ;;  %vm1802_vm15 = vweird.f32 %v2627_v51 }
 0xf2e   :  { %v1659_v28 = vpop.f32.mrf.mxu0  ;;  %vm1803_vm4 = vmor %vm1801_vm3, %vm1802_vm15 }
 0xf2f   :  { %v1798_v29 = vsub.f32 1.0, %v1797_v27  ;;  %2479 = vmatmul.msk.f32.gmra.mxu1 %vm281_vm2, %v1659_v28 }
 0xf31   :  { %v1799_v41 = vmul.f32 %v2627_v51, %v1798_v29 }
 0xf33   :  { %v1800_v32 = vadd.f32 %v2627_v51, %v1799_v41 }
 0xf35   :  { %v1804_v35 = vsel %vm1803_vm4, %v2627_v51, %v1800_v32 }
 0xf36   :  { %v1809_v36 = vsel %vm1806_vm5, %v1808_v33, %v1804_v35  ;;  %v1773_v12 = vpop.f32.mrf.mxu0 }
 0xf37   :  { %v1777_v42 = vmul.f32 0.35355338, %v1773_v12  ;;  %v1810_v46 = vmul.f32 %v2625_v22, %v1809_v36  ;;  %v2533_v22 = vpack.i.bf16 %v3197_v44, %v3168_v16 }
 0xf38   :  { %v1910_v47 = vpop.permute.xlu0 %1909 }
 0xf39   :  { %2486 = vmatmul.msk.f32.vlgmr.msra.gmra.mxu3 %vm281_vm2, %v1810_v46  ;;  %2491 = vmatmul.msk.f32.vlgmr.msrb.gmra.mxu2 %vm281_vm2, %v1910_v47  ;;  %v1781_v48 = vsel %vm281_vm2, %v1777_v42, -inf }
 0xf3a   :  { %1782 = vmax.xlane.f32.xlu2 %v1781_v48 }
 0xf41   :  { %2493 = vmatmul.msk.f32.vlgmr.msrb.gmra.mxu3 %vm281_vm2, %v1938_v13 }
 0xfad   :  { %v1783_v50 = vpop.xlane.xlu2 %1782 }
 0xfae   :  { %v1785_v53 = vsub.f32 %v1777_v42, %v1783_v50 }
 0xfb0   :  { %v1788_v55 = vmul.f32 1.442695, %v1785_v53 }
 0xfb2   :  { %2628 = vpow2.f32 %v1788_v55 }
 0xfb8   :  { %v2629_v57 = vpop.eup %2628 }
 0xfb9   :  { %v1793_v58 = vsel %vm281_vm2, %v2629_v57, 0.0 }
 0xfba   :  { %1794 = vadd.xlane.f32.xlu2 %v1793_v58 }
 0xfbc   :  { %v1849_v59 = vpop.f32.mrf.mxu3  ;;  %v1934_v60 = vpop.f32.mrf.mxu2 }
 0xfbd   :  { %v1965_v40 = vmul.f32 0.35355338, %v1934_v60  ;;  %2488 = vmatmul.msk.f32.vlgmr.msra.gmra.mxu1 %vm281_vm2, %v1849_v59  ;;  %v2465_v59 = vld [vmem:[%s3427_s13 + $0x38] sm:$0xff] }
 0xfbe   :  { %2088 = vmatpush.msra.mxu3 %v2465_v59 }
 0xfbf   :  { %v1967_v61 = vsel %vm281_vm2, %v1965_v40, -inf }
 0xfc0   :  { %1968 = vmax.xlane.f32.xlu0 %v1967_v61  ;;  %v1685_v61 = vpop.f32.mrf.mxu1 }
 0xfc4   :  { %v1962_v62 = vpop.f32.mrf.mxu3 }
 0xfc5   :  { %v1966_v63 = vmul.f32 0.35355338, %v1962_v62 }
 0xfc7   :  { %v1970_v0 = vsel %vm281_vm2, %v1966_v63, -inf }
 0xfc8   :  { %1971 = vmax.xlane.f32.xlu1 %v1970_v0  ;;  %v1688_v62 = vpop.f32.mrf.mxu1  ;;  %v1715_v0 = vadd.f32 %v3262_v49, %v1685_v61 }
 0xfd2   :  { %1852 = vrot.lane.b32.xlu2 %v3197_v44, %s3488_s28 }
0x102d   :  { %v1795_v1 = vpop.xlane.xlu2 %1794 }
0x102e   :  { %2630 = vrcp.f32 %v1795_v1  ;;  %v1822_v7 = vand.u32 2147483648, %v1795_v1  ;;  %v1820_v9 = vand.u32 2147483647, %v1795_v1  ;;  %vm1816_vm7 = vweird.f32 %v1795_v1 }
0x1030   :  { %v1823_v14 = vor.u32 1.1754944e-38, %v1822_v7  ;;  %vm1821_vm9 = vcmp.eq.f32.partialorder %v1820_v9, 8.507059e+37  ;;  %v1718_v7 = vadd.f32 %v3264_v56, %v1688_v62 }
0x1033   :  { %v1969_v2 = vpop.xlane.xlu0 %1968 }
0x1034   :  { %v2631_v3 = vpop.eup %2630  ;;  %v1973_v43 = vsub.f32 %v1965_v40, %v1969_v2  ;;  %v2553_v2 = vld [vmem:[%s3428_s14 + $0x1] ss:$0 sm:$0xff] }
0x1035   :  { %v1812_v4 = vmul.f32 %v2631_v3, %v1795_v1  ;;  %v1853_v5 = vpop.permute.xlu2 %1852  ;;  %vm1817_vm6 = vweird.f32 %v2631_v3 }
0x1036   :  { %v1975_v6 = vmul.f32 1.442695, %v1973_v43  ;;  %1873 = vmatpush.msra.mxu0 %v1853_v5  ;;  %vm1818_vm8 = vmor %vm1816_vm7, %vm1817_vm6 }
0x1037   :  { %v1813_v45 = vsub.f32 1.0, %v1812_v4 }
0x1038   :  { %2632 = vpow2.f32 %v1975_v6 }
0x1039   :  { %v1814_v8 = vmul.f32 %v2631_v3, %v1813_v45 }
0x103b   :  { %v1815_v10 = vadd.f32 %v2631_v3, %v1814_v8  ;;  %v1972_v11 = vpop.xlane.xlu1 %1971 }
0x103c   :  { %v1974_v15 = vsub.f32 %v1966_v63, %v1972_v11  ;;  %v1901_v63 = vpop.f32.mrf.mxu1 }
0x103d   :  { %v1819_v17 = vsel %vm1818_vm8, %v2631_v3, %v1815_v10  ;;  %v1907_v1 = vadd.f32 %v1901_v63, %v1715_v0  ;;  %v2510_v0 = vld [vmem:[%s3433_s19 + $0x50] sm:$0xff] }
0x103e   :  { %v2633_v18 = vpop.eup %2632  ;;  %v1824_v37 = vsel %vm1821_vm9, %v1823_v14, %v1819_v17  ;;  %v1977_v19 = vmul.f32 1.442695, %v1974_v15 }
0x103f   :  { %v1979_v39 = vsel %vm281_vm2, %v2633_v18, 0.0  ;;  %v1825_v54 = vmul.f32 %v2629_v57, %v1824_v37 }
0x1040   :  { %2634 = vpow2.f32 %v1977_v19  ;;  %1980 = vadd.xlane.f32.xlu0 %v1979_v39 }
0x1041   :  { %2487 = vmatmul.msk.f32.vlgmr.msra.gmra.mxu0 %vm281_vm2, %v1825_v54 }
0x1046   :  { %v2635_v21 = vpop.eup %2634 }
0x1047   :  { %v1982_v34 = vsel %vm281_vm2, %v2635_v21, 0.0 }
0x1048   :  { %1983 = vadd.xlane.f32.xlu1 %v1982_v34  ;;  %v2503_v34 = vld [vmem:[%s3431_s17 + $0x30] sm:$0xff] }
0x1054   :  { %2534 = vrot.lane.b32.xlu0 %v2533_v22, %s3489_s10  ;;  %v2502_v22 = vld [vmem:[%s3431_s17 + $0x28] sm:$0xff] }
0x10b3   :  { %v1981_v23 = vpop.xlane.xlu0 %1980 }
0x10b4   :  { %2636 = vrcp.f32 %v1981_v23  ;;  %v1996_v30 = vand.u32 2147483648, %v1981_v23  ;;  %v1994_v41 = vand.u32 2147483647, %v1981_v23  ;;  %vm1990_vm11 = vweird.f32 %v1981_v23 }
0x10b6   :  { %v1997_v44 = vor.u32 1.1754944e-38, %v1996_v30  ;;  %vm1995_vm14 = vcmp.eq.f32.partialorder %v1994_v41, 8.507059e+37 }
0x10ba   :  { %v2637_v24 = vpop.eup %2636 }
0x10bb   :  { %v1986_v25 = vmul.f32 %v2637_v24, %v1981_v23  ;;  %v1984_v51 = vpop.xlane.xlu1 %1983  ;;  %vm1991_vm10 = vweird.f32 %v2637_v24  ;;  %v2501_v23 = vld [vmem:[%s3431_s17 + $0x20] sm:$0xff] }
0x10bc   :  { %2638 = vrcp.f32 %v1984_v51  ;;  %vm1992_vm12 = vmor %vm1990_vm11, %vm1991_vm10  ;;  %v2009_v12 = vand.u32 2147483647, %v1984_v51  ;;  %v2011_v42 = vand.u32 2147483648, %v1984_v51  ;;  %vm2005_vm3 = vweird.f32 %v1984_v51 }
0x10bd   :  { %v1987_v27 = vsub.f32 1.0, %v1986_v25 }
0x10be   :  { %v1875_v28 = vpop.f32.mrf.mxu0  ;;  %v2012_v53 = vor.u32 1.1754944e-38, %v2011_v42  ;;  %vm2010_vm5 = vcmp.eq.f32.partialorder %v2009_v12, 8.507059e+37 }
0x10bf   :  { %v1988_v29 = vmul.f32 %v2637_v24, %v1987_v27  ;;  %2489 = vmatmul.msk.f32.gmra.mxu1 %vm281_vm2, %v1875_v28  ;;  %v2515_v27 = vld [vmem:[%s3433_s19 + $0x78] sm:$0xff]  ;;  %v2514_v28 = vld [vmem:[%s3433_s19 + $0x70] sm:$0xff] }
0x10c0   :  { %2234 = vmatpush.msrb.mxu1 %v2515_v27 }
0x10c1   :  { %v1989_v31 = vadd.f32 %v2637_v24, %v1988_v29  ;;  %v2513_v29 = vld [vmem:[%s3433_s19 + $0x68] sm:$0xff] }
0x10c2   :  { %v2639_v32 = vpop.eup %2638  ;;  %2235 = vmatpush.msrb.mxu1 %v2514_v28 }
0x10c3   :  { %v1993_v16 = vsel %vm1992_vm12, %v2637_v24, %v1989_v31  ;;  %v2001_v33 = vmul.f32 %v2639_v32, %v1984_v51  ;;  %vm2006_vm15 = vweird.f32 %v2639_v32 }
0x10c4   :  { %v1998_v35 = vsel %vm1995_vm14, %v1997_v44, %v1993_v16  ;;  %vm2007_vm4 = vmor %vm2005_vm3, %vm2006_vm15  ;;  %v2512_v16 = vld [vmem:[%s3433_s19 + $0x60] sm:$0xff]  ;;  %2236 = vmatpush.msrb.mxu1 %v2513_v29 }
0x10c5   :  { %v2002_v36 = vsub.f32 1.0, %v2001_v33  ;;  %v1999_v38 = vmul.f32 %v2633_v18, %v1998_v35  ;;  %v2511_v35 = vld [vmem:[%s3433_s19 + $0x58] sm:$0xff] }
0x10c6   :  { %v2535_v46 = vpop.permute.xlu0 %2534  ;;  %2237 = vmatpush.msrb.mxu1 %v2512_v16 }
0x10c7   :  { %v2003_v47 = vmul.f32 %v2639_v32, %v2002_v36  ;;  %v2537_v48 = vunpack.i.h.bf16 %v2535_v46  ;;  %v2536_v13 = vunpack.i.l.bf16 %v2535_v46  ;;  %v2554_v46 = vld [vmem:[%s3429_s15 + $0x1] ss:$0 sm:$0xff] }
0x10c8   :  { %2238 = vmatpush.msrb.mxu1 %v2511_v35 }
0x10c9   :  { %v2004_v50 = vadd.f32 %v2639_v32, %v2003_v47  ;;  %2036 = vmatpush.msrb.mxu0 %v2536_v13  ;;  %2062 = vmatpush.msra.mxu2 %v2537_v48 }
0x10ca   :  { %2494 = vmatmul.msk.f32.vlgmr.msrb.gmra.mxu0 %vm281_vm2, %v1999_v38  ;;  %2239 = vmatpush.msrb.mxu1 %v2510_v0  ;;  %v2348_v0 = vld [vmem:[%s3440_s25] sm:$0xff] }
0x10cb   :  { %v2008_v55 = vsel %vm2007_vm4, %v2639_v32, %v2004_v50  ;;  %v2555_v50 = vld [vmem:[%s3430_s16 + $0x1] ss:$0 sm:$0xff] }
0x10cc   :  { %v2013_v57 = vsel %vm2010_vm5, %v2012_v53, %v2008_v55 }
0x10cd   :  { %v2014_v58 = vmul.f32 %v2635_v21, %v2013_v57 }
0x10cf   :  { %2495 = vmatmul.msk.f32.vlgmr.msra.gmra.mxu2 %vm281_vm2, %v2014_v58 }
0x113c   :  { %v1904_v6 = vpop.f32.mrf.mxu1 }
0x113d   :  { %v1908_v8 = vadd.f32 %v1904_v6, %v1718_v7 }
0x1147   :  { %v2038_v60 = vpop.f32.mrf.mxu0 }
0x1148   :  { %2496 = vmatmul.msk.f32.vlgmr.msra.gmra.mxu3 %vm281_vm2, %v2038_v60 }
0x1152   :  { %v2064_v40 = vpop.f32.mrf.mxu2 }
0x1153   :  { %2497 = vmatmul.msk.f32.gmra.mxu3 %vm281_vm2, %v2064_v40 }
0x11cb   :  { %v2090_v3 = vpop.f32.mrf.mxu3 }
0x11cc   :  { %v2096_v43 = vadd.f32 %v2090_v3, %v1907_v1  ;;  %v2509_v1 = vld [vmem:[%s3433_s19 + $0x48] sm:$0xff]  ;;  %v2556_v3 = vld [vmem:[%s3432_s18 + $0x1] ss:$0 sm:$0xff] }
0x11cd   :  { %2240 = vmatpush.msrb.mxu1 %v2509_v1  ;;  %v2560_v1 = vld [vmem:[%s3437_s24] ss:$0 sm:$0xff]  ;;  %s3490_s24 = sld [smem:[#allocation14_spill]] }
0x11ce   :  { %v2103_v4 = vadd.f32 %v2553_v2, %v2096_v43 }
0x11d0   :  { %v2105_v5 = vadd.f32 %v2103_v4, %v3137_v52 }
0x11d2   :  { %v2111_v45 = vsel %vm140_vm1, %v2105_v5, 0.0 }
0x11d3   :  { %2112 = vadd.xlane.f32.xlu1 %v2111_v45 }
0x11d6   :  { %v2093_v9 = vpop.f32.mrf.mxu3 }
0x11d7   :  { %v2097_v10 = vadd.f32 %v2093_v9, %v1908_v8  ;;  %v2557_v8 = vld [vmem:[%s3434_s20 + $0x1] ss:$0 sm:$0xff] }
0x11d9   :  { %v2104_v49 = vadd.f32 %v2553_v2, %v2097_v10  ;;  %v2508_v2 = vld [vmem:[%s3433_s19 + $0x40] sm:$0xff] }
0x11da   :  { %2241 = vmatpush.msrb.mxu1 %v2508_v2 }
0x11db   :  { %v2106_v11 = vadd.f32 %v2104_v49, %v3176_v26  ;;  %v2504_v26 = vld [vmem:[%s3431_s17 + $0x38] sm:$0xff] }
0x11dc   :  { %2193 = vmatpush.msra.mxu0 %v2504_v26 }
0x11dd   :  { %v2114_v14 = vsel %vm140_vm1, %v2106_v11, 0.0 }
0x11de   :  { %2115 = vadd.xlane.f32.xlu1 %v2114_v14  ;;  %2194 = vmatpush.msra.mxu0 %v2503_v34 }
0x11e0   :  { %2195 = vmatpush.msra.mxu0 %v2502_v22 }
0x11e2   :  { %2196 = vmatpush.msra.mxu0 %v2501_v23  ;;  %v2312_v23 = vld [vmem:[%s3438_s23 + $0x18] sm:$0xff] }
0x11e3   :  { %2335 = vmatpush.msrb.mxu2 %v2312_v23 }
0x1246   :  { %v2113_v15 = vpop.xlane.xlu1 %2112 }
0x1247   :  { %v2117_v17 = vmul.f32 %v2113_v15, %v3027_v20 }
0x1249   :  { %v2119_v18 = vsub.f32 %v2105_v5, %v2117_v17 }
0x124b   :  { %v2121_v52 = vmul.f32 %v2119_v18, %v2119_v18 }
0x124d   :  { %v2123_v37 = vsel %vm140_vm1, %v2121_v52, 0.0 }
0x124e   :  { %2124 = vadd.xlane.f32.xlu1 %v2123_v37 }
0x1251   :  { %v2116_v19 = vpop.xlane.xlu1 %2115 }
0x1252   :  { %v2118_v56 = vmul.f32 %v2116_v19, %v3027_v20 }
0x1254   :  { %v2120_v39 = vsub.f32 %v2106_v11, %v2118_v56 }
0x1256   :  { %v2122_v54 = vmul.f32 %v2120_v39, %v2120_v39 }
0x1258   :  { %v2126_v21 = vsel %vm140_vm1, %v2122_v54, 0.0 }
0x1259   :  { %2127 = vadd.xlane.f32.xlu2 %v2126_v21 }
0x12c1   :  { %v2125_v24 = vpop.xlane.xlu1 %2124 }
0x12c2   :  { %v2129_v25 = vmul.f32 %v2125_v24, %v3027_v20  ;;  %v2311_v24 = vld [vmem:[%s3438_s23 + $0x10] sm:$0xff] }
0x12c3   :  { %2336 = vmatpush.msrb.mxu2 %v2311_v24 }
0x12c4   :  { %v2131_v51 = vadd.f32 1e-05, %v2129_v25  ;;  %v2310_v25 = vld [vmem:[%s3438_s23 + $0x8] sm:$0xff] }
0x12c5   :  { %2337 = vmatpush.msrb.mxu2 %v2310_v25 }
0x12c6   :  { %2640 = vrsqrt.f32 %v2131_v51  ;;  %vm2139_vm6 = vweird.f32 %v2131_v51 }
0x12cc   :  { %v2641_v30 = vpop.eup %2640  ;;  %v2128_v41 = vpop.xlane.xlu2 %2127 }
0x12cd   :  { %v2134_v31 = vmul.f32 %v2641_v30, %v2131_v51  ;;  %v2130_v32 = vmul.f32 %v2128_v41, %v3027_v20  ;;  %vm2140_vm2 = vweird.f32 %v2641_v30  ;;  %v2309_v51 = vld [vmem:[%s3438_s23] sm:$0xff] }
0x12ce   :  { %vm2141_vm7 = vmor %vm2139_vm6, %vm2140_vm2  ;;  %2338 = vmatpush.msrb.mxu2 %v2309_v51 }
0x12cf   :  { %v2135_v44 = vmul.f32 %v2641_v30, %v2134_v31  ;;  %v2132_v33 = vadd.f32 1e-05, %v2130_v32 }
0x12d1   :  { %v2136_v36 = vmul.f32 0.5, %v2135_v44  ;;  %2642 = vrsqrt.f32 %v2132_v33  ;;  %vm2149_vm9 = vweird.f32 %v2132_v33 }
0x12d3   :  { %v2137_v12 = vsub.f32 1.5, %v2136_v36 }
0x12d5   :  { %v2138_v42 = vmul.f32 %v2641_v30, %v2137_v12  ;;  %v2558_v12 = vld [vmem:[%s3435_s21 + $0x1] ss:$0 sm:$0xff] }
0x12d7   :  { %v2643_v47 = vpop.eup %2642  ;;  %v2142_v48 = vsel %vm2141_vm7, %v2641_v30, %v2138_v42 }
0x12d8   :  { %v2153_v13 = vmul.f32 %v2142_v48, %v2119_v18  ;;  %v2144_v38 = vmul.f32 %v2643_v47, %v2132_v33  ;;  %vm2150_vm8 = vweird.f32 %v2643_v47 }
0x12d9   :  { %vm2151_vm10 = vmor %vm2149_vm9, %vm2150_vm8 }
0x12da   :  { %v2158_v53 = vmul.f32 %v2554_v46, %v2153_v13  ;;  %v2145_v55 = vmul.f32 %v2643_v47, %v2144_v38 }
0x12dc   :  { %v2146_v57 = vmul.f32 0.5, %v2145_v55  ;;  %v2163_v58 = vadd.f32 %v2555_v50, %v2158_v53 }
0x12de   :  { %v2147_v59 = vsub.f32 1.5, %v2146_v57  ;;  %2506 = vmatmul.msk.f32.vlgmr.msra.gmra.mxu0 %vm140_vm1, %v2163_v58 }
0x12e0   :  { %v2148_v60 = vmul.f32 %v2643_v47, %v2147_v59 }
0x12e2   :  { %v2152_v40 = vsel %vm2151_vm10, %v2643_v47, %v2148_v60 }
0x12e3   :  { %v2154_v61 = vmul.f32 %v2152_v40, %v2120_v39 }
0x12e5   :  { %v2159_v62 = vmul.f32 %v2554_v46, %v2154_v61  ;;  %v2351_v61 = vld [vmem:[%s3440_s25 + $0x18] sm:$0xff] }
0x12e6   :  { %2374 = vmatpush.msrb.mxu3 %v2351_v61 }
0x12e7   :  { %v2164_v63 = vadd.f32 %v2555_v50, %v2159_v62  ;;  %v2350_v62 = vld [vmem:[%s3440_s25 + $0x10] sm:$0xff] }
0x12e8   :  { %2375 = vmatpush.msrb.mxu3 %v2350_v62 }
0x12e9   :  { %2507 = vmatmul.msk.f32.gmra.mxu0 %vm140_vm1, %v2164_v63 }
0x135b   :  { %v2198_v43 = vpop.f32.mrf.mxu0 }
0x135c   :  { %v2199_v4 = vadd.f32 %v2556_v3, %v2198_v43 }
0x135e   :  { %v2204_v5 = vmax.f32 %v2199_v4, 0.0 }
0x1360   :  { %2517 = vmatmul.msk.f32.vlgmr.msrb.gmra.mxu1 %vm1148_vm13, %v2204_v5 }
0x1366   :  { %v2201_v6 = vpop.f32.mrf.mxu0 }
0x1367   :  { %v2202_v45 = vadd.f32 %v2556_v3, %v2201_v6 }
0x1369   :  { %v2205_v7 = vmax.f32 %v2202_v45, 0.0  ;;  %v2561_v45 = vld [vmem:[%s3439_s26] ss:$0 sm:$0xff] }
0x136b   :  { %2518 = vmatmul.msk.f32.gmra.mxu1 %vm1148_vm13, %v2205_v7 }
0x13dd   :  { %v2243_v9 = vpop.f32.mrf.mxu1 }
0x13de   :  { %v2244_v10 = vadd.f32 %v2557_v8, %v2243_v9 }
0x13e0   :  { %v2249_v49 = vadd.f32 %v2244_v10, %v2163_v58 }
0x13e2   :  { %v2255_v11 = vsel %vm140_vm1, %v2249_v49, 0.0 }
0x13e3   :  { %2256 = vadd.xlane.f32.xlu0 %v2255_v11  ;;  %v2386_v11 = vld [vmem:[%s3490_s24 + $0x8] sm:$0xff] }
0x13e8   :  { %v2246_v14 = vpop.f32.mrf.mxu1 }
0x13e9   :  { %v2247_v15 = vadd.f32 %v2557_v8, %v2246_v14  ;;  %v2385_v8 = vld [vmem:[%s3490_s24] sm:$0xff] }
0x13eb   :  { %v2250_v17 = vadd.f32 %v2247_v15, %v2164_v63  ;;  %v2349_v63 = vld [vmem:[%s3440_s25 + $0x8] sm:$0xff] }
0x13ec   :  { %2376 = vmatpush.msrb.mxu3 %v2349_v63 }
0x13ed   :  { %v2258_v18 = vsel %vm140_vm1, %v2250_v17, 0.0 }
0x13ee   :  { %2259 = vadd.xlane.f32.xlu1 %v2258_v18  ;;  %2377 = vmatpush.msrb.mxu3 %v2348_v0 }
0x1456   :  { %v2257_v52 = vpop.xlane.xlu0 %2256 }
0x1457   :  { %v2261_v37 = vmul.f32 %v2257_v52, %v3027_v20 }
0x1459   :  { %v2263_v19 = vsub.f32 %v2249_v49, %v2261_v37 }
0x145b   :  { %v2265_v56 = vmul.f32 %v2263_v19, %v2263_v19 }
0x145d   :  { %v2267_v39 = vsel %vm140_vm1, %v2265_v56, 0.0 }
0x145e   :  { %2268 = vadd.xlane.f32.xlu1 %v2267_v39 }
0x1461   :  { %v2260_v54 = vpop.xlane.xlu1 %2259 }
0x1462   :  { %v2262_v21 = vmul.f32 %v2260_v54, %v3027_v20 }
0x1464   :  { %v2264_v26 = vsub.f32 %v2250_v17, %v2262_v21 }
0x1466   :  { %v2266_v34 = vmul.f32 %v2264_v26, %v2264_v26 }
0x1468   :  { %v2270_v22 = vsel %vm140_vm1, %v2266_v34, 0.0 }
0x1469   :  { %2271 = vadd.xlane.f32.xlu1 %v2270_v22 }
0x14d1   :  { %v2269_v27 = vpop.xlane.xlu1 %2268 }
0x14d2   :  { %v2273_v28 = vmul.f32 %v2269_v27, %v3027_v20 }
0x14d4   :  { %v2275_v29 = vadd.f32 1e-05, %v2273_v28 }
0x14d6   :  { %2644 = vrsqrt.f32 %v2275_v29  ;;  %vm2283_vm11 = vweird.f32 %v2275_v29 }
0x14dc   :  { %v2645_v30 = vpop.eup %2644  ;;  %v2272_v41 = vpop.xlane.xlu1 %2271 }
0x14dd   :  { %v2278_v31 = vmul.f32 %v2645_v30, %v2275_v29  ;;  %v2274_v32 = vmul.f32 %v2272_v41, %v3027_v20  ;;  %vm2284_vm13 = vweird.f32 %v2645_v30  ;;  %v2559_v20 = vld [vmem:[%s3436_s22 + $0x1] ss:$0 sm:$0xff] }
0x14de   :  { %vm2285_vm12 = vmor %vm2283_vm11, %vm2284_vm13 }
0x14df   :  { %v2279_v16 = vmul.f32 %v2645_v30, %v2278_v31  ;;  %v2276_v44 = vadd.f32 1e-05, %v2274_v32 }
0x14e1   :  { %v2280_v33 = vmul.f32 0.5, %v2279_v16  ;;  %2646 = vrsqrt.f32 %v2276_v44  ;;  %vm2293_vm15 = vweird.f32 %v2276_v44 }
0x14e3   :  { %v2281_v35 = vsub.f32 1.5, %v2280_v33 }
0x14e5   :  { %v2282_v36 = vmul.f32 %v2645_v30, %v2281_v35 }
0x14e7   :  { %v2647_v42 = vpop.eup %2646  ;;  %v2286_v46 = vsel %vm2285_vm12, %v2645_v30, %v2282_v36 }
0x14e8   :  { %v2297_v47 = vmul.f32 %v2286_v46, %v2263_v19  ;;  %v2288_v48 = vmul.f32 %v2647_v42, %v2276_v44  ;;  %vm2294_vm14 = vweird.f32 %v2647_v42 }
0x14e9   :  { %vm2295_vm3 = vmor %vm2293_vm15, %vm2294_vm14 }
0x14ea   :  { %v2302_v13 = vmul.f32 %v2558_v12, %v2297_v47  ;;  %v2289_v38 = vmul.f32 %v2647_v42, %v2288_v48 }
0x14ec   :  { %v2290_v50 = vmul.f32 0.5, %v2289_v38  ;;  %v2307_v53 = vadd.f32 %v2559_v20, %v2302_v13 }
0x14ee   :  { %v2291_v55 = vsub.f32 1.5, %v2290_v50  ;;  %2521 = vmatmul.msk.f32.vlgmr.msrb.gmra.mxu2 %vm140_vm1, %v2307_v53 }
0x14f0   :  { %v2292_v57 = vmul.f32 %v2647_v42, %v2291_v55 }
0x14f2   :  { %v2296_v58 = vsel %vm2295_vm3, %v2647_v42, %v2292_v57 }
0x14f3   :  { %v2298_v59 = vmul.f32 %v2296_v58, %v2264_v26 }
0x14f5   :  { %v2303_v60 = vmul.f32 %v2558_v12, %v2298_v59 }
0x14f7   :  { %v2308_v40 = vadd.f32 %v2559_v20, %v2303_v60 }
0x14f9   :  { %2522 = vmatmul.msk.f32.gmra.mxu2 %vm140_vm1, %v2308_v40 }
0x1571   :  { %v2340_v2 = vpop.f32.mrf.mxu2 }
0x1572   :  { %v2341_v3 = vadd.f32 %v2560_v1, %v2340_v2 }
0x1574   :  { %2648 = vtanh.f32 %v2341_v3 }
0x157a   :  { %v2649_v43 = vpop.eup %2648 }
0x157b   :  { %2523 = vmatmul.msk.f32.vlgmr.msrb.gmra.mxu3 %vm140_vm1, %v2649_v43 }
0x157c   :  { %v2343_v4 = vpop.f32.mrf.mxu2 }
0x157d   :  { %v2344_v5 = vadd.f32 %v2560_v1, %v2343_v4 }
0x157f   :  { %2650 = vtanh.f32 %v2344_v5 }
0x1585   :  { %v2651_v6 = vpop.eup %2650 }
0x1586   :  { %2524 = vmatmul.msk.f32.gmra.mxu3 %vm140_vm1, %v2651_v6 }
0x15fe   :  { %v2379_v7 = vpop.f32.mrf.mxu3 }
0x15ff   :  { %v2380_v9 = vadd.f32 %v2561_v45, %v2379_v7 }
0x1601   :  { %v2387_v10 = vadd.f32 %v2385_v8, %v2380_v9 }
0x1603   :  { %2389 = vst.msk [vmem:[%s3491_s6] sm:$0xff] %vm100_vm0, %v2387_v10 }
0x1609   :  { %v2382_v49 = vpop.f32.mrf.mxu3 }
0x160a   :  { %v2383_v14 = vadd.f32 %v2561_v45, %v2382_v49 }
0x160c   :  { %v2388_v15 = vadd.f32 %v2386_v11, %v2383_v14 }
0x160e   :  { %2390 = vst.msk [vmem:[%s3491_s6 + $0x8] sm:$0xff] %vm100_vm0, %v2388_v15 }

</bundles_post_ra>
